<compile_context>
chip_gen: v5e
topology: v5e:2x2
jax: 0.10.0
libtpu: 0.0.40
codegen_flags: <defaults>
</compile_context>

<pallas_src>
import math

import jax
import jax.numpy as jnp
from jax.experimental import pallas as pl
from jax.experimental.pallas import tpu as pltpu

LANE = 128


# ----------------------------- Pallas kernel -------------------------------


def _pointnet_seg_kernel(
    x_ref,
    # SpatialTransformerDimK(k=3), BN folded
    sw1, sb1, sw2, sb2, sw3, sb3,
    sfw1, sfb1, sfw2, sfb2, sfw3, sfb3,
    # PointNetBase convs, BN folded
    bw1, bb1, bw2, bb2, bw3, bb3,
    # Segmentation head (conv_1 weight split: global-feature half / point-feature half)
    gw1a, gw1b, gb1, gw2, gb2, gw3, gb3, gw4, gb4,
    out_ref,
):
    f32 = jnp.float32
    act_dt = sw2.dtype                             # matmul operand dtype (bf16 by default)
    bblk, n, _ = x_ref.shape
    x3 = x_ref[...]                                # (bblk, n, 3) f32
    x = x3.reshape(bblk * n, 3)                    # flatten clouds -> M = bblk*n rows

    def relu_a(a):
        # relu + cast to the matmul operand dtype: halves intermediate VMEM and makes
        # the next layer's LHS cast a no-op.  relu/max/reshape are exact in bf16.
        return jnp.maximum(a, 0.0).astype(act_dt)

    def mm(a, w_ref, b_ref):
        # MXU matmul; f32 accumulation, f32 bias add.
        w = w_ref[...]
        return jnp.dot(a.astype(w.dtype), w, preferred_element_type=f32) + b_ref[...]

    def mm3(a, w_ref, b_ref):
        # (M, 3) @ (3, C) via VPU broadcasts (K=3 would waste >97% of the MXU K dim).
        w = w_ref[...]
        return (a[:, 0:1] * w[0:1, :]
                + a[:, 1:2] * w[1:2, :]
                + a[:, 2:3] * w[2:3, :]
                + b_ref[...])

    # ---- SpatialTransformerDimK(k=3) ----
    h = relu_a(mm3(x, sw1, sb1))                   # (M, 64)   bf16
    h = relu_a(mm(h, sw2, sb2))                    # (M, 128)  bf16
    h = relu_a(mm(h, sw3, sb3))                    # (M, 1024) bf16 (pre-maxpool, bf16 halves VMEM)
    # TODO(synk): for large N (>= ~4K points) tile the per-point pipeline over N with a
    # running-max VMEM scratch (second "arbitrary" grid axis) so the (N, 1024) working
    # set stays within v7x's 64 MiB VMEM.
    g = jnp.max(h.reshape(bblk, n, 1024), axis=1)  # (bblk, 1024) per-cloud max pool
    g = relu_a(mm(g, sfw1, sfb1))                  # (bblk, 512)
    g = relu_a(mm(g, sfw2, sfb2))                  # (bblk, 256)
    t = mm(g, sfw3, sfb3)                          # (bblk, 9) f32 -- "+ I" folded into bias

    # x @ T per cloud (T = t.reshape(3, 3)) via lane-slice broadcasts (no 3x3 matmul)
    t3 = t.reshape(bblk, 1, 9)
    xt = (x3[:, :, 0:1] * t3[:, :, 0:3]
          + x3[:, :, 1:2] * t3[:, :, 3:6]
          + x3[:, :, 2:3] * t3[:, :, 6:9])         # (bblk, n, 3) f32
    xt = xt.reshape(bblk * n, 3)

    # ---- PointNetBase ----
    pf = relu_a(mm3(xt, bw1, bb1))                 # (M, 64)  bf16 point features (kept live)
    h = relu_a(mm(pf, bw2, bb2))                   # (M, 128)
    h = mm(h, bw3, bb3).astype(act_dt)             # (M, 1024) bf16 (bn, no relu; pre-maxpool)
    gfeat = jnp.max(h.reshape(bblk, n, 1024), axis=1)   # (bblk, 1024) global feature

    # ---- Segmentation head ----
    # concat([global_repeated, pf], channels) @ W1 == gfeat @ W1[:1024] + pf @ W1[1024:]
    w1b = gw1b[...]
    hp = jnp.dot(pf.astype(w1b.dtype), w1b, preferred_element_type=f32)   # (M, 512) f32
    gpart = mm(gfeat, gw1a, gb1)                                          # (bblk, 512) f32
    h = relu_a(hp.reshape(bblk, n, 512) + gpart.reshape(bblk, 1, 512))    # (bblk, n, 512) bf16
    h = h.reshape(bblk * n, 512)
    h = relu_a(mm(h, gw2, gb2))                    # (M, 256)
    h = relu_a(mm(h, gw3, gb3))                    # (M, 128)
    h = mm(h, gw4, gb4)                            # (M, C_pad) lane-padded classes, f32
    out_ref[...] = h.reshape(out_ref.shape).astype(out_ref.dtype)


# ----------------------------- JAX glue -------------------------------------


def _uniform(key, shape, bound):
    return jax.random.uniform(key, shape, jnp.float32, -bound, bound)


def _linear_params(key, cin, cout):
    # PyTorch-style U(-1/sqrt(fan_in), 1/sqrt(fan_in)); weight stored as (in, out).
    kw, kb = jax.random.split(key)
    bound = 1.0 / (cin ** 0.5)
    return _uniform(kw, (cin, cout), bound), _uniform(kb, (1, cout), bound)


def _bn_params(key, c):
    k1, k2, k3, k4 = jax.random.split(key, 4)
    gamma = jax.random.uniform(k1, (c,), jnp.float32, 0.5, 1.5)
    beta = jax.random.uniform(k2, (c,), jnp.float32, -0.1, 0.1)
    mean = jax.random.uniform(k3, (c,), jnp.float32, -0.1, 0.1)
    var = jax.random.uniform(k4, (c,), jnp.float32, 0.5, 1.5)
    return gamma, beta, mean, var


def _fold_bn(w, b, bn, eps=1e-5):
    gamma, beta, mean, var = bn
    s = gamma / jnp.sqrt(var + eps)
    return w * s[None, :], (b - mean[None, :]) * s[None, :] + beta[None, :]


def init_params(key, num_classes, *, matmul_dtype=jnp.bfloat16):
    keys = iter(jax.random.split(key, 64))

    def lin_bn(cin, cout):
        w, b = _linear_params(next(keys), cin, cout)
        return _fold_bn(w, b, _bn_params(next(keys), cout))

    c_pad = LANE * pl.cdiv(num_classes, LANE)

    # SpatialTransformerDimK(k=3)
    sw1, sb1 = lin_bn(3, 64)                       # K=3 layer stays f32 (VPU path)
    sw2, sb2 = lin_bn(64, 128)
    sw3, sb3 = lin_bn(128, 1024)
    sfw1, sfb1 = lin_bn(1024, 512)
    sfw2, sfb2 = lin_bn(512, 256)
    sfw3, sfb3 = _linear_params(next(keys), 256, 9)
    sfb3 = sfb3 + jnp.eye(3, dtype=jnp.float32).reshape(1, 9)   # "+ I" folded into bias
    # PointNetBase
    bw1, bb1 = lin_bn(3, 64)                       # K=3 layer stays f32 (VPU path)
    bw2, bb2 = lin_bn(64, 128)
    bw3, bb3 = lin_bn(128, 1024)
    # Segmentation head
    gw1, gb1 = lin_bn(1088, 512)
    gw1a, gw1b = gw1[:1024], gw1[1024:]
    gw2, gb2 = lin_bn(512, 256)
    gw3, gb3 = lin_bn(256, 128)
    gw4, gb4 = _linear_params(next(keys), 128, num_classes)
    # Zero-pad classes to a full lane group (avoids masked vst on the HBM store).
    gw4 = jnp.pad(gw4, ((0, 0), (0, c_pad - num_classes)))
    gb4 = jnp.pad(gb4, ((0, 0), (0, c_pad - num_classes)))

    def mx(w):   # MXU-operand weights -> bf16; accumulation stays f32 in-kernel
        # TODO(synk): on v6e the two 128->1024 layers (sw3, bw3) are int8 candidates,
        # and fp8 on v7x, if the accuracy budget allows (MXU K under-fill recovery).
        return w.astype(matmul_dtype)

    return [sw1, sb1, mx(sw2), sb2, mx(sw3), sb3,
            mx(sfw1), sfb1, mx(sfw2), sfb2, sfw3, sfb3,    # sfw3 kept f32 (tiny; keeps T accurate)
            bw1, bb1, mx(bw2), bb2, mx(bw3), bb3,
            mx(gw1a), mx(gw1b), gb1, mx(gw2), gb2, mx(gw3), gb3, mx(gw4), gb4]


# ----------------------------- sizing / feature detection --------------------


def _vmem_limit_bytes():
    # ~3/4 of physical VMEM: ~48 MiB on v7x (64 MiB/core), ~96 MiB on v5e/v6e (128 MiB).
    try:
        cap = int(pltpu.get_tpu_info().vmem_capacity_bytes)
    except Exception:
        cap = 64 * 1024 * 1024        # conservative (v7x) fallback
    return (cap * 3) // 4


def _choose_b_blk(B, N, vmem_limit_bytes):
    # Peak live activations with bf16 intermediates are ~8 KiB per point-row (the f32
    # (M,1024) matmul output + its bf16 copy dominate), plus ~1.5 KiB/row for the
    # double-buffered lane-padded x / out blocks -> budget 10 KiB/row and leave half
    # the VMEM limit (plus ~6 MiB for weights) to the compiler.
    bytes_per_row = 10 * 1024
    act_budget = max(vmem_limit_bytes // 2 - 6 * (1 << 20), 2 << 20)
    m_max = max(act_budget // bytes_per_row, N)
    m_target = min(2048, m_max)                    # amortize ~0.35 us/step grid overhead
    b_blk = max(1, min(B, m_target // max(N, 1)))
    # Keep >= 2 grid steps so "parallel" can shard the batch across TensorCores (v7x
    # has 2 TCs) and the x/out DMAs have another step to pipeline against.
    if B >= 2:
        b_blk = min(b_blk, pl.cdiv(B, 2))
    # Prefer b_blk*N a multiple of 256 (full M tiles on 256-wide MXU generations).
    if N % 256 != 0 and b_blk * N >= 256:
        step = 256 // math.gcd(N, 256)
        if b_blk >= step:
            b_blk = (b_blk // step) * step
    return max(b_blk, 1)


_BUFFERED_WEIGHTS_SUPPORTED = None


def _buffered_weights_supported():
    """Feature-detect pl.Buffered(1) (single-buffered resident weights) with a tiny
    probe kernel, so the real kernel never hides genuine errors behind a fallback."""
    global _BUFFERED_WEIGHTS_SUPPORTED
    if _BUFFERED_WEIGHTS_SUPPORTED is not None:
        return _BUFFERED_WEIGHTS_SUPPORTED
    try:
        def probe(w_ref, x_ref, o_ref):
            o_ref[...] = x_ref[...] + w_ref[...]

        f = pl.pallas_call(
            probe,
            out_shape=jax.ShapeDtypeStruct((16, 128), jnp.float32),
            grid=(2,),
            in_specs=[pl.BlockSpec((8, 128), lambda i: (0, 0),
                                   pipeline_mode=pl.Buffered(1)),
                      pl.BlockSpec((8, 128), lambda i: (i, 0))],
            out_specs=pl.BlockSpec((8, 128), lambda i: (i, 0)),
        )
        jax.block_until_ready(f(jnp.ones((8, 128), jnp.float32),
                                jnp.ones((16, 128), jnp.float32)))
        _BUFFERED_WEIGHTS_SUPPORTED = True
    except Exception:
        _BUFFERED_WEIGHTS_SUPPORTED = False
    return _BUFFERED_WEIGHTS_SUPPORTED


# ----------------------------- wrapper ---------------------------------------


def pointnet_segmenter(x, params, num_classes, *, b_blk=None, out_dtype=jnp.bfloat16):
    B, N, _ = x.shape
    c_pad = params[-1].shape[-1]   # gb4 is (1, c_pad)

    # Align N to the bf16 sublane granularity by replicating the last point: the
    # reshape pairs around the max-pools stay tile-aligned (no hidden VMEM copies)
    # and duplicated points cannot change a per-cloud max.
    N_ALIGN = 16
    n_pad = N_ALIGN * pl.cdiv(N, N_ALIGN)
    if n_pad != N:
        x = jnp.pad(x, ((0, 0), (0, n_pad - N), (0, 0)), mode="edge")

    vmem_limit = _vmem_limit_bytes()
    if b_blk is None:
        b_blk = _choose_b_blk(B, n_pad, vmem_limit)
    b_pad = pl.cdiv(B, b_blk) * b_blk
    if b_pad != B:
        # Zero clouds are independent of real clouds (max-pool is per-cloud); sliced off.
        x = jnp.concatenate([x, jnp.zeros((b_pad - B, n_pad, 3), x.dtype)], axis=0)

    single_buffer = _buffered_weights_supported()

    def weight_spec(p):
        idx = lambda b, _nd=p.ndim: (0,) * _nd
        if single_buffer:
            # Constant index maps: keep weights resident in a single VMEM buffer
            # instead of the default double buffer.
            return pl.BlockSpec(p.shape, idx, pipeline_mode=pl.Buffered(1))
        return pl.BlockSpec(p.shape, idx)

    in_specs = ([pl.BlockSpec((b_blk, n_pad, 3), lambda b: (b, 0, 0))]
                + [weight_spec(p) for p in params])
    out_spec = pl.BlockSpec((b_blk, n_pad, c_pad), lambda b: (b, 0, 0))

    out = pl.pallas_call(
        _pointnet_seg_kernel,
        out_shape=jax.ShapeDtypeStruct((b_pad, n_pad, c_pad), out_dtype),
        grid=(b_pad // b_blk,),
        in_specs=in_specs,
        out_specs=out_spec,
        compiler_params=pltpu.CompilerParams(
            # Batch steps are independent -> shard the grid across TensorCores
            # (2 TCs on v7x); harmless no-op on v5e/v6e.
            dimension_semantics=("parallel",),
            vmem_limit_bytes=vmem_limit,
        ),
    )(x, *params)

    return out[:B, :N, :num_classes]


# ----------------------------- reference (plain JAX) ------------------------


def reference(x, params, num_classes):
    (sw1, sb1, sw2, sb2, sw3, sb3,
     sfw1, sfb1, sfw2, sfb2, sfw3, sfb3,
     bw1, bb1, bw2, bb2, bw3, bb3,
     gw1a, gw1b, gb1, gw2, gb2, gw3, gb3, gw4, gb4) = params
    f32 = jnp.float32
    act_dt = sw2.dtype   # mirror the kernel's mixed precision (bf16 intermediates)

    def relu_a(a):
        return jnp.maximum(a, 0.0).astype(act_dt)

    def mm(a, w, b):
        return jnp.dot(a.astype(w.dtype), w, preferred_element_type=f32) + b

    h = relu_a(mm(x, sw1, sb1))
    h = relu_a(mm(h, sw2, sb2))
    h = relu_a(mm(h, sw3, sb3))
    g = jnp.max(h, axis=1)                                   # (B, 1024)
    g = relu_a(mm(g, sfw1, sfb1))
    g = relu_a(mm(g, sfw2, sfb2))
    t = mm(g, sfw3, sfb3)                                    # (B, 9)
    T = t.reshape(-1, 3, 3)
    xt = jnp.einsum("bni,bij->bnj", x, T)
    pf = relu_a(mm(xt, bw1, bb1))
    h = relu_a(mm(pf, bw2, bb2))
    h = mm(h, bw3, bb3).astype(act_dt)
    gf = jnp.max(h, axis=1, keepdims=True)                   # (B, 1, 1024)
    h = relu_a(mm(pf, gw1b, gb1)
               + jnp.dot(gf.astype(gw1a.dtype), gw1a, preferred_element_type=f32))
    h = relu_a(mm(h, gw2, gb2))
    h = relu_a(mm(h, gw3, gb3))
    out = mm(h, gw4, gb4)
    return out[:, :, :num_classes]


# ----------------------------- main ------------------------------------------


if __name__ == "__main__":
    B, N, NUM_CLASSES = 2, 16, 8
    key = jax.random.PRNGKey(0)
    kx, kp = jax.random.split(key)
    # PyTorch input would be (B, 3, N); we feed the equivalent (B, N, 3) layout.
    x = jax.random.normal(kx, (B, N, 3), jnp.float32)
    params = init_params(kp, NUM_CLASSES)

    out = jax.block_until_ready(pointnet_segmenter(x, params, NUM_CLASSES))
    ref = reference(x, params, NUM_CLASSES)

    assert out.shape == (B, N, NUM_CLASSES), out.shape
    out_f32 = out.astype(jnp.float32)
    assert bool(jnp.all(jnp.isfinite(out_f32)))
    max_err = float(jnp.max(jnp.abs(out_f32 - ref)))
    assert bool(jnp.allclose(out_f32, ref, atol=2e-2, rtol=2e-2)), max_err
    print("KERNEL_OK")
</pallas_src>

<mosaic_0001>
module attributes {stable_mosaic.version = 11 : i64} {
  func.func @probe(%arg0: i32, %arg1: memref<8x128xf32, #tpu.memory_space<vmem>>, %arg2: memref<8x128xf32, #tpu.memory_space<vmem>>, %arg3: memref<8x128xf32, #tpu.memory_space<vmem>>) attributes {dimension_semantics = [#tpu.dimension_semantics<arbitrary>], iteration_bounds = array<i64: 2>, scalar_prefetch = 0 : i64, scratch_operands = 0 : i64, tpu.core_type = #tpu.core_type<tc>, window_params = [{pipeline_mode = #tpu.pipeline_mode<synchronous>, transform_indices = @transform_0, window_bounds = array<i64: 8, 128>}, {transform_indices = @transform_1, window_bounds = array<i64: 8, 128>}, {transform_indices = @transform_2, window_bounds = array<i64: 8, 128>}]} {
    %c0 = arith.constant 0 : index
    %c0_0 = arith.constant 0 : index
    %0 = vector.load %arg2[%c0, %c0_0] : memref<8x128xf32, #tpu.memory_space<vmem>>, vector<8x128xf32>
    %c0_1 = arith.constant 0 : index
    %c0_2 = arith.constant 0 : index
    %1 = vector.load %arg1[%c0_1, %c0_2] : memref<8x128xf32, #tpu.memory_space<vmem>>, vector<8x128xf32>
    %2 = arith.addf %0, %1 : vector<8x128xf32>
    %c0_3 = arith.constant 0 : index
    %c0_4 = arith.constant 0 : index
    %3 = vector.load %arg3[%c0_3, %c0_4] : memref<8x128xf32, #tpu.memory_space<vmem>>, vector<8x128xf32>
    tpu.vector_store %arg3[%c0_3, %c0_4], %2 {strides = array<i32>} : memref<8x128xf32, #tpu.memory_space<vmem>>, vector<8x128xf32>,
    return
  }
  func.func @transform_0(%arg0: i32) -> (i32, i32) {
    %c0_i32 = arith.constant 0 : i32
    %c0_i32_0 = arith.constant 0 : i32
    %c0_i32_1 = arith.constant 0 : i32
    return %c0_i32, %c0_i32_0 : i32, i32
  }
  func.func @transform_1(%arg0: i32) -> (i32, i32) {
    %c0_i32 = arith.constant 0 : i32
    %c0_i32_0 = arith.constant 0 : i32
    return %arg0, %c0_i32 : i32, i32
  }
  func.func @transform_2(%arg0: i32) -> (i32, i32) {
    %c0_i32 = arith.constant 0 : i32
    %c0_i32_0 = arith.constant 0 : i32
    return %arg0, %c0_i32 : i32, i32
  }
}

module attributes {stable_mosaic.version = 11 : i64} {
  func.func @_pointnet_seg_kernel(%arg0: i32, %arg1: memref<1x16x3xf32, #tpu.memory_space<vmem>>, %arg2: memref<3x64xf32, #tpu.memory_space<vmem>>, %arg3: memref<1x64xf32, #tpu.memory_space<vmem>>, %arg4: memref<64x128xbf16, #tpu.memory_space<vmem>>, %arg5: memref<1x128xf32, #tpu.memory_space<vmem>>, %arg6: memref<128x1024xbf16, #tpu.memory_space<vmem>>, %arg7: memref<1x1024xf32, #tpu.memory_space<vmem>>, %arg8: memref<1024x512xbf16, #tpu.memory_space<vmem>>, %arg9: memref<1x512xf32, #tpu.memory_space<vmem>>, %arg10: memref<512x256xbf16, #tpu.memory_space<vmem>>, %arg11: memref<1x256xf32, #tpu.memory_space<vmem>>, %arg12: memref<256x9xf32, #tpu.memory_space<vmem>>, %arg13: memref<1x9xf32, #tpu.memory_space<vmem>>, %arg14: memref<3x64xf32, #tpu.memory_space<vmem>>, %arg15: memref<1x64xf32, #tpu.memory_space<vmem>>, %arg16: memref<64x128xbf16, #tpu.memory_space<vmem>>, %arg17: memref<1x128xf32, #tpu.memory_space<vmem>>, %arg18: memref<128x1024xbf16, #tpu.memory_space<vmem>>, %arg19: memref<1x1024xf32, #tpu.memory_space<vmem>>, %arg20: memref<1024x512xbf16, #tpu.memory_space<vmem>>, %arg21: memref<64x512xbf16, #tpu.memory_space<vmem>>, %arg22: memref<1x512xf32, #tpu.memory_space<vmem>>, %arg23: memref<512x256xbf16, #tpu.memory_space<vmem>>, %arg24: memref<1x256xf32, #tpu.memory_space<vmem>>, %arg25: memref<256x128xbf16, #tpu.memory_space<vmem>>, %arg26: memref<1x128xf32, #tpu.memory_space<vmem>>, %arg27: memref<128x128xbf16, #tpu.memory_space<vmem>>, %arg28: memref<1x128xf32, #tpu.memory_space<vmem>>, %arg29: memref<1x16x128xbf16, #tpu.memory_space<vmem>>) attributes {dimension_semantics = [#tpu.dimension_semantics<parallel>], iteration_bounds = array<i64: 2>, scalar_prefetch = 0 : i64, scratch_operands = 0 : i64, tpu.core_type = #tpu.core_type<tc>, window_params = [{transform_indices = @transform_0, window_bounds = array<i64: 1, 16, 3>}, {pipeline_mode = #tpu.pipeline_mode<synchronous>, transform_indices = @transform_1, window_bounds = array<i64: 3, 64>}, {pipeline_mode = #tpu.pipeline_mode<synchronous>, transform_indices = @transform_2, window_bounds = array<i64: 1, 64>}, {pipeline_mode = #tpu.pipeline_mode<synchronous>, transform_indices = @transform_3, window_bounds = array<i64: 64, 128>}, {pipeline_mode = #tpu.pipeline_mode<synchronous>, transform_indices = @transform_4, window_bounds = array<i64: 1, 128>}, {pipeline_mode = #tpu.pipeline_mode<synchronous>, transform_indices = @transform_5, window_bounds = array<i64: 128, 1024>}, {pipeline_mode = #tpu.pipeline_mode<synchronous>, transform_indices = @transform_6, window_bounds = array<i64: 1, 1024>}, {pipeline_mode = #tpu.pipeline_mode<synchronous>, transform_indices = @transform_7, window_bounds = array<i64: 1024, 512>}, {pipeline_mode = #tpu.pipeline_mode<synchronous>, transform_indices = @transform_8, window_bounds = array<i64: 1, 512>}, {pipeline_mode = #tpu.pipeline_mode<synchronous>, transform_indices = @transform_9, window_bounds = array<i64: 512, 256>}, {pipeline_mode = #tpu.pipeline_mode<synchronous>, transform_indices = @transform_10, window_bounds = array<i64: 1, 256>}, {pipeline_mode = #tpu.pipeline_mode<synchronous>, transform_indices = @transform_11, window_bounds = array<i64: 256, 9>}, {pipeline_mode = #tpu.pipeline_mode<synchronous>, transform_indices = @transform_12, window_bounds = array<i64: 1, 9>}, {pipeline_mode = #tpu.pipeline_mode<synchronous>, transform_indices = @transform_13, window_bounds = array<i64: 3, 64>}, {pipeline_mode = #tpu.pipeline_mode<synchronous>, transform_indices = @transform_14, window_bounds = array<i64: 1, 64>}, {pipeline_mode = #tpu.pipeline_mode<synchronous>, transform_indices = @transform_15, window_bounds = array<i64: 64, 128>}, {pipeline_mode = #tpu.pipeline_mode<synchronous>, transform_indices = @transform_16, window_bounds = array<i64: 1, 128>}, {pipeline_mode = #tpu.pipeline_mode<synchronous>, transform_indices = @transform_17, window_bounds = array<i64: 128, 1024>}, {pipeline_mode = #tpu.pipeline_mode<synchronous>, transform_indices = @transform_18, window_bounds = array<i64: 1, 1024>}, {pipeline_mode = #tpu.pipeline_mode<synchronous>, transform_indices = @transform_19, window_bounds = array<i64: 1024, 512>}, {pipeline_mode = #tpu.pipeline_mode<synchronous>, transform_indices = @transform_20, window_bounds = array<i64: 64, 512>}, {pipeline_mode = #tpu.pipeline_mode<synchronous>, transform_indices = @transform_21, window_bounds = array<i64: 1, 512>}, {pipeline_mode = #tpu.pipeline_mode<synchronous>, transform_indices = @transform_22, window_bounds = array<i64: 512, 256>}, {pipeline_mode = #tpu.pipeline_mode<synchronous>, transform_indices = @transform_23, window_bounds = array<i64: 1, 256>}, {pipeline_mode = #tpu.pipeline_mode<synchronous>, transform_indices = @transform_24, window_bounds = array<i64: 256, 128>}, {pipeline_mode = #tpu.pipeline_mode<synchronous>, transform_indices = @transform_25, window_bounds = array<i64: 1, 128>}, {pipeline_mode = #tpu.pipeline_mode<synchronous>, transform_indices = @transform_26, window_bounds = array<i64: 128, 128>}, {pipeline_mode = #tpu.pipeline_mode<synchronous>, transform_indices = @transform_27, window_bounds = array<i64: 1, 128>}, {transform_indices = @transform_28, window_bounds = array<i64: 1, 16, 128>}]} {
    %c0 = arith.constant 0 : index
    %c0_0 = arith.constant 0 : index
    %c0_1 = arith.constant 0 : index
    %0 = vector.load %arg1[%c0, %c0_0, %c0_1] : memref<1x16x3xf32, #tpu.memory_space<vmem>>, vector<1x16x3xf32>
    %1 = vector.shape_cast %0 : vector<1x16x3xf32> to vector<16x3xf32>
    %c0_2 = arith.constant 0 : index
    %c0_3 = arith.constant 0 : index
    %2 = vector.load %arg2[%c0_2, %c0_3] : memref<3x64xf32, #tpu.memory_space<vmem>>, vector<3x64xf32>
    %3 = vector.extract_strided_slice %1 {offsets = [0, 0], sizes = [16, 1], strides = [1, 1]} : vector<16x3xf32> to vector<16x1xf32>
    %4 = vector.extract_strided_slice %2 {offsets = [0, 0], sizes = [1, 64], strides = [1, 1]} : vector<3x64xf32> to vector<1x64xf32>
    %5 = vector.broadcast %3 : vector<16x1xf32> to vector<16x64xf32>
    %6 = vector.broadcast %4 : vector<1x64xf32> to vector<16x64xf32>
    %7 = arith.mulf %5, %6 : vector<16x64xf32>
    %8 = vector.extract_strided_slice %1 {offsets = [0, 1], sizes = [16, 1], strides = [1, 1]} : vector<16x3xf32> to vector<16x1xf32>
    %9 = vector.extract_strided_slice %2 {offsets = [1, 0], sizes = [1, 64], strides = [1, 1]} : vector<3x64xf32> to vector<1x64xf32>
    %10 = vector.broadcast %8 : vector<16x1xf32> to vector<16x64xf32>
    %11 = vector.broadcast %9 : vector<1x64xf32> to vector<16x64xf32>
    %12 = arith.mulf %10, %11 : vector<16x64xf32>
    %13 = arith.addf %7, %12 : vector<16x64xf32>
    %14 = vector.extract_strided_slice %1 {offsets = [0, 2], sizes = [16, 1], strides = [1, 1]} : vector<16x3xf32> to vector<16x1xf32>
    %15 = vector.extract_strided_slice %2 {offsets = [2, 0], sizes = [1, 64], strides = [1, 1]} : vector<3x64xf32> to vector<1x64xf32>
    %16 = vector.broadcast %14 : vector<16x1xf32> to vector<16x64xf32>
    %17 = vector.broadcast %15 : vector<1x64xf32> to vector<16x64xf32>
    %18 = arith.mulf %16, %17 : vector<16x64xf32>
    %19 = arith.addf %13, %18 : vector<16x64xf32>
    %c0_4 = arith.constant 0 : index
    %c0_5 = arith.constant 0 : index
    %20 = vector.load %arg3[%c0_4, %c0_5] : memref<1x64xf32, #tpu.memory_space<vmem>>, vector<1x64xf32>
    %21 = vector.broadcast %20 : vector<1x64xf32> to vector<16x64xf32>
    %22 = arith.addf %19, %21 : vector<16x64xf32>
    %cst = arith.constant 0.000000e+00 : f32
    %23 = vector.broadcast %cst : f32 to vector<16x64xf32>
    %24 = arith.maximumf %22, %23 : vector<16x64xf32>
    %25 = arith.truncf %24 : vector<16x64xf32> to vector<16x64xbf16>
    %c0_6 = arith.constant 0 : index
    %c0_7 = arith.constant 0 : index
    %26 = vector.load %arg4[%c0_6, %c0_7] : memref<64x128xbf16, #tpu.memory_space<vmem>>, vector<64x128xbf16>
    %cst_8 = arith.constant dense<0.000000e+00> : vector<16x128xf32>
    %27 = tpu.matmul %25, %26, %cst_8 {dimension_numbers = #tpu.dot_dimension_numbers<[1], [0], [0], [1], [0, 0, 1, 1], [], []>} : vector<16x64xbf16>, vector<64x128xbf16>, vector<16x128xf32> -> vector<16x128xf32>
    %c0_9 = arith.constant 0 : index
    %c0_10 = arith.constant 0 : index
    %28 = vector.load %arg5[%c0_9, %c0_10] : memref<1x128xf32, #tpu.memory_space<vmem>>, vector<1x128xf32>
    %29 = vector.broadcast %28 : vector<1x128xf32> to vector<16x128xf32>
    %30 = arith.addf %27, %29 : vector<16x128xf32>
    %cst_11 = arith.constant 0.000000e+00 : f32
    %31 = vector.broadcast %cst_11 : f32 to vector<16x128xf32>
    %32 = arith.maximumf %30, %31 : vector<16x128xf32>
    %33 = arith.truncf %32 : vector<16x128xf32> to vector<16x128xbf16>
    %c0_12 = arith.constant 0 : index
    %c0_13 = arith.constant 0 : index
    %34 = vector.load %arg6[%c0_12, %c0_13] : memref<128x1024xbf16, #tpu.memory_space<vmem>>, vector<128x1024xbf16>
    %cst_14 = arith.constant dense<0.000000e+00> : vector<16x1024xf32>
    %35 = tpu.matmul %33, %34, %cst_14 {dimension_numbers = #tpu.dot_dimension_numbers<[1], [0], [0], [1], [0, 0, 1, 1], [], []>} : vector<16x128xbf16>, vector<128x1024xbf16>, vector<16x1024xf32> -> vector<16x1024xf32>
    %c0_15 = arith.constant 0 : index
    %c0_16 = arith.constant 0 : index
    %36 = vector.load %arg7[%c0_15, %c0_16] : memref<1x1024xf32, #tpu.memory_space<vmem>>, vector<1x1024xf32>
    %37 = vector.broadcast %36 : vector<1x1024xf32> to vector<16x1024xf32>
    %38 = arith.addf %35, %37 : vector<16x1024xf32>
    %cst_17 = arith.constant 0.000000e+00 : f32
    %39 = vector.broadcast %cst_17 : f32 to vector<16x1024xf32>
    %40 = arith.maximumf %38, %39 : vector<16x1024xf32>
    %41 = arith.truncf %40 : vector<16x1024xf32> to vector<16x1024xbf16>
    %42 = vector.shape_cast %41 : vector<16x1024xbf16> to vector<1x16x1024xbf16>
    %cst_18 = arith.constant dense<0xFF80> : vector<1x1024xbf16>
    %43 = vector.multi_reduction <maximumf>, %42, %cst_18 [1] : vector<1x16x1024xbf16> to vector<1x1024xbf16>
    %c0_19 = arith.constant 0 : index
    %c0_20 = arith.constant 0 : index
    %44 = vector.load %arg8[%c0_19, %c0_20] : memref<1024x512xbf16, #tpu.memory_space<vmem>>, vector<1024x512xbf16>
    %cst_21 = arith.constant dense<0.000000e+00> : vector<1x512xf32>
    %45 = tpu.matmul %43, %44, %cst_21 {dimension_numbers = #tpu.dot_dimension_numbers<[1], [0], [0], [1], [0, 0, 1, 1], [], []>} : vector<1x1024xbf16>, vector<1024x512xbf16>, vector<1x512xf32> -> vector<1x512xf32>
    %c0_22 = arith.constant 0 : index
    %c0_23 = arith.constant 0 : index
    %46 = vector.load %arg9[%c0_22, %c0_23] : memref<1x512xf32, #tpu.memory_space<vmem>>, vector<1x512xf32>
    %47 = arith.addf %45, %46 : vector<1x512xf32>
    %cst_24 = arith.constant 0.000000e+00 : f32
    %48 = vector.broadcast %cst_24 : f32 to vector<1x512xf32>
    %49 = arith.maximumf %47, %48 : vector<1x512xf32>
    %50 = arith.truncf %49 : vector<1x512xf32> to vector<1x512xbf16>
    %c0_25 = arith.constant 0 : index
    %c0_26 = arith.constant 0 : index
    %51 = vector.load %arg10[%c0_25, %c0_26] : memref<512x256xbf16, #tpu.memory_space<vmem>>, vector<512x256xbf16>
    %cst_27 = arith.constant dense<0.000000e+00> : vector<1x256xf32>
    %52 = tpu.matmul %50, %51, %cst_27 {dimension_numbers = #tpu.dot_dimension_numbers<[1], [0], [0], [1], [0, 0, 1, 1], [], []>} : vector<1x512xbf16>, vector<512x256xbf16>, vector<1x256xf32> -> vector<1x256xf32>
    %c0_28 = arith.constant 0 : index
    %c0_29 = arith.constant 0 : index
    %53 = vector.load %arg11[%c0_28, %c0_29] : memref<1x256xf32, #tpu.memory_space<vmem>>, vector<1x256xf32>
    %54 = arith.addf %52, %53 : vector<1x256xf32>
    %cst_30 = arith.constant 0.000000e+00 : f32
    %55 = vector.broadcast %cst_30 : f32 to vector<1x256xf32>
    %56 = arith.maximumf %54, %55 : vector<1x256xf32>
    %57 = arith.truncf %56 : vector<1x256xf32> to vector<1x256xbf16>
    %c0_31 = arith.constant 0 : index
    %c0_32 = arith.constant 0 : index
    %58 = vector.load %arg12[%c0_31, %c0_32] : memref<256x9xf32, #tpu.memory_space<vmem>>, vector<256x9xf32>
    %59 = arith.extf %57 : vector<1x256xbf16> to vector<1x256xf32>
    %cst_33 = arith.constant dense<0.000000e+00> : vector<1x9xf32>
    %60 = tpu.matmul %59, %58, %cst_33 {dimension_numbers = #tpu.dot_dimension_numbers<[1], [0], [0], [1], [0, 0, 1, 1], [], []>} : vector<1x256xf32>, vector<256x9xf32>, vector<1x9xf32> -> vector<1x9xf32>
    %c0_34 = arith.constant 0 : index
    %c0_35 = arith.constant 0 : index
    %61 = vector.load %arg13[%c0_34, %c0_35] : memref<1x9xf32, #tpu.memory_space<vmem>>, vector<1x9xf32>
    %62 = arith.addf %60, %61 : vector<1x9xf32>
    %63 = vector.shape_cast %62 : vector<1x9xf32> to vector<1x1x9xf32>
    %64 = vector.extract_strided_slice %0 {offsets = [0, 0, 0], sizes = [1, 16, 1], strides = [1, 1, 1]} : vector<1x16x3xf32> to vector<1x16x1xf32>
    %65 = vector.extract_strided_slice %63 {offsets = [0, 0, 0], sizes = [1, 1, 3], strides = [1, 1, 1]} : vector<1x1x9xf32> to vector<1x1x3xf32>
    %66 = vector.broadcast %64 : vector<1x16x1xf32> to vector<1x16x3xf32>
    %67 = vector.broadcast %65 : vector<1x1x3xf32> to vector<1x16x3xf32>
    %68 = arith.mulf %66, %67 : vector<1x16x3xf32>
    %69 = vector.extract_strided_slice %0 {offsets = [0, 0, 1], sizes = [1, 16, 1], strides = [1, 1, 1]} : vector<1x16x3xf32> to vector<1x16x1xf32>
    %70 = vector.extract_strided_slice %63 {offsets = [0, 0, 3], sizes = [1, 1, 3], strides = [1, 1, 1]} : vector<1x1x9xf32> to vector<1x1x3xf32>
    %71 = vector.broadcast %69 : vector<1x16x1xf32> to vector<1x16x3xf32>
    %72 = vector.broadcast %70 : vector<1x1x3xf32> to vector<1x16x3xf32>
    %73 = arith.mulf %71, %72 : vector<1x16x3xf32>
    %74 = arith.addf %68, %73 : vector<1x16x3xf32>
    %75 = vector.extract_strided_slice %0 {offsets = [0, 0, 2], sizes = [1, 16, 1], strides = [1, 1, 1]} : vector<1x16x3xf32> to vector<1x16x1xf32>
    %76 = vector.extract_strided_slice %63 {offsets = [0, 0, 6], sizes = [1, 1, 3], strides = [1, 1, 1]} : vector<1x1x9xf32> to vector<1x1x3xf32>
    %77 = vector.broadcast %75 : vector<1x16x1xf32> to vector<1x16x3xf32>
    %78 = vector.broadcast %76 : vector<1x1x3xf32> to vector<1x16x3xf32>
    %79 = arith.mulf %77, %78 : vector<1x16x3xf32>
    %80 = arith.addf %74, %79 : vector<1x16x3xf32>
    %81 = vector.shape_cast %80 : vector<1x16x3xf32> to vector<16x3xf32>
    %c0_36 = arith.constant 0 : index
    %c0_37 = arith.constant 0 : index
    %82 = vector.load %arg14[%c0_36, %c0_37] : memref<3x64xf32, #tpu.memory_space<vmem>>, vector<3x64xf32>
    %83 = vector.extract_strided_slice %81 {offsets = [0, 0], sizes = [16, 1], strides = [1, 1]} : vector<16x3xf32> to vector<16x1xf32>
    %84 = vector.extract_strided_slice %82 {offsets = [0, 0], sizes = [1, 64], strides = [1, 1]} : vector<3x64xf32> to vector<1x64xf32>
    %85 = vector.broadcast %83 : vector<16x1xf32> to vector<16x64xf32>
    %86 = vector.broadcast %84 : vector<1x64xf32> to vector<16x64xf32>
    %87 = arith.mulf %85, %86 : vector<16x64xf32>
    %88 = vector.extract_strided_slice %81 {offsets = [0, 1], sizes = [16, 1], strides = [1, 1]} : vector<16x3xf32> to vector<16x1xf32>
    %89 = vector.extract_strided_slice %82 {offsets = [1, 0], sizes = [1, 64], strides = [1, 1]} : vector<3x64xf32> to vector<1x64xf32>
    %90 = vector.broadcast %88 : vector<16x1xf32> to vector<16x64xf32>
    %91 = vector.broadcast %89 : vector<1x64xf32> to vector<16x64xf32>
    %92 = arith.mulf %90, %91 : vector<16x64xf32>
    %93 = arith.addf %87, %92 : vector<16x64xf32>
    %94 = vector.extract_strided_slice %81 {offsets = [0, 2], sizes = [16, 1], strides = [1, 1]} : vector<16x3xf32> to vector<16x1xf32>
    %95 = vector.extract_strided_slice %82 {offsets = [2, 0], sizes = [1, 64], strides = [1, 1]} : vector<3x64xf32> to vector<1x64xf32>
    %96 = vector.broadcast %94 : vector<16x1xf32> to vector<16x64xf32>
    %97 = vector.broadcast %95 : vector<1x64xf32> to vector<16x64xf32>
    %98 = arith.mulf %96, %97 : vector<16x64xf32>
    %99 = arith.addf %93, %98 : vector<16x64xf32>
    %c0_38 = arith.constant 0 : index
    %c0_39 = arith.constant 0 : index
    %100 = vector.load %arg15[%c0_38, %c0_39] : memref<1x64xf32, #tpu.memory_space<vmem>>, vector<1x64xf32>
    %101 = vector.broadcast %100 : vector<1x64xf32> to vector<16x64xf32>
    %102 = arith.addf %99, %101 : vector<16x64xf32>
    %cst_40 = arith.constant 0.000000e+00 : f32
    %103 = vector.broadcast %cst_40 : f32 to vector<16x64xf32>
    %104 = arith.maximumf %102, %103 : vector<16x64xf32>
    %105 = arith.truncf %104 : vector<16x64xf32> to vector<16x64xbf16>
    %c0_41 = arith.constant 0 : index
    %c0_42 = arith.constant 0 : index
    %106 = vector.load %arg16[%c0_41, %c0_42] : memref<64x128xbf16, #tpu.memory_space<vmem>>, vector<64x128xbf16>
    %cst_43 = arith.constant dense<0.000000e+00> : vector<16x128xf32>
    %107 = tpu.matmul %105, %106, %cst_43 {dimension_numbers = #tpu.dot_dimension_numbers<[1], [0], [0], [1], [0, 0, 1, 1], [], []>} : vector<16x64xbf16>, vector<64x128xbf16>, vector<16x128xf32> -> vector<16x128xf32>
    %c0_44 = arith.constant 0 : index
    %c0_45 = arith.constant 0 : index
    %108 = vector.load %arg17[%c0_44, %c0_45] : memref<1x128xf32, #tpu.memory_space<vmem>>, vector<1x128xf32>
    %109 = vector.broadcast %108 : vector<1x128xf32> to vector<16x128xf32>
    %110 = arith.addf %107, %109 : vector<16x128xf32>
    %cst_46 = arith.constant 0.000000e+00 : f32
    %111 = vector.broadcast %cst_46 : f32 to vector<16x128xf32>
    %112 = arith.maximumf %110, %111 : vector<16x128xf32>
    %113 = arith.truncf %112 : vector<16x128xf32> to vector<16x128xbf16>
    %c0_47 = arith.constant 0 : index
    %c0_48 = arith.constant 0 : index
    %114 = vector.load %arg18[%c0_47, %c0_48] : memref<128x1024xbf16, #tpu.memory_space<vmem>>, vector<128x1024xbf16>
    %cst_49 = arith.constant dense<0.000000e+00> : vector<16x1024xf32>
    %115 = tpu.matmul %113, %114, %cst_49 {dimension_numbers = #tpu.dot_dimension_numbers<[1], [0], [0], [1], [0, 0, 1, 1], [], []>} : vector<16x128xbf16>, vector<128x1024xbf16>, vector<16x1024xf32> -> vector<16x1024xf32>
    %c0_50 = arith.constant 0 : index
    %c0_51 = arith.constant 0 : index
    %116 = vector.load %arg19[%c0_50, %c0_51] : memref<1x1024xf32, #tpu.memory_space<vmem>>, vector<1x1024xf32>
    %117 = vector.broadcast %116 : vector<1x1024xf32> to vector<16x1024xf32>
    %118 = arith.addf %115, %117 : vector<16x1024xf32>
    %119 = arith.truncf %118 : vector<16x1024xf32> to vector<16x1024xbf16>
    %120 = vector.shape_cast %119 : vector<16x1024xbf16> to vector<1x16x1024xbf16>
    %cst_52 = arith.constant dense<0xFF80> : vector<1x1024xbf16>
    %121 = vector.multi_reduction <maximumf>, %120, %cst_52 [1] : vector<1x16x1024xbf16> to vector<1x1024xbf16>
    %c0_53 = arith.constant 0 : index
    %c0_54 = arith.constant 0 : index
    %122 = vector.load %arg21[%c0_53, %c0_54] : memref<64x512xbf16, #tpu.memory_space<vmem>>, vector<64x512xbf16>
    %cst_55 = arith.constant dense<0.000000e+00> : vector<16x512xf32>
    %123 = tpu.matmul %105, %122, %cst_55 {dimension_numbers = #tpu.dot_dimension_numbers<[1], [0], [0], [1], [0, 0, 1, 1], [], []>} : vector<16x64xbf16>, vector<64x512xbf16>, vector<16x512xf32> -> vector<16x512xf32>
    %c0_56 = arith.constant 0 : index
    %c0_57 = arith.constant 0 : index
    %124 = vector.load %arg20[%c0_56, %c0_57] : memref<1024x512xbf16, #tpu.memory_space<vmem>>, vector<1024x512xbf16>
    %cst_58 = arith.constant dense<0.000000e+00> : vector<1x512xf32>
    %125 = tpu.matmul %121, %124, %cst_58 {dimension_numbers = #tpu.dot_dimension_numbers<[1], [0], [0], [1], [0, 0, 1, 1], [], []>} : vector<1x1024xbf16>, vector<1024x512xbf16>, vector<1x512xf32> -> vector<1x512xf32>
    %c0_59 = arith.constant 0 : index
    %c0_60 = arith.constant 0 : index
    %126 = vector.load %arg22[%c0_59, %c0_60] : memref<1x512xf32, #tpu.memory_space<vmem>>, vector<1x512xf32>
    %127 = arith.addf %125, %126 : vector<1x512xf32>
    %128 = vector.shape_cast %123 : vector<16x512xf32> to vector<1x16x512xf32>
    %129 = vector.shape_cast %127 : vector<1x512xf32> to vector<1x1x512xf32>
    %130 = vector.broadcast %129 : vector<1x1x512xf32> to vector<1x16x512xf32>
    %131 = arith.addf %128, %130 : vector<1x16x512xf32>
    %cst_61 = arith.constant 0.000000e+00 : f32
    %132 = vector.broadcast %cst_61 : f32 to vector<1x16x512xf32>
    %133 = arith.maximumf %131, %132 : vector<1x16x512xf32>
    %134 = arith.truncf %133 : vector<1x16x512xf32> to vector<1x16x512xbf16>
    %135 = vector.shape_cast %134 : vector<1x16x512xbf16> to vector<16x512xbf16>
    %c0_62 = arith.constant 0 : index
    %c0_63 = arith.constant 0 : index
    %136 = vector.load %arg23[%c0_62, %c0_63] : memref<512x256xbf16, #tpu.memory_space<vmem>>, vector<512x256xbf16>
    %cst_64 = arith.constant dense<0.000000e+00> : vector<16x256xf32>
    %137 = tpu.matmul %135, %136, %cst_64 {dimension_numbers = #tpu.dot_dimension_numbers<[1], [0], [0], [1], [0, 0, 1, 1], [], []>} : vector<16x512xbf16>, vector<512x256xbf16>, vector<16x256xf32> -> vector<16x256xf32>
    %c0_65 = arith.constant 0 : index
    %c0_66 = arith.constant 0 : index
    %138 = vector.load %arg24[%c0_65, %c0_66] : memref<1x256xf32, #tpu.memory_space<vmem>>, vector<1x256xf32>
    %139 = vector.broadcast %138 : vector<1x256xf32> to vector<16x256xf32>
    %140 = arith.addf %137, %139 : vector<16x256xf32>
    %cst_67 = arith.constant 0.000000e+00 : f32
    %141 = vector.broadcast %cst_67 : f32 to vector<16x256xf32>
    %142 = arith.maximumf %140, %141 : vector<16x256xf32>
    %143 = arith.truncf %142 : vector<16x256xf32> to vector<16x256xbf16>
    %c0_68 = arith.constant 0 : index
    %c0_69 = arith.constant 0 : index
    %144 = vector.load %arg25[%c0_68, %c0_69] : memref<256x128xbf16, #tpu.memory_space<vmem>>, vector<256x128xbf16>
    %cst_70 = arith.constant dense<0.000000e+00> : vector<16x128xf32>
    %145 = tpu.matmul %143, %144, %cst_70 {dimension_numbers = #tpu.dot_dimension_numbers<[1], [0], [0], [1], [0, 0, 1, 1], [], []>} : vector<16x256xbf16>, vector<256x128xbf16>, vector<16x128xf32> -> vector<16x128xf32>
    %c0_71 = arith.constant 0 : index
    %c0_72 = arith.constant 0 : index
    %146 = vector.load %arg26[%c0_71, %c0_72] : memref<1x128xf32, #tpu.memory_space<vmem>>, vector<1x128xf32>
    %147 = vector.broadcast %146 : vector<1x128xf32> to vector<16x128xf32>
    %148 = arith.addf %145, %147 : vector<16x128xf32>
    %cst_73 = arith.constant 0.000000e+00 : f32
    %149 = vector.broadcast %cst_73 : f32 to vector<16x128xf32>
    %150 = arith.maximumf %148, %149 : vector<16x128xf32>
    %151 = arith.truncf %150 : vector<16x128xf32> to vector<16x128xbf16>
    %c0_74 = arith.constant 0 : index
    %c0_75 = arith.constant 0 : index
    %152 = vector.load %arg27[%c0_74, %c0_75] : memref<128x128xbf16, #tpu.memory_space<vmem>>, vector<128x128xbf16>
    %cst_76 = arith.constant dense<0.000000e+00> : vector<16x128xf32>
    %153 = tpu.matmul %151, %152, %cst_76 {dimension_numbers = #tpu.dot_dimension_numbers<[1], [0], [0], [1], [0, 0, 1, 1], [], []>} : vector<16x128xbf16>, vector<128x128xbf16>, vector<16x128xf32> -> vector<16x128xf32>
    %c0_77 = arith.constant 0 : index
    %c0_78 = arith.constant 0 : index
    %154 = vector.load %arg28[%c0_77, %c0_78] : memref<1x128xf32, #tpu.memory_space<vmem>>, vector<1x128xf32>
    %155 = vector.broadcast %154 : vector<1x128xf32> to vector<16x128xf32>
    %156 = arith.addf %153, %155 : vector<16x128xf32>
    %157 = vector.shape_cast %156 : vector<16x128xf32> to vector<1x16x128xf32>
    %158 = arith.truncf %157 : vector<1x16x128xf32> to vector<1x16x128xbf16>
    %c0_79 = arith.constant 0 : index
    %c0_80 = arith.constant 0 : index
    %c0_81 = arith.constant 0 : index
    %159 = vector.load %arg29[%c0_79, %c0_80, %c0_81] : memref<1x16x128xbf16, #tpu.memory_space<vmem>>, vector<1x16x128xbf16>
    tpu.vector_store %arg29[%c0_79, %c0_80, %c0_81], %158 {strides = array<i32>} : memref<1x16x128xbf16, #tpu.memory_space<vmem>>, vector<1x16x128xbf16>,
    return
  }
  func.func @transform_0(%arg0: i32) -> (i32, i32, i32) {
    %c0_i32 = arith.constant 0 : i32
    %c0_i32_0 = arith.constant 0 : i32
    %c0_i32_1 = arith.constant 0 : i32
    return %arg0, %c0_i32, %c0_i32_0 : i32, i32, i32
  }
  func.func @transform_1(%arg0: i32) -> (i32, i32) {
    %c0_i32 = arith.constant 0 : i32
    %c0_i32_0 = arith.constant 0 : i32
    %c0_i32_1 = arith.constant 0 : i32
    return %c0_i32, %c0_i32_0 : i32, i32
  }
  func.func @transform_2(%arg0: i32) -> (i32, i32) {
    %c0_i32 = arith.constant 0 : i32
    %c0_i32_0 = arith.constant 0 : i32
    %c0_i32_1 = arith.constant 0 : i32
    return %c0_i32, %c0_i32_0 : i32, i32
  }
  func.func @transform_3(%arg0: i32) -> (i32, i32) {
    %c0_i32 = arith.constant 0 : i32
    %c0_i32_0 = arith.constant 0 : i32
    %c0_i32_1 = arith.constant 0 : i32
    return %c0_i32, %c0_i32_0 : i32, i32
  }
  func.func @transform_4(%arg0: i32) -> (i32, i32) {
    %c0_i32 = arith.constant 0 : i32
    %c0_i32_0 = arith.constant 0 : i32
    %c0_i32_1 = arith.constant 0 : i32
    return %c0_i32, %c0_i32_0 : i32, i32
  }
  func.func @transform_5(%arg0: i32) -> (i32, i32) {
    %c0_i32 = arith.constant 0 : i32
    %c0_i32_0 = arith.constant 0 : i32
    %c0_i32_1 = arith.constant 0 : i32
    return %c0_i32, %c0_i32_0 : i32, i32
  }
  func.func @transform_6(%arg0: i32) -> (i32, i32) {
    %c0_i32 = arith.constant 0 : i32
    %c0_i32_0 = arith.constant 0 : i32
    %c0_i32_1 = arith.constant 0 : i32
    return %c0_i32, %c0_i32_0 : i32, i32
  }
  func.func @transform_7(%arg0: i32) -> (i32, i32) {
    %c0_i32 = arith.constant 0 : i32
    %c0_i32_0 = arith.constant 0 : i32
    %c0_i32_1 = arith.constant 0 : i32
    return %c0_i32, %c0_i32_0 : i32, i32
  }
  func.func @transform_8(%arg0: i32) -> (i32, i32) {
    %c0_i32 = arith.constant 0 : i32
    %c0_i32_0 = arith.constant 0 : i32
    %c0_i32_1 = arith.constant 0 : i32
    return %c0_i32, %c0_i32_0 : i32, i32
  }
  func.func @transform_9(%arg0: i32) -> (i32, i32) {
    %c0_i32 = arith.constant 0 : i32
    %c0_i32_0 = arith.constant 0 : i32
    %c0_i32_1 = arith.constant 0 : i32
    return %c0_i32, %c0_i32_0 : i32, i32
  }
  func.func @transform_10(%arg0: i32) -> (i32, i32) {
    %c0_i32 = arith.constant 0 : i32
    %c0_i32_0 = arith.constant 0 : i32
    %c0_i32_1 = arith.constant 0 : i32
    return %c0_i32, %c0_i32_0 : i32, i32
  }
  func.func @transform_11(%arg0: i32) -> (i32, i32) {
    %c0_i32 = arith.constant 0 : i32
    %c0_i32_0 = arith.constant 0 : i32
    %c0_i32_1 = arith.constant 0 : i32
    return %c0_i32, %c0_i32_0 : i32, i32
  }
  func.func @transform_12(%arg0: i32) -> (i32, i32) {
    %c0_i32 = arith.constant 0 : i32
    %c0_i32_0 = arith.constant 0 : i32
    %c0_i32_1 = arith.constant 0 : i32
    return %c0_i32, %c0_i32_0 : i32, i32
  }
  func.func @transform_13(%arg0: i32) -> (i32, i32) {
    %c0_i32 = arith.constant 0 : i32
    %c0_i32_0 = arith.constant 0 : i32
    %c0_i32_1 = arith.constant 0 : i32
    return %c0_i32, %c0_i32_0 : i32, i32
  }
  func.func @transform_14(%arg0: i32) -> (i32, i32) {
    %c0_i32 = arith.constant 0 : i32
    %c0_i32_0 = arith.constant 0 : i32
    %c0_i32_1 = arith.constant 0 : i32
    return %c0_i32, %c0_i32_0 : i32, i32
  }
  func.func @transform_15(%arg0: i32) -> (i32, i32) {
    %c0_i32 = arith.constant 0 : i32
    %c0_i32_0 = arith.constant 0 : i32
    %c0_i32_1 = arith.constant 0 : i32
    return %c0_i32, %c0_i32_0 : i32, i32
  }
  func.func @transform_16(%arg0: i32) -> (i32, i32) {
    %c0_i32 = arith.constant 0 : i32
    %c0_i32_0 = arith.constant 0 : i32
    %c0_i32_1 = arith.constant 0 : i32
    return %c0_i32, %c0_i32_0 : i32, i32
  }
  func.func @transform_17(%arg0: i32) -> (i32, i32) {
    %c0_i32 = arith.constant 0 : i32
    %c0_i32_0 = arith.constant 0 : i32
    %c0_i32_1 = arith.constant 0 : i32
    return %c0_i32, %c0_i32_0 : i32, i32
  }
  func.func @transform_18(%arg0: i32) -> (i32, i32) {
    %c0_i32 = arith.constant 0 : i32
    %c0_i32_0 = arith.constant 0 : i32
    %c0_i32_1 = arith.constant 0 : i32
    return %c0_i32, %c0_i32_0 : i32, i32
  }
  func.func @transform_19(%arg0: i32) -> (i32, i32) {
    %c0_i32 = arith.constant 0 : i32
    %c0_i32_0 = arith.constant 0 : i32
    %c0_i32_1 = arith.constant 0 : i32
    return %c0_i32, %c0_i32_0 : i32, i32
  }
  func.func @transform_20(%arg0: i32) -> (i32, i32) {
    %c0_i32 = arith.constant 0 : i32
    %c0_i32_0 = arith.constant 0 : i32
    %c0_i32_1 = arith.constant 0 : i32
    return %c0_i32, %c0_i32_0 : i32, i32
  }
  func.func @transform_21(%arg0: i32) -> (i32, i32) {
    %c0_i32 = arith.constant 0 : i32
    %c0_i32_0 = arith.constant 0 : i32
    %c0_i32_1 = arith.constant 0 : i32
    return %c0_i32, %c0_i32_0 : i32, i32
  }
  func.func @transform_22(%arg0: i32) -> (i32, i32) {
    %c0_i32 = arith.constant 0 : i32
    %c0_i32_0 = arith.constant 0 : i32
    %c0_i32_1 = arith.constant 0 : i32
    return %c0_i32, %c0_i32_0 : i32, i32
  }
  func.func @transform_23(%arg0: i32) -> (i32, i32) {
    %c0_i32 = arith.constant 0 : i32
    %c0_i32_0 = arith.constant 0 : i32
    %c0_i32_1 = arith.constant 0 : i32
    return %c0_i32, %c0_i32_0 : i32, i32
  }
  func.func @transform_24(%arg0: i32) -> (i32, i32) {
    %c0_i32 = arith.constant 0 : i32
    %c0_i32_0 = arith.constant 0 : i32
    %c0_i32_1 = arith.constant 0 : i32
    return %c0_i32, %c0_i32_0 : i32, i32
  }
  func.func @transform_25(%arg0: i32) -> (i32, i32) {
    %c0_i32 = arith.constant 0 : i32
    %c0_i32_0 = arith.constant 0 : i32
    %c0_i32_1 = arith.constant 0 : i32
    return %c0_i32, %c0_i32_0 : i32, i32
  }
  func.func @transform_26(%arg0: i32) -> (i32, i32) {
    %c0_i32 = arith.constant 0 : i32
    %c0_i32_0 = arith.constant 0 : i32
    %c0_i32_1 = arith.constant 0 : i32
    return %c0_i32, %c0_i32_0 : i32, i32
  }
  func.func @transform_27(%arg0: i32) -> (i32, i32) {
    %c0_i32 = arith.constant 0 : i32
    %c0_i32_0 = arith.constant 0 : i32
    %c0_i32_1 = arith.constant 0 : i32
    return %c0_i32, %c0_i32_0 : i32, i32
  }
  func.func @transform_28(%arg0: i32) -> (i32, i32, i32) {
    %c0_i32 = arith.constant 0 : i32
    %c0_i32_0 = arith.constant 0 : i32
    %c0_i32_1 = arith.constant 0 : i32
    return %arg0, %c0_i32, %c0_i32_0 : i32, i32, i32
  }
}

</mosaic_0001>

<bundles_post_ra>
// kernel: tpu_custom_call.1
= control target key start
LH: loop header
LB: loop body
LE: loop exit
PB: predicated region body
PF: predicated region fallthrough
CT: control target
= control target key end

     0   :  { %7 = vsyncpa [#allocation3], 0  ;;  %s635_s0 = inlined_call_operand.hbm [shape: f32[8,128], index: 0, kind: input, shape index: {}]   ;;  %s636_s1 = inlined_call_operand.hbm [shape: f32[16,128], index: 1, kind: input, shape index: {}]   ;;  %s637_s2 = inlined_call_operand.hbm [shape: f32[16,128], index: 2, kind: output, shape index: {}]  }
   0x1   :  { %8 = vsyncpa [#allocation6], 0 }
   0x2   :  { %10 = vsyncpa [#allocation6 + $0x1], 0 }
   0x3   :  { %11 = vsyncpa [#allocation4], 0 }
   0x4   :  { %13 = vsyncpa [#allocation4 + $0x1], 0  ;;  %s497_s9 = smov 0   ;;  %s499_s10 = smov 0  }
   0x5   :  { %s501_s11 = smov 0   ;;  %s503_s12 = smov 0  }
   0x6 LB: > { %s518_s13 = sadd.s32 4294967295, %s479_s12   ;;  %s278_s14 = sadd.s32 4294967294, %s479_s12   ;;  %s479_s12 = sphi %s503_s12, %s647_s12   ;;  %s475_s11 = sphi %s501_s11, %s646_s11   ;;  %s471_s10 = sphi %s499_s10, %s645_s10   ;;  %s467_s9 = sphi %s497_s9, %s644_s9  }
   0x7   : > { %p60_p0 = scmp.ne.s32.totalorder %s471_s10, %s467_s9  ;;  %p61_p1 = scmp.eq.s32.totalorder %s518_s13, 0 }
   0x8   : > { %p84_p2 = scmp.eq.s32.totalorder %s518_s13, 1  ;;  %p90_p3 = scmp.eq.s32.totalorder %s278_s14, 1 }
   0x9   : > { %p527_p4 = por %p61_p1, %p60_p0  ;;  %p279_p5 = scmp.ge.s32.totalorder %s479_s12, 1 }
   0xa   : > { %p532_p6 = por %p90_p3, %p60_p0  ;;  %p97_p7 = scmp.lt.s32.totalorder %s479_s12, 3 }
   0xb   : > { %s109_s19 = sshll.u32 %s635_s0, 4  ;;  %s481_s21 = smov [#allocation2]   ;;  %s110_s19 = int_to_ptr.hbm [resolvable:$true] %s109_s19 }
   0xc   : > { %p540_p8 = pnand %p279_p5, %p97_p7  ;;  %s111_s22 = sshll.u32 %s481_s21, 4  ;;  %s112_s22 = int_to_ptr.vmem [resolvable:$true] %s111_s22 }
   0xd   : > { %s550_s23 = sadd.s32 1, %s479_s12   ;;  %s47_s24 = sadd.s32 1, %s475_s11 }
   0xe   : > { %p300_p10 = pneg %p540_p8  ;;  %s44_s25 = ssub.s32 %s479_s12, %s550_s23 }
   0xf   : > { %p45_p12 = scmp.eq.s32.totalorder %s44_s25, 0  ;;  %p54_p13 = scmp.ne.s32.totalorder %s475_s11, %s471_s10 }
  0x10   : > { %p301_p11 = pnand %p300_p10, %p61_p1  ;;  %p55_p0 = scmp.eq.s32.totalorder %s479_s12, 0 }
  0x11   : > { %s559_s26 = scalar_select %p45_p12, %s475_s11, %s47_s24  }
  0x12   : > { %303 = dma.hbm_to_vmem [thread:$0]  (!%p301_p11), %s110_s19, 128, %s112_s22, [#allocation3]  }
  0x13   : > { %p563_p3 = por %p84_p2, %p54_p13  ;;  %p313_p5 = scmp.lt.s32.totalorder %s479_s12, 2 }
  0x14   : > { %s122_s28 = sand.u32 1, %s475_s11   ;;  %s283_s29 = sshll.u32 %s479_s12, 3 }
  0x15   : > { %p56_p7 = por %p55_p0, %p54_p13  ;;  %s282_s30 = sshll.u32 %s122_s28, 3 }
  0x16   : > { %s130_s5 = scalar_lea.hbm %s636_s1, %s283_s29  ;;  %s126_s7 = scalar_lea.vmem [#allocation5], %s282_s30 }
  0x17   : > { %s132_s6 = sshll.u32 %s130_s5, 4  ;;  %s134_s8 = sshll.u32 %s126_s7, 4  ;;  %s133_s6 = int_to_ptr.hbm [resolvable:$true] %s132_s6  ;;  %s135_s8 = int_to_ptr.vmem [resolvable:$true] %s134_s8 }
  0x18   : > { %p573_p10 = pnand %p313_p5, %p56_p7  ;;  %s123_s17 = scalar_lea.sflag [#allocation6], %s122_s28 }
  0x19   : > { %s379_s18 = sshra.s32 %s133_s6, 4  ;;  %s386_s24 = scalar_lea.hbm %s636_s1, 16  ;;  %s380_s18 = int_to_ptr.hbm [resolvable:$true] %s379_s18 }
  0x1a   : > { %s381_s19 = scalar_lea.hbm %s380_s18, 8  ;;  %p383_p11 = pneg %p573_p10 }
  0x1b   : > { %p382_p2 = scmp.ne.s32.totalorder %s380_s18, %s381_s19  ;;  %p387_p0 = scmp.lt.s32.totalorder %s380_s18, %s636_s1 }
  0x1c   : > { %p388_p5 = scmp.lt.s32.totalorder %s386_s24, %s381_s19 }
  0x1d   : > { %p384_p12 = pnand %p383_p11, %p382_p2 }
  0x1e   : > { %p389_p7 = por %p388_p5, %p387_p0 }
  0x1f   : > { %p385_p13 = pneg %p384_p12 }
  0x21   : > { %p390_p9 = pnand %p389_p7, %p385_p13 }
  0x23   : > { %393 = shalt.err (!%p390_p9)
}
  0x24   : > { %307 = dma.hbm_to_vmem [thread:$0]  (!%p573_p10), %s133_s6, 128, %s135_s8, %s123_s17  }
  0x25   : > { %143 = sbr.rel (%p540_p8) target bundleno = 62 (0x3e), region = 28 }
  0x2a   : > { %454 = dma.done.wait (%p61_p1), [#allocation3], 128  }
  0x2b   : > { %456 = vsyncadd (%p61_p1), [#allocation3], 4294967168  ;;  %s594_s28 = sand.u32 1, %s471_s10  }
  0x2c   : > { %s286_s30 = sshll.u32 %s594_s28, 3  ;;  %s151_s3 = scalar_lea.sflag [#allocation6], %s594_s28 }
  0x2d   : > { %s154_s4 = scalar_lea.vmem [#allocation5], %s286_s30 }
  0x2e   : > { %458 = dma.done.wait (%p527_p4), %s151_s3, 128  }
  0x2f   : > { %460 = vsyncadd (%p527_p4), %s151_s3, 4294967168  ;;  %s289_s20 = sshll.u32 %s518_s13, 3  ;;  %s175_s8 = scalar_lea.vmem [#allocation7], %s286_s30  ;;  %v176_v0 = vld [vmem:[%s154_s4] sm:$0xff]  ;;  %v177_v1 = vld [vmem:[#allocation2] sm:$0xff] }
  0x30   : > { %s191_s7 = scalar_lea.hbm %s637_s2, %s289_s20  ;;  %s193_s14 = sshll.u32 %s175_s8, 4  ;;  %v178_v2 = vadd.f32 %v177_v1, %v176_v0  ;;  %s194_s14 = int_to_ptr.vmem [resolvable:$true] %s193_s14 }
  0x31   : > { %s195_s17 = sshll.u32 %s191_s7, 4  ;;  %s181_s18 = scalar_lea.sflag [#allocation4], %s594_s28  ;;  %s196_s17 = int_to_ptr.hbm [resolvable:$true] %s195_s17 }
  0x32   : > { %179 = vst [vmem:[%s175_s8] sm:$0xff] %v178_v2  ;;  %s423_s15 = sshra.s32 %s196_s17, 4  ;;  %s429_s22 = scalar_lea.hbm %s637_s2, 16  ;;  %s424_s15 = int_to_ptr.hbm [resolvable:$true] %s423_s15 }
  0x33   : > { %s425_s19 = scalar_lea.hbm %s424_s15, 8  ;;  %p430_p9 = scmp.lt.s32.totalorder %s424_s15, %s637_s2 }
  0x34   : > { %p426_p1 = scmp.ne.s32.totalorder %s424_s15, %s425_s19  ;;  %p431_p10 = scmp.lt.s32.totalorder %s429_s22, %s425_s19 }
  0x36   : > { %p427_p4 = pnand %p426_p1, %p563_p3  ;;  %p432_p2 = por %p431_p10, %p430_p9 }
  0x38   : > { %p428_p8 = pneg %p427_p4 }
  0x3a   : > { %p433_p11 = pnand %p432_p2, %p428_p8 }
  0x3c   : > { %436 = shalt.err (!%p433_p11)
}
  0x3d   : > { %298 = dma.vmem_to_hbm [thread:$0]  (%p563_p3), %s194_s14, 128, %s196_s17, %s181_s18  }
  0x3e PF: > { %s207_s29 = sand.u32 1, %s467_s9   ;;  %p643_p12 = scmp.ge.s32.totalorder %s479_s12, 2 }
  0x3f   : > { %s208_s28 = scalar_lea.sflag [#allocation4], %s207_s29 }
  0x40   : > { %p309_p13 = pnand %p643_p12, %p532_p6 }
  0x42   : > { %p310_p0 = pneg %p309_p13 }
  0x44   : > { %462 = dma.done.wait (%p310_p0), %s208_s28, 128  }
  0x45   : > { %464 = vsyncadd (%p310_p0), %s208_s28, 4294967168  ;;  %p16_p5 = scmp.ge.s32.totalorder %s550_s23, 4   ;;  %s644_s9 = smov %s471_s10 }
  0x46   : > { %s645_s10 = smov %s475_s11  ;;  %s646_s11 = smov %s559_s26 }
  0x47   : > { %s647_s12 = smov %s550_s23  ;;  %18 = sbr.rel (!%p16_p5) target bundleno = 6 (0x6), region = 78 }
  0x4c   :  { %214 = vsyncpa [#allocation3], 1 }
  0x4d   :  { %216 = vsyncpa [#allocation3 + $0x1], 1 }
  0x4e   :  { %217 = vsyncpa [#allocation6], 1 }
  0x4f   :  { %219 = vsyncpa [#allocation6 + $0x1], 1 }
  0x50   :  { %220 = vsyncpa [#allocation4], 1 }
  0x51   :  { %222 = vsyncpa [#allocation4 + $0x1], 1 }

// kernel: tpu_custom_call.1
= control target key start
LH: loop header
LB: loop body
LE: loop exit
PB: predicated region body
PF: predicated region fallthrough
CT: control target
= control target key end

     0   :  { %s14248_s0 = inlined_call_operand.vmem [shape: f32[2,16,3], index: 0, kind: input, shape index: {}]   ;;  %s14249_s1 = inlined_call_operand.hbm [shape: f32[3,64], index: 1, kind: input, shape index: {}]   ;;  %s14250_s2 = inlined_call_operand.hbm [shape: f32[1,64], index: 2, kind: input, shape index: {}]   ;;  %s14251_s3 = inlined_call_operand.vmem [shape: bf16[64,128], index: 3, kind: input, shape index: {}]   ;;  %s14252_s4 = inlined_call_operand.hbm [shape: f32[1,128], index: 4, kind: input, shape index: {}]   ;;  %s14253_s5 = inlined_call_operand.hbm [shape: bf16[128,1024], index: 5, kind: input, shape index: {}]   ;;  %s14254_s6 = inlined_call_operand.vmem [shape: f32[1,1024], index: 6, kind: input, shape index: {}]   ;;  %s14255_s7 = inlined_call_operand.hbm [shape: bf16[1024,512], index: 7, kind: input, shape index: {}]   ;;  %s14256_s8 = inlined_call_operand.hbm [shape: f32[1,512], index: 8, kind: input, shape index: {}]   ;;  %s14257_s9 = inlined_call_operand.hbm [shape: bf16[512,256], index: 9, kind: input, shape index: {}]   ;;  %s14258_s10 = inlined_call_operand.hbm [shape: f32[1,256], index: 10, kind: input, shape index: {}]   ;;  %s14259_s11 = inlined_call_operand.vmem [shape: f32[256,9], index: 11, kind: input, shape index: {}]   ;;  %s14260_s12 = inlined_call_operand.vmem [shape: f32[1,9], index: 12, kind: input, shape index: {}]   ;;  %s14261_s13 = inlined_call_operand.hbm [shape: f32[3,64], index: 13, kind: input, shape index: {}]   ;;  %s14262_s14 = inlined_call_operand.hbm [shape: f32[1,64], index: 14, kind: input, shape index: {}]   ;;  %s14263_s15 = inlined_call_operand.hbm [shape: bf16[64,128], index: 15, kind: input, shape index: {}]   ;;  %s14264_s16 = inlined_call_operand.hbm [shape: f32[1,128], index: 16, kind: input, shape index: {}]   ;;  %s14265_s17 = inlined_call_operand.hbm [shape: bf16[128,1024], index: 17, kind: input, shape index: {}]   ;;  %s14266_s18 = inlined_call_operand.vmem [shape: f32[1,1024], index: 18, kind: input, shape index: {}]   ;;  %s14267_s19 = inlined_call_operand.hbm [shape: bf16[1024,512], index: 19, kind: input, shape index: {}]   ;;  %s14268_s20 = inlined_call_operand.vmem [shape: bf16[64,512], index: 20, kind: input, shape index: {}]   ;;  %s14269_s21 = inlined_call_operand.vmem [shape: f32[1,512], index: 21, kind: input, shape index: {}]   ;;  %s14270_s22 = inlined_call_operand.hbm [shape: bf16[512,256], index: 22, kind: input, shape index: {}]   ;;  %s14271_s23 = inlined_call_operand.vmem [shape: f32[1,256], index: 23, kind: input, shape index: {}]   ;;  %s14272_s24 = inlined_call_operand.vmem [shape: bf16[256,128], index: 24, kind: input, shape index: {}]   ;;  %s14273_s25 = inlined_call_operand.vmem [shape: f32[1,128], index: 25, kind: input, shape index: {}]   ;;  %s14274_s26 = inlined_call_operand.hbm [shape: bf16[128,128], index: 26, kind: input, shape index: {}]   ;;  %s14275_s27 = inlined_call_operand.vmem [shape: f32[1,128], index: 27, kind: input, shape index: {}]   ;;  %s14276_s28 = inlined_call_operand.hbm [shape: bf16[2,16,128], index: 28, kind: output, shape index: {}]  }
   0x1   :  { %14291 = sst [smem:[#allocation47_spill]] %s14248_s0 }
   0x2   :  { %14292 = sst [smem:[#allocation48_spill]] %s14249_s1 }
   0x3   :  { %14293 = sst [smem:[#allocation49_spill]] %s14250_s2 }
   0x4   :  { %14294 = sst [smem:[#allocation50_spill]] %s14251_s3 }
   0x5   :  { %14295 = sst [smem:[#allocation51_spill]] %s14252_s4 }
   0x6   :  { %14296 = sst [smem:[#allocation52_spill]] %s14253_s5 }
   0x7   :  { %14297 = sst [smem:[#allocation53_spill]] %s14254_s6 }
   0x8   :  { %14298 = sst [smem:[#allocation54_spill]] %s14255_s7 }
   0x9   :  { %14299 = sst [smem:[#allocation55_spill]] %s14256_s8 }
   0xa   :  { %14300 = sst [smem:[#allocation56_spill]] %s14257_s9 }
   0xb   :  { %14301 = sst [smem:[#allocation57_spill]] %s14258_s10 }
   0xc   :  { %14302 = sst [smem:[#allocation58_spill]] %s14259_s11 }
   0xd   :  { %14303 = sst [smem:[#allocation59_spill]] %s14260_s12 }
   0xe   :  { %14304 = sst [smem:[#allocation60_spill]] %s14262_s14 }
   0xf   :  { %14305 = sst [smem:[#allocation61_spill]] %s14271_s23 }
  0x10   :  { %14306 = sst [smem:[#allocation62_spill]] %s14273_s25 }
  0x11   :  { %14307 = sst [smem:[#allocation63_spill]] %s14275_s27 }
  0x12   :  { %14308 = sst [smem:[#allocation64_spill]] %s14276_s28 }
  0x13   :  { %33 = vsyncpa [#allocation3], 0 }
  0x14   :  { %34 = vsyncpa [#allocation6], 0 }
  0x15   :  { %35 = vsyncpa [#allocation9], 0 }
  0x16   :  { %36 = vsyncpa [#allocation12], 0 }
  0x17   :  { %37 = vsyncpa [#allocation15], 0 }
  0x18   :  { %38 = vsyncpa [#allocation18], 0 }
  0x19   :  { %39 = vsyncpa [#allocation21], 0 }
  0x1a   :  { %40 = vsyncpa [#allocation24], 0 }
  0x1b   :  { %41 = vsyncpa [#allocation27], 0 }
  0x1c   :  { %42 = vsyncpa [#allocation4], 0 }
  0x1d   :  { %44 = vsyncpa [#allocation4 + $0x1], 0  ;;  %s13371_s8 = smov 0   ;;  %s13373_s5 = smov 0  }
  0x1e   :  { %s13375_s9 = smov 0   ;;  %s13377_s30 = smov 0  }
  0x1f LB: > { %14309 = sst [smem:[#allocation39_spill]] %s13181_s8  ;;  %s13392_s3 = sadd.s32 4294967295, %s13193_s30   ;;  %s13193_s30 = sphi %s13377_s30, %s14346_s30   ;;  %s13189_s9 = sphi %s13375_s9, %s14349_s9   ;;  %s13185_s5 = sphi %s13373_s5, %s14348_s5   ;;  %s13181_s8 = sphi %s13371_s8, %s14347_s8  }
  0x20   : > { %14310 = sst [smem:[#allocation40_spill]] %s13185_s5  ;;  %s8245_s6 = sadd.s32 4294967294, %s13193_s30  }
  0x21   : > { %14311 = sst [smem:[#allocation41_spill]] %s13189_s9  ;;  %s13396_s10 = sadd.s32 1, %s13193_s30  }
  0x22   : > { %14312 = sst [smem:[#allocation42_spill]] %s13193_s30  ;;  %s650_s0 = sadd.s32 1, %s13189_s9 }
  0x23   : > { %14313 = sst [smem:[#allocation43_spill]] %s13396_s10  ;;  %s647_s11 = ssub.s32 %s13193_s30, %s13396_s10 }
  0x24   : > { %p660_p0 = scmp.ne.s32.totalorder %s13189_s9, %s13185_s5  ;;  %p648_p1 = scmp.eq.s32.totalorder %s647_s11, 0 }
  0x25   : > { %p661_p2 = scmp.eq.s32.totalorder %s13392_s3, 1  ;;  %p666_p3 = scmp.ne.s32.totalorder %s13185_s5, %s13181_s8 }
  0x26   : > { %p667_p4 = scmp.eq.s32.totalorder %s8245_s6, 1  ;;  %p8246_p7 = scmp.ge.s32.totalorder %s13193_s30, 1 }
  0x27   : > { %s13407_s29 = scalar_select %p648_p1, %s13189_s9, %s650_s0  }
  0x28   : > { %p13409_p5 = por %p661_p2, %p660_p0  ;;  %p13413_p6 = por %p667_p4, %p666_p3 }
  0x29   : > { %14314 = sst [smem:[#allocation44_spill]] %s13407_s29  ;;  %p674_p8 = scmp.lt.s32.totalorder %s13193_s30, 3 }
  0x2a   : > { %s14315_s2 = scalar_select %p13409_p5, 1, 0 }
  0x2b   : > { %s14317_s7 = scalar_select %p13413_p6, 1, 0 }
  0x2c   : > { %14316 = sst [smem:[#allocation45_spill]] %s14315_s2  ;;  %p12501_p9 = scmp.eq.s32.totalorder %s13392_s3, 0 }
  0x2d   : > { %14318 = sst [smem:[#allocation46_spill]] %s14317_s7  ;;  %p13420_p10 = pnand %p8246_p7, %p674_p8 }
  0x2e   : > { %s14320_s6 = sld [smem:[#allocation49_spill]]  ;;  %s13195_s11 = smov [#allocation5]  }
  0x2f   : > { %p12448_p11 = pneg %p13420_p10  ;;  %s700_s29 = sshll.u32 %s13195_s11, 4  ;;  %s701_s29 = int_to_ptr.vmem [resolvable:$true] %s700_s29 }
  0x30   : > { %s14321_s7 = sld [smem:[#allocation52_spill]]  ;;  %s13196_s1 = smov [#allocation8]  }
  0x31   : > { %p13434_p12 = pnand %p12501_p9, %p12448_p11  ;;  %s726_s4 = sshll.u32 %s13196_s1, 4  ;;  %s727_s4 = int_to_ptr.vmem [resolvable:$true] %s726_s4 }
  0x32   : > { %s14290_s11 = smov 32   ;;  %s13199_s27 = smov [#allocation11]  }
  0x33   : > { %s758_s28 = sshll.u32 %s13199_s27, 4  ;;  %s13200_s5 = smov [#allocation14]   ;;  %s759_s28 = int_to_ptr.vmem [resolvable:$true] %s758_s28 }
  0x34   : > { %s698_s0 = sshll.u32 %s14320_s6, 4  ;;  %s14289_s6 = smov 512   ;;  %s699_s0 = int_to_ptr.hbm [resolvable:$true] %s698_s0 }
  0x35   : > { %12454 = dma.hbm_to_vmem [thread:$0]  (!%p13434_p12), %s699_s0, 16, %s701_s29, [#allocation6]  }
  0x36   : > { %s724_s8 = sshll.u32 %s14321_s7, 4  ;;  %s14323_s7 = sld [smem:[#allocation55_spill]]  ;;  %s725_s8 = int_to_ptr.hbm [resolvable:$true] %s724_s8 }
  0x37   : > { %12460 = dma.hbm_to_vmem [thread:$0]  (!%p13434_p12), %s725_s8, 8192, %s727_s4, [#allocation9], %s14289_s6, %s14289_s6, %s14290_s11  }
  0x38   : > { %s14324_s0 = sld [smem:[#allocation57_spill]]  ;;  %s784_s23 = sshll.u32 %s13200_s5, 4  ;;  %s785_s23 = int_to_ptr.vmem [resolvable:$true] %s784_s23 }
  0x39   : > { %s14325_s14 = sld [smem:[#allocation60_spill]]  ;;  %s13201_s1 = smov [#allocation17]  }
  0x3a   : > { %s814_s29 = sshll.u32 %s13201_s1, 4  ;;  %s14326_s10 = sld [smem:[#allocation48_spill]]  ;;  %s815_s29 = int_to_ptr.vmem [resolvable:$true] %s814_s29 }
  0x3b   : > { %s14328_s27 = sld [smem:[#allocation54_spill]]  ;;  %s13207_s11 = smov [#allocation7]  }
  0x3c   : > { %s756_s2 = sshll.u32 %s14323_s7, 4  ;;  %s838_s7 = sshll.u32 %s14264_s16, 4  ;;  %s757_s2 = int_to_ptr.hbm [resolvable:$true] %s756_s2  ;;  %s839_s7 = int_to_ptr.hbm [resolvable:$true] %s838_s7 }
  0x3d   : > { %12466 = dma.hbm_to_vmem [thread:$0]  (!%p13434_p12), %s757_s2, 64, %s759_s28, [#allocation12]  }
  0x3e   : > { %s782_s25 = sshll.u32 %s14324_s0, 4  ;;  %s13202_s28 = smov [#allocation20]   ;;  %s783_s25 = int_to_ptr.hbm [resolvable:$true] %s782_s25 }
  0x3f   : > { %s812_s9 = sshll.u32 %s14325_s14, 4  ;;  %s840_s5 = sshll.u32 %s13202_s28, 4  ;;  %s813_s9 = int_to_ptr.hbm [resolvable:$true] %s812_s9  ;;  %s841_s5 = int_to_ptr.vmem [resolvable:$true] %s840_s5 }
  0x40   : > { %12472 = dma.hbm_to_vmem [thread:$0]  (!%p13434_p12), %s783_s25, 32, %s785_s23, [#allocation15]  }
  0x41   : > { %12478 = dma.hbm_to_vmem [thread:$0]  (!%p13434_p12), %s813_s9, 16, %s815_s29, [#allocation18]  }
  0x42   : > { %12484 = dma.hbm_to_vmem [thread:$0]  (!%p13434_p12), %s839_s7, 16, %s841_s5, [#allocation21]  }
  0x43   : > { %s866_s23 = sshll.u32 %s14267_s19, 4  ;;  %s13203_s25 = smov [#allocation23]   ;;  %s867_s23 = int_to_ptr.hbm [resolvable:$true] %s866_s23 }
  0x44   : > { %s868_s8 = sshll.u32 %s13203_s25, 4  ;;  %s686_s1 = sshll.u32 %s14326_s10, 4  ;;  %s869_s8 = int_to_ptr.vmem [resolvable:$true] %s868_s8  ;;  %s687_s1 = int_to_ptr.hbm [resolvable:$true] %s686_s1 }
  0x45   : > { %s13204_s9 = smov 256   ;;  %s13205_s29 = smov 16  }
  0x46   : > { %12490 = dma.hbm_to_vmem [thread:$0]  (!%p13434_p12), %s867_s23, 32768, %s869_s8, [#allocation24], %s13204_s9, %s13204_s9, %s13205_s29  }
  0x47   : > { %s13206_s7 = smov [#allocation2]   ;;  %s14327_s0 = sld [smem:[#allocation51_spill]] }
  0x48   : > { %s688_s28 = sshll.u32 %s13206_s7, 4  ;;  %s741_s10 = sshll.u32 %s14328_s27, 4  ;;  %s689_s28 = int_to_ptr.vmem [resolvable:$true] %s688_s28  ;;  %s742_s10 = int_to_ptr.hbm [resolvable:$true] %s741_s10 }
  0x49   : > { %12451 = dma.hbm_to_vmem [thread:$0]  (!%p13434_p12), %s687_s1, 64, %s689_s28, [#allocation3]  }
  0x4a   : > { %s715_s14 = sshll.u32 %s13207_s11, 4  ;;  %s13208_s23 = smov [#allocation10]   ;;  %s716_s14 = int_to_ptr.vmem [resolvable:$true] %s715_s14 }
  0x4b   : > { %s743_s8 = sshll.u32 %s13208_s23, 4  ;;  %s14329_s2 = sld [smem:[#allocation56_spill]]  ;;  %s744_s8 = int_to_ptr.vmem [resolvable:$true] %s743_s8 }
  0x4c   : > { %12463 = dma.hbm_to_vmem [thread:$0]  (!%p13434_p12), %s742_s10, 32768, %s744_s8, [#allocation9], %s13204_s9, %s13204_s9, %s13205_s29  }
  0x4d   : > { %s713_s6 = sshll.u32 %s14327_s0, 4  ;;  %s13209_s1 = smov [#allocation13]   ;;  %s714_s6 = int_to_ptr.hbm [resolvable:$true] %s713_s6 }
  0x4e   : > { %12457 = dma.hbm_to_vmem [thread:$0]  (!%p13434_p12), %s714_s6, 16, %s716_s14, [#allocation6]  }
  0x4f   : > { %s769_s28 = sshll.u32 %s13209_s1, 4  ;;  %s800_s4 = sshll.u32 %s14261_s13, 4  ;;  %s770_s28 = int_to_ptr.vmem [resolvable:$true] %s769_s28  ;;  %s801_s4 = int_to_ptr.hbm [resolvable:$true] %s800_s4 }
  0x50   : > { %s13210_s27 = smov 128   ;;  %s13211_s14 = smov 8  }
  0x51   : > { %s767_s0 = sshll.u32 %s14329_s2, 4  ;;  %s13212_s6 = smov [#allocation16]   ;;  %s768_s0 = int_to_ptr.hbm [resolvable:$true] %s767_s0 }
  0x52   : > { %12469 = dma.hbm_to_vmem [thread:$0]  (!%p13434_p12), %s768_s0, 8192, %s770_s28, [#allocation12], %s13210_s27, %s13210_s27, %s13211_s14  }
  0x53   : > { %s802_s23 = sshll.u32 %s13212_s6, 4  ;;  %s823_s29 = sshll.u32 %s14263_s15, 4  ;;  %s803_s23 = int_to_ptr.vmem [resolvable:$true] %s802_s23  ;;  %s824_s29 = int_to_ptr.hbm [resolvable:$true] %s823_s29 }
  0x54   : > { %12475 = dma.hbm_to_vmem [thread:$0]  (!%p13434_p12), %s801_s4, 64, %s803_s23, [#allocation15]  }
  0x55   : > { %s13213_s10 = smov [#allocation19]   ;;  %s849_s1 = sshll.u32 %s14265_s17, 4  ;;  %s850_s1 = int_to_ptr.hbm [resolvable:$true] %s849_s1 }
  0x56   : > { %s825_s8 = sshll.u32 %s13213_s10, 4  ;;  %s13214_s0 = smov 64   ;;  %s826_s8 = int_to_ptr.vmem [resolvable:$true] %s825_s8 }
  0x57   : > { %s13215_s28 = smov 4   ;;  %s13216_s11 = smov [#allocation22]  }
  0x58   : > { %12481 = dma.hbm_to_vmem [thread:$0]  (!%p13434_p12), %s824_s29, 512, %s826_s8, [#allocation18], %s13214_s0, %s13214_s0, %s13215_s28  }
  0x59   : > { %s851_s25 = sshll.u32 %s13216_s11, 4  ;;  %s886_s4 = sshll.u32 %s14270_s22, 4  ;;  %s852_s25 = int_to_ptr.vmem [resolvable:$true] %s851_s25  ;;  %s887_s4 = int_to_ptr.hbm [resolvable:$true] %s886_s4 }
  0x5a   : > { %s14330_s23 = smov 32   ;;  %s14331_s9 = smov 512  }
  0x5b   : > { %12487 = dma.hbm_to_vmem [thread:$0]  (!%p13434_p12), %s850_s1, 8192, %s852_s25, [#allocation21], %s14331_s9, %s14331_s9, %s14330_s23  }
  0x5c   : > { %s909_s2 = sshll.u32 %s14274_s26, 4  ;;  %s13217_s29 = smov [#allocation25]   ;;  %s910_s2 = int_to_ptr.hbm [resolvable:$true] %s909_s2 }
  0x5d   : > { %s888_s8 = sshll.u32 %s13217_s29, 4  ;;  %s13218_s11 = smov [#allocation26]   ;;  %s889_s8 = int_to_ptr.vmem [resolvable:$true] %s888_s8 }
  0x5e   : > { %12493 = dma.hbm_to_vmem [thread:$0]  (!%p13434_p12), %s887_s4, 8192, %s889_s8, [#allocation24], %s13210_s27, %s13210_s27, %s13211_s14  }
  0x5f   : > { %s911_s6 = sshll.u32 %s13218_s11, 4  ;;  %938 = sbr.rel (%p13420_p10) target bundleno = 2546 (0x9f2), region = 132  ;;  %s912_s6 = int_to_ptr.vmem [resolvable:$true] %s911_s6 }
  0x60   : > { %12496 = dma.hbm_to_vmem [thread:$0]  (!%p13434_p12), %s910_s2, 1024, %s912_s6, [#allocation27], %s13214_s0, %s13214_s0, %s13215_s28  }
  0x64   : > { %13140 = dma.done.wait (%p12501_p9), [#allocation3], 64  }
  0x65   : > { %13142 = vsyncadd (%p12501_p9), [#allocation3], 4294967232 }
  0x66   : > { %13144 = dma.done.wait (%p12501_p9), [#allocation6], 32  }
  0x67   : > { %13146 = vsyncadd (%p12501_p9), [#allocation6], 4294967264 }
  0x68   : > { %13148 = dma.done.wait (%p12501_p9), [#allocation9], 40960  }
  0x69   : > { %13150 = vsyncadd (%p12501_p9), [#allocation9], 4294926336 }
  0x6a   : > { %13152 = dma.done.wait (%p12501_p9), [#allocation12], 8256  }
  0x6b   : > { %13154 = vsyncadd (%p12501_p9), [#allocation12], 4294959040 }
  0x6c   : > { %13156 = dma.done.wait (%p12501_p9), [#allocation15], 96  }
  0x6d   : > { %13158 = vsyncadd (%p12501_p9), [#allocation15], 4294967200 }
  0x6e   : > { %13160 = dma.done.wait (%p12501_p9), [#allocation18], 528  }
  0x6f   : > { %13162 = vsyncadd (%p12501_p9), [#allocation18], 4294966768 }
  0x70   : > { %13164 = dma.done.wait (%p12501_p9), [#allocation21], 8208  }
  0x71   : > { %13166 = vsyncadd (%p12501_p9), [#allocation21], 4294959088 }
  0x72   : > { %13168 = dma.done.wait (%p12501_p9), [#allocation24], 40960  }
  0x73   : > { %13170 = vsyncadd (%p12501_p9), [#allocation24], 4294926336 }
  0x74   : > { %13172 = dma.done.wait (%p12501_p9), [#allocation27], 1024  }
  0x75   : > { %13174 = vsyncadd (%p12501_p9), [#allocation27], 4294966272  ;;  %p1088_p13 = scmp.lt.s32.totalorder %s13392_s3, 1  ;;  %v13219_v0 = vmov 1   ;;  %v13220_v1 = vmov 0   ;;  %v13221_v2 = vmov 2  }
  0x76   : > { %12598 = vset.pattern.permute.xlu1 %v13219_v0  ;;  %12597 = vset.pattern.permute.xlu0 %v13220_v1  ;;  %s14332_s1 = sld [smem:[#allocation47_spill]]  ;;  %v13582_v9 = vld [vmem:[#allocation2] sm:$0x7]  ;;  %v8527_v12 = vld [vmem:[#allocation8 + $0x1c0] sm:$0xf]  ;;  %vm1181_vm0 = vcmask 523264  }
  0x77   : > { %s1089_s30 = scalar_select %p1088_p13, %s13392_s3, 1  ;;  %12599 = vset.pattern.permute.xlu2 %v13221_v2  ;;  %v1118_v10 = vperm.slane %v13582_v9, 1  ;;  %v1107_v11 = vperm.slane %v13582_v9, 0  ;;  %v11624_v13 = vld [vmem:[#allocation8 + $0x1dc] sm:$0xf0]  ;;  %v1131_v57 = vperm.slane %v13582_v9, 2 }
  0x78   : > { %s14333_s7 = sld [smem:[#allocation50_spill]]  ;;  %v11620_v14 = vld [vmem:[#allocation8 + $0x1c4] sm:$0xf]  ;;  %v8528_v15 = vor.u32 %v11624_v13, %v8527_v12  ;;  %v8535_v17 = vld [vmem:[#allocation8 + $0x1c8] sm:$0xf]  ;;  %s13223_s6 = smov 125  }
  0x79   : > { %s11559_s12 = sshll.u32 %s1089_s30, 4  ;;  %v8529_v16 = vld [vmem:[#allocation8 + $0x1e0] sm:$0xf0]  ;;  %v11625_v18 = vld [vmem:[#allocation8 + $0x1e4] sm:$0xf0]  ;;  %s14334_s11 = sld [smem:[#allocation53_spill]] }
  0x7a   : > { %v8532_v19 = vor.u32 %v11620_v14, %v8529_v16  ;;  %v8536_v20 = vor.u32 %v11625_v18, %v8535_v17  ;;  %v11621_v21 = vld [vmem:[#allocation8 + $0x1cc] sm:$0xf]  ;;  %v8495_v23 = vld [vmem:[#allocation8 + $0x180] sm:$0xf]  ;;  %v11612_v26 = vld [vmem:[#allocation8 + $0x184] sm:$0xf] }
  0x7b   : > { %v8537_v22 = vld [vmem:[#allocation8 + $0x1e8] sm:$0xf0]  ;;  %v11616_v25 = vld [vmem:[#allocation8 + $0x19c] sm:$0xf0]  ;;  %v8497_v27 = vld [vmem:[#allocation8 + $0x1a0] sm:$0xf0] }
  0x7c   : > { %s1092_s0 = scalar_lea.vmem %s14332_s1, %s11559_s12  ;;  %v8540_v24 = vor.u32 %v11621_v21, %v8537_v22  ;;  %1618 = vmatpush.bf16.msra.mxu2 %v8532_v19  ;;  %1632 = vmatpush.bf16.msra.mxu3 %v8536_v20  ;;  %v8496_v28 = vor.u32 %v11616_v25, %v8495_v23  ;;  %v8500_v29 = vor.u32 %v11612_v26, %v8497_v27  ;;  %v8503_v30 = vld [vmem:[#allocation8 + $0x188] sm:$0xf]  ;;  %v11613_v32 = vld [vmem:[#allocation8 + $0x18c] sm:$0xf]  ;;  %v8463_v35 = vld [vmem:[#allocation8 + $0x140] sm:$0xf] }
  0x7d   : > { %v1094_v3 = vld [vmem:[%s1092_s0] sm:$0xff]  ;;  %v1095_v4 = vld [vmem:[%s1092_s0 + $0x8] sm:$0xff]  ;;  %v11617_v31 = vld [vmem:[#allocation8 + $0x1a4] sm:$0xf0]  ;;  %s14335_s12 = sld [smem:[#allocation58_spill]]  ;;  %s12376_s9 = sshll.u32 %s13392_s3, 3 }
  0x7e   : > { %1111 = vperm.xlu1 %12598, %v1094_v3   ;;  %1099 = vperm.xlu0 %12597, %v1094_v3   ;;  %v11563_v5 = vld [vmem:[%s14333_s7 + $0x18] sm:$0xff]  ;;  %v11562_v6 = vld [vmem:[%s14333_s7 + $0x10] sm:$0xff]  ;;  %v11561_v7 = vld [vmem:[%s14333_s7 + $0x8] sm:$0xff]  ;;  %v8504_v33 = vor.u32 %v11617_v31, %v8503_v30  ;;  %s14336_s8 = sld [smem:[#allocation59_spill]] }
  0x7f   : > { %1124 = vperm.xlu2 %12599, %v1094_v3   ;;  %1189 = vmatpush.bf16.msra.mxu1 %v11563_v5  ;;  %v11560_v8 = vld [vmem:[%s14333_s7] sm:$0xff]  ;;  %v8505_v34 = vld [vmem:[#allocation8 + $0x1a8] sm:$0xf0]  ;;  %v11608_v36 = vld [vmem:[#allocation8 + $0x15c] sm:$0xf0]  ;;  %s14338_s1 = sld [smem:[#allocation40_spill]] }
  0x80   : > { %1646 = vmatpush.bf16.msra.mxu0 %v8540_v24  ;;  %v8508_v37 = vor.u32 %v11613_v32, %v8505_v34  ;;  %v11604_v38 = vld [vmem:[#allocation8 + $0x144] sm:$0xf]  ;;  %v8471_v40 = vld [vmem:[#allocation8 + $0x148] sm:$0xf]  ;;  %v8464_v41 = vor.u32 %v11608_v36, %v8463_v35  ;;  %v11605_v43 = vld [vmem:[#allocation8 + $0x14c] sm:$0xf]  ;;  %1619 = vmatpush.bf16.msra.mxu2 %v8500_v29 }
  0x81   : > { %v8465_v39 = vld [vmem:[#allocation8 + $0x160] sm:$0xf0]  ;;  %v11609_v42 = vld [vmem:[#allocation8 + $0x164] sm:$0xf0]  ;;  %v8473_v44 = vld [vmem:[#allocation8 + $0x168] sm:$0xf0]  ;;  %1633 = vmatpush.bf16.msra.mxu3 %v8504_v33 }
  0x82   : > { %v8468_v46 = vor.u32 %v11604_v38, %v8465_v39  ;;  %v8472_v47 = vor.u32 %v11609_v42, %v8471_v40  ;;  %v8431_v48 = vld [vmem:[#allocation8 + $0x100] sm:$0xf]  ;;  %v11596_v50 = vld [vmem:[#allocation8 + $0x104] sm:$0xf]  ;;  %v8476_v51 = vor.u32 %v11605_v43, %v8473_v44  ;;  %v8439_v53 = vld [vmem:[#allocation8 + $0x108] sm:$0xf] }
  0x83   : > { %1190 = vmatpush.bf16.msra.mxu1 %v11562_v6  ;;  %v11600_v49 = vld [vmem:[#allocation8 + $0x11c] sm:$0xf0]  ;;  %v8433_v52 = vld [vmem:[#allocation8 + $0x120] sm:$0xf0]  ;;  %v11601_v54 = vld [vmem:[#allocation8 + $0x124] sm:$0xf0] }
  0x84   : > { %1647 = vmatpush.bf16.msra.mxu0 %v8508_v37  ;;  %v11597_v55 = vld [vmem:[#allocation8 + $0x10c] sm:$0xf]  ;;  %v8432_v60 = vor.u32 %v11600_v49, %v8431_v48  ;;  %v8436_v61 = vor.u32 %v11596_v50, %v8433_v52  ;;  %1620 = vmatpush.bf16.msra.mxu2 %v8468_v46  ;;  %v8399_v3 = vld [vmem:[#allocation8 + $0xc0] sm:$0xf]  ;;  %v11588_v5 = vld [vmem:[#allocation8 + $0xc4] sm:$0xf] }
  0x85   : > { %v8441_v56 = vld [vmem:[#allocation8 + $0x128] sm:$0xf0]  ;;  %1634 = vmatpush.bf16.msra.mxu3 %v8472_v47  ;;  %v11593_v12 = vld [vmem:[#allocation8 + $0xe4] sm:$0xf0]  ;;  %v8367_v18 = vld [vmem:[#allocation8 + $0x80] sm:$0xf] }
  0x86   : > { %1115 = vperm.xlu1 %12598, %v1095_v4   ;;  %1104 = vperm.xlu0 %12597, %v1095_v4   ;;  %v8444_v6 = vor.u32 %v11597_v55, %v8441_v56  ;;  %v11589_v13 = vld [vmem:[#allocation8 + $0xcc] sm:$0xf]  ;;  %v11584_v21 = vld [vmem:[#allocation8 + $0x9c] sm:$0xf0]  ;;  %v11580_v22 = vld [vmem:[#allocation8 + $0x84] sm:$0xf] }
  0x87   : > { %1128 = vperm.xlu2 %12599, %v1095_v4   ;;  %1191 = vmatpush.bf16.msra.mxu1 %v11561_v7  ;;  %v11592_v4 = vld [vmem:[#allocation8 + $0xdc] sm:$0xf0]  ;;  %v8401_v7 = vld [vmem:[#allocation8 + $0xe0] sm:$0xf0]  ;;  %v8409_v14 = vld [vmem:[#allocation8 + $0xe8] sm:$0xf0]  ;;  %v8368_v34 = vor.u32 %v11584_v21, %v8367_v18 }
  0x88   : > { %1648 = vmatpush.bf16.msra.mxu0 %v8476_v51  ;;  %v8400_v17 = vor.u32 %v11592_v4, %v8399_v3  ;;  %1621 = vmatpush.bf16.msra.mxu2 %v8436_v61  ;;  %v8404_v19 = vor.u32 %v11588_v5, %v8401_v7  ;;  %v8369_v23 = vld [vmem:[#allocation8 + $0xa0] sm:$0xf0]  ;;  %v8412_v24 = vor.u32 %v11589_v13, %v8409_v14  ;;  %v8375_v25 = vld [vmem:[#allocation8 + $0x88] sm:$0xf]  ;;  %v8377_v29 = vld [vmem:[#allocation8 + $0xa8] sm:$0xf0] }
  0x89   : > { %v11585_v26 = vld [vmem:[#allocation8 + $0xa4] sm:$0xf0]  ;;  %v12607_v33 = vld [vmem:[#allocation5] ss:$0 sm:$0xff]  ;;  %v8372_v35 = vor.u32 %v11580_v22, %v8369_v23  ;;  %v8335_v39 = vld [vmem:[#allocation8 + $0x40] sm:$0xf] }
  0x8a   : > { %v8376_v38 = vor.u32 %v11585_v26, %v8375_v25  ;;  %v11576_v40 = vld [vmem:[#allocation8 + $0x5c] sm:$0xf0]  ;;  %v8337_v43 = vld [vmem:[#allocation8 + $0x60] sm:$0xf0]  ;;  %v8343_v44 = vld [vmem:[#allocation8 + $0x48] sm:$0xf] }
  0x8b   : > { %1192 = vmatpush.bf16.msra.mxu1 %v11560_v8  ;;  %v8407_v8 = vld [vmem:[#allocation8 + $0xc8] sm:$0xf]  ;;  %v11573_v49 = vld [vmem:[#allocation8 + $0x4c] sm:$0xf]  ;;  %v8336_v9 = vor.u32 %v11576_v40, %v8335_v39  ;;  %v11564_v56 = vld [vmem:[#allocation8 + $0x4] sm:$0xf] }
  0x8c   : > { %v8408_v20 = vor.u32 %v11593_v12, %v8407_v8  ;;  %1649 = vmatpush.bf16.msra.mxu0 %v8444_v6  ;;  %1622 = vmatpush.bf16.msra.mxu2 %v8404_v19  ;;  %v11577_v46 = vld [vmem:[#allocation8 + $0x64] sm:$0xf0]  ;;  %v8543_v13 = vld [vmem:[#allocation8 + $0x1d0] sm:$0xf]  ;;  %v8551_v18 = vld [vmem:[#allocation8 + $0x1d8] sm:$0xf] }
  0x8d   : > { %v8344_v52 = vor.u32 %v11577_v46, %v8343_v44  ;;  %v8311_v61 = vld [vmem:[#allocation8 + $0x8] sm:$0xf]  ;;  %v11626_v14 = vld [vmem:[#allocation8 + $0x1ec] sm:$0xf0]  ;;  %v11627_v19 = vld [vmem:[#allocation8 + $0x1f4] sm:$0xf0] }
  0x8e   : > { %12600 = vset.pattern.permute.xlu1 %v13220_v1  ;;  %12602 = vset.pattern.permute.xlu0 %v13219_v0  ;;  %v8552_v21 = vor.u32 %v11627_v19, %v8551_v18  ;;  %v11623_v22 = vld [vmem:[#allocation8 + $0x1dc] sm:$0xf]  ;;  %v8511_v25 = vld [vmem:[#allocation8 + $0x190] sm:$0xf]  ;;  %v8481_v44 = vld [vmem:[#allocation8 + $0x170] sm:$0xf0] }
  0x8f   : > { %12601 = vset.pattern.permute.xlu2 %v13220_v1  ;;  %1604 = vmatpush.bf16.msrb.mxu1 %v8528_v15  ;;  %v8440_v1 = vor.u32 %v11601_v54, %v8439_v53  ;;  %v8303_v53 = vld [vmem:[#allocation8] sm:$0xf]  ;;  %v8553_v23 = vld [vmem:[#allocation8 + $0x1f8] sm:$0xf0]  ;;  %v11618_v26 = vld [vmem:[#allocation8 + $0x1ac] sm:$0xf0] }
  0x90   : > { %1650 = vmatpush.bf16.msra.mxu0 %v8412_v24  ;;  %1623 = vmatpush.bf16.msra.mxu2 %v8372_v35  ;;  %v11568_v54 = vld [vmem:[#allocation8 + $0x1c] sm:$0xf0]  ;;  %v8556_v24 = vor.u32 %v11623_v22, %v8553_v23  ;;  %v8479_v40 = vld [vmem:[#allocation8 + $0x150] sm:$0xf]  ;;  %v8487_v46 = vld [vmem:[#allocation8 + $0x158] sm:$0xf] }
  0x91   : > { %1635 = vmatpush.bf16.msra.mxu3 %v8440_v1  ;;  %v8313_v1 = vld [vmem:[#allocation8 + $0x28] sm:$0xf0]  ;;  %v8304_v3 = vor.u32 %v11568_v54, %v8303_v53  ;;  %v8449_v54 = vld [vmem:[#allocation8 + $0x130] sm:$0xf0]  ;;  %v11586_v18 = vld [vmem:[#allocation8 + $0xac] sm:$0xf0] }
  0x92   : > { %v11582_v19 = vld [vmem:[#allocation8 + $0x94] sm:$0xf]  ;;  %v8391_v23 = vld [vmem:[#allocation8 + $0x98] sm:$0xf]  ;;  %s14339_s25 = sld [smem:[#allocation62_spill]]  ;;  %s1085_s4 = sand.u32 1, %s14338_s1  }
  0x93   : > { %1605 = vmatpush.bf16.msrb.mxu1 %v8496_v28  ;;  %v11581_v28 = vld [vmem:[#allocation8 + $0x8c] sm:$0xf]  ;;  %s8281_s23 = sshll.u32 %s1085_s4, 3  ;;  %s14340_s2 = sld [smem:[#allocation64_spill]] }
  0x94   : > { %v8380_v42 = vor.u32 %v11581_v28, %v8377_v29  ;;  %v11614_v28 = vld [vmem:[#allocation8 + $0x194] sm:$0xf]  ;;  %v8512_v29 = vor.u32 %v11618_v26, %v8511_v25  ;;  %v11583_v25 = vld [vmem:[#allocation8 + $0x9c] sm:$0xf]  ;;  %s1087_s27 = scalar_lea.vmem [#allocation28], %s8281_s23  ;;  %s8013_s3 = scalar_lea.sflag [#allocation4], %s1085_s4 }
  0x95   : > { %1636 = vmatpush.bf16.msra.mxu3 %v8408_v20  ;;  %s14218_s14 = sshll.u32 %s1087_s27, 4  ;;  %s8026_s14 = int_to_ptr.vmem [resolvable:$true] %s14218_s14 }
  0x96   : > { %1651 = vmatpush.bf16.msra.mxu0 %v8380_v42  ;;  %v11606_v42 = vld [vmem:[#allocation8 + $0x154] sm:$0xf] }
  0x97   : > { %1606 = vmatpush.bf16.msrb.mxu1 %v8464_v41  ;;  %v11572_v41 = vld [vmem:[#allocation8 + $0x44] sm:$0xf] }
  0x98   : > { %v8340_v51 = vor.u32 %v11572_v41, %v8337_v43  ;;  %v11610_v41 = vld [vmem:[#allocation8 + $0x16c] sm:$0xf0] }
  0x99   : > { %1637 = vmatpush.bf16.msra.mxu3 %v8376_v38  ;;  %v8521_v38 = vld [vmem:[#allocation8 + $0x1b8] sm:$0xf0]  ;;  %v8480_v43 = vor.u32 %v11610_v41, %v8479_v40  ;;  %s8024_s29 = scalar_lea.hbm %s14340_s2, %s12376_s9  ;;  %s13115_s9 = scalar_lea.hbm %s14340_s2, 16 }
  0x9a   : > { %1624 = vmatpush.bf16.msra.mxu2 %v8340_v51  ;;  %v11602_v51 = vld [vmem:[#allocation8 + $0x12c] sm:$0xf0]  ;;  %v8361_v40 = vld [vmem:[#allocation8 + $0x78] sm:$0xf0]  ;;  %s8027_s0 = sshll.u32 %s8024_s29, 4  ;;  %s8028_s0 = int_to_ptr.hbm [resolvable:$true] %s8027_s0 }
  0x9b   : > { %1607 = vmatpush.bf16.msrb.mxu1 %v8432_v60  ;;  %v8305_v60 = vld [vmem:[#allocation8 + $0x20] sm:$0xf0]  ;;  %s13109_s1 = sshra.s32 %s8028_s0, 4  ;;  %s13110_s1 = int_to_ptr.hbm [resolvable:$true] %s13109_s1 }
  0x9c   : > { %v8308_v6 = vor.u32 %v11564_v56, %v8305_v60  ;;  %v11603_v56 = vld [vmem:[#allocation8 + $0x134] sm:$0xf0]  ;;  %s13111_s28 = scalar_lea.hbm %s13110_s1, 8  ;;  %p13116_p3 = scmp.lt.s32.totalorder %s13110_s1, %s14340_s2 }
  0x9d   : > { %1638 = vmatpush.bf16.msra.mxu3 %v8344_v52  ;;  %v11598_v52 = vld [vmem:[#allocation8 + $0x114] sm:$0xf]  ;;  %p13112_p0 = scmp.ne.s32.totalorder %s13110_s1, %s13111_s28  ;;  %p13117_p4 = scmp.lt.s32.totalorder %s13115_s9, %s13111_s28 }
  0x9e   : > { %1625 = vmatpush.bf16.msra.mxu2 %v8308_v6  ;;  %v8452_v60 = vor.u32 %v11598_v52, %v8449_v54  ;;  %v8417_v6 = vld [vmem:[#allocation8 + $0xf0] sm:$0xf0] }
  0x9f   : > { %1608 = vmatpush.bf16.msrb.mxu1 %v8400_v17  ;;  %v8545_v17 = vld [vmem:[#allocation8 + $0x1f0] sm:$0xf0]  ;;  %p13113_p1 = pnand %p13112_p0, %p13409_p5  ;;  %p13118_p7 = por %p13117_p4, %p13116_p3 }
  0xa1   : > { %p13114_p2 = pneg %p13113_p1 }
  0xa3   : > { %1609 = vmatpush.bf16.msrb.mxu1 %v8368_v34  ;;  %v11619_v34 = vld [vmem:[#allocation8 + $0x1b4] sm:$0xf0]  ;;  %p13119_p8 = pnand %p13118_p7, %p13114_p2 }
  0xa7   : > { %1610 = vmatpush.bf16.msrb.mxu1 %v8336_v9 }
  0xab   : > { %1611 = vmatpush.bf16.msrb.mxu1 %v8304_v3  ;;  %v11594_v3 = vld [vmem:[#allocation8 + $0xec] sm:$0xf0] }
  0xd9   : > { %v13586_v45 = vpop.permute.xlu2 %1124 }
  0xda   : > { %v1132_v15 = vmul.f32 %v1131_v57, %v13586_v45 }
  0xe1   : > { %v13600_v27 = vpop.permute.xlu2 %1128 }
  0xe2   : > { %v1133_v47 = vmul.f32 %v1131_v57, %v13600_v27  ;;  %v11569_v57 = vld [vmem:[#allocation8 + $0x24] sm:$0xf0] }
  0xe3   : > { %v8312_v7 = vor.u32 %v11569_v57, %v8311_v61  ;;  %v8457_v57 = vld [vmem:[#allocation8 + $0x138] sm:$0xf0] }
  0xe5   : > { %1639 = vmatpush.bf16.msra.mxu3 %v8312_v7  ;;  %v8423_v7 = vld [vmem:[#allocation8 + $0xd8] sm:$0xf] }
  0xe9   : > { %1688 = vmatpush.bf16.msrb.mxu3 %v8552_v21 }
  0xf0   : > { %v13589_v58 = vpop.permute.xlu1 %1111  ;;  %v13591_v59 = vpop.permute.xlu0 %1099 }
  0xf1   : > { %v1119_v62 = vmul.f32 %v1118_v10, %v13589_v58  ;;  %v1108_v63 = vmul.f32 %v1107_v11, %v13591_v59 }
  0xf3   : > { %v1121_v16 = vadd.f32 %v1119_v62, %v1108_v63  ;;  %v11565_v63 = vld [vmem:[#allocation8 + $0xc] sm:$0xf] }
  0xf4   : > { %v8316_v8 = vor.u32 %v11565_v63, %v8313_v1  ;;  %v8415_v1 = vld [vmem:[#allocation8 + $0xd0] sm:$0xf] }
  0xf5   : > { %v1134_v30 = vadd.f32 %v1132_v15, %v1121_v16  ;;  %v11622_v15 = vld [vmem:[#allocation8 + $0x1d4] sm:$0xf]  ;;  %v8544_v16 = vor.u32 %v11626_v14, %v8543_v13  ;;  %v11591_v14 = vld [vmem:[#allocation8 + $0xdc] sm:$0xf] }
  0xf6   : > { %v8548_v20 = vor.u32 %v11622_v15, %v8545_v17  ;;  %v8425_v15 = vld [vmem:[#allocation8 + $0xf8] sm:$0xf0] }
  0xf7   : > { %v1140_v50 = vadd.f32 %v12607_v33, %v1134_v30  ;;  %v8513_v30 = vld [vmem:[#allocation8 + $0x1b0] sm:$0xf0]  ;;  %v8428_v17 = vor.u32 %v11591_v14, %v8425_v15  ;;  %v8655_v15 = vld [vmem:[#allocation10 + $0xc0] sm:$0xf] }
  0xf8   : > { %v13602_v31 = vpop.permute.xlu1 %1115  ;;  %v13604_v32 = vpop.permute.xlu0 %1104  ;;  %1674 = vmatpush.bf16.msrb.mxu2 %v8548_v20  ;;  %v8516_v35 = vor.u32 %v11614_v28, %v8513_v30  ;;  %v8385_v20 = vld [vmem:[#allocation8 + $0xb0] sm:$0xf0]  ;;  %v8393_v28 = vld [vmem:[#allocation8 + $0xb8] sm:$0xf0]  ;;  %v11578_v30 = vld [vmem:[#allocation8 + $0x6c] sm:$0xf0] }
  0xf9   : > { %v1120_v36 = vmul.f32 %v1118_v10, %v13602_v31  ;;  %v1109_v37 = vmul.f32 %v1107_v11, %v13604_v32  ;;  %v8345_v10 = vld [vmem:[#allocation8 + $0x68] sm:$0xf0]  ;;  %v1142_v4 = vmax.f32 %v1140_v50, 0.0  ;;  %v8489_v50 = vld [vmem:[#allocation8 + $0x178] sm:$0xf0]  ;;  %v8388_v22 = vor.u32 %v11582_v19, %v8385_v20 }
  0xfa   : > { %v8348_v55 = vor.u32 %v11573_v49, %v8345_v10  ;;  %v11607_v10 = vld [vmem:[#allocation8 + $0x15c] sm:$0xf]  ;;  %v8783_v19 = vld [vmem:[#allocation10 + $0x1c0] sm:$0xf]  ;;  %v11686_v20 = vld [vmem:[#allocation10 + $0x1cc] sm:$0xf0] }
  0xfb   : > { %v1122_v48 = vadd.f32 %v1120_v36, %v1109_v37  ;;  %v11615_v37 = vld [vmem:[#allocation8 + $0x19c] sm:$0xf]  ;;  %v8492_v9 = vor.u32 %v11607_v10, %v8489_v50  ;;  %v11571_v10 = vld [vmem:[#allocation8 + $0x34] sm:$0xf0] }
  0xfc   : > { %1652 = vmatpush.bf16.msra.mxu0 %v8348_v55  ;;  %v8524_v39 = vor.u32 %v11615_v37, %v8521_v38  ;;  %1675 = vmatpush.bf16.msrb.mxu2 %v8516_v35  ;;  %v8455_v55 = vld [vmem:[#allocation8 + $0x118] sm:$0xf]  ;;  %v8353_v35 = vld [vmem:[#allocation8 + $0x70] sm:$0xf0]  ;;  %v11567_v50 = vld [vmem:[#allocation8 + $0x1c] sm:$0xf] }
  0xfd   : > { %v1135_v11 = vadd.f32 %v1133_v47, %v1122_v48  ;;  %v11611_v47 = vld [vmem:[#allocation8 + $0x174] sm:$0xf0]  ;;  %v8484_v48 = vor.u32 %v11606_v42, %v8481_v44  ;;  %v8456_v61 = vor.u32 %v11603_v56, %v8455_v55  ;;  %v11570_v44 = vld [vmem:[#allocation8 + $0x2c] sm:$0xf0]  ;;  %v12608_v55 = vld [vmem:[#allocation7] ss:$0 sm:$0xff] }
  0xfe   : > { %v8488_v49 = vor.u32 %v11611_v47, %v8487_v46  ;;  %v11579_v38 = vld [vmem:[#allocation8 + $0x74] sm:$0xf0]  ;;  %v11566_v46 = vld [vmem:[#allocation8 + $0x14] sm:$0xf] }
  0xff   : > { %v1141_v62 = vadd.f32 %v12607_v33, %v1135_v11  ;;  %v8519_v33 = vld [vmem:[#allocation8 + $0x198] sm:$0xf]  ;;  %v8447_v11 = vld [vmem:[#allocation8 + $0x110] sm:$0xf] }
 0x100   : > { %1653 = vmatpush.bf16.msra.mxu0 %v8316_v8  ;;  %v8520_v36 = vor.u32 %v11619_v34, %v8519_v33  ;;  %1676 = vmatpush.bf16.msrb.mxu2 %v8484_v48  ;;  %v8448_v53 = vor.u32 %v11602_v51, %v8447_v11  ;;  %v11595_v8 = vld [vmem:[#allocation8 + $0xf4] sm:$0xf0]  ;;  %v8396_v33 = vor.u32 %v11583_v25, %v8393_v28  ;;  %v11574_v34 = vld [vmem:[#allocation8 + $0x54] sm:$0xf]  ;;  %v8639_v28 = vld [vmem:[#allocation10 + $0xa0] sm:$0xf] }
 0x101   : > { %v1143_v5 = vmax.f32 %v1141_v62, 0.0  ;;  %v11599_v62 = vld [vmem:[#allocation8 + $0x11c] sm:$0xf]  ;;  %v8424_v13 = vor.u32 %v11595_v8, %v8423_v7  ;;  %v8356_v41 = vor.u32 %v11574_v34, %v8353_v35  ;;  %v8321_v48 = vld [vmem:[#allocation8 + $0x30] sm:$0xf0] }
 0x102   : > { %1689 = vmatpush.bf16.msrb.mxu3 %v8520_v36  ;;  %v8460_v63 = vor.u32 %v11599_v62, %v8457_v57  ;;  %v8359_v36 = vld [vmem:[#allocation8 + $0x58] sm:$0xf]  ;;  %v8324_v51 = vor.u32 %v11566_v46, %v8321_v48  ;;  %v8671_v62 = vld [vmem:[#allocation10 + $0xe0] sm:$0xf]  ;;  %v11658_v57 = vld [vmem:[#allocation10 + $0xec] sm:$0xf0] }
 0x103   : > { %v1144_v12 = vpack.c.bf16 %v1143_v5, %v1142_v4  ;;  %v11590_v4 = vld [vmem:[#allocation8 + $0xd4] sm:$0xf]  ;;  %v8416_v5 = vor.u32 %v11594_v3, %v8415_v1  ;;  %v8360_v42 = vor.u32 %v11579_v38, %v8359_v36  ;;  %v11690_v1 = vld [vmem:[#allocation10 + $0x1ec] sm:$0xf0]  ;;  %v8927_v3 = vld [vmem:[#allocation10 + $0x2e0] sm:$0xf] }
 0x104   : > { %1702 = vmatpush.bf16.msrb.mxu0 %v8556_v24  ;;  %1677 = vmatpush.bf16.msrb.mxu2 %v8452_v60  ;;  %v11587_v24 = vld [vmem:[#allocation8 + $0xb4] sm:$0xf0]  ;;  %v9055_v7 = vld [vmem:[#allocation10 + $0x3e0] sm:$0xf]  ;;  %v11754_v8 = vld [vmem:[#allocation10 + $0x3ec] sm:$0xf0] }
 0x105   : > { %8300 = vmatmul.msk.bf16.vlgmr.msra.gmra.mxu1 %vm1181_vm0, %v1144_v12  ;;  %v8420_v12 = vor.u32 %v11590_v4, %v8417_v6  ;;  %v8392_v26 = vor.u32 %v11587_v24, %v8391_v23  ;;  %v11722_v4 = vld [vmem:[#allocation10 + $0x2ec] sm:$0xf0]  ;;  %v9039_v23 = vld [vmem:[#allocation10 + $0x3c0] sm:$0xf] }
 0x106   : > { %1660 = vmatpush.bf16.msra.mxu1 %v8544_v16  ;;  %1690 = vmatpush.bf16.msrb.mxu3 %v8488_v49  ;;  %v8383_v16 = vld [vmem:[#allocation8 + $0x90] sm:$0xf]  ;;  %v8327_v49 = vld [vmem:[#allocation8 + $0x18] sm:$0xf]  ;;  %v8767_v34 = vld [vmem:[#allocation10 + $0x1a0] sm:$0xf] }
 0x107   : > { %v8384_v21 = vor.u32 %v11586_v18, %v8383_v16  ;;  %v8328_v52 = vor.u32 %v11571_v10, %v8327_v49  ;;  %v11654_v16 = vld [vmem:[#allocation10 + $0xcc] sm:$0xf0]  ;;  %v9056_v18 = vor.u32 %v11754_v8, %v9055_v7  ;;  %v8895_v36 = vld [vmem:[#allocation10 + $0x2a0] sm:$0xf] }
 0x108   : > { %1703 = vmatpush.bf16.msrb.mxu0 %v8524_v39  ;;  %1678 = vmatpush.bf16.msrb.mxu2 %v8420_v12  ;;  %v11575_v39 = vld [vmem:[#allocation8 + $0x5c] sm:$0xf]  ;;  %v11750_v24 = vld [vmem:[#allocation10 + $0x3cc] sm:$0xf0]  ;;  %v8656_v25 = vor.u32 %v11654_v16, %v8655_v15  ;;  %v9023_v38 = vld [vmem:[#allocation10 + $0x3a0] sm:$0xf] }
 0x109   : > { %v8364_v47 = vor.u32 %v11575_v39, %v8361_v40  ;;  %v11682_v35 = vld [vmem:[#allocation10 + $0x1ac] sm:$0xf0]  ;;  %v8879_v49 = vld [vmem:[#allocation10 + $0x280] sm:$0xf] }
 0x10a   : > { %1661 = vmatpush.bf16.msra.mxu1 %v8512_v29  ;;  %1691 = vmatpush.bf16.msrb.mxu3 %v8456_v61  ;;  %v8351_v29 = vld [vmem:[#allocation8 + $0x50] sm:$0xf]  ;;  %v8719_v8 = vld [vmem:[#allocation10 + $0x140] sm:$0xf] }
 0x10b   : > { %v8352_v37 = vor.u32 %v11578_v30, %v8351_v29  ;;  %v11650_v29 = vld [vmem:[#allocation10 + $0xac] sm:$0xf0]  ;;  %v8847_v15 = vld [vmem:[#allocation10 + $0x240] sm:$0xf] }
 0x10c   : > { %1704 = vmatpush.bf16.msrb.mxu0 %v8492_v9  ;;  %1679 = vmatpush.bf16.msrb.mxu2 %v8388_v22  ;;  %v8329_v9 = vld [vmem:[#allocation8 + $0x38] sm:$0xf0]  ;;  %v11718_v22 = vld [vmem:[#allocation10 + $0x2cc] sm:$0xf0]  ;;  %v8640_v40 = vor.u32 %v11650_v29, %v8639_v28 }
 0x10d   : > { %v11746_v39 = vld [vmem:[#allocation10 + $0x3ac] sm:$0xf0] }
 0x10e   : > { %1662 = vmatpush.bf16.msra.mxu1 %v8480_v43  ;;  %1692 = vmatpush.bf16.msrb.mxu3 %v8424_v13  ;;  %v8319_v43 = vld [vmem:[#allocation8 + $0x10] sm:$0xf]  ;;  %v8672_v13 = vor.u32 %v11658_v57, %v8671_v62  ;;  %v9024_v46 = vor.u32 %v11746_v39, %v9023_v38  ;;  %v8991_v57 = vld [vmem:[#allocation10 + $0x360] sm:$0xf] }
 0x10f   : > { %v8320_v11 = vor.u32 %v11570_v44, %v8319_v43  ;;  %v11646_v43 = vld [vmem:[#allocation10 + $0x8c] sm:$0xf0]  ;;  %v8687_v38 = vld [vmem:[#allocation10 + $0x100] sm:$0xf] }
 0x110   : > { %1705 = vmatpush.bf16.msrb.mxu0 %v8460_v63  ;;  %1680 = vmatpush.bf16.msrb.mxu2 %v8356_v41  ;;  %v8799_v63 = vld [vmem:[#allocation10 + $0x1e0] sm:$0xf]  ;;  %v8768_v41 = vor.u32 %v11682_v35, %v8767_v34  ;;  %v11678_v48 = vld [vmem:[#allocation10 + $0x18c] sm:$0xf0] }
 0x111   : > { %v8800_v14 = vor.u32 %v11690_v1, %v8799_v63  ;;  %v11710_v10 = vld [vmem:[#allocation10 + $0x28c] sm:$0xf0] }
 0x112   : > { %1663 = vmatpush.bf16.msra.mxu1 %v8448_v53  ;;  %1693 = vmatpush.bf16.msrb.mxu3 %v8392_v26  ;;  %v8332_v53 = vor.u32 %v11567_v50, %v8329_v9  ;;  %v8784_v26 = vor.u32 %v11686_v20, %v8783_v19  ;;  %v9007_v50 = vld [vmem:[#allocation10 + $0x380] sm:$0xf]  ;;  %v11742_v9 = vld [vmem:[#allocation10 + $0x38c] sm:$0xf0] }
 0x113   : > { %v11706_v62 = vld [vmem:[#allocation10 + $0x26c] sm:$0xf0] }
 0x114   : > { %1706 = vmatpush.bf16.msrb.mxu0 %v8428_v17  ;;  %1681 = vmatpush.bf16.msrb.mxu2 %v8324_v51  ;;  %v8928_v17 = vor.u32 %v11722_v4, %v8927_v3  ;;  %v11738_v63 = vld [vmem:[#allocation10 + $0x36c] sm:$0xf0] }
 0x115   : > { %v11638_v7 = vld [vmem:[#allocation10 + $0x4c] sm:$0xf0] }
 0x116   : > { %1664 = vmatpush.bf16.msra.mxu1 %v8416_v5  ;;  %1694 = vmatpush.bf16.msrb.mxu3 %v8360_v42  ;;  %v8623_v42 = vld [vmem:[#allocation10 + $0x80] sm:$0xf]  ;;  %v11734_v19 = vld [vmem:[#allocation10 + $0x34c] sm:$0xf0] }
 0x117   : > { %v11698_v28 = vld [vmem:[#allocation10 + $0x22c] sm:$0xf0] }
 0x118   : > { %1707 = vmatpush.bf16.msrb.mxu0 %v8396_v33  ;;  %v9040_v33 = vor.u32 %v11750_v24, %v9039_v23  ;;  %v8703_v23 = vld [vmem:[#allocation10 + $0x120] sm:$0xf]  ;;  %v11730_v34 = vld [vmem:[#allocation10 + $0x32c] sm:$0xf0] }
 0x11a   : > { %1665 = vmatpush.bf16.msra.mxu1 %v8384_v21  ;;  %1695 = vmatpush.bf16.msrb.mxu3 %v8328_v52  ;;  %v8911_v21 = vld [vmem:[#allocation10 + $0x2c0] sm:$0xf] }
 0x11b   : > { %v8912_v30 = vor.u32 %v11718_v22, %v8911_v21  ;;  %v8607_v52 = vld [vmem:[#allocation10 + $0x60] sm:$0xf] }
 0x11c   : > { %1708 = vmatpush.bf16.msrb.mxu0 %v8364_v47  ;;  %v8751_v47 = vld [vmem:[#allocation10 + $0x180] sm:$0xf] }
 0x11d   : > { %v8752_v51 = vor.u32 %v11678_v48, %v8751_v47  ;;  %v8575_v22 = vld [vmem:[#allocation10 + $0x20] sm:$0xf]  ;;  %v11726_v47 = vld [vmem:[#allocation10 + $0x30c] sm:$0xf0] }
 0x11e   : > { %1666 = vmatpush.bf16.msra.mxu1 %v8352_v37  ;;  %v11714_v37 = vld [vmem:[#allocation10 + $0x2ac] sm:$0xf0]  ;;  %v9183_v48 = vld [vmem:[#allocation10 + $0x4e0] sm:$0xf] }
 0x11f   : > { %v8896_v44 = vor.u32 %v11714_v37, %v8895_v36  ;;  %v8559_v36 = vld [vmem:[#allocation10] sm:$0xf]  ;;  %v11630_v37 = vld [vmem:[#allocation10 + $0xc] sm:$0xf0] }
 0x120   : > { %1709 = vmatpush.bf16.msrb.mxu0 %v8332_v53  ;;  %v11642_v53 = vld [vmem:[#allocation10 + $0x6c] sm:$0xf0]  ;;  %v8560_v39 = vor.u32 %v11630_v37, %v8559_v36  ;;  %v9519_v37 = vld [vmem:[#allocation10 + $0x780] sm:$0xf] }
 0x121   : > { %v8608_v1 = vor.u32 %v11642_v53, %v8607_v52  ;;  %v9439_v52 = vld [vmem:[#allocation10 + $0x6e0] sm:$0xf]  ;;  %v11850_v53 = vld [vmem:[#allocation10 + $0x6ec] sm:$0xf0] }
 0x122   : > { %1667 = vmatpush.bf16.msra.mxu1 %v8320_v11  ;;  %v8624_v11 = vor.u32 %v11646_v43, %v8623_v42  ;;  %v11694_v42 = vld [vmem:[#allocation10 + $0x20c] sm:$0xf0] }
 0x182   : > { %v1194_v54 = vpop.f32.mrf.mxu1 }
 0x183   : > { %v1195_v56 = vadd.f32 %v12608_v55, %v1194_v54  ;;  %v8880_v54 = vor.u32 %v11710_v10, %v8879_v49  ;;  %v11786_v10 = vld [vmem:[#allocation10 + $0x4ec] sm:$0xf0] }
 0x185   : > { %v1199_v5 = vmax.f32 %v1195_v56, 0.0  ;;  %v8735_v56 = vld [vmem:[#allocation10 + $0x160] sm:$0xf] }
 0x18a   : > { %v1196_v60 = vpop.f32.mrf.mxu1 }
 0x18b   : > { %v1197_v61 = vadd.f32 %v12608_v55, %v1196_v60  ;;  %v9008_v55 = vor.u32 %v11742_v9, %v9007_v50  ;;  %v11674_v60 = vld [vmem:[#allocation10 + $0x16c] sm:$0xf0]  ;;  %v9311_v50 = vld [vmem:[#allocation10 + $0x5e0] sm:$0xf] }
 0x18c   : > { %v8736_v3 = vor.u32 %v11674_v60, %v8735_v56  ;;  %v11818_v9 = vld [vmem:[#allocation10 + $0x5ec] sm:$0xf0]  ;;  %v9167_v60 = vld [vmem:[#allocation10 + $0x4c0] sm:$0xf] }
 0x18d   : > { %v1200_v6 = vmax.f32 %v1197_v61, 0.0  ;;  %v8863_v61 = vld [vmem:[#allocation10 + $0x260] sm:$0xf]  ;;  %v11882_v56 = vld [vmem:[#allocation10 + $0x7ec] sm:$0xf0] }
 0x18e   : > { %v8864_v4 = vor.u32 %v11706_v62, %v8863_v61  ;;  %v11782_v61 = vld [vmem:[#allocation10 + $0x4cc] sm:$0xf0] }
 0x18f   : > { %v13614_v12 = vpack.c.bf16 %v1200_v6, %v1199_v5  ;;  %v8992_v5 = vor.u32 %v11738_v63, %v8991_v57  ;;  %v8591_v6 = vld [vmem:[#allocation10 + $0x40] sm:$0xf]  ;;  %v9168_v57 = vor.u32 %v11782_v61, %v9167_v60 }
 0x190   : > { %v9295_v63 = vld [vmem:[#allocation10 + $0x5c0] sm:$0xf] }
 0x191   : > { %1612 = vmatmul.bf16.vlgmr.msrb.gmra.mxu1 %v13614_v12  ;;  %1626 = vmatmul.bf16.vlgmr.msra.gmra.mxu2 %v13614_v12 }
 0x192   : > { %1640 = vmatmul.bf16.vlgmr.msra.gmra.mxu3 %v13614_v12  ;;  %1654 = vmatmul.bf16.vlgmr.msra.gmra.mxu0 %v13614_v12 }
 0x193   : > { %3366 = vmatpush.bf16.msrb.mxu1 %v8672_v13  ;;  %3379 = vmatpush.bf16.msra.mxu2 %v8800_v14  ;;  %v8592_v13 = vor.u32 %v11638_v7, %v8591_v6  ;;  %v11670_v14 = vld [vmem:[#allocation10 + $0x14c] sm:$0xf0]  ;;  %v9551_v6 = vld [vmem:[#allocation10 + $0x7c0] sm:$0xf] }
 0x194   : > { %3392 = vmatpush.bf16.msra.mxu3 %v8928_v17  ;;  %3405 = vmatpush.bf16.msra.mxu0 %v9056_v18  ;;  %v8720_v16 = vor.u32 %v11670_v14, %v8719_v8  ;;  %v11702_v17 = vld [vmem:[#allocation10 + $0x24c] sm:$0xf0]  ;;  %v8975_v18 = vld [vmem:[#allocation10 + $0x340] sm:$0xf] }
 0x195   : > { %v8848_v20 = vor.u32 %v11702_v17, %v8847_v15  ;;  %v8976_v21 = vor.u32 %v11734_v19, %v8975_v18  ;;  %v11878_v7 = vld [vmem:[#allocation10 + $0x7cc] sm:$0xf0]  ;;  %v9151_v14 = vld [vmem:[#allocation10 + $0x4a0] sm:$0xf] }
 0x196   : > { %v11778_v15 = vld [vmem:[#allocation10 + $0x4ac] sm:$0xf0]  ;;  %v9279_v17 = vld [vmem:[#allocation10 + $0x5a0] sm:$0xf] }
 0x197   : > { %3367 = vmatpush.bf16.msrb.mxu1 %v8656_v25  ;;  %3380 = vmatpush.bf16.msra.mxu2 %v8784_v26  ;;  %v11666_v25 = vld [vmem:[#allocation10 + $0x12c] sm:$0xf0]  ;;  %v8831_v26 = vld [vmem:[#allocation10 + $0x220] sm:$0xf] }
 0x198   : > { %3393 = vmatpush.bf16.msra.mxu3 %v8912_v30  ;;  %3406 = vmatpush.bf16.msra.mxu0 %v9040_v33  ;;  %v8704_v29 = vor.u32 %v11666_v25, %v8703_v23  ;;  %v8832_v30 = vor.u32 %v11698_v28, %v8831_v26  ;;  %v8959_v33 = vld [vmem:[#allocation10 + $0x320] sm:$0xf]  ;;  %v11810_v18 = vld [vmem:[#allocation10 + $0x5ac] sm:$0xf0] }
 0x199   : > { %v8960_v35 = vor.u32 %v11730_v34, %v8959_v33  ;;  %v9407_v19 = vld [vmem:[#allocation10 + $0x6a0] sm:$0xf]  ;;  %v11774_v26 = vld [vmem:[#allocation10 + $0x48c] sm:$0xf0] }
 0x19a   : > { %v9135_v25 = vld [vmem:[#allocation10 + $0x480] sm:$0xf]  ;;  %v11838_v34 = vld [vmem:[#allocation10 + $0x68c] sm:$0xf0] }
 0x19b   : > { %3368 = vmatpush.bf16.msrb.mxu1 %v8640_v40  ;;  %3381 = vmatpush.bf16.msra.mxu2 %v8768_v41  ;;  %v11662_v40 = vld [vmem:[#allocation10 + $0x10c] sm:$0xf0]  ;;  %v8815_v41 = vld [vmem:[#allocation10 + $0x200] sm:$0xf] }
 0x19c   : > { %3394 = vmatpush.bf16.msra.mxu3 %v8896_v44  ;;  %3407 = vmatpush.bf16.msra.mxu0 %v9024_v46  ;;  %v8688_v43 = vor.u32 %v11662_v40, %v8687_v38  ;;  %v8816_v44 = vor.u32 %v11694_v42, %v8815_v41  ;;  %v8943_v46 = vld [vmem:[#allocation10 + $0x300] sm:$0xf]  ;;  %v11870_v38 = vld [vmem:[#allocation10 + $0x78c] sm:$0xf0] }
 0x19d   : > { %v8944_v49 = vor.u32 %v11726_v47, %v8943_v46  ;;  %v9263_v28 = vld [vmem:[#allocation10 + $0x580] sm:$0xf]  ;;  %v11770_v41 = vld [vmem:[#allocation10 + $0x46c] sm:$0xf0] }
 0x19e   : > { %v9391_v33 = vld [vmem:[#allocation10 + $0x680] sm:$0xf]  ;;  %v11834_v47 = vld [vmem:[#allocation10 + $0x66c] sm:$0xf0] }
 0x19f   : > { %3369 = vmatpush.bf16.msrb.mxu1 %v8624_v11  ;;  %3382 = vmatpush.bf16.msra.mxu2 %v8752_v51  ;;  %v9184_v11 = vor.u32 %v11786_v10, %v9183_v48  ;;  %v9312_v51 = vor.u32 %v11818_v9, %v9311_v50  ;;  %v9392_v36 = vor.u32 %v11838_v34, %v9391_v33  ;;  %v9119_v40 = vld [vmem:[#allocation10 + $0x460] sm:$0xf]  ;;  %v11866_v50 = vld [vmem:[#allocation10 + $0x76c] sm:$0xf0] }
 0x1a0   : > { %3395 = vmatpush.bf16.msra.mxu3 %v8880_v54  ;;  %3408 = vmatpush.bf16.msra.mxu0 %v9008_v55  ;;  %v9567_v54 = vld [vmem:[#allocation10 + $0x7e0] sm:$0xf]  ;;  %v9440_v55 = vor.u32 %v11850_v53, %v9439_v52  ;;  %v11822_v33 = vld [vmem:[#allocation10 + $0x60c] sm:$0xf0] }
 0x1a1   : > { %1668 = vmatmul.bf16.vlgmr.msra.gmra.mxu1 %v13614_v12  ;;  %1682 = vmatmul.bf16.vlgmr.msrb.gmra.mxu2 %v13614_v12  ;;  %v9568_v62 = vor.u32 %v11882_v56, %v9567_v54  ;;  %v9247_v42 = vld [vmem:[#allocation10 + $0x560] sm:$0xf]  ;;  %v11798_v54 = vld [vmem:[#allocation10 + $0x54c] sm:$0xf0] }
 0x1a2   : > { %1696 = vmatmul.bf16.vlgmr.msrb.gmra.mxu3 %v13614_v12  ;;  %1710 = vmatmul.bf16.vlgmr.msrb.gmra.mxu0 %v13614_v12  ;;  %v11634_v12 = vld [vmem:[#allocation10 + $0x2c] sm:$0xf0]  ;;  %v9375_v46 = vld [vmem:[#allocation10 + $0x660] sm:$0xf] }
 0x1a3   : > { %3370 = vmatpush.bf16.msrb.mxu1 %v8608_v1  ;;  %3383 = vmatpush.bf16.msra.mxu2 %v8736_v3  ;;  %v8576_v24 = vor.u32 %v11634_v12, %v8575_v22  ;;  %v11814_v1 = vld [vmem:[#allocation10 + $0x5cc] sm:$0xf0]  ;;  %v9423_v3 = vld [vmem:[#allocation10 + $0x6c0] sm:$0xf] }
 0x1a4   : > { %3396 = vmatpush.bf16.msra.mxu3 %v8864_v4  ;;  %3409 = vmatpush.bf16.msra.mxu0 %v8992_v5  ;;  %v9296_v4 = vor.u32 %v11814_v1, %v9295_v63  ;;  %v11846_v5 = vld [vmem:[#allocation10 + $0x6cc] sm:$0xf0]  ;;  %v9535_v22 = vld [vmem:[#allocation10 + $0x7a0] sm:$0xf] }
 0x1a5   : > { %v9424_v8 = vor.u32 %v11846_v5, %v9423_v3  ;;  %v11874_v12 = vld [vmem:[#allocation10 + $0x7ac] sm:$0xf0]  ;;  %v9503_v10 = vld [vmem:[#allocation10 + $0x760] sm:$0xf] }
 0x1a6   : > { %v9504_v9 = vor.u32 %v11866_v50, %v9503_v10  ;;  %v9231_v52 = vld [vmem:[#allocation10 + $0x540] sm:$0xf]  ;;  %v11830_v56 = vld [vmem:[#allocation10 + $0x64c] sm:$0xf0] }
 0x1a7   : > { %3371 = vmatpush.bf16.msrb.mxu1 %v8592_v13  ;;  %3384 = vmatpush.bf16.msra.mxu2 %v8720_v16  ;;  %v9552_v13 = vor.u32 %v11878_v7, %v9551_v6  ;;  %v9152_v16 = vor.u32 %v11778_v15, %v9151_v14  ;;  %v9232_v60 = vor.u32 %v11798_v54, %v9231_v52  ;;  %v9087_v3 = vld [vmem:[#allocation10 + $0x420] sm:$0xf]  ;;  %v11826_v14 = vld [vmem:[#allocation10 + $0x62c] sm:$0xf0] }
 0x1a8   : > { %3397 = vmatpush.bf16.msra.mxu3 %v8848_v20  ;;  %3410 = vmatpush.bf16.msra.mxu0 %v8976_v21  ;;  %v9280_v20 = vor.u32 %v11810_v18, %v9279_v17  ;;  %v11842_v21 = vld [vmem:[#allocation10 + $0x6ac] sm:$0xf0]  ;;  %v9215_v5 = vld [vmem:[#allocation10 + $0x520] sm:$0xf] }
 0x1a9   : > { %v9408_v23 = vor.u32 %v11842_v21, %v9407_v19  ;;  %v9471_v17 = vld [vmem:[#allocation10 + $0x720] sm:$0xf]  ;;  %v11858_v18 = vld [vmem:[#allocation10 + $0x72c] sm:$0xf0]  ;;  %v13627_v19 = vld [vmem:[%s14334_s11] sm:$0xff]  ;;  %s13222_s11 = smov 122  }
 0x1aa   : > { %v1269_v21 = vperm.slane %v13627_v19, 1  ;;  %v9455_v34 = vld [vmem:[#allocation10 + $0x700] sm:$0xf] }
 0x1ab   : > { %3372 = vmatpush.bf16.msrb.mxu1 %v8576_v24  ;;  %3385 = vmatpush.bf16.msra.mxu2 %v8704_v29  ;;  %v9536_v24 = vor.u32 %v11874_v12, %v9535_v22  ;;  %v9136_v29 = vor.u32 %v11774_v26, %v9135_v25  ;;  %v1270_v22 = vperm.slane %v13627_v19, 2  ;;  %v9071_v12 = vld [vmem:[#allocation10 + $0x400] sm:$0xf]  ;;  %v11790_v26 = vld [vmem:[#allocation10 + $0x50c] sm:$0xf0] }
 0x1ac   : > { %3398 = vmatpush.bf16.msra.mxu3 %v8832_v30  ;;  %3411 = vmatpush.bf16.msra.mxu0 %v8960_v35  ;;  %v11806_v30 = vld [vmem:[#allocation10 + $0x58c] sm:$0xf0]  ;;  %v9199_v25 = vld [vmem:[#allocation10 + $0x500] sm:$0xf] }
 0x1ad   : > { %v9264_v35 = vor.u32 %v11806_v30, %v9263_v28  ;;  %v9327_v28 = vld [vmem:[#allocation10 + $0x600] sm:$0xf]  ;;  %v9200_v30 = vor.u32 %v11790_v26, %v9199_v25 }
 0x1af   : > { %3373 = vmatpush.bf16.msrb.mxu1 %v8560_v39  ;;  %3386 = vmatpush.bf16.msra.mxu2 %v8688_v43  ;;  %v9520_v39 = vor.u32 %v11870_v38, %v9519_v37  ;;  %v9120_v43 = vor.u32 %v11770_v41, %v9119_v40  ;;  %v9328_v38 = vor.u32 %v11822_v33, %v9327_v28  ;;  %v1271_v40 = vperm.slane %v13627_v19, 3 }
 0x1b0   : > { %3399 = vmatpush.bf16.msra.mxu3 %v8816_v44  ;;  %3412 = vmatpush.bf16.msra.mxu0 %v8944_v49  ;;  %v11802_v44 = vld [vmem:[#allocation10 + $0x56c] sm:$0xf0]  ;;  %v9376_v49 = vor.u32 %v11834_v47, %v9375_v46 }
 0x1b1   : > { %v9248_v48 = vor.u32 %v11802_v44, %v9247_v42 }
 0x1b3   : > { %3418 = vmatpush.bf16.msra.mxu1 %v9184_v11  ;;  %3431 = vmatpush.bf16.msrb.mxu2 %v9312_v51  ;;  %v9103_v11 = vld [vmem:[#allocation10 + $0x440] sm:$0xf]  ;;  %v11766_v51 = vld [vmem:[#allocation10 + $0x44c] sm:$0xf0] }
 0x1b4   : > { %3444 = vmatpush.bf16.msrb.mxu3 %v9440_v55  ;;  %3457 = vmatpush.bf16.msrb.mxu0 %v9568_v62  ;;  %v9104_v53 = vor.u32 %v11766_v51, %v9103_v11  ;;  %v9359_v55 = vld [vmem:[#allocation10 + $0x640] sm:$0xf] }
 0x1b5   : > { %v9360_v61 = vor.u32 %v11830_v56, %v9359_v55  ;;  %v9487_v62 = vld [vmem:[#allocation10 + $0x740] sm:$0xf] }
 0x1b7   : > { %3419 = vmatpush.bf16.msra.mxu1 %v9168_v57  ;;  %3432 = vmatpush.bf16.msrb.mxu2 %v9296_v4  ;;  %v11862_v57 = vld [vmem:[#allocation10 + $0x74c] sm:$0xf0] }
 0x1b8   : > { %3445 = vmatpush.bf16.msrb.mxu3 %v9424_v8  ;;  %3458 = vmatpush.bf16.msrb.mxu0 %v9552_v13  ;;  %v9488_v63 = vor.u32 %v11862_v57, %v9487_v62  ;;  %v11762_v4 = vld [vmem:[#allocation10 + $0x42c] sm:$0xf0]  ;;  %v9343_v13 = vld [vmem:[#allocation10 + $0x620] sm:$0xf] }
 0x1b9   : > { %v9088_v7 = vor.u32 %v11762_v4, %v9087_v3  ;;  %v11794_v8 = vld [vmem:[#allocation10 + $0x52c] sm:$0xf0]  ;;  %v1272_v4 = vperm.slane %v13627_v19, 4 }
 0x1ba   : > { %v9216_v15 = vor.u32 %v11794_v8, %v9215_v5  ;;  %v1273_v5 = vperm.slane %v13627_v19, 5  ;;  %v1274_v8 = vperm.slane %v13627_v19, 6 }
 0x1bb   : > { %3420 = vmatpush.bf16.msra.mxu1 %v9152_v16  ;;  %3433 = vmatpush.bf16.msrb.mxu2 %v9280_v20  ;;  %v9344_v16 = vor.u32 %v11826_v14, %v9343_v13  ;;  %v9472_v20 = vor.u32 %v11858_v18, %v9471_v17  ;;  %v13637_v17 = vld [vmem:[#allocation10 + $0xe4] sm:$0xf]  ;;  %v13639_v18 = vld [vmem:[#allocation10 + $0xf0] sm:$0xf0] }
 0x1bc   : > { %3446 = vmatpush.bf16.msrb.mxu3 %v9408_v23  ;;  %3459 = vmatpush.bf16.msrb.mxu0 %v9536_v24  ;;  %v11758_v23 = vld [vmem:[#allocation10 + $0x40c] sm:$0xf0] }
 0x1bd   : > { %v9072_v24 = vor.u32 %v11758_v23, %v9071_v12 }
 0x1bf   : > { %3421 = vmatpush.bf16.msra.mxu1 %v9136_v29  ;;  %3434 = vmatpush.bf16.msrb.mxu2 %v9264_v35  ;;  %v11854_v35 = vld [vmem:[#allocation10 + $0x70c] sm:$0xf0] }
 0x1c0   : > { %3447 = vmatpush.bf16.msrb.mxu3 %v9392_v36  ;;  %3460 = vmatpush.bf16.msrb.mxu0 %v9520_v39  ;;  %v1268_v36 = vperm.slane %v13627_v19, 0  ;;  %v9456_v39 = vor.u32 %v11854_v35, %v9455_v34 }
 0x1c3   : > { %3422 = vmatpush.bf16.msra.mxu1 %v9120_v43  ;;  %3435 = vmatpush.bf16.msrb.mxu2 %v9248_v48 }
 0x1c4   : > { %3448 = vmatpush.bf16.msrb.mxu3 %v9376_v49  ;;  %3461 = vmatpush.bf16.msrb.mxu0 %v9504_v9 }
 0x1c7   : > { %3423 = vmatpush.bf16.msra.mxu1 %v9104_v53  ;;  %3436 = vmatpush.bf16.msrb.mxu2 %v9232_v60 }
 0x1c8   : > { %3449 = vmatpush.bf16.msrb.mxu3 %v9360_v61  ;;  %3462 = vmatpush.bf16.msrb.mxu0 %v9488_v63 }
 0x1cb   : > { %3424 = vmatpush.bf16.msra.mxu1 %v9088_v7  ;;  %3437 = vmatpush.bf16.msrb.mxu2 %v9216_v15  ;;  %v1275_v7 = vperm.slane %v13627_v19, 7  ;;  %v13643_v19 = vld [vmem:[#allocation10 + $0x1f0] sm:$0xf0] }
 0x1cc   : > { %3450 = vmatpush.bf16.msrb.mxu3 %v9344_v16  ;;  %3463 = vmatpush.bf16.msrb.mxu0 %v9472_v20 }
 0x1cf   : > { %3425 = vmatpush.bf16.msra.mxu1 %v9072_v24  ;;  %3438 = vmatpush.bf16.msrb.mxu2 %v9200_v30  ;;  %v13641_v30 = vld [vmem:[#allocation10 + $0x1e4] sm:$0xf] }
 0x1d0   : > { %3451 = vmatpush.bf16.msrb.mxu3 %v9328_v38  ;;  %3464 = vmatpush.bf16.msrb.mxu0 %v9456_v39  ;;  %v13647_v38 = vld [vmem:[#allocation10 + $0x2e4] sm:$0xf] }
 0x20e   : > { %v1613_v1 = vpop.f32.mrf.mxu1 }
 0x20f   : > { %v1655_v6 = vpop.f32.mrf.mxu0  ;;  %v1614_v46 = vadd.f32 %v1613_v1, %v1268_v36 }
 0x210   : > { %v1656_v47 = vadd.f32 %v1655_v6, %v1271_v40 }
 0x211   : > { %v1716_v11 = vmax.f32 %v1614_v46, 0.0 }
 0x212   : > { %v1719_v53 = vmax.f32 %v1656_v47, 0.0 }
 0x214   : > { %v1627_v29 = vpop.f32.mrf.mxu2 }
 0x215   : > { %v1641_v37 = vpop.f32.mrf.mxu3  ;;  %v1628_v42 = vadd.f32 %v1627_v29, %v1269_v21 }
 0x216   : > { %v1615_v41 = vpop.f32.mrf.mxu1  ;;  %v1642_v44 = vadd.f32 %v1641_v37, %v1270_v22  ;;  %v8676_v37 = vor.u32 %v13637_v17, %v13639_v18  ;;  %v11712_v17 = vld [vmem:[#allocation10 + $0x2a4] sm:$0xf] }
 0x217   : > { %v1657_v43 = vpop.f32.mrf.mxu0  ;;  %v1717_v48 = vmax.f32 %v1628_v42, 0.0  ;;  %v1616_v49 = vadd.f32 %v1615_v41, %v1268_v36 }
 0x218   : > { %v1718_v10 = vmax.f32 %v1642_v44, 0.0  ;;  %v1658_v50 = vadd.f32 %v1657_v43, %v1271_v40  ;;  %v13649_v44 = vld [vmem:[#allocation10 + $0x2f0] sm:$0xf0] }
 0x219   : > { %v1732_v56 = vpack.c.bf16 %v1717_v48, %v1716_v11  ;;  %v1724_v60 = vmax.f32 %v1616_v49, 0.0  ;;  %v8804_v49 = vor.u32 %v13641_v30, %v13643_v19  ;;  %v11744_v30 = vld [vmem:[#allocation10 + $0x3a4] sm:$0xf]  ;;  %v9025_v19 = vld [vmem:[#allocation10 + $0x3b0] sm:$0xf0] }
 0x21a   : > { %v1733_v57 = vpack.c.bf16 %v1719_v53, %v1718_v10  ;;  %v1727_v63 = vmax.f32 %v1658_v50, 0.0 }
 0x21b   : > { %v1740_v13 = vunpack.c.l.bf16 %v1732_v56  ;;  %v1741_v14 = vunpack.c.h.bf16 %v1732_v56  ;;  %v8932_v56 = vor.u32 %v13647_v38, %v13649_v44  ;;  %v8625_v44 = vld [vmem:[#allocation10 + $0x90] sm:$0xf0] }
 0x21c   : > { %v1629_v9 = vpop.f32.mrf.mxu2  ;;  %v1742_v20 = vunpack.c.l.bf16 %v1733_v57 }
 0x21d   : > { %v1630_v51 = vadd.f32 %v1629_v9, %v1269_v21  ;;  %v1643_v52 = vpop.f32.mrf.mxu3  ;;  %v1743_v21 = vunpack.c.h.bf16 %v1733_v57 }
 0x21e   : > { %v1644_v54 = vadd.f32 %v1643_v52, %v1270_v22  ;;  %v1669_v55 = vpop.f32.mrf.mxu1  ;;  %v13655_v52 = vld [vmem:[#allocation10 + $0x3f0] sm:$0xf0] }
 0x21f   : > { %v1725_v61 = vmax.f32 %v1630_v51, 0.0  ;;  %v1711_v62 = vpop.f32.mrf.mxu0  ;;  %v1670_v26 = vadd.f32 %v1669_v55, %v1272_v4  ;;  %v13653_v51 = vld [vmem:[#allocation10 + $0x3e4] sm:$0xf] }
 0x220   : > { %v1726_v1 = vmax.f32 %v1644_v54, 0.0  ;;  %v1712_v41 = vadd.f32 %v1711_v62, %v1275_v7 }
 0x221   : > { %v1736_v3 = vpack.c.bf16 %v1725_v61, %v1724_v60  ;;  %v1720_v9 = vmax.f32 %v1670_v26, 0.0 }
 0x222   : > { %v1737_v6 = vpack.c.bf16 %v1727_v63, %v1726_v1  ;;  %v1723_v62 = vmax.f32 %v1712_v41, 0.0 }
 0x223   : > { %v1748_v15 = vunpack.c.l.bf16 %v1736_v3  ;;  %v1749_v16 = vunpack.c.h.bf16 %v1736_v3 }
 0x224   : > { %v1750_v22 = vunpack.c.l.bf16 %v1737_v6  ;;  %v1751_v12 = vunpack.c.h.bf16 %v1737_v6  ;;  %v1683_v23 = vpop.f32.mrf.mxu2  ;;  %v9060_v6 = vor.u32 %v13653_v51, %v13655_v52 }
 0x225   : > { %v1756_v24 = vmax.f32 %v1740_v13, %v1748_v15  ;;  %v1763_v25 = vmax.f32 %v1741_v14, %v1749_v16  ;;  %v1684_v28 = vadd.f32 %v1683_v23, %v1273_v5  ;;  %v1697_v29 = vpop.f32.mrf.mxu3 }
 0x226   : > { %v1770_v33 = vmax.f32 %v1742_v20, %v1750_v22  ;;  %v1777_v34 = vmax.f32 %v1743_v21, %v1751_v12  ;;  %v1698_v35 = vadd.f32 %v1697_v29, %v1274_v8  ;;  %v1671_v36 = vpop.f32.mrf.mxu1 }
 0x227   : > { %v1757_v39 = vrot.slane %v1756_v24, 4  ;;  %v1764_v40 = vrot.slane %v1763_v25, 4  ;;  %v1721_v42 = vmax.f32 %v1684_v28, 0.0  ;;  %v1713_v43 = vpop.f32.mrf.mxu0  ;;  %v1672_v48 = vadd.f32 %v1671_v36, %v1272_v4 }
 0x228   : > { %v1771_v46 = vrot.slane %v1770_v33, 4  ;;  %v1778_v47 = vrot.slane %v1777_v34, 4  ;;  %v1722_v11 = vmax.f32 %v1698_v35, 0.0  ;;  %v1714_v55 = vadd.f32 %v1713_v43, %v1275_v7 }
 0x229   : > { %v1758_v10 = vmax.f32 %v1756_v24, %v1757_v39  ;;  %v1765_v50 = vmax.f32 %v1763_v25, %v1764_v40  ;;  %v1734_v57 = vpack.c.bf16 %v1721_v42, %v1720_v9  ;;  %v1728_v63 = vmax.f32 %v1672_v48, 0.0 }
 0x22a   : > { %v1772_v53 = vmax.f32 %v1770_v33, %v1771_v46  ;;  %v1779_v54 = vmax.f32 %v1777_v34, %v1778_v47  ;;  %v1735_v13 = vpack.c.bf16 %v1723_v62, %v1722_v11  ;;  %v1731_v7 = vmax.f32 %v1714_v55, 0.0  ;;  %v11716_v55 = vld [vmem:[#allocation10 + $0x2c4] sm:$0xf]  ;;  %v8913_v62 = vld [vmem:[#allocation10 + $0x2d0] sm:$0xf0] }
 0x22b   : > { %v1759_v60 = vrot.slane %v1758_v10, 2  ;;  %v1766_v61 = vrot.slane %v1765_v50, 2  ;;  %v1744_v23 = vunpack.c.l.bf16 %v1734_v57  ;;  %v1745_v28 = vunpack.c.h.bf16 %v1734_v57  ;;  %v11748_v57 = vld [vmem:[#allocation10 + $0x3c4] sm:$0xf] }
 0x22c   : > { %v1685_v1 = vpop.f32.mrf.mxu2  ;;  %v1773_v3 = vrot.slane %v1772_v53, 2  ;;  %v1780_v4 = vrot.slane %v1779_v54, 2  ;;  %v1746_v35 = vunpack.c.l.bf16 %v1735_v13 }
 0x22d   : > { %v1686_v14 = vadd.f32 %v1685_v1, %v1273_v5  ;;  %v1699_v15 = vpop.f32.mrf.mxu3  ;;  %v1760_v16 = vmax.f32 %v1758_v10, %v1759_v60  ;;  %v1767_v20 = vmax.f32 %v1765_v50, %v1766_v61  ;;  %v1747_v5 = vunpack.c.h.bf16 %v1735_v13  ;;  %v11652_v10 = vld [vmem:[#allocation10 + $0xc4] sm:$0xf]  ;;  %v8657_v50 = vld [vmem:[#allocation10 + $0xd0] sm:$0xf0] }
 0x22e   : > { %v1700_v21 = vadd.f32 %v1699_v15, %v1274_v8  ;;  %v1774_v22 = vmax.f32 %v1772_v53, %v1773_v3  ;;  %v1781_v12 = vmax.f32 %v1779_v54, %v1780_v4  ;;  %v11684_v53 = vld [vmem:[#allocation10 + $0x1c4] sm:$0xf]  ;;  %v8785_v54 = vld [vmem:[#allocation10 + $0x1d0] sm:$0xf0]  ;;  %v8660_v15 = vor.u32 %v11652_v10, %v8657_v50 }
 0x22f   : > { %v1729_v24 = vmax.f32 %v1686_v14, 0.0  ;;  %v1761_v25 = vrot.slane %v1760_v16, 1  ;;  %v1768_v26 = vrot.slane %v1767_v20, 1  ;;  %v11648_v4 = vld [vmem:[#allocation10 + $0xa4] sm:$0xf] }
 0x230   : > { %v1730_v29 = vmax.f32 %v1700_v21, 0.0  ;;  %v1775_v33 = vrot.slane %v1774_v22, 1  ;;  %v1782_v34 = vrot.slane %v1781_v12, 1 }
 0x231   : > { %v1738_v36 = vpack.c.bf16 %v1729_v24, %v1728_v63  ;;  %v1762_v39 = vmax.f32 %v1760_v16, %v1761_v25  ;;  %v1769_v40 = vmax.f32 %v1767_v20, %v1768_v26  ;;  %v9041_v63 = vld [vmem:[#allocation10 + $0x3d0] sm:$0xf0]  ;;  %v8788_v16 = vor.u32 %v11684_v53, %v8785_v54 }
 0x232   : > { %v1739_v41 = vpack.c.bf16 %v1731_v7, %v1730_v29  ;;  %v1776_v42 = vmax.f32 %v1774_v22, %v1775_v33  ;;  %v1783_v43 = vmax.f32 %v1781_v12, %v1782_v34  ;;  %v8641_v20 = vld [vmem:[#allocation10 + $0xb0] sm:$0xf0]  ;;  %v11680_v7 = vld [vmem:[#allocation10 + $0x1a4] sm:$0xf]  ;;  %v8916_v12 = vor.u32 %v11716_v55, %v8913_v62 }
 0x233   : > { %v1752_v46 = vunpack.c.l.bf16 %v1738_v36  ;;  %v1753_v8 = vunpack.c.h.bf16 %v1738_v36  ;;  %v13661_v47 = vpack.c.bf16 %v1762_v39, %v1762_v39  ;;  %v13663_v48 = vpack.c.bf16 %v1769_v40, %v1769_v40  ;;  %v8769_v24 = vld [vmem:[#allocation10 + $0x1b0] sm:$0xf0]  ;;  %v11708_v39 = vld [vmem:[#allocation10 + $0x284] sm:$0xf] }
 0x234   : > { %v1754_v9 = vunpack.c.l.bf16 %v1739_v41  ;;  %v1755_v11 = vunpack.c.h.bf16 %v1739_v41  ;;  %v13665_v51 = vpack.c.bf16 %v1776_v42, %v1776_v42  ;;  %v13667_v52 = vpack.c.bf16 %v1783_v43, %v1783_v43  ;;  %v8897_v25 = vld [vmem:[#allocation10 + $0x2b0] sm:$0xf0]  ;;  %v11740_v42 = vld [vmem:[#allocation10 + $0x384] sm:$0xf] }
 0x235   : > { %v1784_v60 = vmax.f32 %v1744_v23, %v1752_v46  ;;  %v1791_v61 = vmax.f32 %v1745_v28, %v1753_v8  ;;  %3374 = vmatmul.bf16.vlgmr.msrb.gmra.mxu1 %v13661_v47  ;;  %3387 = vmatmul.bf16.vlgmr.msra.gmra.mxu2 %v13663_v48  ;;  %v9044_v23 = vor.u32 %v11748_v57, %v9041_v63  ;;  %v11644_v28 = vld [vmem:[#allocation10 + $0x84] sm:$0xf]  ;;  %v8753_v36 = vld [vmem:[#allocation10 + $0x190] sm:$0xf0] }
 0x236   : > { %v1798_v1 = vmax.f32 %v1746_v35, %v1754_v9  ;;  %v1805_v3 = vmax.f32 %v1747_v5, %v1755_v11  ;;  %3400 = vmatmul.bf16.vlgmr.msra.gmra.mxu3 %v13665_v51  ;;  %3413 = vmatmul.bf16.vlgmr.msra.gmra.mxu0 %v13667_v52  ;;  %v8644_v34 = vor.u32 %v11648_v4, %v8641_v20  ;;  %v8881_v41 = vld [vmem:[#allocation10 + $0x290] sm:$0xf0]  ;;  %v11640_v9 = vld [vmem:[#allocation10 + $0x64] sm:$0xf] }
 0x237   : > { %v1785_v13 = vrot.slane %v1784_v60, 4  ;;  %v1792_v14 = vrot.slane %v1791_v61, 4  ;;  %3470 = vmatpush.bf16.msrb.mxu1 %v8676_v37  ;;  %3483 = vmatpush.bf16.msra.mxu2 %v8804_v49  ;;  %v8772_v38 = vor.u32 %v11680_v7, %v8769_v24  ;;  %v9028_v35 = vor.u32 %v11744_v30, %v9025_v19  ;;  %v9009_v43 = vld [vmem:[#allocation10 + $0x390] sm:$0xf0]  ;;  %v11704_v4 = vld [vmem:[#allocation10 + $0x264] sm:$0xf] }
 0x238   : > { %v1799_v21 = vrot.slane %v1798_v1, 4  ;;  %v1806_v22 = vrot.slane %v1805_v3, 4  ;;  %3496 = vmatpush.bf16.msra.mxu3 %v8932_v56  ;;  %3509 = vmatpush.bf16.msra.mxu0 %v9060_v6  ;;  %v11676_v56 = vld [vmem:[#allocation10 + $0x184] sm:$0xf]  ;;  %v8900_v6 = vor.u32 %v11712_v17, %v8897_v25  ;;  %v8609_v11 = vld [vmem:[#allocation10 + $0x70] sm:$0xf0]  ;;  %v8628_v53 = vor.u32 %v11644_v28, %v8625_v44 }
 0x239   : > { %v1786_v18 = vmax.f32 %v1784_v60, %v1785_v13  ;;  %v1793_v37 = vmax.f32 %v1791_v61, %v1792_v14  ;;  %v8756_v54 = vor.u32 %v11676_v56, %v8753_v36  ;;  %v11672_v61 = vld [vmem:[#allocation10 + $0x164] sm:$0xf]  ;;  %v8737_v62 = vld [vmem:[#allocation10 + $0x170] sm:$0xf0]  ;;  %v8884_v57 = vor.u32 %v11708_v39, %v8881_v41 }
 0x23a   : > { %v1800_v49 = vmax.f32 %v1798_v1, %v1799_v21  ;;  %v1807_v26 = vmax.f32 %v1805_v3, %v1806_v22  ;;  %v9012_v63 = vor.u32 %v11740_v42, %v9009_v43  ;;  %v8865_v13 = vld [vmem:[#allocation10 + $0x270] sm:$0xf0]  ;;  %v8612_v22 = vor.u32 %v11640_v9, %v8609_v11  ;;  %v11700_v28 = vld [vmem:[#allocation10 + $0x244] sm:$0xf] }
 0x23b   : > { %v1787_v29 = vrot.slane %v1786_v18, 2  ;;  %v1794_v33 = vrot.slane %v1793_v37, 2  ;;  %3471 = vmatpush.bf16.msrb.mxu1 %v8660_v15  ;;  %3484 = vmatpush.bf16.msra.mxu2 %v8788_v16  ;;  %v11736_v16 = vld [vmem:[#allocation10 + $0x364] sm:$0xf]  ;;  %v8993_v20 = vld [vmem:[#allocation10 + $0x370] sm:$0xf0]  ;;  %v8868_v17 = vor.u32 %v11704_v4, %v8865_v13 }
 0x23c   : > { %3497 = vmatpush.bf16.msra.mxu3 %v8916_v12  ;;  %3510 = vmatpush.bf16.msra.mxu0 %v9044_v23  ;;  %v1801_v40 = vrot.slane %v1800_v49, 2  ;;  %v1808_v5 = vrot.slane %v1807_v26, 2  ;;  %v8740_v12 = vor.u32 %v11672_v61, %v8737_v62  ;;  %v8996_v19 = vor.u32 %v11736_v16, %v8993_v20  ;;  %v11632_v56 = vld [vmem:[#allocation10 + $0x24] sm:$0xf]  ;;  %v8833_v41 = vld [vmem:[#allocation10 + $0x230] sm:$0xf0] }
 0x23d   : > { %v1788_v46 = vmax.f32 %v1786_v18, %v1787_v29  ;;  %v1795_v8 = vmax.f32 %v1793_v37, %v1794_v33  ;;  %v11636_v18 = vld [vmem:[#allocation10 + $0x44] sm:$0xf]  ;;  %v8593_v37 = vld [vmem:[#allocation10 + $0x50] sm:$0xf0] }
 0x23e   : > { %v1802_v10 = vmax.f32 %v1800_v49, %v1801_v40  ;;  %v1809_v50 = vmax.f32 %v1807_v26, %v1808_v5  ;;  %v11668_v49 = vld [vmem:[#allocation10 + $0x144] sm:$0xf]  ;;  %v8721_v26 = vld [vmem:[#allocation10 + $0x150] sm:$0xf0] }
 0x23f   : > { %3472 = vmatpush.bf16.msrb.mxu1 %v8644_v34  ;;  %3485 = vmatpush.bf16.msra.mxu2 %v8772_v38  ;;  %v1789_v55 = vrot.slane %v1788_v46, 1  ;;  %v1796_v60 = vrot.slane %v1795_v8, 1  ;;  %v8849_v29 = vld [vmem:[#allocation10 + $0x250] sm:$0xf0]  ;;  %v11732_v33 = vld [vmem:[#allocation10 + $0x344] sm:$0xf]  ;;  %v8596_v38 = vor.u32 %v11636_v18, %v8593_v37  ;;  %v8724_v44 = vor.u32 %v11668_v49, %v8721_v26 }
 0x240   : > { %3498 = vmatpush.bf16.msra.mxu3 %v8900_v6  ;;  %3511 = vmatpush.bf16.msra.mxu0 %v9028_v35  ;;  %v1803_v1 = vrot.slane %v1802_v10, 1  ;;  %v1810_v3 = vrot.slane %v1809_v50, 1  ;;  %v8977_v34 = vld [vmem:[#allocation10 + $0x350] sm:$0xf0]  ;;  %v8852_v35 = vor.u32 %v11700_v28, %v8849_v29  ;;  %v11664_v39 = vld [vmem:[#allocation10 + $0x124] sm:$0xf] }
 0x241   : > { %v1790_v14 = vmax.f32 %v1788_v46, %v1789_v55  ;;  %v1797_v15 = vmax.f32 %v1795_v8, %v1796_v60  ;;  %v8577_v6 = vld [vmem:[#allocation10 + $0x30] sm:$0xf0]  ;;  %v8980_v36 = vor.u32 %v11732_v33, %v8977_v34  ;;  %v11696_v5 = vld [vmem:[#allocation10 + $0x224] sm:$0xf] }
 0x242   : > { %v1804_v7 = vmax.f32 %v1802_v10, %v1803_v1  ;;  %v1811_v21 = vmax.f32 %v1809_v50, %v1810_v3  ;;  %v8705_v40 = vld [vmem:[#allocation10 + $0x130] sm:$0xf0]  ;;  %v11728_v42 = vld [vmem:[#allocation10 + $0x324] sm:$0xf]  ;;  %v8580_v8 = vor.u32 %v11632_v56, %v8577_v6 }
 0x243   : > { %3473 = vmatpush.bf16.msrb.mxu1 %v8628_v53  ;;  %3486 = vmatpush.bf16.msra.mxu2 %v8756_v54  ;;  %v13682_v23 = vpack.c.bf16 %v1790_v14, %v1790_v14  ;;  %v13684_v24 = vpack.c.bf16 %v1797_v15, %v1797_v15  ;;  %v8961_v43 = vld [vmem:[#allocation10 + $0x330] sm:$0xf0]  ;;  %v11628_v46 = vld [vmem:[#allocation10 + $0x4] sm:$0xf]  ;;  %v8708_v10 = vor.u32 %v11664_v39, %v8705_v40 }
 0x244   : > { %3499 = vmatpush.bf16.msra.mxu3 %v8884_v57  ;;  %3512 = vmatpush.bf16.msra.mxu0 %v9012_v63  ;;  %v13686_v25 = vpack.c.bf16 %v1804_v7, %v1804_v7  ;;  %v13688_v30 = vpack.c.bf16 %v1811_v21, %v1811_v21  ;;  %v8561_v50 = vld [vmem:[#allocation10 + $0x10] sm:$0xf0]  ;;  %v11660_v9 = vld [vmem:[#allocation10 + $0x104] sm:$0xf]  ;;  %v8836_v53 = vor.u32 %v11696_v5, %v8833_v41 }
 0x245   : > { %3426 = vmatmul.bf16.vlgmr.msra.gmra.mxu1 %v13682_v23  ;;  %3439 = vmatmul.bf16.vlgmr.msrb.gmra.mxu2 %v13684_v24  ;;  %v8689_v11 = vld [vmem:[#allocation10 + $0x110] sm:$0xf0]  ;;  %v8964_v54 = vor.u32 %v11728_v42, %v8961_v43  ;;  %v11692_v55 = vld [vmem:[#allocation10 + $0x204] sm:$0xf]  ;;  %v8564_v13 = vor.u32 %v11628_v46, %v8561_v50 }
 0x246   : > { %3452 = vmatmul.bf16.vlgmr.msrb.gmra.mxu3 %v13686_v25  ;;  %3465 = vmatmul.bf16.vlgmr.msrb.gmra.mxu0 %v13688_v30  ;;  %v8817_v60 = vld [vmem:[#allocation10 + $0x210] sm:$0xf0]  ;;  %v11724_v61 = vld [vmem:[#allocation10 + $0x304] sm:$0xf]  ;;  %v8692_v14 = vor.u32 %v11660_v9, %v8689_v11 }
 0x247   : > { %3474 = vmatpush.bf16.msrb.mxu1 %v8612_v22  ;;  %3487 = vmatpush.bf16.msra.mxu2 %v8740_v12  ;;  %v8945_v62 = vld [vmem:[#allocation10 + $0x310] sm:$0xf0]  ;;  %v11784_v57 = vld [vmem:[#allocation10 + $0x4e4] sm:$0xf]  ;;  %v8820_v7 = vor.u32 %v11692_v55, %v8817_v60 }
 0x248   : > { %3500 = vmatpush.bf16.msra.mxu3 %v8868_v17  ;;  %3513 = vmatpush.bf16.msra.mxu0 %v8996_v19  ;;  %v9185_v63 = vld [vmem:[#allocation10 + $0x4f0] sm:$0xf0]  ;;  %v11816_v1 = vld [vmem:[#allocation10 + $0x5e4] sm:$0xf]  ;;  %v8948_v21 = vor.u32 %v11724_v61, %v8945_v62 }
 0x249   : > { %v9313_v3 = vld [vmem:[#allocation10 + $0x5f0] sm:$0xf0]  ;;  %v11848_v4 = vld [vmem:[#allocation10 + $0x6e4] sm:$0xf]  ;;  %v9188_v22 = vor.u32 %v11784_v57, %v9185_v63 }
 0x24a   : > { %v9441_v15 = vld [vmem:[#allocation10 + $0x6f0] sm:$0xf0]  ;;  %v11880_v16 = vld [vmem:[#allocation10 + $0x7e4] sm:$0xf]  ;;  %v9316_v12 = vor.u32 %v11816_v1, %v9313_v3 }
 0x24b   : > { %3475 = vmatpush.bf16.msrb.mxu1 %v8596_v38  ;;  %3488 = vmatpush.bf16.msra.mxu2 %v8724_v44  ;;  %v9569_v20 = vld [vmem:[#allocation10 + $0x7f0] sm:$0xf0]  ;;  %v11780_v17 = vld [vmem:[#allocation10 + $0x4c4] sm:$0xf]  ;;  %v9444_v37 = vor.u32 %v11848_v4, %v9441_v15 }
 0x24c   : > { %3501 = vmatpush.bf16.msra.mxu3 %v8852_v35  ;;  %3514 = vmatpush.bf16.msra.mxu0 %v8980_v36  ;;  %v9169_v18 = vld [vmem:[#allocation10 + $0x4d0] sm:$0xf0]  ;;  %v9572_v19 = vor.u32 %v11880_v16, %v9569_v20  ;;  %v11812_v49 = vld [vmem:[#allocation10 + $0x5c4] sm:$0xf] }
 0x24d   : > { %v9297_v26 = vld [vmem:[#allocation10 + $0x5d0] sm:$0xf0]  ;;  %v11844_v28 = vld [vmem:[#allocation10 + $0x6c4] sm:$0xf]  ;;  %v9172_v38 = vor.u32 %v11780_v17, %v9169_v18 }
 0x24e   : > { %v9425_v29 = vld [vmem:[#allocation10 + $0x6d0] sm:$0xf0]  ;;  %v11876_v33 = vld [vmem:[#allocation10 + $0x7c4] sm:$0xf]  ;;  %v9300_v44 = vor.u32 %v11812_v49, %v9297_v26 }
 0x24f   : > { %3476 = vmatpush.bf16.msrb.mxu1 %v8580_v8  ;;  %3489 = vmatpush.bf16.msra.mxu2 %v8708_v10  ;;  %v9553_v34 = vld [vmem:[#allocation10 + $0x7d0] sm:$0xf0]  ;;  %v11776_v56 = vld [vmem:[#allocation10 + $0x4a4] sm:$0xf]  ;;  %v9428_v35 = vor.u32 %v11844_v28, %v9425_v29 }
 0x250   : > { %3502 = vmatpush.bf16.msra.mxu3 %v8836_v53  ;;  %3515 = vmatpush.bf16.msra.mxu0 %v8964_v54  ;;  %v9153_v6 = vld [vmem:[#allocation10 + $0x4b0] sm:$0xf0]  ;;  %v9556_v36 = vor.u32 %v11876_v33, %v9553_v34  ;;  %v11808_v39 = vld [vmem:[#allocation10 + $0x5a4] sm:$0xf] }
 0x251   : > { %v9281_v40 = vld [vmem:[#allocation10 + $0x5b0] sm:$0xf0]  ;;  %v11840_v5 = vld [vmem:[#allocation10 + $0x6a4] sm:$0xf]  ;;  %v9156_v46 = vor.u32 %v11776_v56, %v9153_v6 }
 0x252   : > { %v9409_v41 = vld [vmem:[#allocation10 + $0x6b0] sm:$0xf0]  ;;  %v11872_v42 = vld [vmem:[#allocation10 + $0x7a4] sm:$0xf]  ;;  %v9284_v8 = vor.u32 %v11808_v39, %v9281_v40 }
 0x253   : > { %3477 = vmatpush.bf16.msrb.mxu1 %v8564_v13  ;;  %3490 = vmatpush.bf16.msra.mxu2 %v8692_v14  ;;  %v9537_v43 = vld [vmem:[#allocation10 + $0x7b0] sm:$0xf0]  ;;  %v11772_v10 = vld [vmem:[#allocation10 + $0x484] sm:$0xf]  ;;  %v9412_v9 = vor.u32 %v11840_v5, %v9409_v41 }
 0x254   : > { %3503 = vmatpush.bf16.msra.mxu3 %v8820_v7  ;;  %3516 = vmatpush.bf16.msra.mxu0 %v8948_v21  ;;  %v9137_v50 = vld [vmem:[#allocation10 + $0x490] sm:$0xf0]  ;;  %v9540_v11 = vor.u32 %v11872_v42, %v9537_v43  ;;  %v11804_v53 = vld [vmem:[#allocation10 + $0x584] sm:$0xf] }
 0x255   : > { %v9265_v54 = vld [vmem:[#allocation10 + $0x590] sm:$0xf0]  ;;  %v11836_v55 = vld [vmem:[#allocation10 + $0x684] sm:$0xf]  ;;  %v9140_v57 = vor.u32 %v11772_v10, %v9137_v50 }
 0x256   : > { %3478 = vmatmul.bf16.vlgmr.msrb.gmra.mxu1 %v13661_v47  ;;  %3491 = vmatmul.bf16.vlgmr.msra.gmra.mxu2 %v13663_v48  ;;  %v9393_v60 = vld [vmem:[#allocation10 + $0x690] sm:$0xf0]  ;;  %v11868_v61 = vld [vmem:[#allocation10 + $0x784] sm:$0xf]  ;;  %v9268_v63 = vor.u32 %v11804_v53, %v9265_v54 }
 0x257   : > { %3522 = vmatpush.bf16.msra.mxu1 %v9188_v22  ;;  %3535 = vmatpush.bf16.msrb.mxu2 %v9316_v12  ;;  %v9521_v62 = vld [vmem:[#allocation10 + $0x790] sm:$0xf0]  ;;  %v11768_v1 = vld [vmem:[#allocation10 + $0x464] sm:$0xf]  ;;  %v9396_v4 = vor.u32 %v11836_v55, %v9393_v60 }
 0x258   : > { %3548 = vmatpush.bf16.msrb.mxu3 %v9444_v37  ;;  %3561 = vmatpush.bf16.msrb.mxu0 %v9572_v19  ;;  %v9121_v3 = vld [vmem:[#allocation10 + $0x470] sm:$0xf0]  ;;  %v9524_v13 = vor.u32 %v11868_v61, %v9521_v62  ;;  %v11800_v14 = vld [vmem:[#allocation10 + $0x564] sm:$0xf] }
 0x259   : > { %3504 = vmatmul.bf16.vlgmr.msra.gmra.mxu3 %v13665_v51  ;;  %3517 = vmatmul.bf16.vlgmr.msra.gmra.mxu0 %v13667_v52  ;;  %v9249_v15 = vld [vmem:[#allocation10 + $0x570] sm:$0xf0]  ;;  %v11832_v16 = vld [vmem:[#allocation10 + $0x664] sm:$0xf]  ;;  %v9124_v22 = vor.u32 %v11768_v1, %v9121_v3  ;;  %v8807_v1 = vld [vmem:[#allocation10 + $0x1e8] sm:$0xf] }
 0x25a   : > { %v9377_v20 = vld [vmem:[#allocation10 + $0x670] sm:$0xf0]  ;;  %v11864_v7 = vld [vmem:[#allocation10 + $0x764] sm:$0xf]  ;;  %v9252_v12 = vor.u32 %v11800_v14, %v9249_v15  ;;  %v11691_v3 = vld [vmem:[#allocation10 + $0x1f4] sm:$0xf0] }
 0x25b   : > { %3523 = vmatpush.bf16.msra.mxu1 %v9172_v38  ;;  %3536 = vmatpush.bf16.msrb.mxu2 %v9300_v44  ;;  %v9505_v21 = vld [vmem:[#allocation10 + $0x770] sm:$0xf0]  ;;  %v11764_v17 = vld [vmem:[#allocation10 + $0x444] sm:$0xf]  ;;  %v9380_v37 = vor.u32 %v11832_v16, %v9377_v20  ;;  %v11723_v15 = vld [vmem:[#allocation10 + $0x2f4] sm:$0xf0] }
 0x25c   : > { %3549 = vmatpush.bf16.msrb.mxu3 %v9428_v35  ;;  %3562 = vmatpush.bf16.msrb.mxu0 %v9556_v36  ;;  %v9105_v18 = vld [vmem:[#allocation10 + $0x450] sm:$0xf0]  ;;  %v9508_v19 = vor.u32 %v11864_v7, %v9505_v21  ;;  %v11796_v49 = vld [vmem:[#allocation10 + $0x544] sm:$0xf]  ;;  %v9063_v16 = vld [vmem:[#allocation10 + $0x3e8] sm:$0xf] }
 0x25d   : > { %v9233_v26 = vld [vmem:[#allocation10 + $0x550] sm:$0xf0]  ;;  %v11828_v28 = vld [vmem:[#allocation10 + $0x644] sm:$0xf]  ;;  %v9108_v38 = vor.u32 %v11764_v17, %v9105_v18  ;;  %v11755_v20 = vld [vmem:[#allocation10 + $0x3f4] sm:$0xf0] }
 0x25e   : > { %v9361_v29 = vld [vmem:[#allocation10 + $0x650] sm:$0xf0]  ;;  %v11860_v33 = vld [vmem:[#allocation10 + $0x744] sm:$0xf]  ;;  %v9236_v44 = vor.u32 %v11796_v49, %v9233_v26  ;;  %v8663_v17 = vld [vmem:[#allocation10 + $0xc8] sm:$0xf] }
 0x25f   : > { %3524 = vmatpush.bf16.msra.mxu1 %v9156_v46  ;;  %3537 = vmatpush.bf16.msrb.mxu2 %v9284_v8  ;;  %v9489_v34 = vld [vmem:[#allocation10 + $0x750] sm:$0xf0]  ;;  %v11760_v56 = vld [vmem:[#allocation10 + $0x424] sm:$0xf]  ;;  %v9364_v35 = vor.u32 %v11828_v28, %v9361_v29  ;;  %v11655_v18 = vld [vmem:[#allocation10 + $0xd4] sm:$0xf0] }
 0x260   : > { %3550 = vmatpush.bf16.msrb.mxu3 %v9412_v9  ;;  %3563 = vmatpush.bf16.msrb.mxu0 %v9540_v11  ;;  %v9089_v6 = vld [vmem:[#allocation10 + $0x430] sm:$0xf0]  ;;  %v9492_v36 = vor.u32 %v11860_v33, %v9489_v34  ;;  %v11792_v39 = vld [vmem:[#allocation10 + $0x524] sm:$0xf]  ;;  %v8791_v49 = vld [vmem:[#allocation10 + $0x1c8] sm:$0xf] }
 0x261   : > { %v9217_v40 = vld [vmem:[#allocation10 + $0x530] sm:$0xf0]  ;;  %v11824_v5 = vld [vmem:[#allocation10 + $0x624] sm:$0xf]  ;;  %v9092_v8 = vor.u32 %v11760_v56, %v9089_v6  ;;  %v11687_v26 = vld [vmem:[#allocation10 + $0x1d4] sm:$0xf0] }
 0x262   : > { %v9345_v41 = vld [vmem:[#allocation10 + $0x630] sm:$0xf0]  ;;  %v11856_v42 = vld [vmem:[#allocation10 + $0x724] sm:$0xf]  ;;  %v9220_v10 = vor.u32 %v11792_v39, %v9217_v40  ;;  %v8919_v28 = vld [vmem:[#allocation10 + $0x2c8] sm:$0xf] }
 0x263   : > { %3525 = vmatpush.bf16.msra.mxu1 %v9140_v57  ;;  %3538 = vmatpush.bf16.msrb.mxu2 %v9268_v63  ;;  %v9473_v43 = vld [vmem:[#allocation10 + $0x730] sm:$0xf0]  ;;  %v11756_v46 = vld [vmem:[#allocation10 + $0x404] sm:$0xf]  ;;  %v9348_v53 = vor.u32 %v11824_v5, %v9345_v41  ;;  %v8679_v57 = vld [vmem:[#allocation10 + $0xe8] sm:$0xf] }
 0x264   : > { %3551 = vmatpush.bf16.msrb.mxu3 %v9396_v4  ;;  %3564 = vmatpush.bf16.msrb.mxu0 %v9524_v13  ;;  %v9073_v50 = vld [vmem:[#allocation10 + $0x410] sm:$0xf0]  ;;  %v11788_v9 = vld [vmem:[#allocation10 + $0x504] sm:$0xf]  ;;  %v9476_v54 = vor.u32 %v11856_v42, %v9473_v43  ;;  %v11659_v63 = vld [vmem:[#allocation10 + $0xf4] sm:$0xf0] }
 0x265   : > { %v9201_v11 = vld [vmem:[#allocation10 + $0x510] sm:$0xf0]  ;;  %v11820_v55 = vld [vmem:[#allocation10 + $0x604] sm:$0xf]  ;;  %v8935_v4 = vld [vmem:[#allocation10 + $0x2e8] sm:$0xf]  ;;  %v9076_v13 = vor.u32 %v11756_v46, %v9073_v50 }
 0x266   : > { %v9329_v60 = vld [vmem:[#allocation10 + $0x610] sm:$0xf0]  ;;  %v11852_v61 = vld [vmem:[#allocation10 + $0x704] sm:$0xf]  ;;  %v9204_v14 = vor.u32 %v11788_v9, %v9201_v11  ;;  %v11719_v29 = vld [vmem:[#allocation10 + $0x2d4] sm:$0xf0] }
 0x267   : > { %3526 = vmatpush.bf16.msra.mxu1 %v9124_v22  ;;  %3539 = vmatpush.bf16.msrb.mxu2 %v9252_v12  ;;  %v9457_v62 = vld [vmem:[#allocation10 + $0x710] sm:$0xf0]  ;;  %v9332_v7 = vor.u32 %v11820_v55, %v9329_v60  ;;  %v8680_v22 = vor.u32 %v11659_v63, %v8679_v57  ;;  %v8808_v12 = vor.u32 %v11691_v3, %v8807_v1  ;;  %v9047_v33 = vld [vmem:[#allocation10 + $0x3c8] sm:$0xf]  ;;  %v11751_v34 = vld [vmem:[#allocation10 + $0x3d4] sm:$0xf0] }
 0x268   : > { %3552 = vmatpush.bf16.msrb.mxu3 %v9380_v37  ;;  %3565 = vmatpush.bf16.msrb.mxu0 %v9508_v19  ;;  %v9460_v21 = vor.u32 %v11852_v61, %v9457_v62  ;;  %v8936_v37 = vor.u32 %v11723_v15, %v8935_v4  ;;  %v9064_v19 = vor.u32 %v11755_v20, %v9063_v16  ;;  %v8647_v56 = vld [vmem:[#allocation10 + $0xa8] sm:$0xf]  ;;  %v11651_v6 = vld [vmem:[#allocation10 + $0xb4] sm:$0xf0] }
 0x269   : > { %v8775_v39 = vld [vmem:[#allocation10 + $0x1a8] sm:$0xf]  ;;  %v11683_v40 = vld [vmem:[#allocation10 + $0x1b4] sm:$0xf0]  ;;  %v8648_v46 = vor.u32 %v11651_v6, %v8647_v56 }
 0x26a   : > { %v8903_v5 = vld [vmem:[#allocation10 + $0x2a8] sm:$0xf]  ;;  %v11715_v41 = vld [vmem:[#allocation10 + $0x2b4] sm:$0xf0] }
 0x26b   : > { %3527 = vmatpush.bf16.msra.mxu1 %v9108_v38  ;;  %3540 = vmatpush.bf16.msrb.mxu2 %v9236_v44  ;;  %v8664_v38 = vor.u32 %v11655_v18, %v8663_v17  ;;  %v8792_v44 = vor.u32 %v11687_v26, %v8791_v49  ;;  %v9031_v42 = vld [vmem:[#allocation10 + $0x3a8] sm:$0xf]  ;;  %v11747_v43 = vld [vmem:[#allocation10 + $0x3b4] sm:$0xf0]  ;;  %v8904_v9 = vor.u32 %v11715_v41, %v8903_v5 }
 0x26c   : > { %3553 = vmatpush.bf16.msrb.mxu3 %v9364_v35  ;;  %3566 = vmatpush.bf16.msrb.mxu0 %v9492_v36  ;;  %v8920_v35 = vor.u32 %v11719_v29, %v8919_v28  ;;  %v9048_v36 = vor.u32 %v11751_v34, %v9047_v33  ;;  %v11647_v50 = vld [vmem:[#allocation10 + $0x94] sm:$0xf0]  ;;  %v9032_v11 = vor.u32 %v11747_v43, %v9031_v42  ;;  %v8887_v55 = vld [vmem:[#allocation10 + $0x288] sm:$0xf] }
 0x26d   : > { %v11711_v60 = vld [vmem:[#allocation10 + $0x294] sm:$0xf0]  ;;  %v9015_v61 = vld [vmem:[#allocation10 + $0x388] sm:$0xf] }
 0x26e   : > { %v11743_v62 = vld [vmem:[#allocation10 + $0x394] sm:$0xf0]  ;;  %v8615_v1 = vld [vmem:[#allocation10 + $0x68] sm:$0xf]  ;;  %v8888_v4 = vor.u32 %v11711_v60, %v8887_v55 }
 0x26f   : > { %3528 = vmatpush.bf16.msra.mxu1 %v9092_v8  ;;  %3541 = vmatpush.bf16.msrb.mxu2 %v9220_v10  ;;  %v8776_v8 = vor.u32 %v11683_v40, %v8775_v39  ;;  %v8631_v10 = vld [vmem:[#allocation10 + $0x88] sm:$0xf]  ;;  %v11643_v3 = vld [vmem:[#allocation10 + $0x74] sm:$0xf0] }
 0x270   : > { %3554 = vmatpush.bf16.msrb.mxu3 %v9348_v53  ;;  %3567 = vmatpush.bf16.msrb.mxu0 %v9476_v54  ;;  %v8759_v53 = vld [vmem:[#allocation10 + $0x188] sm:$0xf]  ;;  %v11679_v54 = vld [vmem:[#allocation10 + $0x194] sm:$0xf0]  ;;  %v8632_v57 = vor.u32 %v11647_v50, %v8631_v10 }
 0x271   : > { %v8760_v63 = vor.u32 %v11679_v54, %v8759_v53  ;;  %v11675_v15 = vld [vmem:[#allocation10 + $0x174] sm:$0xf0]  ;;  %v8871_v16 = vld [vmem:[#allocation10 + $0x268] sm:$0xf] }
 0x272   : > { %v11707_v20 = vld [vmem:[#allocation10 + $0x274] sm:$0xf0]  ;;  %v8599_v17 = vld [vmem:[#allocation10 + $0x48] sm:$0xf] }
 0x273   : > { %3529 = vmatpush.bf16.msra.mxu1 %v9076_v13  ;;  %3542 = vmatpush.bf16.msrb.mxu2 %v9204_v14  ;;  %v9016_v13 = vor.u32 %v11743_v62, %v9015_v61  ;;  %v8743_v14 = vld [vmem:[#allocation10 + $0x168] sm:$0xf]  ;;  %v11639_v18 = vld [vmem:[#allocation10 + $0x54] sm:$0xf0] }
 0x274   : > { %3555 = vmatpush.bf16.msrb.mxu3 %v9332_v7  ;;  %3568 = vmatpush.bf16.msrb.mxu0 %v9460_v21  ;;  %v8999_v7 = vld [vmem:[#allocation10 + $0x368] sm:$0xf]  ;;  %v11739_v21 = vld [vmem:[#allocation10 + $0x374] sm:$0xf0] }
 0x275   : > { %v8727_v49 = vld [vmem:[#allocation10 + $0x148] sm:$0xf]  ;;  %v11671_v26 = vld [vmem:[#allocation10 + $0x154] sm:$0xf0] }
 0x276   : > { %3530 = vmatmul.bf16.vlgmr.msra.gmra.mxu1 %v13682_v23  ;;  %3543 = vmatmul.bf16.vlgmr.msrb.gmra.mxu2 %v13684_v24  ;;  %v8855_v28 = vld [vmem:[#allocation10 + $0x248] sm:$0xf]  ;;  %v11703_v29 = vld [vmem:[#allocation10 + $0x254] sm:$0xf0] }
 0x277   : > { %3574 = vmatpush.bf16.msrb.mxu1 %v8680_v22  ;;  %3587 = vmatpush.bf16.msra.mxu2 %v8808_v12  ;;  %v8616_v22 = vor.u32 %v11643_v3, %v8615_v1  ;;  %v8744_v12 = vor.u32 %v11675_v15, %v8743_v14  ;;  %v8983_v33 = vld [vmem:[#allocation10 + $0x348] sm:$0xf]  ;;  %v11735_v34 = vld [vmem:[#allocation10 + $0x354] sm:$0xf0] }
 0x278   : > { %3600 = vmatpush.bf16.msra.mxu3 %v8936_v37  ;;  %3613 = vmatpush.bf16.msra.mxu0 %v9064_v19  ;;  %v8872_v37 = vor.u32 %v11707_v20, %v8871_v16  ;;  %v9000_v19 = vor.u32 %v11739_v21, %v8999_v7  ;;  %v8583_v56 = vld [vmem:[#allocation10 + $0x28] sm:$0xf]  ;;  %v11635_v6 = vld [vmem:[#allocation10 + $0x34] sm:$0xf0] }
 0x279   : > { %3556 = vmatmul.bf16.vlgmr.msrb.gmra.mxu3 %v13686_v25  ;;  %3569 = vmatmul.bf16.vlgmr.msrb.gmra.mxu0 %v13688_v30  ;;  %v8711_v39 = vld [vmem:[#allocation10 + $0x128] sm:$0xf]  ;;  %v11667_v40 = vld [vmem:[#allocation10 + $0x134] sm:$0xf0] }
 0x27a   : > { %v8839_v5 = vld [vmem:[#allocation10 + $0x228] sm:$0xf]  ;;  %v11699_v41 = vld [vmem:[#allocation10 + $0x234] sm:$0xf0]  ;;  %v8712_v10 = vor.u32 %v11667_v40, %v8711_v39 }
 0x27b   : > { %3575 = vmatpush.bf16.msrb.mxu1 %v8664_v38  ;;  %3588 = vmatpush.bf16.msra.mxu2 %v8792_v44  ;;  %v8600_v38 = vor.u32 %v11639_v18, %v8599_v17  ;;  %v8728_v44 = vor.u32 %v11671_v26, %v8727_v49  ;;  %v8967_v42 = vld [vmem:[#allocation10 + $0x328] sm:$0xf]  ;;  %v11731_v43 = vld [vmem:[#allocation10 + $0x334] sm:$0xf0]  ;;  %v8840_v53 = vor.u32 %v11699_v41, %v8839_v5 }
 0x27c   : > { %3601 = vmatpush.bf16.msra.mxu3 %v8920_v35  ;;  %3614 = vmatpush.bf16.msra.mxu0 %v9048_v36  ;;  %v8856_v35 = vor.u32 %v11703_v29, %v8855_v28  ;;  %v8984_v36 = vor.u32 %v11735_v34, %v8983_v33  ;;  %v11631_v50 = vld [vmem:[#allocation10 + $0x14] sm:$0xf0]  ;;  %v8968_v54 = vor.u32 %v11731_v43, %v8967_v42  ;;  %v8823_v55 = vld [vmem:[#allocation10 + $0x208] sm:$0xf] }
 0x27d   : > { %v11695_v60 = vld [vmem:[#allocation10 + $0x214] sm:$0xf0]  ;;  %v8951_v61 = vld [vmem:[#allocation10 + $0x308] sm:$0xf] }
 0x27e   : > { %v11727_v62 = vld [vmem:[#allocation10 + $0x314] sm:$0xf0]  ;;  %v9319_v1 = vld [vmem:[#allocation10 + $0x5e8] sm:$0xf]  ;;  %v8824_v7 = vor.u32 %v11695_v60, %v8823_v55 }
 0x27f   : > { %3576 = vmatpush.bf16.msrb.mxu1 %v8648_v46  ;;  %3589 = vmatpush.bf16.msra.mxu2 %v8776_v8  ;;  %v8567_v46 = vld [vmem:[#allocation10 + $0x8] sm:$0xf]  ;;  %v8584_v8 = vor.u32 %v11635_v6, %v8583_v56  ;;  %v11819_v3 = vld [vmem:[#allocation10 + $0x5f4] sm:$0xf0]  ;;  %v8952_v21 = vor.u32 %v11727_v62, %v8951_v61 }
 0x280   : > { %3602 = vmatpush.bf16.msra.mxu3 %v8904_v9  ;;  %3615 = vmatpush.bf16.msra.mxu0 %v9032_v11  ;;  %v8695_v9 = vld [vmem:[#allocation10 + $0x108] sm:$0xf]  ;;  %v11663_v11 = vld [vmem:[#allocation10 + $0x114] sm:$0xf0] }
 0x281   : > { %v8696_v14 = vor.u32 %v11663_v11, %v8695_v9  ;;  %v11851_v15 = vld [vmem:[#allocation10 + $0x6f4] sm:$0xf0]  ;;  %v9575_v16 = vld [vmem:[#allocation10 + $0x7e8] sm:$0xf] }
 0x282   : > { %v11883_v20 = vld [vmem:[#allocation10 + $0x7f4] sm:$0xf0]  ;;  %v9175_v17 = vld [vmem:[#allocation10 + $0x4c8] sm:$0xf] }
 0x283   : > { %3577 = vmatpush.bf16.msrb.mxu1 %v8632_v57  ;;  %3590 = vmatpush.bf16.msra.mxu2 %v8760_v63  ;;  %v9191_v57 = vld [vmem:[#allocation10 + $0x4e8] sm:$0xf]  ;;  %v11787_v63 = vld [vmem:[#allocation10 + $0x4f4] sm:$0xf0] }
 0x284   : > { %3603 = vmatpush.bf16.msra.mxu3 %v8888_v4  ;;  %3616 = vmatpush.bf16.msra.mxu0 %v9016_v13  ;;  %v9447_v4 = vld [vmem:[#allocation10 + $0x6e8] sm:$0xf]  ;;  %v8568_v13 = vor.u32 %v11631_v50, %v8567_v46  ;;  %v11783_v18 = vld [vmem:[#allocation10 + $0x4d4] sm:$0xf0] }
 0x285   : > { %v9303_v49 = vld [vmem:[#allocation10 + $0x5c8] sm:$0xf]  ;;  %v11815_v26 = vld [vmem:[#allocation10 + $0x5d4] sm:$0xf0] }
 0x286   : > { %v9431_v28 = vld [vmem:[#allocation10 + $0x6c8] sm:$0xf]  ;;  %v11847_v29 = vld [vmem:[#allocation10 + $0x6d4] sm:$0xf0] }
 0x287   : > { %3578 = vmatpush.bf16.msrb.mxu1 %v8616_v22  ;;  %3591 = vmatpush.bf16.msra.mxu2 %v8744_v12  ;;  %v9192_v22 = vor.u32 %v11787_v63, %v9191_v57  ;;  %v9320_v12 = vor.u32 %v11819_v3, %v9319_v1  ;;  %v9559_v33 = vld [vmem:[#allocation10 + $0x7c8] sm:$0xf]  ;;  %v11879_v34 = vld [vmem:[#allocation10 + $0x7d4] sm:$0xf0] }
 0x288   : > { %3604 = vmatpush.bf16.msra.mxu3 %v8872_v37  ;;  %3617 = vmatpush.bf16.msra.mxu0 %v9000_v19  ;;  %v9448_v37 = vor.u32 %v11851_v15, %v9447_v4  ;;  %v9576_v19 = vor.u32 %v11883_v20, %v9575_v16  ;;  %v9159_v56 = vld [vmem:[#allocation10 + $0x4a8] sm:$0xf]  ;;  %v11779_v6 = vld [vmem:[#allocation10 + $0x4b4] sm:$0xf0] }
 0x289   : > { %v9287_v39 = vld [vmem:[#allocation10 + $0x5a8] sm:$0xf]  ;;  %v11811_v40 = vld [vmem:[#allocation10 + $0x5b4] sm:$0xf0]  ;;  %v9160_v46 = vor.u32 %v11779_v6, %v9159_v56 }
 0x28a   : > { %v9415_v5 = vld [vmem:[#allocation10 + $0x6a8] sm:$0xf]  ;;  %v11843_v41 = vld [vmem:[#allocation10 + $0x6b4] sm:$0xf0] }
 0x28b   : > { %3579 = vmatpush.bf16.msrb.mxu1 %v8600_v38  ;;  %3592 = vmatpush.bf16.msra.mxu2 %v8728_v44  ;;  %v9176_v38 = vor.u32 %v11783_v18, %v9175_v17  ;;  %v9304_v44 = vor.u32 %v11815_v26, %v9303_v49  ;;  %v9543_v42 = vld [vmem:[#allocation10 + $0x7a8] sm:$0xf]  ;;  %v11875_v43 = vld [vmem:[#allocation10 + $0x7b4] sm:$0xf0]  ;;  %v9416_v9 = vor.u32 %v11843_v41, %v9415_v5 }
 0x28c   : > { %3605 = vmatpush.bf16.msra.mxu3 %v8856_v35  ;;  %3618 = vmatpush.bf16.msra.mxu0 %v8984_v36  ;;  %v9432_v35 = vor.u32 %v11847_v29, %v9431_v28  ;;  %v9560_v36 = vor.u32 %v11879_v34, %v9559_v33  ;;  %v11775_v50 = vld [vmem:[#allocation10 + $0x494] sm:$0xf0]  ;;  %v9544_v11 = vor.u32 %v11875_v43, %v9543_v42  ;;  %v9399_v55 = vld [vmem:[#allocation10 + $0x688] sm:$0xf] }
 0x28d   : > { %v11839_v60 = vld [vmem:[#allocation10 + $0x694] sm:$0xf0]  ;;  %v9527_v61 = vld [vmem:[#allocation10 + $0x788] sm:$0xf] }
 0x28e   : > { %v11871_v62 = vld [vmem:[#allocation10 + $0x794] sm:$0xf0]  ;;  %v9127_v1 = vld [vmem:[#allocation10 + $0x468] sm:$0xf]  ;;  %v9400_v4 = vor.u32 %v11839_v60, %v9399_v55 }
 0x28f   : > { %3580 = vmatpush.bf16.msrb.mxu1 %v8584_v8  ;;  %3593 = vmatpush.bf16.msra.mxu2 %v8712_v10  ;;  %v9288_v8 = vor.u32 %v11811_v40, %v9287_v39  ;;  %v9143_v10 = vld [vmem:[#allocation10 + $0x488] sm:$0xf]  ;;  %v11771_v3 = vld [vmem:[#allocation10 + $0x474] sm:$0xf0] }
 0x290   : > { %3606 = vmatpush.bf16.msra.mxu3 %v8840_v53  ;;  %3619 = vmatpush.bf16.msra.mxu0 %v8968_v54  ;;  %v9271_v53 = vld [vmem:[#allocation10 + $0x588] sm:$0xf]  ;;  %v11807_v54 = vld [vmem:[#allocation10 + $0x594] sm:$0xf0]  ;;  %v9144_v57 = vor.u32 %v11775_v50, %v9143_v10 }
 0x291   : > { %v9272_v63 = vor.u32 %v11807_v54, %v9271_v53  ;;  %v11803_v15 = vld [vmem:[#allocation10 + $0x574] sm:$0xf0]  ;;  %v9383_v16 = vld [vmem:[#allocation10 + $0x668] sm:$0xf] }
 0x292   : > { %v11835_v20 = vld [vmem:[#allocation10 + $0x674] sm:$0xf0]  ;;  %v9111_v17 = vld [vmem:[#allocation10 + $0x448] sm:$0xf] }
 0x293   : > { %3581 = vmatpush.bf16.msrb.mxu1 %v8568_v13  ;;  %3594 = vmatpush.bf16.msra.mxu2 %v8696_v14  ;;  %v9528_v13 = vor.u32 %v11871_v62, %v9527_v61  ;;  %v9255_v14 = vld [vmem:[#allocation10 + $0x568] sm:$0xf]  ;;  %v11767_v18 = vld [vmem:[#allocation10 + $0x454] sm:$0xf0] }
 0x294   : > { %3607 = vmatpush.bf16.msra.mxu3 %v8824_v7  ;;  %3620 = vmatpush.bf16.msra.mxu0 %v8952_v21  ;;  %v9511_v7 = vld [vmem:[#allocation10 + $0x768] sm:$0xf]  ;;  %v11867_v21 = vld [vmem:[#allocation10 + $0x774] sm:$0xf0] }
 0x295   : > { %v9239_v49 = vld [vmem:[#allocation10 + $0x548] sm:$0xf]  ;;  %v11799_v26 = vld [vmem:[#allocation10 + $0x554] sm:$0xf0] }
 0x296   : > { %3582 = vmatmul.bf16.vlgmr.msrb.gmra.mxu1 %v13661_v47  ;;  %3595 = vmatmul.bf16.vlgmr.msra.gmra.mxu2 %v13663_v48  ;;  %v9367_v28 = vld [vmem:[#allocation10 + $0x648] sm:$0xf]  ;;  %v11831_v29 = vld [vmem:[#allocation10 + $0x654] sm:$0xf0] }
 0x297   : > { %3626 = vmatpush.bf16.msra.mxu1 %v9192_v22  ;;  %3639 = vmatpush.bf16.msrb.mxu2 %v9320_v12  ;;  %v9128_v22 = vor.u32 %v11771_v3, %v9127_v1  ;;  %v9256_v12 = vor.u32 %v11803_v15, %v9255_v14  ;;  %v9495_v33 = vld [vmem:[#allocation10 + $0x748] sm:$0xf]  ;;  %v11863_v34 = vld [vmem:[#allocation10 + $0x754] sm:$0xf0]  ;;  %v11689_v1 = vld [vmem:[#allocation10 + $0x1ec] sm:$0xf] }
 0x298   : > { %3652 = vmatpush.bf16.msrb.mxu3 %v9448_v37  ;;  %3665 = vmatpush.bf16.msrb.mxu0 %v9576_v19  ;;  %v9384_v37 = vor.u32 %v11835_v20, %v9383_v16  ;;  %v9512_v19 = vor.u32 %v11867_v21, %v9511_v7  ;;  %v9095_v56 = vld [vmem:[#allocation10 + $0x428] sm:$0xf]  ;;  %v11763_v6 = vld [vmem:[#allocation10 + $0x434] sm:$0xf0]  ;;  %v8809_v3 = vld [vmem:[#allocation10 + $0x1f8] sm:$0xf0] }
 0x299   : > { %3608 = vmatmul.bf16.vlgmr.msra.gmra.mxu3 %v13665_v51  ;;  %3621 = vmatmul.bf16.vlgmr.msra.gmra.mxu0 %v13667_v52  ;;  %v9223_v39 = vld [vmem:[#allocation10 + $0x528] sm:$0xf]  ;;  %v11795_v40 = vld [vmem:[#allocation10 + $0x534] sm:$0xf0]  ;;  %v8937_v15 = vld [vmem:[#allocation10 + $0x2f8] sm:$0xf0] }
 0x29a   : > { %v9351_v5 = vld [vmem:[#allocation10 + $0x628] sm:$0xf]  ;;  %v11827_v41 = vld [vmem:[#allocation10 + $0x634] sm:$0xf0]  ;;  %v9224_v10 = vor.u32 %v11795_v40, %v9223_v39  ;;  %v11753_v16 = vld [vmem:[#allocation10 + $0x3ec] sm:$0xf] }
 0x29b   : > { %3627 = vmatpush.bf16.msra.mxu1 %v9176_v38  ;;  %3640 = vmatpush.bf16.msrb.mxu2 %v9304_v44  ;;  %v9112_v38 = vor.u32 %v11767_v18, %v9111_v17  ;;  %v9240_v44 = vor.u32 %v11799_v26, %v9239_v49  ;;  %v9479_v42 = vld [vmem:[#allocation10 + $0x728] sm:$0xf]  ;;  %v11859_v43 = vld [vmem:[#allocation10 + $0x734] sm:$0xf0]  ;;  %v9352_v53 = vor.u32 %v11827_v41, %v9351_v5  ;;  %v9065_v20 = vld [vmem:[#allocation10 + $0x3f8] sm:$0xf0] }
 0x29c   : > { %3653 = vmatpush.bf16.msrb.mxu3 %v9432_v35  ;;  %3666 = vmatpush.bf16.msrb.mxu0 %v9560_v36  ;;  %v9368_v35 = vor.u32 %v11831_v29, %v9367_v28  ;;  %v9496_v36 = vor.u32 %v11863_v34, %v9495_v33  ;;  %v11759_v50 = vld [vmem:[#allocation10 + $0x414] sm:$0xf0]  ;;  %v9480_v54 = vor.u32 %v11859_v43, %v9479_v42  ;;  %v9335_v55 = vld [vmem:[#allocation10 + $0x608] sm:$0xf]  ;;  %v11653_v17 = vld [vmem:[#allocation10 + $0xcc] sm:$0xf] }
 0x29d   : > { %v11823_v60 = vld [vmem:[#allocation10 + $0x614] sm:$0xf0]  ;;  %v9463_v61 = vld [vmem:[#allocation10 + $0x708] sm:$0xf]  ;;  %v8665_v18 = vld [vmem:[#allocation10 + $0xd8] sm:$0xf0] }
 0x29e   : > { %v11855_v62 = vld [vmem:[#allocation10 + $0x714] sm:$0xf0]  ;;  %v9336_v7 = vor.u32 %v11823_v60, %v9335_v55  ;;  %v11685_v49 = vld [vmem:[#allocation10 + $0x1cc] sm:$0xf]  ;;  %v8793_v26 = vld [vmem:[#allocation10 + $0x1d8] sm:$0xf0] }
 0x29f   : > { %3628 = vmatpush.bf16.msra.mxu1 %v9160_v46  ;;  %3641 = vmatpush.bf16.msrb.mxu2 %v9288_v8  ;;  %v9079_v46 = vld [vmem:[#allocation10 + $0x408] sm:$0xf]  ;;  %v9096_v8 = vor.u32 %v11763_v6, %v9095_v56  ;;  %v9464_v21 = vor.u32 %v11855_v62, %v9463_v61  ;;  %v11717_v28 = vld [vmem:[#allocation10 + $0x2cc] sm:$0xf]  ;;  %v8921_v29 = vld [vmem:[#allocation10 + $0x2d8] sm:$0xf0] }
 0x2a0   : > { %3654 = vmatpush.bf16.msrb.mxu3 %v9416_v9  ;;  %3667 = vmatpush.bf16.msrb.mxu0 %v9544_v11  ;;  %v9207_v9 = vld [vmem:[#allocation10 + $0x508] sm:$0xf]  ;;  %v11791_v11 = vld [vmem:[#allocation10 + $0x514] sm:$0xf0]  ;;  %v11749_v33 = vld [vmem:[#allocation10 + $0x3cc] sm:$0xf] }
 0x2a1   : > { %v9208_v14 = vor.u32 %v11791_v11, %v9207_v9  ;;  %v9049_v34 = vld [vmem:[#allocation10 + $0x3d8] sm:$0xf0]  ;;  %v11649_v56 = vld [vmem:[#allocation10 + $0xac] sm:$0xf]  ;;  %v13706_v41 = vld [vmem:[#allocation11] sm:$0xf] }
 0x2a2   : > { %v8649_v6 = vld [vmem:[#allocation10 + $0xb8] sm:$0xf0]  ;;  %v9052_v39 = vor.u32 %v11749_v33, %v9049_v34  ;;  %v11713_v5 = vld [vmem:[#allocation10 + $0x2ac] sm:$0xf]  ;;  %v3358_v9 = vperm.slane %v13706_v41, 0 }
 0x2a3   : > { %3629 = vmatpush.bf16.msra.mxu1 %v9144_v57  ;;  %3642 = vmatpush.bf16.msrb.mxu2 %v9272_v63  ;;  %v11657_v57 = vld [vmem:[#allocation10 + $0xec] sm:$0xf]  ;;  %v8681_v63 = vld [vmem:[#allocation10 + $0xf8] sm:$0xf0] }
 0x2a4   : > { %3655 = vmatpush.bf16.msrb.mxu3 %v9400_v4  ;;  %3668 = vmatpush.bf16.msrb.mxu0 %v9528_v13  ;;  %v11721_v4 = vld [vmem:[#allocation10 + $0x2ec] sm:$0xf]  ;;  %v9080_v13 = vor.u32 %v11759_v50, %v9079_v46  ;;  %v8777_v40 = vld [vmem:[#allocation10 + $0x1b8] sm:$0xf0] }
 0x2a5   : > { %v8905_v42 = vld [vmem:[#allocation10 + $0x2b8] sm:$0xf0]  ;;  %v11745_v43 = vld [vmem:[#allocation10 + $0x3ac] sm:$0xf] }
 0x2a6   : > { %v9033_v46 = vld [vmem:[#allocation10 + $0x3b8] sm:$0xf0]  ;;  %v8908_v55 = vor.u32 %v11713_v5, %v8905_v42  ;;  %v11677_v61 = vld [vmem:[#allocation10 + $0x18c] sm:$0xf] }
 0x2a7   : > { %3630 = vmatpush.bf16.msra.mxu1 %v9128_v22  ;;  %3643 = vmatpush.bf16.msrb.mxu2 %v9256_v12  ;;  %v8684_v22 = vor.u32 %v11657_v57, %v8681_v63  ;;  %v8812_v12 = vor.u32 %v11689_v1, %v8809_v3  ;;  %v9036_v60 = vor.u32 %v11745_v43, %v9033_v46  ;;  %v8761_v62 = vld [vmem:[#allocation10 + $0x198] sm:$0xf0]  ;;  %v11709_v57 = vld [vmem:[#allocation10 + $0x28c] sm:$0xf] }
 0x2a8   : > { %3656 = vmatpush.bf16.msrb.mxu3 %v9384_v37  ;;  %3669 = vmatpush.bf16.msrb.mxu0 %v9512_v19  ;;  %v8940_v37 = vor.u32 %v11721_v4, %v8937_v15  ;;  %v9068_v19 = vor.u32 %v11753_v16, %v9065_v20  ;;  %v8889_v63 = vld [vmem:[#allocation10 + $0x298] sm:$0xf0]  ;;  %v11741_v1 = vld [vmem:[#allocation10 + $0x38c] sm:$0xf] }
 0x2a9   : > { %v9017_v3 = vld [vmem:[#allocation10 + $0x398] sm:$0xf0]  ;;  %v11641_v15 = vld [vmem:[#allocation10 + $0x6c] sm:$0xf]  ;;  %v8892_v20 = vor.u32 %v11709_v57, %v8889_v63 }
 0x2aa   : > { %v8617_v16 = vld [vmem:[#allocation10 + $0x78] sm:$0xf0]  ;;  %v11733_v43 = vld [vmem:[#allocation10 + $0x34c] sm:$0xf] }
 0x2ab   : > { %3631 = vmatpush.bf16.msra.mxu1 %v9112_v38  ;;  %3644 = vmatpush.bf16.msrb.mxu2 %v9240_v44  ;;  %v8668_v38 = vor.u32 %v11653_v17, %v8665_v18  ;;  %v8796_v44 = vor.u32 %v11685_v49, %v8793_v26  ;;  %v11705_v17 = vld [vmem:[#allocation10 + $0x26c] sm:$0xf]  ;;  %v9001_v26 = vld [vmem:[#allocation10 + $0x378] sm:$0xf0]  ;;  %v8620_v33 = vor.u32 %v11641_v15, %v8617_v16 }
 0x2ac   : > { %3657 = vmatpush.bf16.msrb.mxu3 %v9368_v35  ;;  %3670 = vmatpush.bf16.msrb.mxu0 %v9496_v36  ;;  %v11681_v35 = vld [vmem:[#allocation10 + $0x1ac] sm:$0xf]  ;;  %v8924_v36 = vor.u32 %v11717_v28, %v8921_v29  ;;  %v8857_v42 = vld [vmem:[#allocation10 + $0x258] sm:$0xf0] }
 0x2ad   : > { %v8780_v50 = vor.u32 %v11681_v35, %v8777_v40  ;;  %v11737_v49 = vld [vmem:[#allocation10 + $0x36c] sm:$0xf]  ;;  %v8985_v46 = vld [vmem:[#allocation10 + $0x358] sm:$0xf0] }
 0x2ae   : > { %v9004_v35 = vor.u32 %v11737_v49, %v9001_v26  ;;  %v11701_v40 = vld [vmem:[#allocation10 + $0x24c] sm:$0xf]  ;;  %v8841_v63 = vld [vmem:[#allocation10 + $0x238] sm:$0xf0] }
 0x2af   : > { %3632 = vmatpush.bf16.msra.mxu1 %v9096_v8  ;;  %3645 = vmatpush.bf16.msrb.mxu2 %v9224_v10  ;;  %v8652_v10 = vor.u32 %v11649_v56, %v8649_v6  ;;  %v8601_v56 = vld [vmem:[#allocation10 + $0x58] sm:$0xf0]  ;;  %v11817_v26 = vld [vmem:[#allocation10 + $0x5ec] sm:$0xf] }
 0x2b0   : > { %3658 = vmatpush.bf16.msrb.mxu3 %v9352_v53  ;;  %3671 = vmatpush.bf16.msrb.mxu0 %v9480_v54  ;;  %v11645_v53 = vld [vmem:[#allocation10 + $0x8c] sm:$0xf]  ;;  %v8633_v54 = vld [vmem:[#allocation10 + $0x98] sm:$0xf0] }
 0x2b1   : > { %v8569_v16 = vld [vmem:[#allocation10 + $0x18] sm:$0xf0] }
 0x2b2   : > { %v3375_v8 = vpop.f32.mrf.mxu1  ;;  %v9193_v49 = vld [vmem:[#allocation10 + $0x4f8] sm:$0xf0] }
 0x2b3   : > { %3633 = vmatpush.bf16.msra.mxu1 %v9080_v13  ;;  %3646 = vmatpush.bf16.msrb.mxu2 %v9208_v14  ;;  %v3414_v11 = vpop.f32.mrf.mxu0  ;;  %v3376_v4 = vadd.f32 %v3375_v8, %v3358_v9  ;;  %v8636_v13 = vor.u32 %v11645_v53, %v8633_v54  ;;  %v8764_v14 = vor.u32 %v11677_v61, %v8761_v62  ;;  %v8585_v9 = vld [vmem:[#allocation10 + $0x38] sm:$0xf0]  ;;  %v11697_v62 = vld [vmem:[#allocation10 + $0x22c] sm:$0xf] }
 0x2b4   : > { %3659 = vmatpush.bf16.msrb.mxu3 %v9336_v7  ;;  %3672 = vmatpush.bf16.msrb.mxu0 %v9464_v21  ;;  %v9020_v7 = vor.u32 %v11741_v1, %v9017_v3  ;;  %v8860_v53 = vor.u32 %v11701_v40, %v8857_v42  ;;  %v8988_v54 = vor.u32 %v11733_v43, %v8985_v46  ;;  %v8713_v61 = vld [vmem:[#allocation10 + $0x138] sm:$0xf0] }
 0x2b5   : > { %v8969_v1 = vld [vmem:[#allocation10 + $0x338] sm:$0xf0] }
 0x2b6   : > { %3634 = vmatmul.bf16.vlgmr.msra.gmra.mxu1 %v13682_v23  ;;  %3647 = vmatmul.bf16.vlgmr.msrb.gmra.mxu2 %v13684_v24 }
 0x2b7   : > { %3678 = vmatpush.bf16.msrb.mxu1 %v8684_v22  ;;  %3691 = vmatpush.bf16.msra.mxu2 %v8812_v12  ;;  %v11673_v22 = vld [vmem:[#allocation10 + $0x16c] sm:$0xf]  ;;  %v8745_v12 = vld [vmem:[#allocation10 + $0x178] sm:$0xf0] }
 0x2b8   : > { %3704 = vmatpush.bf16.msra.mxu3 %v8940_v37  ;;  %3717 = vmatpush.bf16.msra.mxu0 %v9068_v19  ;;  %v3388_v21 = vpop.f32.mrf.mxu2  ;;  %v8873_v19 = vld [vmem:[#allocation10 + $0x278] sm:$0xf0]  ;;  %v8748_v34 = vor.u32 %v11673_v22, %v8745_v12  ;;  %v11693_v12 = vld [vmem:[#allocation10 + $0x20c] sm:$0xf] }
 0x2b9   : > { %3660 = vmatmul.bf16.vlgmr.msrb.gmra.mxu3 %v13686_v25  ;;  %3673 = vmatmul.bf16.vlgmr.msrb.gmra.mxu0 %v13688_v30  ;;  %v3389_v18 = vadd.f32 %v3388_v21, %v3376_v4  ;;  %v3401_v37 = vpop.f32.mrf.mxu3  ;;  %v8876_v6 = vor.u32 %v11705_v17, %v8873_v19  ;;  %v11629_v4 = vld [vmem:[#allocation10 + $0xc] sm:$0xf]  ;;  %v8844_v21 = vor.u32 %v11697_v62, %v8841_v63  ;;  %v8825_v17 = vld [vmem:[#allocation10 + $0x218] sm:$0xf0] }
 0x2ba   : > { %v3377_v28 = vpop.f32.mrf.mxu1  ;;  %v11785_v19 = vld [vmem:[#allocation10 + $0x4ec] sm:$0xf]  ;;  %v9433_v62 = vld [vmem:[#allocation10 + $0x6d8] sm:$0xf0] }
 0x2bb   : > { %3679 = vmatpush.bf16.msrb.mxu1 %v8668_v38  ;;  %3692 = vmatpush.bf16.msra.mxu2 %v8796_v44  ;;  %v3402_v29 = vadd.f32 %v3401_v37, %v3389_v18  ;;  %v3416_v38 = vpop.f32.mrf.mxu0  ;;  %v11637_v44 = vld [vmem:[#allocation10 + $0x4c] sm:$0xf]  ;;  %v8953_v37 = vld [vmem:[#allocation10 + $0x318] sm:$0xf0]  ;;  %v9196_v40 = vor.u32 %v11785_v19, %v9193_v49 }
 0x2bc   : > { %3705 = vmatpush.bf16.msra.mxu3 %v8924_v36  ;;  %3718 = vmatpush.bf16.msra.mxu0 %v9052_v39  ;;  %v11669_v36 = vld [vmem:[#allocation10 + $0x14c] sm:$0xf]  ;;  %v8729_v39 = vld [vmem:[#allocation10 + $0x158] sm:$0xf0]  ;;  %v8604_v8 = vor.u32 %v11637_v44, %v8601_v56 }
 0x2bd   : > { %v3415_v5 = vadd.f32 %v3414_v11, %v3402_v29  ;;  %v11729_v11 = vld [vmem:[#allocation10 + $0x32c] sm:$0xf]  ;;  %v9321_v28 = vld [vmem:[#allocation10 + $0x5f8] sm:$0xf0] }
 0x2be   : > { %v8972_v22 = vor.u32 %v11729_v11, %v8969_v1  ;;  %v11725_v18 = vld [vmem:[#allocation10 + $0x30c] sm:$0xf]  ;;  %v9449_v44 = vld [vmem:[#allocation10 + $0x6f8] sm:$0xf0]  ;;  %v9324_v42 = vor.u32 %v11817_v26, %v9321_v28 }
 0x2bf   : > { %3680 = vmatpush.bf16.msrb.mxu1 %v8652_v10  ;;  %3693 = vmatpush.bf16.msra.mxu2 %v8780_v50  ;;  %v8732_v10 = vor.u32 %v11669_v36, %v8729_v39  ;;  %v11633_v50 = vld [vmem:[#allocation10 + $0x2c] sm:$0xf]  ;;  %v8956_v36 = vor.u32 %v11725_v18, %v8953_v37  ;;  %v9561_v63 = vld [vmem:[#allocation10 + $0x7d8] sm:$0xf0] }
 0x2c0   : > { %3706 = vmatpush.bf16.msra.mxu3 %v8908_v55  ;;  %3719 = vmatpush.bf16.msra.mxu0 %v9036_v60  ;;  %v3390_v55 = vpop.f32.mrf.mxu2  ;;  %v11665_v60 = vld [vmem:[#allocation10 + $0x12c] sm:$0xf]  ;;  %v9145_v26 = vld [vmem:[#allocation10 + $0x498] sm:$0xf0] }
 0x2c1   : > { %v3403_v57 = vpop.f32.mrf.mxu3  ;;  %v11849_v29 = vld [vmem:[#allocation10 + $0x6ec] sm:$0xf] }
 0x2c2   : > { %v3427_v3 = vpop.f32.mrf.mxu1  ;;  %v11881_v56 = vld [vmem:[#allocation10 + $0x7ec] sm:$0xf] }
 0x2c3   : > { %3681 = vmatpush.bf16.msrb.mxu1 %v8636_v13  ;;  %3694 = vmatpush.bf16.msra.mxu2 %v8764_v14  ;;  %v8588_v13 = vor.u32 %v11633_v50, %v8585_v9  ;;  %v8716_v14 = vor.u32 %v11665_v60, %v8713_v61  ;;  %v3466_v15 = vpop.f32.mrf.mxu0  ;;  %v9452_v50 = vor.u32 %v11849_v29, %v9449_v44  ;;  %v11845_v55 = vld [vmem:[#allocation10 + $0x6cc] sm:$0xf]  ;;  %v9273_v29 = vld [vmem:[#allocation10 + $0x598] sm:$0xf0] }
 0x2c4   : > { %3707 = vmatpush.bf16.msra.mxu3 %v8892_v20  ;;  %3720 = vmatpush.bf16.msra.mxu0 %v9020_v7  ;;  %v11661_v20 = vld [vmem:[#allocation10 + $0x10c] sm:$0xf]  ;;  %v8697_v7 = vld [vmem:[#allocation10 + $0x118] sm:$0xf0] }
 0x2c5   : > { %v8700_v38 = vor.u32 %v11661_v20, %v8697_v7  ;;  %v11877_v57 = vld [vmem:[#allocation10 + $0x7cc] sm:$0xf]  ;;  %v9289_v7 = vld [vmem:[#allocation10 + $0x5b8] sm:$0xf0] }
 0x2c6   : > { %v11809_v20 = vld [vmem:[#allocation10 + $0x5ac] sm:$0xf] }
 0x2c7   : > { %3682 = vmatpush.bf16.msrb.mxu1 %v8620_v33  ;;  %3695 = vmatpush.bf16.msra.mxu2 %v8748_v34  ;;  %v3428_v33 = vadd.f32 %v3427_v3, %v3415_v5  ;;  %v8572_v34 = vor.u32 %v11629_v4, %v8569_v16  ;;  %v11813_v5 = vld [vmem:[#allocation10 + $0x5cc] sm:$0xf]  ;;  %v9564_v16 = vor.u32 %v11877_v57, %v9561_v63  ;;  %v9241_v57 = vld [vmem:[#allocation10 + $0x558] sm:$0xf0] }
 0x2c8   : > { %3708 = vmatpush.bf16.msra.mxu3 %v8876_v6  ;;  %3721 = vmatpush.bf16.msra.mxu0 %v9004_v35  ;;  %v9577_v6 = vld [vmem:[#allocation10 + $0x7f8] sm:$0xf0]  ;;  %v8828_v35 = vor.u32 %v11693_v12, %v8825_v17  ;;  %v3440_v39 = vpop.f32.mrf.mxu2  ;;  %v11777_v4 = vld [vmem:[#allocation10 + $0x4ac] sm:$0xf]  ;;  %v9292_v37 = vor.u32 %v11809_v20, %v9289_v7 }
 0x2c9   : > { %v3441_v43 = vadd.f32 %v3440_v39, %v3428_v33  ;;  %v3453_v46 = vpop.f32.mrf.mxu3  ;;  %v9580_v9 = vor.u32 %v11881_v56, %v9577_v6  ;;  %v11873_v12 = vld [vmem:[#allocation10 + $0x7ac] sm:$0xf]  ;;  %v9545_v17 = vld [vmem:[#allocation10 + $0x7b8] sm:$0xf0] }
 0x2ca   : > { %v11773_v49 = vld [vmem:[#allocation10 + $0x48c] sm:$0xf]  ;;  %v9548_v28 = vor.u32 %v11873_v12, %v9545_v17 }
 0x2cb   : > { %3683 = vmatpush.bf16.msrb.mxu1 %v8604_v8  ;;  %3696 = vmatpush.bf16.msra.mxu2 %v8732_v10  ;;  %v11781_v8 = vld [vmem:[#allocation10 + $0x4cc] sm:$0xf]  ;;  %v9177_v10 = vld [vmem:[#allocation10 + $0x4d8] sm:$0xf0]  ;;  %v3454_v60 = vadd.f32 %v3453_v46, %v3441_v43  ;;  %v3468_v61 = vpop.f32.mrf.mxu0  ;;  %v9148_v56 = vor.u32 %v11773_v49, %v9145_v26 }
 0x2cc   : > { %3709 = vmatpush.bf16.msra.mxu3 %v8860_v53  ;;  %3722 = vmatpush.bf16.msra.mxu0 %v8988_v54  ;;  %v3429_v53 = vpop.f32.mrf.mxu1  ;;  %v9305_v54 = vld [vmem:[#allocation10 + $0x5d8] sm:$0xf0]  ;;  %v9180_v1 = vor.u32 %v11781_v8, %v9177_v10  ;;  %v11837_v33 = vld [vmem:[#allocation10 + $0x68c] sm:$0xf] }
 0x2cd   : > { %v13713_v11 = vadd.f32 %v3466_v15, %v3454_v60  ;;  %v9308_v3 = vor.u32 %v11813_v5, %v9305_v54  ;;  %v9257_v43 = vld [vmem:[#allocation10 + $0x578] sm:$0xf0]  ;;  %v11833_v46 = vld [vmem:[#allocation10 + $0x66c] sm:$0xf] }
 0x2ce   : > { %v9385_v8 = vld [vmem:[#allocation10 + $0x678] sm:$0xf0]  ;;  %v11865_v10 = vld [vmem:[#allocation10 + $0x76c] sm:$0xf] }
 0x2cf   : > { %3684 = vmatpush.bf16.msrb.mxu1 %v8588_v13  ;;  %3697 = vmatpush.bf16.msra.mxu2 %v8716_v14  ;;  %v9161_v13 = vld [vmem:[#allocation10 + $0x4b8] sm:$0xf0]  ;;  %v9436_v14 = vor.u32 %v11845_v55, %v9433_v62  ;;  %v11765_v5 = vld [vmem:[#allocation10 + $0x44c] sm:$0xf]  ;;  %v9388_v55 = vor.u32 %v11833_v46, %v9385_v8  ;;  %v9703_v46 = vld [vmem:[#allocation13 + $0xf0] sm:$0xf] }
 0x2d0   : > { %3710 = vmatpush.bf16.msra.mxu3 %v8844_v21  ;;  %3723 = vmatpush.bf16.msra.mxu0 %v8972_v22  ;;  %v11841_v21 = vld [vmem:[#allocation10 + $0x6ac] sm:$0xf]  ;;  %v9417_v22 = vld [vmem:[#allocation10 + $0x6b8] sm:$0xf0]  ;;  %v3442_v15 = vpop.f32.mrf.mxu2  ;;  %v9164_v18 = vor.u32 %v11777_v4, %v9161_v13 }
 0x2d1   : > { %v3455_v19 = vpop.f32.mrf.mxu3  ;;  %v9113_v54 = vld [vmem:[#allocation10 + $0x458] sm:$0xf0]  ;;  %v11797_v62 = vld [vmem:[#allocation10 + $0x54c] sm:$0xf] }
 0x2d2   : > { %v11829_v63 = vld [vmem:[#allocation10 + $0x64c] sm:$0xf]  ;;  %v9497_v13 = vld [vmem:[#allocation10 + $0x758] sm:$0xf0]  ;;  %v9116_v20 = vor.u32 %v11765_v5, %v9113_v54  ;;  %v9244_v7 = vor.u32 %v11797_v62, %v9241_v57  ;;  %v3359_v5 = vperm.slane %v13706_v41, 1 }
 0x2d3   : > { %3685 = vmatpush.bf16.msrb.mxu1 %v8572_v34  ;;  %3698 = vmatpush.bf16.msra.mxu2 %v8700_v38  ;;  %v9401_v34 = vld [vmem:[#allocation10 + $0x698] sm:$0xf0]  ;;  %v11869_v38 = vld [vmem:[#allocation10 + $0x78c] sm:$0xf]  ;;  %v9695_v57 = vld [vmem:[#allocation13 + $0xe0] sm:$0xf] }
 0x2d4   : > { %3711 = vmatpush.bf16.msra.mxu3 %v8828_v35  ;;  %3724 = vmatpush.bf16.msra.mxu0 %v8956_v36  ;;  %v13719_v44 = vpop.f32.mrf.mxu1  ;;  %v11769_v35 = vld [vmem:[#allocation10 + $0x46c] sm:$0xf]  ;;  %v9129_v36 = vld [vmem:[#allocation10 + $0x478] sm:$0xf0]  ;;  %v9404_v39 = vor.u32 %v11837_v33, %v9401_v34 }
 0x2d5   : > { %v11861_v4 = vld [vmem:[#allocation10 + $0x74c] sm:$0xf]  ;;  %v9353_v19 = vld [vmem:[#allocation10 + $0x638] sm:$0xf0] }
 0x2d6   : > { %3686 = vmatmul.bf16.vlgmr.msrb.gmra.mxu1 %v13661_v47  ;;  %3699 = vmatmul.bf16.vlgmr.msra.gmra.mxu2 %v13663_v48  ;;  %v9420_v47 = vor.u32 %v11841_v21, %v9417_v22  ;;  %v11805_v48 = vld [vmem:[#allocation10 + $0x58c] sm:$0xf]  ;;  %v9097_v22 = vld [vmem:[#allocation10 + $0x438] sm:$0xf0]  ;;  %v9500_v17 = vor.u32 %v11861_v4, %v9497_v13 }
 0x2d7   : > { %3730 = vmatpush.bf16.msra.mxu1 %v9196_v40  ;;  %3743 = vmatpush.bf16.msrb.mxu2 %v9324_v42  ;;  %v9276_v6 = vor.u32 %v11805_v48, %v9273_v29  ;;  %v11801_v42 = vld [vmem:[#allocation10 + $0x56c] sm:$0xf]  ;;  %v9481_v26 = vld [vmem:[#allocation10 + $0x738] sm:$0xf0] }
 0x2d8   : > { %3756 = vmatpush.bf16.msrb.mxu3 %v9452_v50  ;;  %3769 = vmatpush.bf16.msrb.mxu0 %v9580_v9  ;;  %v9513_v50 = vld [vmem:[#allocation10 + $0x778] sm:$0xf0]  ;;  %v9132_v9 = vor.u32 %v11769_v35, %v9129_v36  ;;  %v9260_v53 = vor.u32 %v11801_v42, %v9257_v43  ;;  %v11761_v21 = vld [vmem:[#allocation10 + $0x42c] sm:$0xf]  ;;  %v9639_v42 = vld [vmem:[#allocation13 + $0x70] sm:$0xf] }
 0x2d9   : > { %3712 = vmatmul.bf16.vlgmr.msra.gmra.mxu3 %v13665_v51  ;;  %3725 = vmatmul.bf16.vlgmr.msra.gmra.mxu0 %v13667_v52  ;;  %v9529_v51 = vld [vmem:[#allocation10 + $0x798] sm:$0xf0]  ;;  %v13721_v52 = vpop.f32.mrf.mxu0  ;;  %v9516_v60 = vor.u32 %v11865_v10, %v9513_v50  ;;  %v13723_v61 = vpop.f32.mrf.mxu2  ;;  %v11793_v15 = vld [vmem:[#allocation10 + $0x52c] sm:$0xf] }
 0x2da   : > { %v9532_v40 = vor.u32 %v11869_v38, %v9529_v51  ;;  %v11857_v49 = vld [vmem:[#allocation10 + $0x72c] sm:$0xf]  ;;  %v9081_v29 = vld [vmem:[#allocation10 + $0x418] sm:$0xf0] }
 0x2db   : > { %3731 = vmatpush.bf16.msra.mxu1 %v9180_v1  ;;  %3744 = vmatpush.bf16.msrb.mxu2 %v9308_v3  ;;  %v9369_v3 = vld [vmem:[#allocation10 + $0x658] sm:$0xf0]  ;;  %v11757_v48 = vld [vmem:[#allocation10 + $0x40c] sm:$0xf]  ;;  %v9484_v38 = vor.u32 %v11857_v49, %v9481_v26  ;;  %v9607_v26 = vld [vmem:[#allocation13 + $0x30] sm:$0xf] }
 0x2dc   : > { %3757 = vmatpush.bf16.msrb.mxu3 %v9436_v14  ;;  %3770 = vmatpush.bf16.msrb.mxu0 %v9564_v16  ;;  %v13725_v1 = vpop.f32.mrf.mxu3  ;;  %v3481_v14 = vpop.f32.mrf.mxu1  ;;  %v9372_v12 = vor.u32 %v11829_v63, %v9369_v3  ;;  %v11789_v33 = vld [vmem:[#allocation10 + $0x50c] sm:$0xf]  ;;  %v9337_v35 = vld [vmem:[#allocation10 + $0x618] sm:$0xf0]  ;;  %v9084_v10 = vor.u32 %v11757_v48, %v9081_v29  ;;  %v3480_v3 = vadd.f32 %v13719_v44, %v3359_v5 }
 0x2dd   : > { %v11899_v43 = vld [vmem:[#allocation13 + $0x74] sm:$0xf0]  ;;  %v11897_v62 = vld [vmem:[#allocation13 + $0x64] sm:$0xf0]  ;;  %v9623_v14 = vld [vmem:[#allocation13 + $0x50] sm:$0xf] }
 0x2de   : > { %v11915_v8 = vld [vmem:[#allocation13 + $0xf4] sm:$0xf0]  ;;  %v9640_v54 = vor.u32 %v11899_v43, %v9639_v42  ;;  %v11913_v63 = vld [vmem:[#allocation13 + $0xe4] sm:$0xf0] }
 0x2df   : > { %3732 = vmatpush.bf16.msra.mxu1 %v9164_v18  ;;  %3745 = vmatpush.bf16.msrb.mxu2 %v9292_v37  ;;  %v9225_v18 = vld [vmem:[#allocation10 + $0x538] sm:$0xf0]  ;;  %v11825_v37 = vld [vmem:[#allocation10 + $0x62c] sm:$0xf]  ;;  %v9696_v13 = vor.u32 %v11913_v63, %v9695_v57  ;;  %v9743_v57 = vld [vmem:[#allocation13 + $0x140] sm:$0xf] }
 0x2e0   : > { %3758 = vmatpush.bf16.msrb.mxu3 %v9420_v47  ;;  %3771 = vmatpush.bf16.msrb.mxu0 %v9548_v28  ;;  %v9100_v47 = vor.u32 %v11761_v21, %v9097_v22  ;;  %v9228_v28 = vor.u32 %v11793_v15, %v9225_v18  ;;  %v9356_v34 = vor.u32 %v11825_v37, %v9353_v19  ;;  %v9679_v15 = vld [vmem:[#allocation13 + $0xc0] sm:$0xf]  ;;  %v11909_v18 = vld [vmem:[#allocation13 + $0xc4] sm:$0xf0]  ;;  %v9767_v37 = vld [vmem:[#allocation13 + $0x170] sm:$0xf] }
 0x2e1   : > { %v3520_v16 = vpop.f32.mrf.mxu0  ;;  %v3494_v51 = vpop.f32.mrf.mxu2  ;;  %v3493_v21 = vadd.f32 %v13723_v61, %v3480_v3  ;;  %v11931_v19 = vld [vmem:[#allocation13 + $0x174] sm:$0xf0]  ;;  %v11925_v63 = vld [vmem:[#allocation13 + $0x144] sm:$0xf0] }
 0x2e2   : > { %v11895_v16 = vld [vmem:[#allocation13 + $0x54] sm:$0xf0] }
 0x2e3   : > { %3733 = vmatpush.bf16.msra.mxu1 %v9148_v56  ;;  %3746 = vmatpush.bf16.msrb.mxu2 %v9276_v6  ;;  %v9209_v56 = vld [vmem:[#allocation10 + $0x518] sm:$0xf0]  ;;  %v11821_v6 = vld [vmem:[#allocation10 + $0x60c] sm:$0xf]  ;;  %v9624_v44 = vor.u32 %v11895_v16, %v9623_v14  ;;  %v9744_v16 = vor.u32 %v11925_v63, %v9743_v57 }
 0x2e4   : > { %3759 = vmatpush.bf16.msrb.mxu3 %v9404_v39  ;;  %3772 = vmatpush.bf16.msrb.mxu0 %v9532_v40  ;;  %v3507_v36 = vpop.f32.mrf.mxu3  ;;  %v11853_v39 = vld [vmem:[#allocation10 + $0x70c] sm:$0xf]  ;;  %v9465_v40 = vld [vmem:[#allocation10 + $0x718] sm:$0xf0]  ;;  %v9212_v50 = vor.u32 %v11789_v33, %v9209_v56  ;;  %v9599_v56 = vld [vmem:[#allocation13 + $0x20] sm:$0xf] }
 0x2e5   : > { %v11907_v48 = vld [vmem:[#allocation13 + $0xb4] sm:$0xf0]  ;;  %v11889_v36 = vld [vmem:[#allocation13 + $0x24] sm:$0xf0] }
 0x2e6   : > { %v11885_v14 = vld [vmem:[#allocation13 + $0x4] sm:$0xf0] }
 0x2e7   : > { %3734 = vmatpush.bf16.msra.mxu1 %v9132_v9  ;;  %3747 = vmatpush.bf16.msrb.mxu2 %v9260_v53  ;;  %v9340_v9 = vor.u32 %v11821_v6, %v9337_v35  ;;  %v9468_v53 = vor.u32 %v11853_v39, %v9465_v40  ;;  %v9663_v39 = vld [vmem:[#allocation13 + $0xa0] sm:$0xf]  ;;  %v11905_v40 = vld [vmem:[#allocation13 + $0xa4] sm:$0xf0] }
 0x2e8   : > { %3760 = vmatpush.bf16.msrb.mxu3 %v9388_v55  ;;  %3773 = vmatpush.bf16.msrb.mxu0 %v9516_v60  ;;  %v9704_v55 = vor.u32 %v11915_v8, %v9703_v46  ;;  %v9631_v60 = vld [vmem:[#allocation13 + $0x60] sm:$0xf]  ;;  %v9751_v8 = vld [vmem:[#allocation13 + $0x150] sm:$0xf] }
 0x2e9   : > { %v9632_v4 = vor.u32 %v11897_v62, %v9631_v60  ;;  %v9655_v60 = vld [vmem:[#allocation13 + $0x90] sm:$0xf]  ;;  %v11903_v62 = vld [vmem:[#allocation13 + $0x94] sm:$0xf0] }
 0x2eb   : > { %3735 = vmatpush.bf16.msra.mxu1 %v9116_v20  ;;  %3748 = vmatpush.bf16.msrb.mxu2 %v9244_v7  ;;  %v9687_v20 = vld [vmem:[#allocation13 + $0xd0] sm:$0xf]  ;;  %v11911_v7 = vld [vmem:[#allocation13 + $0xd4] sm:$0xf0] }
 0x2ec   : > { %3761 = vmatpush.bf16.msrb.mxu3 %v9372_v12  ;;  %3774 = vmatpush.bf16.msrb.mxu0 %v9500_v17  ;;  %v9688_v22 = vor.u32 %v11911_v7, %v9687_v20  ;;  %v9615_v12 = vld [vmem:[#allocation13 + $0x40] sm:$0xf]  ;;  %v11893_v17 = vld [vmem:[#allocation13 + $0x44] sm:$0xf0] }
 0x2ed   : > { %v9616_v49 = vor.u32 %v11893_v17, %v9615_v12  ;;  %v9641_v17 = vld [vmem:[#allocation13 + $0x78] sm:$0xf0] }
 0x2ef   : > { %3736 = vmatpush.bf16.msra.mxu1 %v9100_v47  ;;  %3749 = vmatpush.bf16.msrb.mxu2 %v9228_v28  ;;  %v9768_v47 = vor.u32 %v11931_v19, %v9767_v37  ;;  %v9671_v28 = vld [vmem:[#allocation13 + $0xb0] sm:$0xf]  ;;  %v3782_v37 = vmax.f32 %v13713_v11, 0.0 }
 0x2f0   : > { %3762 = vmatpush.bf16.msrb.mxu3 %v9356_v34  ;;  %3775 = vmatpush.bf16.msrb.mxu0 %v9484_v38  ;;  %v9759_v34 = vld [vmem:[#allocation13 + $0x160] sm:$0xf]  ;;  %v11929_v38 = vld [vmem:[#allocation13 + $0x164] sm:$0xf0]  ;;  %v9672_v51 = vor.u32 %v11907_v48, %v9671_v28  ;;  %v9633_v28 = vld [vmem:[#allocation13 + $0x68] sm:$0xf0] }
 0x2f1   : > { %v9760_v6 = vor.u32 %v11929_v38, %v9759_v34  ;;  %v11912_v48 = vld [vmem:[#allocation13 + $0xe4] sm:$0xf]  ;;  %v11921_v34 = vld [vmem:[#allocation13 + $0x124] sm:$0xf0]  ;;  %v13737_v38 = vpack.c.bf16 %v3782_v37, %v3782_v37 }
 0x2f3   : > { %3737 = vmatpush.bf16.msra.mxu1 %v9084_v10  ;;  %3750 = vmatpush.bf16.msrb.mxu2 %v9212_v50  ;;  %v9600_v50 = vor.u32 %v11889_v36, %v9599_v56  ;;  %v11894_v36 = vld [vmem:[#allocation13 + $0x54] sm:$0xf] }
 0x2f4   : > { %3763 = vmatpush.bf16.msrb.mxu3 %v9340_v9  ;;  %3776 = vmatpush.bf16.msrb.mxu0 %v9468_v53  ;;  %v9664_v9 = vor.u32 %v11905_v40, %v9663_v39  ;;  %v9591_v53 = vld [vmem:[#allocation13 + $0x10] sm:$0xf]  ;;  %v9625_v39 = vld [vmem:[#allocation13 + $0x58] sm:$0xf0]  ;;  %v11910_v40 = vld [vmem:[#allocation13 + $0xd4] sm:$0xf] }
 0x2f6   : > { %3738 = vmatmul.bf16.vlgmr.msra.gmra.mxu1 %v13682_v23  ;;  %3751 = vmatmul.bf16.vlgmr.msrb.gmra.mxu2 %v13684_v24  ;;  %v3506_v23 = vadd.f32 %v13725_v1, %v3493_v21  ;;  %v3531_v24 = vpop.f32.mrf.mxu1  ;;  %v3570_v61 = vpop.f32.mrf.mxu0  ;;  %v9647_v21 = vld [vmem:[#allocation13 + $0x80] sm:$0xf] }
 0x2f7   : > { %4180 = vmatpush.bf16.msrb.mxu1 %v9640_v54  ;;  %4193 = vmatpush.bf16.msra.mxu2 %v9704_v55  ;;  %v11887_v55 = vld [vmem:[#allocation13 + $0x14] sm:$0xf0] }
 0x2f8   : > { %3764 = vmatmul.bf16.vlgmr.msrb.gmra.mxu3 %v13686_v25  ;;  %3777 = vmatmul.bf16.vlgmr.msrb.gmra.mxu0 %v13688_v30  ;;  %v9680_v25 = vor.u32 %v11909_v18, %v9679_v15  ;;  %v11891_v30 = vld [vmem:[#allocation13 + $0x34] sm:$0xf0]  ;;  %v3519_v29 = vadd.f32 %v13721_v52, %v3506_v23  ;;  %v9592_v3 = vor.u32 %v11887_v55, %v9591_v53  ;;  %v11914_v15 = vld [vmem:[#allocation13 + $0xf4] sm:$0xf]  ;;  %v9705_v18 = vld [vmem:[#allocation13 + $0xf8] sm:$0xf0] }
 0x2f9   : > { %4206 = vmatpush.bf16.msra.mxu3 %v9768_v47  ;;  %v9608_v33 = vor.u32 %v11891_v30, %v9607_v26  ;;  %v3544_v35 = vpop.f32.mrf.mxu2  ;;  %v11927_v52 = vld [vmem:[#allocation13 + $0x154] sm:$0xf0]  ;;  %v9735_v23 = vld [vmem:[#allocation13 + $0x130] sm:$0xf]  ;;  %v9708_v30 = vor.u32 %v11914_v15, %v9705_v18  ;;  %v11896_v47 = vld [vmem:[#allocation13 + $0x64] sm:$0xf] }
 0x2fa   : > { %v3532_v1 = vadd.f32 %v3531_v24, %v3519_v29  ;;  %v9752_v5 = vor.u32 %v11927_v52, %v9751_v8  ;;  %v11923_v24 = vld [vmem:[#allocation13 + $0x134] sm:$0xf0]  ;;  %v9697_v29 = vld [vmem:[#allocation13 + $0xe8] sm:$0xf0]  ;;  %v11892_v52 = vld [vmem:[#allocation13 + $0x44] sm:$0xf] }
 0x2fb   : > { %4181 = vmatpush.bf16.msrb.mxu1 %v9632_v4  ;;  %4194 = vmatpush.bf16.msra.mxu2 %v9696_v13  ;;  %v9656_v4 = vor.u32 %v11903_v62, %v9655_v60  ;;  %v9583_v13 = vld [vmem:[#allocation13] sm:$0xf]  ;;  %v11930_v55 = vld [vmem:[#allocation13 + $0x174] sm:$0xf]  ;;  %v9769_v60 = vld [vmem:[#allocation13 + $0x178] sm:$0xf0] }
 0x2fc   : > { %v3545_v42 = vadd.f32 %v3544_v35, %v3532_v1  ;;  %v3557_v43 = vpop.f32.mrf.mxu3  ;;  %v9584_v19 = vor.u32 %v11885_v14, %v9583_v13  ;;  %v9719_v1 = vld [vmem:[#allocation13 + $0x110] sm:$0xf]  ;;  %v9700_v35 = vor.u32 %v11912_v48, %v9697_v29  ;;  %v9711_v53 = vld [vmem:[#allocation13 + $0x100] sm:$0xf]  ;;  %v9609_v14 = vld [vmem:[#allocation13 + $0x38] sm:$0xf0] }
 0x2fd   : > { %4207 = vmatpush.bf16.msra.mxu3 %v9760_v6  ;;  %v9636_v6 = vor.u32 %v11896_v47, %v9633_v28  ;;  %v9601_v15 = vld [vmem:[#allocation13 + $0x28] sm:$0xf0]  ;;  %v11904_v18 = vld [vmem:[#allocation13 + $0xa4] sm:$0xf]  ;;  %v9593_v48 = vld [vmem:[#allocation13 + $0x18] sm:$0xf0] }
 0x2fe   : > { %v3533_v46 = vpop.f32.mrf.mxu1  ;;  %v3572_v10 = vpop.f32.mrf.mxu0  ;;  %v3558_v54 = vadd.f32 %v3557_v43, %v3545_v42  ;;  %v9689_v42 = vld [vmem:[#allocation13 + $0xd8] sm:$0xf0]  ;;  %v11902_v29 = vld [vmem:[#allocation13 + $0x94] sm:$0xf] }
 0x2ff   : > { %4182 = vmatpush.bf16.msrb.mxu1 %v9624_v44  ;;  %4195 = vmatpush.bf16.msra.mxu2 %v9688_v22  ;;  %v11901_v44 = vld [vmem:[#allocation13 + $0x84] sm:$0xf0]  ;;  %v11898_v22 = vld [vmem:[#allocation13 + $0x74] sm:$0xf]  ;;  %v9628_v46 = vor.u32 %v11894_v36, %v9625_v39  ;;  %v9692_v8 = vor.u32 %v11910_v40, %v9689_v42  ;;  %v9617_v10 = vld [vmem:[#allocation13 + $0x48] sm:$0xf0] }
 0x300   : > { %v3571_v20 = vadd.f32 %v3570_v61, %v3558_v54  ;;  %v9644_v61 = vor.u32 %v11898_v22, %v9641_v17  ;;  %v9620_v57 = vor.u32 %v11892_v52, %v9617_v10  ;;  %v9585_v36 = vld [vmem:[#allocation13 + $0x8] sm:$0xf0]  ;;  %v11900_v39 = vld [vmem:[#allocation13 + $0x84] sm:$0xf] }
 0x301   : > { %4208 = vmatpush.bf16.msra.mxu3 %v9752_v5  ;;  %v3546_v7 = vpop.f32.mrf.mxu2  ;;  %v11917_v5 = vld [vmem:[#allocation13 + $0x104] sm:$0xf0]  ;;  %v9649_v40 = vld [vmem:[#allocation13 + $0x88] sm:$0xf0]  ;;  %v11920_v52 = vld [vmem:[#allocation13 + $0x124] sm:$0xf] }
 0x302   : > { %v3783_v26 = vmax.f32 %v3571_v20, 0.0  ;;  %v9712_v54 = vor.u32 %v11917_v5, %v9711_v53  ;;  %v9673_v20 = vld [vmem:[#allocation13 + $0xb8] sm:$0xf0]  ;;  %v11928_v7 = vld [vmem:[#allocation13 + $0x164] sm:$0xf] }
 0x303   : > { %4183 = vmatpush.bf16.msrb.mxu1 %v9616_v49  ;;  %4196 = vmatpush.bf16.msra.mxu2 %v9680_v25  ;;  %v9648_v49 = vor.u32 %v11901_v44, %v9647_v21  ;;  %v9736_v25 = vor.u32 %v11923_v24, %v9735_v23  ;;  %v9761_v21 = vld [vmem:[#allocation13 + $0x168] sm:$0xf0] }
 0x304   : > { %v3559_v12 = vpop.f32.mrf.mxu3  ;;  %v13739_v56 = vpack.c.bf16 %v3783_v26, %v3783_v26  ;;  %v9764_v17 = vor.u32 %v11928_v7, %v9761_v21  ;;  %v9665_v23 = vld [vmem:[#allocation13 + $0xa8] sm:$0xf0]  ;;  %v11947_v7 = vld [vmem:[#allocation13 + $0x1f4] sm:$0xf0] }
 0x305   : > { %4209 = vmatpush.bf16.msra.mxu3 %v9744_v16  ;;  %v11906_v16 = vld [vmem:[#allocation13 + $0xb4] sm:$0xf]  ;;  %v11888_v12 = vld [vmem:[#allocation13 + $0x24] sm:$0xf]  ;;  %v9729_v53 = vld [vmem:[#allocation13 + $0x128] sm:$0xf0] }
 0x306   : > { %v9676_v22 = vor.u32 %v11906_v16, %v9673_v20  ;;  %v9604_v26 = vor.u32 %v11888_v12, %v9601_v15  ;;  %v9732_v5 = vor.u32 %v11920_v52, %v9729_v53  ;;  %v9831_v20 = vld [vmem:[#allocation13 + $0x1f0] sm:$0xf]  ;;  %v9823_v12 = vld [vmem:[#allocation13 + $0x1e0] sm:$0xf]  ;;  %v9833_v52 = vld [vmem:[#allocation13 + $0x1f8] sm:$0xf0] }
 0x307   : > { %4184 = vmatpush.bf16.msrb.mxu1 %v9608_v33  ;;  %4197 = vmatpush.bf16.msra.mxu2 %v9672_v51  ;;  %v9727_v33 = vld [vmem:[#allocation13 + $0x120] sm:$0xf]  ;;  %v11919_v51 = vld [vmem:[#allocation13 + $0x114] sm:$0xf0]  ;;  %v9832_v21 = vor.u32 %v11947_v7, %v9831_v20  ;;  %v11944_v53 = vld [vmem:[#allocation13 + $0x1e4] sm:$0xf] }
 0x308   : > { %v9728_v11 = vor.u32 %v11921_v34, %v9727_v33  ;;  %v9720_v43 = vor.u32 %v11919_v51, %v9719_v1  ;;  %v9657_v33 = vld [vmem:[#allocation13 + $0x98] sm:$0xf0]  ;;  %v11924_v34 = vld [vmem:[#allocation13 + $0x144] sm:$0xf]  ;;  %v9809_v20 = vld [vmem:[#allocation13 + $0x1c8] sm:$0xf0] }
 0x309   : > { %4210 = vmatpush.bf16.msra.mxu3 %v9736_v25  ;;  %v9660_v51 = vor.u32 %v11902_v29, %v9657_v33  ;;  %4219 = vmatpush.bf16.msra.mxu0 %v9832_v21  ;;  %v11939_v29 = vld [vmem:[#allocation13 + $0x1b4] sm:$0xf0]  ;;  %v9801_v21 = vld [vmem:[#allocation13 + $0x1b8] sm:$0xf0] }
 0x30b   : > { %4185 = vmatpush.bf16.msrb.mxu1 %v9600_v50  ;;  %4198 = vmatpush.bf16.msra.mxu2 %v9664_v9  ;;  %v11908_v50 = vld [vmem:[#allocation13 + $0xc4] sm:$0xf]  ;;  %v9681_v9 = vld [vmem:[#allocation13 + $0xc8] sm:$0xf0] }
 0x30c   : > { %v9684_v63 = vor.u32 %v11908_v50, %v9681_v9  ;;  %v9652_v50 = vor.u32 %v11900_v39, %v9649_v40  ;;  %v11935_v39 = vld [vmem:[#allocation13 + $0x194] sm:$0xf0] }
 0x30d   : > { %4211 = vmatpush.bf16.msra.mxu3 %v9728_v11  ;;  %v9745_v11 = vld [vmem:[#allocation13 + $0x148] sm:$0xf0] }
 0x30f   : > { %4186 = vmatpush.bf16.msrb.mxu1 %v9592_v3  ;;  %4199 = vmatpush.bf16.msra.mxu2 %v9656_v4  ;;  %v11890_v3 = vld [vmem:[#allocation13 + $0x34] sm:$0xf]  ;;  %v9772_v4 = vor.u32 %v11930_v55, %v9769_v60  ;;  %v9721_v60 = vld [vmem:[#allocation13 + $0x118] sm:$0xf0] }
 0x310   : > { %v9612_v44 = vor.u32 %v11890_v3, %v9609_v14  ;;  %v11918_v55 = vld [vmem:[#allocation13 + $0x114] sm:$0xf]  ;;  %v9713_v14 = vld [vmem:[#allocation13 + $0x108] sm:$0xf0] }
 0x311   : > { %4212 = vmatpush.bf16.msra.mxu3 %v9720_v43 }
 0x313   : > { %4187 = vmatpush.bf16.msrb.mxu1 %v9584_v19  ;;  %4200 = vmatpush.bf16.msra.mxu2 %v9648_v49  ;;  %v13743_v62 = vpop.f32.mrf.mxu1  ;;  %v11926_v19 = vld [vmem:[#allocation13 + $0x154] sm:$0xf]  ;;  %v9753_v49 = vld [vmem:[#allocation13 + $0x158] sm:$0xf0] }
 0x314   : > { %v9756_v47 = vor.u32 %v11926_v19, %v9753_v49 }
 0x315   : > { %4213 = vmatpush.bf16.msra.mxu3 %v9712_v54  ;;  %v3360_v54 = vperm.slane %v13706_v41, 2 }
 0x316   : > { %4188 = vmatmul.bf16.vlgmr.msrb.gmra.mxu1 %v13737_v38  ;;  %4201 = vmatmul.bf16.vlgmr.msra.gmra.mxu2 %v13739_v56  ;;  %v13745_v13 = vpop.f32.mrf.mxu0 }
 0x317   : > { %4232 = vmatpush.bf16.msra.mxu1 %v9644_v61  ;;  %4245 = vmatpush.bf16.msrb.mxu2 %v9708_v30  ;;  %v9668_v61 = vor.u32 %v11904_v18, %v9665_v23  ;;  %v11886_v30 = vld [vmem:[#allocation13 + $0x14] sm:$0xf]  ;;  %v9815_v18 = vld [vmem:[#allocation13 + $0x1d0] sm:$0xf]  ;;  %v11943_v23 = vld [vmem:[#allocation13 + $0x1d4] sm:$0xf0] }
 0x318   : > { %v9596_v1 = vor.u32 %v11886_v30, %v9593_v48  ;;  %v9816_v49 = vor.u32 %v11943_v23, %v9815_v18  ;;  %v11941_v30 = vld [vmem:[#allocation13 + $0x1c4] sm:$0xf0]  ;;  %v12613_v18 = vld [vmem:[#allocation11] sm:$0xf] }
 0x319   : > { %4258 = vmatpush.bf16.msrb.mxu3 %v9772_v4  ;;  %v3596_v24 = vpop.f32.mrf.mxu2  ;;  %v11916_v4 = vld [vmem:[#allocation13 + $0x104] sm:$0xf]  ;;  %v3361_v23 = vperm.slane %v12613_v18, 3  ;;  %v4313_v18 = vld [vmem:[%s14335_s12 + $0xc8] sm:$0xff] }
 0x31a   : > { %v9716_v16 = vor.u32 %v11916_v4, %v9713_v14 }
 0x31b   : > { %4233 = vmatpush.bf16.msra.mxu1 %v9636_v6  ;;  %4246 = vmatpush.bf16.msrb.mxu2 %v9700_v35  ;;  %v3585_v25 = vpop.f32.mrf.mxu1  ;;  %v11884_v6 = vld [vmem:[#allocation13 + $0x4] sm:$0xf]  ;;  %v9748_v35 = vor.u32 %v11924_v34, %v9745_v11  ;;  %v9791_v11 = vld [vmem:[#allocation13 + $0x1a0] sm:$0xf] }
 0x31c   : > { %v3609_v37 = vpop.f32.mrf.mxu3  ;;  %v9588_v10 = vor.u32 %v11884_v6, %v9585_v36  ;;  %v9783_v36 = vld [vmem:[#allocation13 + $0x190] sm:$0xf] }
 0x31d   : > { %4259 = vmatpush.bf16.msrb.mxu3 %v9764_v17  ;;  %v11945_v17 = vld [vmem:[#allocation13 + $0x1e4] sm:$0xf0]  ;;  %v9784_v40 = vor.u32 %v11935_v39, %v9783_v36 }
 0x31e   : > { %v3624_v28 = vpop.f32.mrf.mxu0 }
 0x31f   : > { %4234 = vmatpush.bf16.msra.mxu1 %v9628_v46  ;;  %4247 = vmatpush.bf16.msrb.mxu2 %v9692_v8  ;;  %v11922_v46 = vld [vmem:[#allocation13 + $0x134] sm:$0xf]  ;;  %v9737_v8 = vld [vmem:[#allocation13 + $0x138] sm:$0xf0] }
 0x320   : > { %v9740_v9 = vor.u32 %v11922_v46, %v9737_v8  ;;  %v11946_v8 = vld [vmem:[#allocation13 + $0x1f4] sm:$0xf] }
 0x321   : > { %4260 = vmatpush.bf16.msrb.mxu3 %v9756_v47  ;;  %v3598_v42 = vpop.f32.mrf.mxu2 }
 0x322   : > { %v9775_v42 = vld [vmem:[#allocation13 + $0x180] sm:$0xf] }
 0x323   : > { %4235 = vmatpush.bf16.msra.mxu1 %v9620_v57  ;;  %4248 = vmatpush.bf16.msrb.mxu2 %v9684_v63  ;;  %v9724_v57 = vor.u32 %v11918_v55, %v9721_v60  ;;  %v3584_v63 = vadd.f32 %v13743_v62, %v3360_v54  ;;  %v11942_v55 = vld [vmem:[#allocation13 + $0x1d4] sm:$0xf]  ;;  %v9817_v60 = vld [vmem:[#allocation13 + $0x1d8] sm:$0xf0] }
 0x324   : > { %v3611_v43 = vpop.f32.mrf.mxu3 }
 0x325   : > { %4261 = vmatpush.bf16.msrb.mxu3 %v9748_v35  ;;  %v3597_v3 = vadd.f32 %v3596_v24, %v3584_v63  ;;  %v11933_v43 = vld [vmem:[#allocation13 + $0x184] sm:$0xf0]  ;;  %v9820_v63 = vor.u32 %v11942_v55, %v9817_v60  ;;  %v4300_v60 = vld [vmem:[%s14335_s12 + $0x60] sm:$0xff] }
 0x326   : > { %v9776_v46 = vor.u32 %v11933_v43, %v9775_v42  ;;  %v4318_v55 = vld [vmem:[%s14335_s12 + $0xf0] sm:$0xff] }
 0x327   : > { %4236 = vmatpush.bf16.msra.mxu1 %v9612_v44  ;;  %4249 = vmatpush.bf16.msrb.mxu2 %v9676_v22  ;;  %v3610_v41 = vadd.f32 %v3609_v37, %v3597_v3 }
 0x329   : > { %4262 = vmatpush.bf16.msrb.mxu3 %v9740_v9  ;;  %v3623_v62 = vadd.f32 %v13745_v13, %v3610_v41  ;;  %v9799_v13 = vld [vmem:[#allocation13 + $0x1b0] sm:$0xf]  ;;  %v11938_v41 = vld [vmem:[#allocation13 + $0x1b4] sm:$0xf] }
 0x32a   : > { %v9800_v34 = vor.u32 %v11939_v29, %v9799_v13 }
 0x32b   : > { %4237 = vmatpush.bf16.msra.mxu1 %v9604_v26  ;;  %4250 = vmatpush.bf16.msrb.mxu2 %v9668_v61  ;;  %v9807_v61 = vld [vmem:[#allocation13 + $0x1c0] sm:$0xf] }
 0x32c   : > { %v9808_v28 = vor.u32 %v11941_v30, %v9807_v61 }
 0x32d   : > { %4263 = vmatpush.bf16.msrb.mxu3 %v9732_v5  ;;  %v9825_v5 = vld [vmem:[#allocation13 + $0x1e8] sm:$0xf0] }
 0x32e   : > { %v9828_v54 = vor.u32 %v11944_v53, %v9825_v5  ;;  %v4302_v53 = vld [vmem:[%s14335_s12 + $0x70] sm:$0xff]  ;;  %v4301_v5 = vld [vmem:[%s14335_s12 + $0x68] sm:$0xff] }
 0x32f   : > { %4238 = vmatpush.bf16.msra.mxu1 %v9596_v1  ;;  %4251 = vmatpush.bf16.msrb.mxu2 %v9660_v51  ;;  %v11937_v1 = vld [vmem:[#allocation13 + $0x1a4] sm:$0xf0] }
 0x330   : > { %v9792_v35 = vor.u32 %v11937_v1, %v9791_v11 }
 0x331   : > { %4264 = vmatpush.bf16.msrb.mxu3 %v9724_v57 }
 0x333   : > { %4239 = vmatpush.bf16.msra.mxu1 %v9588_v10  ;;  %4252 = vmatpush.bf16.msrb.mxu2 %v9652_v50  ;;  %v3635_v44 = vpop.f32.mrf.mxu1  ;;  %v9836_v10 = vor.u32 %v11946_v8, %v9833_v52 }
 0x334   : > { %v3636_v15 = vadd.f32 %v3635_v44, %v3623_v62 }
 0x335   : > { %4265 = vmatpush.bf16.msrb.mxu3 %v9716_v16  ;;  %v11940_v16 = vld [vmem:[#allocation13 + $0x1c4] sm:$0xf] }
 0x336   : > { %4240 = vmatmul.bf16.vlgmr.msra.gmra.mxu1 %v13737_v38  ;;  %4253 = vmatmul.bf16.vlgmr.msrb.gmra.mxu2 %v13739_v56  ;;  %v3674_v22 = vpop.f32.mrf.mxu0  ;;  %v9824_v38 = vor.u32 %v11945_v17, %v9823_v12  ;;  %v9812_v7 = vor.u32 %v11940_v16, %v9809_v20  ;;  %v11936_v12 = vld [vmem:[#allocation13 + $0x1a4] sm:$0xf]  ;;  %v9793_v17 = vld [vmem:[#allocation13 + $0x1a8] sm:$0xf0]  ;;  %v4297_v20 = vld [vmem:[%s14335_s12 + $0x48] sm:$0xff] }
 0x337   : > { %v4315_v16 = vld [vmem:[%s14335_s12 + $0xd8] sm:$0xff] }
 0x338   : > { %4220 = vmatpush.bf16.msra.mxu0 %v9824_v38  ;;  %v9796_v38 = vor.u32 %v11936_v12, %v9793_v17  ;;  %v4292_v12 = vld [vmem:[%s14335_s12 + $0x20] sm:$0xff]  ;;  %v4291_v17 = vld [vmem:[%s14335_s12 + $0x18] sm:$0xff] }
 0x339   : > { %v3648_v56 = vpop.f32.mrf.mxu2 }
 0x33a   : > { %v3649_v24 = vadd.f32 %v3648_v56, %v3636_v15  ;;  %v11934_v15 = vld [vmem:[#allocation13 + $0x194] sm:$0xf]  ;;  %v9785_v56 = vld [vmem:[#allocation13 + $0x198] sm:$0xf0] }
 0x33b   : > { %v3637_v25 = vpop.f32.mrf.mxu1 }
 0x33c   : > { %v3661_v19 = vpop.f32.mrf.mxu3  ;;  %4221 = vmatpush.bf16.msra.mxu0 %v9816_v49  ;;  %v11932_v25 = vld [vmem:[#allocation13 + $0x184] sm:$0xf] }
 0x33d   : > { %v3662_v37 = vadd.f32 %v3661_v19, %v3649_v24  ;;  %v9788_v24 = vor.u32 %v11934_v15, %v9785_v56  ;;  %v4314_v15 = vld [vmem:[%s14335_s12 + $0xd0] sm:$0xff]  ;;  %v4289_v56 = vld [vmem:[%s14335_s12 + $0x8] sm:$0xff] }
 0x33e   : > { %v3676_v26 = vpop.f32.mrf.mxu0 }
 0x33f   : > { %v3675_v47 = vadd.f32 %v3674_v22, %v3662_v37  ;;  %v9804_v22 = vor.u32 %v11938_v41, %v9801_v21  ;;  %v9777_v37 = vld [vmem:[#allocation13 + $0x188] sm:$0xf0] }
 0x340   : > { %4222 = vmatpush.bf16.msra.mxu0 %v9808_v28  ;;  %v9780_v26 = vor.u32 %v11932_v25, %v9777_v37  ;;  %v4295_v41 = vld [vmem:[%s14335_s12 + $0x38] sm:$0xff]  ;;  %v4310_v25 = vld [vmem:[%s14335_s12 + $0xb0] sm:$0xff]  ;;  %v4309_v37 = vld [vmem:[%s14335_s12 + $0xa8] sm:$0xff] }
 0x341   : > { %v3784_v48 = vmax.f32 %v3675_v47, 0.0  ;;  %v3650_v33 = vpop.f32.mrf.mxu2 }
 0x343   : > { %v3788_v51 = vpack.c.bf16 %v3784_v48, %v3784_v48 }
 0x344   : > { %v3663_v6 = vpop.f32.mrf.mxu3  ;;  %4223 = vmatpush.bf16.msra.mxu0 %v9800_v34 }
 0x345   : > { %4214 = vmatmul.bf16.vlgmr.msra.gmra.mxu3 %v3788_v51 }
 0x348   : > { %4224 = vmatpush.bf16.msra.mxu0 %v9792_v35 }
 0x34c   : > { %4225 = vmatpush.bf16.msra.mxu0 %v9784_v40 }
 0x350   : > { %4226 = vmatpush.bf16.msra.mxu0 %v9776_v46 }
 0x353   : > { %v3687_v50 = vpop.f32.mrf.mxu1 }
 0x354   : > { %4271 = vmatpush.bf16.msrb.mxu0 %v9836_v10  ;;  %v3688_v19 = vadd.f32 %v3687_v50, %v3361_v23 }
 0x355   : > { %4266 = vmatmul.bf16.vlgmr.msrb.gmra.mxu3 %v3788_v51 }
 0x356   : > { %v3726_v9 = vpop.f32.mrf.mxu0 }
 0x358   : > { %4272 = vmatpush.bf16.msrb.mxu0 %v9828_v54  ;;  %v4319_v54 = vld [vmem:[%s14335_s12 + $0xf8] sm:$0xff] }
 0x359   : > { %v3700_v57 = vpop.f32.mrf.mxu2  ;;  %4343 = vmatpush.msra.mxu2 %v4319_v54 }
 0x35a   : > { %v3701_v49 = vadd.f32 %v3700_v57, %v3688_v19  ;;  %v4317_v57 = vld [vmem:[%s14335_s12 + $0xe8] sm:$0xff]  ;;  %v4312_v19 = vld [vmem:[%s14335_s12 + $0xc0] sm:$0xff] }
 0x35b   : > { %v3689_v4 = vpop.f32.mrf.mxu1  ;;  %4344 = vmatpush.msra.mxu2 %v4318_v55 }
 0x35c   : > { %v3713_v3 = vpop.f32.mrf.mxu3  ;;  %4273 = vmatpush.bf16.msrb.mxu0 %v9820_v63  ;;  %v4299_v63 = vld [vmem:[%s14335_s12 + $0x58] sm:$0xff] }
 0x35d   : > { %v3714_v61 = vadd.f32 %v3713_v3, %v3701_v49  ;;  %v4316_v3 = vld [vmem:[%s14335_s12 + $0xe0] sm:$0xff]  ;;  %4345 = vmatpush.msra.mxu2 %v4317_v57  ;;  %v4311_v49 = vld [vmem:[%s14335_s12 + $0xb8] sm:$0xff] }
 0x35e   : > { %v3728_v14 = vpop.f32.mrf.mxu0 }
 0x35f   : > { %v3727_v28 = vadd.f32 %v3726_v9, %v3714_v61  ;;  %v4303_v9 = vld [vmem:[%s14335_s12 + $0x78] sm:$0xff]  ;;  %v4298_v14 = vld [vmem:[%s14335_s12 + $0x50] sm:$0xff]  ;;  %4346 = vmatpush.msra.mxu2 %v4316_v3 }
 0x360   : > { %4274 = vmatpush.bf16.msrb.mxu0 %v9812_v7  ;;  %4323 = vmatpush.msrb.mxu1 %v4303_v9  ;;  %v4296_v7 = vld [vmem:[%s14335_s12 + $0x40] sm:$0xff]  ;;  %v4307_v61 = vld [vmem:[%s14335_s12 + $0x98] sm:$0xff] }
 0x361   : > { %v3702_v44 = vpop.f32.mrf.mxu2  ;;  %4347 = vmatpush.msra.mxu2 %v4315_v16 }
 0x362   : > { %4324 = vmatpush.msrb.mxu1 %v4302_v53  ;;  %v4294_v44 = vld [vmem:[%s14335_s12 + $0x30] sm:$0xff] }
 0x363   : > { %4348 = vmatpush.msra.mxu2 %v4314_v15  ;;  %v12013_v15 = vld [vmem:[#allocation22 + $0x1e4] sm:$0xf0] }
 0x364   : > { %v3715_v62 = vpop.f32.mrf.mxu3  ;;  %4275 = vmatpush.bf16.msrb.mxu0 %v9804_v22  ;;  %4325 = vmatpush.msrb.mxu1 %v4301_v5  ;;  %v4293_v22 = vld [vmem:[%s14335_s12 + $0x28] sm:$0xff] }
 0x365   : > { %4349 = vmatpush.msra.mxu2 %v4313_v18 }
 0x366   : > { %4326 = vmatpush.msrb.mxu1 %v4300_v60 }
 0x367   : > { %4350 = vmatpush.msra.mxu2 %v4312_v19  ;;  %v10048_v19 = vld [vmem:[#allocation22 + $0x180] sm:$0xf] }
 0x368   : > { %4276 = vmatpush.bf16.msrb.mxu0 %v9796_v38  ;;  %4327 = vmatpush.msrb.mxu1 %v4299_v63  ;;  %v4290_v38 = vld [vmem:[%s14335_s12 + $0x10] sm:$0xff] }
 0x369   : > { %4351 = vmatpush.msra.mxu2 %v4311_v49 }
 0x36a   : > { %4328 = vmatpush.msrb.mxu1 %v4298_v14 }
 0x36b   : > { %4352 = vmatpush.msra.mxu2 %v4310_v25 }
 0x36c   : > { %4277 = vmatpush.bf16.msrb.mxu0 %v9788_v24  ;;  %4329 = vmatpush.msrb.mxu1 %v4297_v20  ;;  %v4288_v24 = vld [vmem:[%s14335_s12] sm:$0xff] }
 0x36d   : > { %4353 = vmatpush.msra.mxu2 %v4309_v37  ;;  %v12004_v37 = vld [vmem:[#allocation22 + $0x19c] sm:$0xf0] }
 0x36e   : > { %4330 = vmatpush.msrb.mxu1 %v4296_v7 }
 0x370   : > { %4278 = vmatpush.bf16.msrb.mxu0 %v9780_v26  ;;  %4331 = vmatpush.msrb.mxu1 %v4295_v41  ;;  %v4308_v26 = vld [vmem:[%s14335_s12 + $0xa0] sm:$0xff]  ;;  %v11948_v41 = vld [vmem:[#allocation19] sm:$0xff] }
 0x371   : > { %4354 = vmatpush.msra.mxu2 %v4308_v26  ;;  %v12000_v26 = vld [vmem:[#allocation22 + $0x184] sm:$0xf] }
 0x372   : > { %4332 = vmatpush.msrb.mxu1 %v4294_v44 }
 0x373   : > { %v3739_v30 = vpop.f32.mrf.mxu1  ;;  %4355 = vmatpush.msra.mxu2 %v4307_v61  ;;  %v10050_v61 = vld [vmem:[#allocation22 + $0x1a0] sm:$0xf0] }
 0x374   : > { %v3740_v48 = vadd.f32 %v3739_v30, %v3727_v28  ;;  %4333 = vmatpush.msrb.mxu1 %v4293_v22  ;;  %v4306_v30 = vld [vmem:[%s14335_s12 + $0x90] sm:$0xff]  ;;  %v4304_v28 = vld [vmem:[%s14335_s12 + $0x80] sm:$0xff] }
 0x375   : > { %v3778_v47 = vpop.f32.mrf.mxu0  ;;  %4356 = vmatpush.msra.mxu2 %v4306_v30  ;;  %v10080_v22 = vld [vmem:[#allocation22 + $0x1c0] sm:$0xf] }
 0x376   : > { %4334 = vmatpush.msrb.mxu1 %v4292_v12  ;;  %v12012_v12 = vld [vmem:[#allocation22 + $0x1dc] sm:$0xf0] }
 0x378   : > { %4335 = vmatpush.msrb.mxu1 %v4291_v17  ;;  %v12008_v17 = vld [vmem:[#allocation22 + $0x1c4] sm:$0xf] }
 0x379   : > { %v3752_v13 = vpop.f32.mrf.mxu2 }
 0x37a   : > { %v3753_v29 = vadd.f32 %v3752_v13, %v3740_v48  ;;  %4336 = vmatpush.msrb.mxu1 %v4290_v38  ;;  %v3854_v48 = vld [vmem:[#allocation14] sm:$0x3]  ;;  %v10088_v38 = vld [vmem:[#allocation22 + $0x1c8] sm:$0xf] }
 0x37b   : > { %v3765_v33 = vpop.f32.mrf.mxu3  ;;  %v3741_v34 = vpop.f32.mrf.mxu1  ;;  %v4176_v13 = vperm.slane %v3854_v48, 0  ;;  %v10089_v18 = vor.u32 %v12013_v15, %v10088_v38 }
 0x37c   : > { %v3766_v11 = vadd.f32 %v3765_v33, %v3753_v29  ;;  %4337 = vmatpush.msrb.mxu1 %v4289_v56 }
 0x37d   : > { %v3780_v1 = vpop.f32.mrf.mxu0 }
 0x37e   : > { %v3779_v51 = vadd.f32 %v3778_v47, %v3766_v11  ;;  %4338 = vmatpush.msrb.mxu1 %v4288_v24  ;;  %v4305_v47 = vld [vmem:[%s14335_s12 + $0x88] sm:$0xff]  ;;  %v10090_v24 = vld [vmem:[#allocation22 + $0x1e8] sm:$0xf0] }
 0x37f   : > { %4357 = vmatpush.msra.mxu2 %v4305_v47  ;;  %v10049_v47 = vor.u32 %v12004_v37, %v10048_v19  ;;  %v11973_v37 = vld [vmem:[#allocation22 + $0xa4] sm:$0xf0] }
 0x380   : > { %v3785_v6 = vmax.f32 %v3779_v51, 0.0  ;;  %4925 = vmatpush.bf16.msra.mxu1 %v10089_v18  ;;  %v11972_v18 = vld [vmem:[#allocation22 + $0x9c] sm:$0xf0] }
 0x381   : > { %v3754_v35 = vpop.f32.mrf.mxu2  ;;  %4358 = vmatpush.msra.mxu2 %v4304_v28  ;;  %v10056_v28 = vld [vmem:[#allocation22 + $0x188] sm:$0xf] }
 0x382   : > { %v3789_v36 = vpack.c.bf16 %v3785_v6, %v3785_v6  ;;  %v4177_v6 = vperm.slane %v3854_v48, 1  ;;  %v12005_v48 = vld [vmem:[#allocation22 + $0x1a4] sm:$0xf0] }
 0x383   : > { %v3767_v39 = vpop.f32.mrf.mxu3 }
 0x384   : > { %4227 = vmatmul.bf16.vlgmr.msra.gmra.mxu0 %v3789_v36 }
 0x393   : > { %v13752_v40 = vpop.f32.mrf.mxu1 }
 0x394   : > { %4279 = vmatmul.bf16.vlgmr.msrb.gmra.mxu0 %v3789_v36  ;;  %v4190_v29 = vadd.f32 %v13752_v40, %v4176_v13  ;;  %v4322_v40 = vld [vmem:[%s14336_s8] sm:$0x1]  ;;  %v12001_v13 = vld [vmem:[#allocation22 + $0x18c] sm:$0xf] }
 0x399   : > { %v13754_v42 = vpop.f32.mrf.mxu2 }
 0x39a   : > { %v4203_v33 = vadd.f32 %v13754_v42, %v4190_v29  ;;  %v10053_v29 = vor.u32 %v12000_v26, %v10050_v61  ;;  %v11969_v61 = vld [vmem:[#allocation22 + $0x8c] sm:$0xf] }
 0x39b   : > { %v4191_v43 = vpop.f32.mrf.mxu1 }
 0x3a1   : > { %v4204_v46 = vpop.f32.mrf.mxu2 }
 0x3b3   : > { %v13756_v8 = vpop.f32.mrf.mxu1 }
 0x3b4   : > { %v4242_v36 = vadd.f32 %v13756_v8, %v4177_v6  ;;  %v11992_v6 = vld [vmem:[#allocation22 + $0x144] sm:$0xf] }
 0x3b9   : > { %v13758_v52 = vpop.f32.mrf.mxu2 }
 0x3ba   : > { %v4255_v39 = vadd.f32 %v13758_v52, %v4242_v36  ;;  %v10024_v36 = vld [vmem:[#allocation22 + $0x148] sm:$0xf] }
 0x3bb   : > { %v4243_v10 = vpop.f32.mrf.mxu1 }
 0x3c1   : > { %v4256_v50 = vpop.f32.mrf.mxu2 }
 0x3c8   : > { %v4215_v4 = vpop.f32.mrf.mxu3 }
 0x3c9   : > { %v4216_v34 = vadd.f32 %v4215_v4, %v4203_v33  ;;  %v10057_v33 = vor.u32 %v12005_v48, %v10056_v28  ;;  %v12609_v28 = vld [vmem:[#allocation17] ss:$0 sm:$0xff] }
 0x3cb   : > { %4926 = vmatpush.bf16.msra.mxu1 %v10057_v33 }
 0x3d0   : > { %v4217_v21 = vpop.f32.mrf.mxu3 }
 0x3d1   : > { %v13873_v21 = vld [vmem:[#allocation16] sm:$0x7] }
 0x3d2   : > { %v4412_v44 = vperm.slane %v13873_v21, 1 }
 0x3d8   : > { %v4267_v62 = vpop.f32.mrf.mxu3 }
 0x3d9   : > { %v4268_v43 = vadd.f32 %v4267_v62, %v4255_v39  ;;  %v10081_v62 = vor.u32 %v12012_v12, %v10080_v22  ;;  %v11977_v12 = vld [vmem:[#allocation22 + $0xcc] sm:$0xf] }
 0x3db   : > { %4897 = vmatpush.bf16.msra.mxu0 %v10081_v62 }
 0x3df   : > { %4898 = vmatpush.bf16.msra.mxu0 %v10049_v47  ;;  %v9930_v47 = vld [vmem:[#allocation22 + $0xa8] sm:$0xf0] }
 0x3e0   : > { %v4269_v23 = vpop.f32.mrf.mxu3 }
 0x3e1   : > { %v12009_v23 = vld [vmem:[#allocation22 + $0x1cc] sm:$0xf] }
 0x3e2   : > { %v10093_v25 = vor.u32 %v12009_v23, %v10090_v24  ;;  %v11968_v23 = vld [vmem:[#allocation22 + $0x84] sm:$0xf] }
 0x3e4   : > { %4939 = vmatpush.bf16.msrb.mxu2 %v10093_v25  ;;  %v9928_v25 = vld [vmem:[#allocation22 + $0x88] sm:$0xf] }
 0x401   : > { %v4228_v11 = vpop.f32.mrf.mxu0 }
 0x402   : > { %v4229_v1 = vadd.f32 %v4228_v11, %v4216_v34  ;;  %v10058_v34 = vld [vmem:[#allocation22 + $0x1a8] sm:$0xf0]  ;;  %v10016_v11 = vld [vmem:[#allocation22 + $0x140] sm:$0xf] }
 0x404   : > { %v4284_v51 = vmax.f32 %v4229_v1, 0.0  ;;  %v11996_v1 = vld [vmem:[#allocation22 + $0x15c] sm:$0xf0] }
 0x405   : > { %v10017_v39 = vor.u32 %v11996_v1, %v10016_v11  ;;  %v9888_v11 = vld [vmem:[#allocation22 + $0x40] sm:$0xf] }
 0x406   : > { %4339 = vmatmul.f32.vlgmr.msrb.gmra.mxu1 %v4284_v51  ;;  %v10061_v51 = vor.u32 %v12001_v13, %v10058_v34  ;;  %v9929_v34 = vor.u32 %v11973_v37, %v9928_v25  ;;  %v11964_v1 = vld [vmem:[#allocation22 + $0x5c] sm:$0xf0] }
 0x407   : > { %4899 = vmatpush.bf16.msra.mxu0 %v10017_v39  ;;  %v11965_v39 = vld [vmem:[#allocation22 + $0x64] sm:$0xf0] }
 0x408   : > { %4940 = vmatpush.bf16.msrb.mxu2 %v10061_v51  ;;  %v11960_v51 = vld [vmem:[#allocation22 + $0x44] sm:$0xf] }
 0x409   : > { %v4230_v35 = vpop.f32.mrf.mxu0 }
 0x40a   : > { %v10018_v35 = vld [vmem:[#allocation22 + $0x160] sm:$0xf0] }
 0x411   : > { %v4280_v46 = vpop.f32.mrf.mxu0 }
 0x412   : > { %v4281_v10 = vadd.f32 %v4280_v46, %v4268_v43  ;;  %v11997_v43 = vld [vmem:[#allocation22 + $0x164] sm:$0xf0]  ;;  %v11993_v46 = vld [vmem:[#allocation22 + $0x14c] sm:$0xf] }
 0x414   : > { %v4285_v50 = vmax.f32 %v4281_v10, 0.0  ;;  %v10026_v10 = vld [vmem:[#allocation22 + $0x168] sm:$0xf0] }
 0x416   : > { %4359 = vmatmul.f32.vlgmr.msra.gmra.mxu2 %v4285_v50 }
 0x419   : > { %v4282_v9 = vpop.f32.mrf.mxu0 }
 0x41a   : > { %v10021_v9 = vor.u32 %v11992_v6, %v10018_v35  ;;  %v9890_v35 = vld [vmem:[#allocation22 + $0x60] sm:$0xf0] }
 0x483   : > { %v4340_v42 = vpop.f32.mrf.mxu1 }
 0x484   : > { %v4341_v53 = vadd.f32 %v4340_v42, %v4322_v40  ;;  %v10025_v40 = vor.u32 %v11997_v43, %v10024_v36  ;;  %v9984_v42 = vld [vmem:[#allocation22 + $0x100] sm:$0xf]  ;;  %v9896_v36 = vld [vmem:[#allocation22 + $0x48] sm:$0xf] }
 0x486   : > { %4927 = vmatpush.bf16.msra.mxu1 %v10025_v40  ;;  %v9897_v40 = vor.u32 %v11965_v39, %v9896_v36  ;;  %v10000_v36 = vld [vmem:[#allocation22 + $0x110] sm:$0xf] }
 0x487   : > { %v11990_v39 = vld [vmem:[#allocation22 + $0x12c] sm:$0xf0] }
 0x499   : > { %v4360_v5 = vpop.f32.mrf.mxu2 }
 0x49a   : > { %v4361_v54 = vadd.f32 %v4360_v5, %v4341_v53  ;;  %v11988_v53 = vld [vmem:[#allocation22 + $0x11c] sm:$0xf0]  ;;  %v11984_v5 = vld [vmem:[#allocation22 + $0x104] sm:$0xf] }
 0x49c   : > { %v4363_v55 = vperm.slane %v4361_v54, 0  ;;  %v10029_v54 = vor.u32 %v11993_v46, %v10026_v10  ;;  %v11961_v10 = vld [vmem:[#allocation22 + $0x4c] sm:$0xf] }
 0x49e   : > { %v4378_v60 = vmul.f32 %v4363_v55, %v13586_v45  ;;  %v4367_v8 = vmul.f32 %v4363_v55, %v13602_v31  ;;  %v4366_v52 = vmul.f32 %v4363_v55, %v13589_v58  ;;  %v4379_v57 = vmul.f32 %v4363_v55, %v13600_v27  ;;  %v11950_v27 = vld [vmem:[#allocation19 + $0x10] sm:$0xff]  ;;  %4941 = vmatpush.bf16.msrb.mxu2 %v10029_v54  ;;  %v11952_v54 = vld [vmem:[#allocation22 + $0x4] sm:$0xf] }
 0x49f   : > { %v4364_v63 = vmul.f32 %v4363_v55, %v13591_v59  ;;  %v4365_v45 = vmul.f32 %v4363_v55, %v13604_v32  ;;  %v11951_v59 = vld [vmem:[#allocation19 + $0x18] sm:$0xff]  ;;  %v11949_v32 = vld [vmem:[#allocation19 + $0x8] sm:$0xff] }
 0x4a0   : > { %4382 = vrot.lane.b32.xlu2 %v4378_v60, %s13222_s11  ;;  %4372 = vrot.lane.b32.xlu1 %v4367_v8, %s13223_s6  ;;  %v9986_v55 = vld [vmem:[#allocation22 + $0x120] sm:$0xf0]  ;;  %v9992_v60 = vld [vmem:[#allocation22 + $0x108] sm:$0xf] }
 0x4a1   : > { %4370 = vrot.lane.b32.xlu0 %v4366_v52, %s13223_s6  ;;  %4482 = vmatpush.bf16.msra.mxu3 %v11951_v59  ;;  %v11989_v8 = vld [vmem:[#allocation22 + $0x124] sm:$0xf0]  ;;  %v11985_v52 = vld [vmem:[#allocation22 + $0x10c] sm:$0xf]  ;;  %s14341_s6 = sld [smem:[#allocation63_spill]] }
 0x4a5   : > { %4483 = vmatpush.bf16.msra.mxu3 %v11950_v27  ;;  %v9954_v27 = vld [vmem:[#allocation22 + $0xe0] sm:$0xf0] }
 0x4a9   : > { %4384 = vrot.lane.b32.xlu0 %v4379_v57, %s13222_s11  ;;  %4484 = vmatpush.bf16.msra.mxu3 %v11949_v32  ;;  %v9994_v57 = vld [vmem:[#allocation22 + $0x128] sm:$0xf0]  ;;  %v9960_v32 = vld [vmem:[#allocation22 + $0xc8] sm:$0xf]  ;;  %s14337_s11 = sld [smem:[#allocation61_spill]] }
 0x4aa   : > { %v9997_v59 = vor.u32 %v11985_v52, %v9994_v57  ;;  %v9858_v52 = vld [vmem:[#allocation22 + $0x20] sm:$0xf0]  ;;  %v11953_v57 = vld [vmem:[#allocation22 + $0xc] sm:$0xf] }
 0x4ac   : > { %4942 = vmatpush.bf16.msrb.mxu2 %v9997_v59  ;;  %v12010_v59 = vld [vmem:[#allocation22 + $0x1d4] sm:$0xf] }
 0x4ad   : > { %4485 = vmatpush.bf16.msra.mxu3 %v11948_v41  ;;  %v11981_v41 = vld [vmem:[#allocation22 + $0xe4] sm:$0xf0] }
 0x4ae   : > { %v9961_v15 = vor.u32 %v11981_v41, %v9960_v32  ;;  %v10098_v32 = vld [vmem:[#allocation22 + $0x1f0] sm:$0xf0]  ;;  %v10104_v41 = vld [vmem:[#allocation22 + $0x1d8] sm:$0xf] }
 0x4fa   : > { %v4383_v14 = vpop.permute.xlu2 %4382 }
 0x512   : > { %v4373_v20 = vpop.permute.xlu1 %4372 }
 0x513   : > { %v4371_v3 = vpop.permute.xlu0 %4370  ;;  %v4377_v58 = vadd.f32 %v4373_v20, %v4365_v45  ;;  %v9989_v20 = vor.u32 %v11984_v5, %v9986_v55  ;;  %v9993_v45 = vor.u32 %v11989_v8, %v9992_v60  ;;  %v9864_v55 = vld [vmem:[#allocation22 + $0x8] sm:$0xf] }
 0x514   : > { %v4376_v4 = vadd.f32 %v4371_v3, %v4364_v63  ;;  %v4425_v63 = vperm.slane %v13873_v21, 2  ;;  %v11957_v60 = vld [vmem:[#allocation22 + $0x24] sm:$0xf0] }
 0x515   : > { %4928 = vmatpush.bf16.msra.mxu1 %v9993_v45 }
 0x516   : > { %v4388_v16 = vadd.f32 %v4383_v14, %v4376_v4  ;;  %v9985_v14 = vor.u32 %v11988_v53, %v9984_v42  ;;  %v9856_v42 = vld [vmem:[#allocation22] sm:$0xf] }
 0x517   : > { %v11956_v53 = vld [vmem:[#allocation22 + $0x1c] sm:$0xf0] }
 0x518   : > { %4405 = vperm.xlu0 %12602, %v4388_v16   ;;  %4393 = vperm.xlu1 %12600, %v4388_v16  }
 0x519   : > { %4900 = vmatpush.bf16.msra.mxu0 %v9985_v14  ;;  %4929 = vmatpush.bf16.msra.mxu1 %v9961_v15  ;;  %v10064_v15 = vld [vmem:[#allocation22 + $0x190] sm:$0xf] }
 0x51b   : > { %v4385_v31 = vpop.permute.xlu0 %4384 }
 0x51c   : > { %v4389_v7 = vadd.f32 %v4385_v31, %v4377_v58  ;;  %v9952_v58 = vld [vmem:[#allocation22 + $0xc0] sm:$0xf] }
 0x51d   : > { %v11980_v31 = vld [vmem:[#allocation22 + $0xdc] sm:$0xf0]  ;;  %4930 = vmatpush.bf16.msra.mxu1 %v9929_v34  ;;  %v10040_v34 = vld [vmem:[#allocation22 + $0x158] sm:$0xf] }
 0x51e   : > { %4398 = vperm.xlu2 %12601, %v4389_v7  }
 0x520   : > { %12603 = vset.pattern.permute.xlu1 %v13219_v0  ;;  %12606 = vset.pattern.permute.xlu0 %v13221_v2  ;;  %v4401_v0 = vperm.slane %v13873_v21, 0  ;;  %v9889_v21 = vor.u32 %v11964_v1, %v9888_v11  ;;  %v11999_v11 = vld [vmem:[#allocation22 + $0x174] sm:$0xf0] }
 0x521   : > { %4409 = vperm.xlu1 %12603, %v4389_v7   ;;  %4931 = vmatpush.bf16.msra.mxu1 %v9897_v40  ;;  %v10010_v40 = vld [vmem:[#allocation22 + $0x138] sm:$0xf0] }
 0x526   : > { %12604 = vset.pattern.permute.xlu2 %v13221_v2 }
 0x527   : > { %4418 = vperm.xlu2 %12604, %v4388_v16  }
 0x529   : > { %12605 = vset.pattern.permute.xlu1 %v13221_v2  ;;  %v10082_v2 = vld [vmem:[#allocation22 + $0x1e0] sm:$0xf0] }
 0x52a   : > { %4422 = vperm.xlu1 %12605, %v4389_v7   ;;  %v10085_v56 = vor.u32 %v12008_v17, %v10082_v2  ;;  %v11976_v7 = vld [vmem:[#allocation22 + $0xc4] sm:$0xf]  ;;  %v9962_v17 = vld [vmem:[#allocation22 + $0xe8] sm:$0xf0]  ;;  %v9953_v2 = vor.u32 %v11980_v31, %v9952_v58  ;;  %v10096_v31 = vld [vmem:[#allocation22 + $0x1d0] sm:$0xf] }
 0x52b   : > { %v9957_v38 = vor.u32 %v11976_v7, %v9954_v27  ;;  %v9965_v19 = vor.u32 %v11977_v12, %v9962_v17  ;;  %v12014_v7 = vld [vmem:[#allocation22 + $0x1ec] sm:$0xf0]  ;;  %v10101_v12 = vor.u32 %v12010_v59, %v10098_v32  ;;  %v11975_v32 = vld [vmem:[#allocation22 + $0xb4] sm:$0xf0] }
 0x52c   : > { %4911 = vmatpush.bf16.msrb.mxu3 %v10085_v56  ;;  %v9920_v56 = vld [vmem:[#allocation22 + $0x80] sm:$0xf]  ;;  %4901 = vmatpush.bf16.msra.mxu0 %v9953_v2  ;;  %v10097_v27 = vor.u32 %v12014_v7, %v10096_v31  ;;  %v10106_v2 = vld [vmem:[#allocation22 + $0x1f8] sm:$0xf0]  ;;  %v9938_v31 = vld [vmem:[#allocation22 + $0xb0] sm:$0xf0] }
 0x52d   : > { %v9921_v13 = vor.u32 %v11972_v18, %v9920_v56  ;;  %4943 = vmatpush.bf16.msrb.mxu2 %v9965_v19  ;;  %v12006_v56 = vld [vmem:[#allocation22 + $0x1ac] sm:$0xf0]  ;;  %v12002_v18 = vld [vmem:[#allocation22 + $0x194] sm:$0xf]  ;;  %v10072_v19 = vld [vmem:[#allocation22 + $0x198] sm:$0xf] }
 0x530   : > { %4912 = vmatpush.bf16.msrb.mxu3 %v10053_v29  ;;  %4902 = vmatpush.bf16.msra.mxu0 %v9921_v13  ;;  %v11994_v13 = vld [vmem:[#allocation22 + $0x154] sm:$0xf] }
 0x534   : > { %4913 = vmatpush.bf16.msrb.mxu3 %v10021_v9  ;;  %4903 = vmatpush.bf16.msra.mxu0 %v9889_v21 }
 0x538   : > { %4914 = vmatpush.bf16.msrb.mxu3 %v9989_v20  ;;  %v9861_v20 = vor.u32 %v11952_v54, %v9858_v52  ;;  %v11978_v54 = vld [vmem:[#allocation22 + $0xd4] sm:$0xf]  ;;  %v11983_v52 = vld [vmem:[#allocation22 + $0xf4] sm:$0xf0] }
 0x53c   : > { %4915 = vmatpush.bf16.msrb.mxu3 %v9957_v38 }
 0x578   : > { %v13877_v30 = vpop.permute.xlu2 %4398 }
 0x579   : > { %v4403_v29 = vmul.f32 %v4401_v0, %v13877_v30  ;;  %v9893_v30 = vor.u32 %v11960_v51, %v9890_v35  ;;  %v10041_v51 = vor.u32 %v11999_v11, %v10040_v34 }
 0x581   : > { %v4419_v22 = vpop.permute.xlu2 %4418 }
 0x582   : > { %v4426_v24 = vmul.f32 %v4425_v63, %v4419_v22  ;;  %v12015_v22 = vld [vmem:[#allocation22 + $0x1f4] sm:$0xf0] }
 0x583   : > { %v10105_v17 = vor.u32 %v12015_v22, %v10104_v41  ;;  %v11971_v41 = vld [vmem:[#allocation22 + $0x9c] sm:$0xf] }
 0x58a   : > { %v4394_v49 = vpop.permute.xlu1 %4393  ;;  %v4406_v50 = vpop.permute.xlu0 %4405 }
 0x58b   : > { %v4413_v3 = vmul.f32 %v4412_v44, %v4406_v50  ;;  %v4402_v4 = vmul.f32 %v4401_v0, %v4394_v49  ;;  %v9922_v49 = vld [vmem:[#allocation22 + $0xa0] sm:$0xf0]  ;;  %v9898_v50 = vld [vmem:[#allocation22 + $0x68] sm:$0xf0] }
 0x58c   : > { %v9925_v33 = vor.u32 %v11968_v23, %v9922_v49  ;;  %v9901_v5 = vor.u32 %v11961_v10, %v9898_v50  ;;  %v10065_v23 = vor.u32 %v12006_v56, %v10064_v15  ;;  %v12007_v49 = vld [vmem:[#allocation22 + $0x1b4] sm:$0xf0]  ;;  %v10002_v10 = vld [vmem:[#allocation22 + $0x130] sm:$0xf0] }
 0x58d   : > { %v4415_v62 = vadd.f32 %v4413_v3, %v4402_v4  ;;  %v9857_v3 = vor.u32 %v11956_v53, %v9856_v42  ;;  %v10073_v37 = vor.u32 %v12007_v49, %v10072_v19  ;;  %v10008_v50 = vld [vmem:[#allocation22 + $0x118] sm:$0xf]  ;;  %v9968_v53 = vld [vmem:[#allocation22 + $0xd0] sm:$0xf]  ;;  %v9906_v15 = vld [vmem:[#allocation22 + $0x70] sm:$0xf0] }
 0x58e   : > { %4916 = vmatpush.bf16.msrb.mxu3 %v9925_v33  ;;  %v10034_v33 = vld [vmem:[#allocation22 + $0x170] sm:$0xf0]  ;;  %v9912_v56 = vld [vmem:[#allocation22 + $0x58] sm:$0xf]  ;;  %v9914_v19 = vld [vmem:[#allocation22 + $0x78] sm:$0xf0] }
 0x58f   : > { %v4428_v48 = vadd.f32 %v4426_v24, %v4415_v62  ;;  %4904 = vmatpush.bf16.msra.mxu0 %v9857_v3  ;;  %v12011_v62 = vld [vmem:[#allocation22 + $0x1dc] sm:$0xf]  ;;  %v10066_v24 = vld [vmem:[#allocation22 + $0x1b0] sm:$0xf0]  ;;  %v10037_v1 = vor.u32 %v11994_v13, %v10034_v33  ;;  %v11959_v13 = vld [vmem:[#allocation22 + $0x34] sm:$0xf0] }
 0x590   : > { %v10109_v38 = vor.u32 %v12011_v62, %v10106_v2  ;;  %v10069_v25 = vor.u32 %v12002_v18, %v10066_v24  ;;  %v11979_v3 = vld [vmem:[#allocation22 + $0xdc] sm:$0xf]  ;;  %v11966_v62 = vld [vmem:[#allocation22 + $0x6c] sm:$0xf0] }
 0x591   : > { %v4434_v9 = vadd.f32 %v12609_v28, %v4428_v48  ;;  %v11998_v48 = vld [vmem:[#allocation22 + $0x16c] sm:$0xf0]  ;;  %v11963_v24 = vld [vmem:[#allocation22 + $0x5c] sm:$0xf] }
 0x592   : > { %4917 = vmatpush.bf16.msrb.mxu3 %v9893_v30  ;;  %v11987_v30 = vld [vmem:[#allocation22 + $0x11c] sm:$0xf] }
 0x593   : > { %v4410_v16 = vpop.permute.xlu1 %4409  ;;  %v4436_v4 = vmax.f32 %v4434_v9, 0.0  ;;  %4953 = vmatpush.bf16.msrb.mxu0 %v10097_v27  ;;  %v11991_v9 = vld [vmem:[#allocation22 + $0x134] sm:$0xf0]  ;;  %v10013_v42 = vor.u32 %v11987_v30, %v10010_v40  ;;  %v9882_v33 = vld [vmem:[#allocation22 + $0x38] sm:$0xf0] }
 0x594   : > { %v4414_v26 = vmul.f32 %v4412_v44, %v4410_v16  ;;  %v9933_v44 = vor.u32 %v11969_v61, %v9930_v47  ;;  %v9865_v16 = vor.u32 %v11957_v60, %v9864_v55  ;;  %v10074_v61 = vld [vmem:[#allocation22 + $0x1b8] sm:$0xf0]  ;;  %v9970_v60 = vld [vmem:[#allocation22 + $0xf0] sm:$0xf0]  ;;  %v9944_v27 = vld [vmem:[#allocation22 + $0x98] sm:$0xf] }
 0x595   : > { %v9945_v22 = vor.u32 %v11975_v32, %v9944_v27  ;;  %v10170_v30 = vld [vmem:[%s14268_s20 + $0x78] sm:$0xf0]  ;;  %v10112_v32 = vld [vmem:[%s14268_s20] sm:$0xf] }
 0x596   : > { %v4416_v43 = vadd.f32 %v4414_v26, %v4403_v29  ;;  %4944 = vmatpush.bf16.msrb.mxu2 %v9933_v44  ;;  %4932 = vmatpush.bf16.msra.mxu1 %v9865_v16  ;;  %v12003_v26 = vld [vmem:[#allocation22 + $0x19c] sm:$0xf] }
 0x597   : > { %4918 = vmatpush.bf16.msrb.mxu3 %v9861_v20  ;;  %4954 = vmatpush.bf16.msrb.mxu0 %v10065_v23  ;;  %v10077_v47 = vor.u32 %v12003_v26, %v10074_v61  ;;  %v10042_v44 = vld [vmem:[#allocation22 + $0x178] sm:$0xf0]  ;;  %v11974_v20 = vld [vmem:[#allocation22 + $0xac] sm:$0xf0]  ;;  %v11967_v23 = vld [vmem:[#allocation22 + $0x74] sm:$0xf0] }
 0x598   : > { %v11958_v26 = vld [vmem:[#allocation22 + $0x2c] sm:$0xf0]  ;;  %v11954_v61 = vld [vmem:[#allocation22 + $0x14] sm:$0xf] }
 0x59a   : > { %4945 = vmatpush.bf16.msrb.mxu2 %v9901_v5  ;;  %4981 = vmatpush.bf16.msrb.mxu1 %v10105_v17  ;;  %v11982_v5 = vld [vmem:[#allocation22 + $0xec] sm:$0xf0] }
 0x59b   : > { %v9969_v55 = vor.u32 %v11982_v5, %v9968_v53  ;;  %v9904_v17 = vld [vmem:[#allocation22 + $0x50] sm:$0xf]  ;;  %v10144_v5 = vld [vmem:[%s14268_s20 + $0x40] sm:$0xf] }
 0x59c   : > { %v4423_v6 = vpop.permute.xlu1 %4422  ;;  %v9905_v18 = vor.u32 %v11966_v62, %v9904_v17  ;;  %v10114_v17 = vld [vmem:[%s14268_s20 + $0x10] sm:$0xf0]  ;;  %v12017_v62 = vld [vmem:[%s14268_s20 + $0xc] sm:$0xf] }
 0x59d   : > { %v4427_v46 = vmul.f32 %v4425_v63, %v4423_v6  ;;  %v9866_v63 = vld [vmem:[#allocation22 + $0x28] sm:$0xf0]  ;;  %v11995_v6 = vld [vmem:[#allocation22 + $0x15c] sm:$0xf] }
 0x59e   : > { %v9869_v45 = vor.u32 %v11953_v57, %v9866_v63  ;;  %4982 = vmatpush.bf16.msrb.mxu1 %v10073_v37  ;;  %v10045_v35 = vor.u32 %v11995_v6, %v10042_v44  ;;  %v9973_v57 = vor.u32 %v11978_v54, %v9970_v60  ;;  %v9872_v37 = vld [vmem:[#allocation22 + $0x10] sm:$0xf]  ;;  %v12610_v44 = vld [vmem:[#allocation20] ss:$0 sm:$0xff] }
 0x59f   : > { %v4429_v0 = vadd.f32 %v4427_v46, %v4416_v43  ;;  %v11986_v43 = vld [vmem:[#allocation22 + $0x114] sm:$0xf]  ;;  %v10001_v46 = vor.u32 %v11990_v39, %v10000_v36  ;;  %v9873_v34 = vor.u32 %v11958_v26, %v9872_v37  ;;  %v12024_v60 = vld [vmem:[%s14268_s20 + $0x44] sm:$0xf]  ;;  %v10420_v26 = vld [vmem:[#allocation23 + $0x1e0] sm:$0xf] }
 0x5a0   : > { %4946 = vmatpush.bf16.msrb.mxu2 %v9869_v45  ;;  %v10005_v21 = vor.u32 %v11986_v43, %v10002_v10  ;;  %v11970_v45 = vld [vmem:[#allocation22 + $0x94] sm:$0xf]  ;;  %v10160_v43 = vld [vmem:[%s14268_s20 + $0x60] sm:$0xf]  ;;  %v12028_v10 = vld [vmem:[%s14268_s20 + $0x64] sm:$0xf] }
 0x5a1   : > { %v4435_v8 = vadd.f32 %v12609_v28, %v4429_v0  ;;  %v10032_v28 = vld [vmem:[#allocation22 + $0x150] sm:$0xf]  ;;  %v10009_v0 = vor.u32 %v11991_v9, %v10008_v50  ;;  %v9941_v59 = vor.u32 %v11970_v45, %v9938_v31  ;;  %v10162_v50 = vld [vmem:[%s14268_s20 + $0x70] sm:$0xf0]  ;;  %v12021_v31 = vld [vmem:[%s14268_s20 + $0x2c] sm:$0xf] }
 0x5a2   : > { %v10033_v29 = vor.u32 %v11998_v48, %v10032_v28  ;;  %4983 = vmatpush.bf16.msrb.mxu1 %v10041_v51  ;;  %v9874_v28 = vld [vmem:[#allocation22 + $0x30] sm:$0xf0]  ;;  %v9880_v48 = vld [vmem:[#allocation22 + $0x18] sm:$0xf]  ;;  %v10165_v53 = vor.u32 %v12028_v10, %v10162_v50  ;;  %v10130_v45 = vld [vmem:[%s14268_s20 + $0x30] sm:$0xf0] }
 0x5a3   : > { %v4437_v14 = vmax.f32 %v4435_v8, 0.0  ;;  %v9976_v8 = vld [vmem:[#allocation22 + $0xd8] sm:$0xf]  ;;  %v9877_v11 = vor.u32 %v11954_v61, %v9874_v28  ;;  %v12062_v37 = vld [vmem:[#allocation23 + $0xec] sm:$0xf0] }
 0x5a4   : > { %4995 = vmatpush.bf16.msra.mxu2 %v10109_v38  ;;  %4955 = vmatpush.bf16.msrb.mxu0 %v10033_v29  ;;  %v9977_v63 = vor.u32 %v11983_v52, %v9976_v8  ;;  %v11962_v38 = vld [vmem:[#allocation22 + $0x54] sm:$0xf]  ;;  %v11955_v29 = vld [vmem:[#allocation22 + $0x1c] sm:$0xf]  ;;  %v12054_v10 = vld [vmem:[#allocation23 + $0xac] sm:$0xf0] }
 0x5a5   : > { %v13889_v58 = vpack.c.bf16 %v4437_v14, %v4436_v4  ;;  %v9978_v4 = vld [vmem:[#allocation22 + $0xf8] sm:$0xf0]  ;;  %v9936_v14 = vld [vmem:[#allocation22 + $0x90] sm:$0xf]  ;;  %v9909_v49 = vor.u32 %v11962_v38, %v9906_v15  ;;  %v9885_v51 = vor.u32 %v11955_v29, %v9882_v33  ;;  %v12025_v52 = vld [vmem:[%s14268_s20 + $0x4c] sm:$0xf] }
 0x5a6   : > { %4984 = vmatpush.bf16.msrb.mxu1 %v10009_v0  ;;  %v9981_v16 = vor.u32 %v11979_v3, %v9978_v4  ;;  %v9937_v7 = vor.u32 %v11974_v20, %v9936_v14  ;;  %v12029_v0 = vld [vmem:[%s14268_s20 + $0x6c] sm:$0xf]  ;;  %v10146_v8 = vld [vmem:[%s14268_s20 + $0x50] sm:$0xf0]  ;;  %v10128_v4 = vld [vmem:[%s14268_s20 + $0x20] sm:$0xf] }
 0x5a7   : > { %9853 = vmatmul.msk.bf16.vlgmr.msra.gmra.mxu3 %vm1181_vm0, %v13889_v58  ;;  %v10173_v54 = vor.u32 %v12029_v0, %v10170_v30  ;;  %v10149_v3 = vor.u32 %v12024_v60, %v10146_v8  ;;  %v12020_v20 = vld [vmem:[%s14268_s20 + $0x24] sm:$0xf]  ;;  %v10136_v61 = vld [vmem:[%s14268_s20 + $0x28] sm:$0xf]  ;;  %v10676_v33 = vld [vmem:[#allocation23 + $0x3e0] sm:$0xf] }
 0x5a8   : > { %4967 = vmatpush.bf16.msra.mxu3 %v10101_v12  ;;  %4996 = vmatpush.bf16.msra.mxu2 %v10077_v47  ;;  %v9946_v12 = vld [vmem:[#allocation22 + $0xb8] sm:$0xf0]  ;;  %v9917_v47 = vor.u32 %v11963_v24, %v9914_v19  ;;  %v10133_v27 = vor.u32 %v12020_v20, %v10130_v45  ;;  %v10152_v19 = vld [vmem:[%s14268_s20 + $0x48] sm:$0xf]  ;;  %v10388_v0 = vld [vmem:[#allocation23 + $0x1a0] sm:$0xf] }
 0x5a9   : > { %4956 = vmatpush.bf16.msrb.mxu0 %v10001_v46  ;;  %v9949_v2 = vor.u32 %v11971_v41, %v9946_v12  ;;  %v12030_v46 = vld [vmem:[%s14268_s20 + $0x6c] sm:$0xf0]  ;;  %v12016_v12 = vld [vmem:[%s14268_s20 + $0x4] sm:$0xf]  ;;  %v10228_v45 = vld [vmem:[#allocation23 + $0x60] sm:$0xf] }
 0x5aa   : > { %4985 = vmatpush.bf16.msrb.mxu1 %v9977_v63  ;;  %v10117_v15 = vor.u32 %v12016_v12, %v10114_v17  ;;  %v12086_v30 = vld [vmem:[#allocation23 + $0x1ac] sm:$0xf0] }
 0x5ab   : > { %v12050_v60 = vld [vmem:[#allocation23 + $0x8c] sm:$0xf0] }
 0x5ac   : > { %4968 = vmatpush.bf16.msra.mxu3 %v10069_v25  ;;  %4997 = vmatpush.bf16.msra.mxu2 %v10045_v35  ;;  %v9913_v25 = vor.u32 %v11967_v23, %v9912_v56  ;;  %v12031_v23 = vld [vmem:[%s14268_s20 + $0x74] sm:$0xf0]  ;;  %v12146_v20 = vld [vmem:[#allocation23 + $0x38c] sm:$0xf0] }
 0x5ad   : > { %4957 = vmatpush.bf16.msrb.mxu0 %v9969_v55  ;;  %v12026_v55 = vld [vmem:[%s14268_s20 + $0x4c] sm:$0xf0]  ;;  %v12078_v17 = vld [vmem:[#allocation23 + $0x16c] sm:$0xf0] }
 0x5ae   : > { %4986 = vmatpush.bf16.msrb.mxu1 %v9945_v22  ;;  %v10145_v63 = vor.u32 %v12026_v55, %v10144_v5  ;;  %v12018_v22 = vld [vmem:[%s14268_s20 + $0xc] sm:$0xf0]  ;;  %v12150_v5 = vld [vmem:[#allocation23 + $0x3ac] sm:$0xf0]  ;;  %v10244_v55 = vld [vmem:[#allocation23 + $0x80] sm:$0xf] }
 0x5af   : > { %v10113_v38 = vor.u32 %v12018_v22, %v10112_v32  ;;  %v10356_v22 = vld [vmem:[#allocation23 + $0x160] sm:$0xf] }
 0x5b0   : > { %4969 = vmatpush.bf16.msra.mxu3 %v10037_v1  ;;  %4998 = vmatpush.bf16.msra.mxu2 %v10013_v42  ;;  %v9881_v1 = vor.u32 %v11959_v13, %v9880_v48  ;;  %v10161_v42 = vor.u32 %v12030_v46, %v10160_v43  ;;  %v12094_v48 = vld [vmem:[#allocation23 + $0x1ec] sm:$0xf0]  ;;  %v10260_v46 = vld [vmem:[#allocation23 + $0xa0] sm:$0xf] }
 0x5b1   : > { %4958 = vmatpush.bf16.msrb.mxu0 %v9937_v7  ;;  %v10138_v7 = vld [vmem:[%s14268_s20 + $0x38] sm:$0xf0]  ;;  %v10421_v29 = vor.u32 %v12094_v48, %v10420_v26  ;;  %v12154_v43 = vld [vmem:[#allocation23 + $0x3cc] sm:$0xf0]  ;;  %v10596_v26 = vld [vmem:[#allocation23 + $0x340] sm:$0xf] }
 0x5b2   : > { %4987 = vmatpush.bf16.msrb.mxu1 %v9913_v25  ;;  %v10141_v41 = vor.u32 %v12021_v31, %v10138_v7  ;;  %v10292_v25 = vld [vmem:[#allocation23 + $0xe0] sm:$0xf]  ;;  %v12046_v31 = vld [vmem:[#allocation23 + $0x6c] sm:$0xf0] }
 0x5b3   : > { %v10293_v28 = vor.u32 %v12062_v37, %v10292_v25  ;;  %v10229_v12 = vor.u32 %v12046_v31, %v10228_v45  ;;  %v12074_v37 = vld [vmem:[#allocation23 + $0x14c] sm:$0xf0]  ;;  %v11060_v31 = vld [vmem:[#allocation23 + $0x6e0] sm:$0xf] }
 0x5b4   : > { %4970 = vmatpush.bf16.msra.mxu3 %v10005_v21  ;;  %4999 = vmatpush.bf16.msra.mxu2 %v9981_v16  ;;  %v12022_v16 = vld [vmem:[%s14268_s20 + $0x2c] sm:$0xf0]  ;;  %v12114_v48 = vld [vmem:[#allocation23 + $0x28c] sm:$0xf0] }
 0x5b5   : > { %4959 = vmatpush.bf16.msrb.mxu0 %v9905_v18  ;;  %v10168_v18 = vld [vmem:[%s14268_s20 + $0x68] sm:$0xf] }
 0x5b6   : > { %4988 = vmatpush.bf16.msrb.mxu1 %v9881_v1  ;;  %v10169_v24 = vor.u32 %v12031_v23, %v10168_v18  ;;  %v10516_v18 = vld [vmem:[#allocation23 + $0x2a0] sm:$0xf]  ;;  %v12118_v23 = vld [vmem:[#allocation23 + $0x2ac] sm:$0xf0] }
 0x5b7   : > { %v12222_v45 = vld [vmem:[#allocation23 + $0x5ec] sm:$0xf0] }
 0x5b8   : > { %4971 = vmatpush.bf16.msra.mxu3 %v9973_v57  ;;  %5000 = vmatpush.bf16.msra.mxu2 %v9949_v2  ;;  %v10154_v57 = vld [vmem:[%s14268_s20 + $0x58] sm:$0xf0] }
 0x5b9   : > { %4960 = vmatpush.bf16.msrb.mxu0 %v9873_v34  ;;  %v10157_v14 = vor.u32 %v12025_v52, %v10154_v57  ;;  %v10122_v2 = vld [vmem:[%s14268_s20 + $0x18] sm:$0xf0]  ;;  %v12158_v34 = vld [vmem:[#allocation23 + $0x3ec] sm:$0xf0]  ;;  %v10548_v57 = vld [vmem:[#allocation23 + $0x2e0] sm:$0xf] }
 0x5ba   : > { %v10125_v56 = vor.u32 %v12017_v62, %v10122_v2  ;;  %v10677_v1 = vor.u32 %v12158_v34, %v10676_v33  ;;  %v10612_v62 = vld [vmem:[#allocation23 + $0x360] sm:$0xf]  ;;  %v12142_v2 = vld [vmem:[#allocation23 + $0x36c] sm:$0xf0] }
 0x5bb   : > { %v10484_v34 = vld [vmem:[#allocation23 + $0x260] sm:$0xf] }
 0x5bc   : > { %4972 = vmatpush.bf16.msra.mxu3 %v9941_v59  ;;  %5001 = vmatpush.bf16.msra.mxu2 %v9917_v47  ;;  %v10129_v59 = vor.u32 %v12022_v16, %v10128_v4  ;;  %v12023_v47 = vld [vmem:[%s14268_s20 + $0x34] sm:$0xf0]  ;;  %v10245_v4 = vor.u32 %v12050_v60, %v10244_v55 }
 0x5bd   : > { %v10137_v50 = vor.u32 %v12023_v47, %v10136_v61  ;;  %v10628_v16 = vld [vmem:[#allocation23 + $0x380] sm:$0xf]  ;;  %v12138_v61 = vld [vmem:[#allocation23 + $0x34c] sm:$0xf0]  ;;  %v10517_v47 = vor.u32 %v12118_v23, %v10516_v18 }
 0x5be   : > { %v10436_v55 = vld [vmem:[#allocation23 + $0x200] sm:$0xf]  ;;  %v12250_v18 = vld [vmem:[#allocation23 + $0x6cc] sm:$0xf0] }
 0x5bf   : > { %v11172_v23 = vld [vmem:[#allocation23 + $0x7c0] sm:$0xf] }
 0x5c0   : > { %4973 = vmatpush.bf16.msra.mxu3 %v9909_v49  ;;  %5002 = vmatpush.bf16.msra.mxu2 %v9885_v51  ;;  %v12027_v49 = vld [vmem:[%s14268_s20 + $0x54] sm:$0xf0]  ;;  %v12058_v51 = vld [vmem:[#allocation23 + $0xcc] sm:$0xf0] }
 0x5c1   : > { %v10153_v13 = vor.u32 %v12027_v49, %v10152_v19  ;;  %v10613_v19 = vor.u32 %v12142_v2, %v10612_v62  ;;  %v10340_v49 = vld [vmem:[#allocation23 + $0x140] sm:$0xf]  ;;  %v12218_v2 = vld [vmem:[#allocation23 + $0x5cc] sm:$0xf0] }
 0x5c2   : > { %v10916_v62 = vld [vmem:[#allocation23 + $0x5c0] sm:$0xf] }
 0x5c4   : > { %4974 = vmatpush.bf16.msra.mxu3 %v9877_v11  ;;  %v10276_v11 = vld [vmem:[#allocation23 + $0xc0] sm:$0xf] }
 0x62a   : > { %v4487_v6 = vpop.f32.mrf.mxu3 }
 0x62b   : > { %v4488_v35 = vadd.f32 %v12610_v44, %v4487_v6  ;;  %v10404_v6 = vld [vmem:[#allocation23 + $0x1c0] sm:$0xf] }
 0x62d   : > { %v4492_v9 = vmax.f32 %v4488_v35, 0.0  ;;  %v10277_v35 = vor.u32 %v12058_v51, %v10276_v11  ;;  %v12110_v11 = vld [vmem:[#allocation23 + $0x26c] sm:$0xf0]  ;;  %v10468_v51 = vld [vmem:[#allocation23 + $0x240] sm:$0xf] }
 0x632   : > { %v4489_v36 = vpop.f32.mrf.mxu3 }
 0x633   : > { %v4490_v39 = vadd.f32 %v12610_v44, %v4489_v36  ;;  %v12090_v44 = vld [vmem:[#allocation23 + $0x1cc] sm:$0xf0] }
 0x634   : > { %v10405_v36 = vor.u32 %v12090_v44, %v10404_v6  ;;  %v12106_v6 = vld [vmem:[#allocation23 + $0x24c] sm:$0xf0] }
 0x635   : > { %v4493_v21 = vmax.f32 %v4490_v39, 0.0  ;;  %v10660_v39 = vld [vmem:[#allocation23 + $0x3c0] sm:$0xf]  ;;  %v10469_v44 = vor.u32 %v12106_v6, %v10468_v51  ;;  %v12178_v51 = vld [vmem:[#allocation23 + $0x48c] sm:$0xf0] }
 0x636   : > { %v10884_v6 = vld [vmem:[#allocation23 + $0x580] sm:$0xf] }
 0x637   : > { %v4494_v40 = vpack.c.bf16 %v4493_v21, %v4492_v9  ;;  %v10120_v9 = vld [vmem:[%s14268_s20 + $0x8] sm:$0xf]  ;;  %v10661_v21 = vor.u32 %v12154_v43, %v10660_v39  ;;  %v10324_v39 = vld [vmem:[#allocation23 + $0x120] sm:$0xf] }
 0x639   : > { %4905 = vmatmul.bf16.vlgmr.msra.gmra.mxu0 %v4494_v40  ;;  %4919 = vmatmul.bf16.vlgmr.msrb.gmra.mxu3 %v4494_v40 }
 0x63a   : > { %4933 = vmatmul.bf16.vlgmr.msra.gmra.mxu1 %v4494_v40  ;;  %4947 = vmatmul.bf16.vlgmr.msrb.gmra.mxu2 %v4494_v40 }
 0x63b   : > { %5197 = vmatpush.bf16.msra.mxu0 %v10161_v42  ;;  %5211 = vmatpush.bf16.msrb.mxu3 %v10165_v53  ;;  %v10261_v42 = vor.u32 %v12054_v10, %v10260_v46  ;;  %v10644_v53 = vld [vmem:[#allocation23 + $0x3a0] sm:$0xf]  ;;  %v12070_v46 = vld [vmem:[#allocation23 + $0x12c] sm:$0xf0] }
 0x63c   : > { %5239 = vmatpush.bf16.msra.mxu1 %v10173_v54  ;;  %6795 = vmatpush.bf16.msrb.mxu2 %v10293_v28  ;;  %v10389_v54 = vor.u32 %v12086_v30, %v10388_v0  ;;  %v10645_v8 = vor.u32 %v12150_v5, %v10644_v53  ;;  %v10500_v28 = vld [vmem:[#allocation23 + $0x280] sm:$0xf]  ;;  %v12134_v30 = vld [vmem:[#allocation23 + $0x32c] sm:$0xf0] }
 0x63d   : > { %v10501_v33 = vor.u32 %v12114_v48, %v10500_v28  ;;  %v10452_v10 = vld [vmem:[#allocation23 + $0x220] sm:$0xf]  ;;  %v12246_v48 = vld [vmem:[#allocation23 + $0x6ac] sm:$0xf0] }
 0x63e   : > { %v10580_v0 = vld [vmem:[#allocation23 + $0x320] sm:$0xf] }
 0x63f   : > { %5198 = vmatpush.bf16.msra.mxu0 %v10145_v63  ;;  %5212 = vmatpush.bf16.msrb.mxu3 %v10149_v3  ;;  %v12126_v63 = vld [vmem:[#allocation23 + $0x2ec] sm:$0xf0]  ;;  %v10372_v3 = vld [vmem:[#allocation23 + $0x180] sm:$0xf] }
 0x640   : > { %5240 = vmatpush.bf16.msra.mxu1 %v10157_v14  ;;  %6796 = vmatpush.bf16.msrb.mxu2 %v10277_v35  ;;  %v12082_v14 = vld [vmem:[#allocation23 + $0x18c] sm:$0xf0]  ;;  %v10549_v7 = vor.u32 %v12126_v63, %v10548_v57  ;;  %v10196_v35 = vld [vmem:[#allocation23 + $0x20] sm:$0xf] }
 0x641   : > { %v10373_v32 = vor.u32 %v12082_v14, %v10372_v3  ;;  %v10308_v53 = vld [vmem:[#allocation23 + $0x100] sm:$0xf]  ;;  %v12130_v57 = vld [vmem:[#allocation23 + $0x30c] sm:$0xf0] }
 0x642   : > { %v12190_v14 = vld [vmem:[#allocation23 + $0x4ec] sm:$0xf0]  ;;  %v11028_v28 = vld [vmem:[#allocation23 + $0x6a0] sm:$0xf] }
 0x643   : > { %5199 = vmatpush.bf16.msra.mxu0 %v10129_v59  ;;  %5213 = vmatpush.bf16.msrb.mxu3 %v10133_v27  ;;  %v10532_v59 = vld [vmem:[#allocation23 + $0x2c0] sm:$0xf]  ;;  %v12122_v27 = vld [vmem:[#allocation23 + $0x2cc] sm:$0xf0] }
 0x644   : > { %5241 = vmatpush.bf16.msra.mxu1 %v10141_v41  ;;  %6797 = vmatpush.bf16.msrb.mxu2 %v10261_v42  ;;  %v10629_v41 = vor.u32 %v12146_v20, %v10628_v16  ;;  %v10180_v42 = vld [vmem:[#allocation23] sm:$0xf] }
 0x645   : > { %v10932_v16 = vld [vmem:[#allocation23 + $0x5e0] sm:$0xf] }
 0x647   : > { %5200 = vmatpush.bf16.msra.mxu0 %v10113_v38  ;;  %5214 = vmatpush.bf16.msrb.mxu3 %v10117_v15  ;;  %v10212_v38 = vld [vmem:[#allocation23 + $0x40] sm:$0xf]  ;;  %v12042_v15 = vld [vmem:[#allocation23 + $0x4c] sm:$0xf0] }
 0x648   : > { %5242 = vmatpush.bf16.msra.mxu1 %v10125_v56  ;;  %6798 = vmatpush.bf16.msrb.mxu2 %v10245_v4  ;;  %v10533_v56 = vor.u32 %v12122_v27, %v10532_v59  ;;  %v10213_v25 = vor.u32 %v12042_v15, %v10212_v38  ;;  %v10804_v4 = vld [vmem:[#allocation23 + $0x4e0] sm:$0xf]  ;;  %v10933_v59 = vor.u32 %v12222_v45, %v10932_v16  ;;  %v12234_v16 = vld [vmem:[#allocation23 + $0x64c] sm:$0xf0] }
 0x649   : > { %4961 = vmatmul.bf16.vlgmr.msrb.gmra.mxu0 %v4494_v40  ;;  %4975 = vmatmul.bf16.vlgmr.msra.gmra.mxu3 %v4494_v40  ;;  %v10805_v20 = vor.u32 %v12190_v14, %v10804_v4  ;;  %v10917_v15 = vor.u32 %v12218_v2, %v10916_v62  ;;  %v12202_v4 = vld [vmem:[#allocation23 + $0x54c] sm:$0xf0]  ;;  %v10980_v14 = vld [vmem:[#allocation23 + $0x640] sm:$0xf] }
 0x64a   : > { %4989 = vmatmul.bf16.vlgmr.msrb.gmra.mxu1 %v4494_v40  ;;  %5003 = vmatmul.bf16.vlgmr.msra.gmra.mxu2 %v4494_v40  ;;  %v12019_v40 = vld [vmem:[%s14268_s20 + $0x14] sm:$0xf0]  ;;  %v10981_v45 = vor.u32 %v12234_v16, %v10980_v14  ;;  %v12230_v62 = vld [vmem:[#allocation23 + $0x62c] sm:$0xf0] }
 0x64b   : > { %5225 = vmatpush.bf16.msrb.mxu0 %v10169_v24  ;;  %6808 = vmatpush.bf16.msra.mxu3 %v10421_v29  ;;  %v10121_v52 = vor.u32 %v12019_v40, %v10120_v9  ;;  %v10357_v24 = vor.u32 %v12078_v17, %v10356_v22  ;;  %v10597_v29 = vor.u32 %v12138_v61, %v10596_v26  ;;  %v10788_v22 = vld [vmem:[#allocation23 + $0x4c0] sm:$0xf]  ;;  %v12186_v17 = vld [vmem:[#allocation23 + $0x4cc] sm:$0xf0] }
 0x64c   : > { %6834 = vmatpush.bf16.msrb.mxu1 %v10677_v1  ;;  %6799 = vmatpush.bf16.msrb.mxu2 %v10229_v12  ;;  %v10485_v1 = vor.u32 %v12110_v11, %v10484_v34  ;;  %v10325_v9 = vor.u32 %v12070_v46, %v10324_v39  ;;  %v10581_v40 = vor.u32 %v12134_v30, %v10580_v0  ;;  %v10900_v26 = vld [vmem:[#allocation23 + $0x5a0] sm:$0xf]  ;;  %v12278_v34 = vld [vmem:[#allocation23 + $0x7ac] sm:$0xf0] }
 0x64d   : > { %v10789_v38 = vor.u32 %v12186_v17, %v10788_v22  ;;  %v12242_v39 = vld [vmem:[#allocation23 + $0x68c] sm:$0xf0]  ;;  %v10964_v17 = vld [vmem:[#allocation23 + $0x620] sm:$0xf] }
 0x64e   : > { %v12174_v0 = vld [vmem:[#allocation23 + $0x46c] sm:$0xf0] }
 0x64f   : > { %5226 = vmatpush.bf16.msrb.mxu0 %v10153_v13  ;;  %6809 = vmatpush.bf16.msra.mxu3 %v10405_v36  ;;  %v10341_v13 = vor.u32 %v12074_v37, %v10340_v49  ;;  %v12038_v36 = vld [vmem:[#allocation23 + $0x2c] sm:$0xf0] }
 0x650   : > { %6835 = vmatpush.bf16.msrb.mxu1 %v10661_v21  ;;  %6800 = vmatpush.bf16.msrb.mxu2 %v10213_v25  ;;  %v10197_v43 = vor.u32 %v12038_v36, %v10196_v35  ;;  %v10772_v25 = vld [vmem:[#allocation23 + $0x4a0] sm:$0xf]  ;;  %v12182_v37 = vld [vmem:[#allocation23 + $0x4ac] sm:$0xf0] }
 0x651   : > { %v10773_v61 = vor.u32 %v12182_v37, %v10772_v25  ;;  %v12210_v35 = vld [vmem:[#allocation23 + $0x58c] sm:$0xf0]  ;;  %v11012_v36 = vld [vmem:[#allocation23 + $0x680] sm:$0xf] }
 0x652   : > { %v11013_v46 = vor.u32 %v12242_v39, %v11012_v36  ;;  %v10820_v25 = vld [vmem:[#allocation23 + $0x500] sm:$0xf] }
 0x653   : > { %5227 = vmatpush.bf16.msrb.mxu0 %v10137_v50  ;;  %6810 = vmatpush.bf16.msra.mxu3 %v10389_v54  ;;  %v12102_v50 = vld [vmem:[#allocation23 + $0x22c] sm:$0xf0] }
 0x654   : > { %6836 = vmatpush.bf16.msrb.mxu1 %v10645_v8  ;;  %v10453_v21 = vor.u32 %v12102_v50, %v10452_v10  ;;  %6801 = vmatpush.bf16.msrb.mxu2 %v10197_v43  ;;  %v12066_v54 = vld [vmem:[#allocation23 + $0x10c] sm:$0xf0]  ;;  %v10885_v43 = vor.u32 %v12210_v35, %v10884_v6  ;;  %v11140_v10 = vld [vmem:[#allocation23 + $0x780] sm:$0xf] }
 0x655   : > { %v10309_v60 = vor.u32 %v12066_v54, %v10308_v53  ;;  %v12098_v8 = vld [vmem:[#allocation23 + $0x20c] sm:$0xf0]  ;;  %v11124_v54 = vld [vmem:[#allocation23 + $0x760] sm:$0xf] }
 0x656   : > { %v10437_v63 = vor.u32 %v12098_v8, %v10436_v55  ;;  %v12274_v50 = vld [vmem:[#allocation23 + $0x78c] sm:$0xf0] }
 0x657   : > { %5228 = vmatpush.bf16.msrb.mxu0 %v10121_v52  ;;  %6811 = vmatpush.bf16.msra.mxu3 %v10373_v32  ;;  %v10564_v52 = vld [vmem:[#allocation23 + $0x300] sm:$0xf]  ;;  %v12270_v55 = vld [vmem:[#allocation23 + $0x76c] sm:$0xf0] }
 0x658   : > { %6837 = vmatpush.bf16.msrb.mxu1 %v10629_v41  ;;  %v10565_v3 = vor.u32 %v12130_v57, %v10564_v52  ;;  %v11188_v32 = vld [vmem:[#allocation23 + $0x7e0] sm:$0xf]  ;;  %v12286_v41 = vld [vmem:[#allocation23 + $0x7ec] sm:$0xf0]  ;;  %v11125_v8 = vor.u32 %v12270_v55, %v11124_v54 }
 0x659   : > { %10174 = vmatmul.msk.bf16.vlgmr.msra.gmra.mxu0 %vm1181_vm0, %v13889_v58  ;;  %10175 = vmatmul.msk.bf16.vlgmr.msrb.gmra.mxu3 %vm1181_vm0, %v13889_v58  ;;  %v11189_v12 = vor.u32 %v12286_v41, %v11188_v32  ;;  %v10724_v52 = vld [vmem:[#allocation23 + $0x440] sm:$0xf]  ;;  %v12170_v57 = vld [vmem:[#allocation23 + $0x44c] sm:$0xf0] }
 0x65a   : > { %10177 = vmatmul.msk.bf16.vlgmr.msra.gmra.mxu1 %vm1181_vm0, %v13889_v58  ;;  %v12166_v32 = vld [vmem:[#allocation23 + $0x42c] sm:$0xf0]  ;;  %v10836_v41 = vld [vmem:[#allocation23 + $0x520] sm:$0xf] }
 0x65b   : > { %6821 = vmatpush.bf16.msra.mxu0 %v10549_v7  ;;  %6812 = vmatpush.bf16.msra.mxu3 %v10357_v24  ;;  %v12254_v7 = vld [vmem:[#allocation23 + $0x6ec] sm:$0xf0] }
 0x65c   : > { %6838 = vmatpush.bf16.msrb.mxu1 %v10613_v19  ;;  %v11061_v27 = vor.u32 %v12254_v7, %v11060_v31  ;;  %v12282_v19 = vld [vmem:[#allocation23 + $0x7cc] sm:$0xf0]  ;;  %v11108_v31 = vld [vmem:[#allocation23 + $0x740] sm:$0xf] }
 0x65d   : > { %v11173_v49 = vor.u32 %v12282_v19, %v11172_v23  ;;  %v12266_v7 = vld [vmem:[#allocation23 + $0x74c] sm:$0xf0]  ;;  %v10692_v19 = vld [vmem:[#allocation23 + $0x400] sm:$0xf] }
 0x65f   : > { %6822 = vmatpush.bf16.msra.mxu0 %v10533_v56  ;;  %6813 = vmatpush.bf16.msra.mxu3 %v10341_v13  ;;  %v11044_v56 = vld [vmem:[#allocation23 + $0x6c0] sm:$0xf] }
 0x660   : > { %6839 = vmatpush.bf16.msrb.mxu1 %v10597_v29  ;;  %v11045_v24 = vor.u32 %v12250_v18, %v11044_v56  ;;  %v11029_v29 = vor.u32 %v12246_v48, %v11028_v28  ;;  %v11092_v56 = vld [vmem:[#allocation23 + $0x720] sm:$0xf]  ;;  %v12262_v18 = vld [vmem:[#allocation23 + $0x72c] sm:$0xf0] }
 0x663   : > { %6823 = vmatpush.bf16.msra.mxu0 %v10517_v47  ;;  %6814 = vmatpush.bf16.msra.mxu3 %v10325_v9  ;;  %v12214_v47 = vld [vmem:[#allocation23 + $0x5ac] sm:$0xf0]  ;;  %v11141_v9 = vor.u32 %v12274_v50, %v11140_v10 }
 0x664   : > { %6840 = vmatpush.bf16.msrb.mxu1 %v10581_v40  ;;  %v10901_v13 = vor.u32 %v12214_v47, %v10900_v26  ;;  %v10868_v40 = vld [vmem:[#allocation23 + $0x560] sm:$0xf]  ;;  %v12194_v26 = vld [vmem:[#allocation23 + $0x50c] sm:$0xf0] }
 0x665   : > { %v12226_v47 = vld [vmem:[#allocation23 + $0x60c] sm:$0xf0]  ;;  %v10821_v28 = vor.u32 %v12194_v26, %v10820_v25  ;;  %v14018_v26 = vld [vmem:[#allocation23 + $0x2e4] sm:$0xf] }
 0x667   : > { %6824 = vmatpush.bf16.msra.mxu0 %v10501_v33  ;;  %6815 = vmatpush.bf16.msra.mxu3 %v10309_v60  ;;  %v11156_v33 = vld [vmem:[#allocation23 + $0x7a0] sm:$0xf] }
 0x668   : > { %6841 = vmatpush.bf16.msrb.mxu1 %v10565_v3  ;;  %v11157_v11 = vor.u32 %v12278_v34, %v11156_v33  ;;  %v10725_v3 = vor.u32 %v12170_v57, %v10724_v52  ;;  %v14000_v34 = vld [vmem:[%s14266_s18] sm:$0xff] }
 0x669   : > { %10176 = vmatmul.msk.bf16.vlgmr.msrb.gmra.mxu0 %vm1181_vm0, %v13889_v58  ;;  %v12034_v58 = vld [vmem:[#allocation23 + $0xc] sm:$0xf0]  ;;  %v4564_v6 = vperm.slane %v14000_v34, 3  ;;  %v4561_v35 = vperm.slane %v14000_v34, 0  ;;  %v4563_v39 = vperm.slane %v14000_v34, 2 }
 0x66a   : > { %v10181_v5 = vor.u32 %v12034_v58, %v10180_v42  ;;  %v12206_v42 = vld [vmem:[#allocation23 + $0x56c] sm:$0xf0]  ;;  %v10996_v58 = vld [vmem:[#allocation23 + $0x660] sm:$0xf] }
 0x66b   : > { %6825 = vmatpush.bf16.msra.mxu0 %v10485_v1  ;;  %6860 = vmatpush.bf16.msrb.mxu3 %v10933_v59  ;;  %v10756_v1 = vld [vmem:[#allocation23 + $0x480] sm:$0xf]  ;;  %v10869_v53 = vor.u32 %v12206_v42, %v10868_v40  ;;  %v11109_v59 = vor.u32 %v12266_v7, %v11108_v31  ;;  %v4565_v7 = vperm.slane %v14000_v34, 4 }
 0x66c   : > { %6802 = vmatpush.bf16.msrb.mxu2 %v10181_v5  ;;  %6886 = vmatpush.bf16.msra.mxu1 %v11189_v12  ;;  %v12238_v5 = vld [vmem:[#allocation23 + $0x66c] sm:$0xf0] }
 0x66d   : > { %v10997_v60 = vor.u32 %v12238_v5, %v10996_v58  ;;  %v12198_v12 = vld [vmem:[#allocation23 + $0x52c] sm:$0xf0] }
 0x66f   : > { %6826 = vmatpush.bf16.msra.mxu0 %v10469_v44  ;;  %6861 = vmatpush.bf16.msrb.mxu3 %v10917_v15  ;;  %v10757_v44 = vor.u32 %v12178_v51, %v10756_v1  ;;  %v10965_v15 = vor.u32 %v12230_v62, %v10964_v17  ;;  %v4562_v1 = vperm.slane %v14000_v34, 1 }
 0x670   : > { %6847 = vmatpush.bf16.msra.mxu2 %v10805_v20  ;;  %6887 = vmatpush.bf16.msra.mxu1 %v11173_v49  ;;  %v12162_v49 = vld [vmem:[#allocation23 + $0x40c] sm:$0xf0] }
 0x671   : > { %v10693_v37 = vor.u32 %v12162_v49, %v10692_v19 }
 0x673   : > { %6827 = vmatpush.bf16.msra.mxu0 %v10453_v21  ;;  %6862 = vmatpush.bf16.msrb.mxu3 %v10901_v13  ;;  %v10740_v21 = vld [vmem:[#allocation23 + $0x460] sm:$0xf] }
 0x674   : > { %6848 = vmatpush.bf16.msra.mxu2 %v10789_v38  ;;  %6888 = vmatpush.bf16.msra.mxu1 %v11157_v11  ;;  %v10741_v30 = vor.u32 %v12174_v0, %v10740_v21  ;;  %v10837_v38 = vor.u32 %v12198_v12, %v10836_v41  ;;  %v11076_v13 = vld [vmem:[#allocation23 + $0x700] sm:$0xf]  ;;  %v4567_v41 = vperm.slane %v14000_v34, 6 }
 0x677   : > { %6828 = vmatpush.bf16.msra.mxu0 %v10437_v63  ;;  %6863 = vmatpush.bf16.msrb.mxu3 %v10885_v43  ;;  %v10852_v63 = vld [vmem:[#allocation23 + $0x540] sm:$0xf] }
 0x678   : > { %6849 = vmatpush.bf16.msra.mxu2 %v10773_v61  ;;  %6889 = vmatpush.bf16.msra.mxu1 %v11141_v9  ;;  %v10853_v20 = vor.u32 %v12202_v4, %v10852_v63  ;;  %v10948_v61 = vld [vmem:[#allocation23 + $0x600] sm:$0xf] }
 0x679   : > { %v10949_v48 = vor.u32 %v12226_v47, %v10948_v61  ;;  %v14020_v61 = vld [vmem:[#allocation23 + $0x2f0] sm:$0xf0] }
 0x67b   : > { %6873 = vmatpush.bf16.msrb.mxu0 %v11061_v27  ;;  %6864 = vmatpush.bf16.msrb.mxu3 %v10869_v53  ;;  %v10708_v27 = vld [vmem:[#allocation23 + $0x420] sm:$0xf] }
 0x67c   : > { %6850 = vmatpush.bf16.msra.mxu2 %v10757_v44  ;;  %6890 = vmatpush.bf16.msra.mxu1 %v11125_v8  ;;  %v10709_v22 = vor.u32 %v12166_v32, %v10708_v27  ;;  %v4566_v8 = vperm.slane %v14000_v34, 5 }
 0x67f   : > { %6874 = vmatpush.bf16.msrb.mxu0 %v11045_v24  ;;  %6865 = vmatpush.bf16.msrb.mxu3 %v10853_v20  ;;  %v11093_v24 = vor.u32 %v12262_v18, %v11092_v56 }
 0x680   : > { %6851 = vmatpush.bf16.msra.mxu2 %v10741_v30  ;;  %6891 = vmatpush.bf16.msra.mxu1 %v11109_v59  ;;  %v4568_v59 = vperm.slane %v14000_v34, 7 }
 0x683   : > { %6875 = vmatpush.bf16.msrb.mxu0 %v11029_v29  ;;  %6866 = vmatpush.bf16.msrb.mxu3 %v10837_v38  ;;  %v12258_v29 = vld [vmem:[#allocation23 + $0x70c] sm:$0xf0]  ;;  %v14010_v38 = vld [vmem:[#allocation23 + $0xe4] sm:$0xf] }
 0x684   : > { %6852 = vmatpush.bf16.msra.mxu2 %v10725_v3  ;;  %6892 = vmatpush.bf16.msra.mxu1 %v11093_v24  ;;  %v11077_v33 = vor.u32 %v12258_v29, %v11076_v13  ;;  %v14024_v13 = vld [vmem:[#allocation23 + $0x3e4] sm:$0xf]  ;;  %v14026_v29 = vld [vmem:[#allocation23 + $0x3f0] sm:$0xf0] }
 0x687   : > { %6876 = vmatpush.bf16.msrb.mxu0 %v11013_v46  ;;  %6867 = vmatpush.bf16.msrb.mxu3 %v10821_v28 }
 0x688   : > { %6853 = vmatpush.bf16.msra.mxu2 %v10709_v22  ;;  %6893 = vmatpush.bf16.msra.mxu1 %v11077_v33 }
 0x68b   : > { %6877 = vmatpush.bf16.msrb.mxu0 %v10997_v60 }
 0x68c   : > { %6854 = vmatpush.bf16.msra.mxu2 %v10693_v37  ;;  %v14016_v37 = vld [vmem:[#allocation23 + $0x1f0] sm:$0xf0] }
 0x68f   : > { %6878 = vmatpush.bf16.msrb.mxu0 %v10981_v45 }
 0x693   : > { %6879 = vmatpush.bf16.msrb.mxu0 %v10965_v15  ;;  %v14012_v15 = vld [vmem:[#allocation23 + $0xf0] sm:$0xf0] }
 0x697   : > { %6880 = vmatpush.bf16.msrb.mxu0 %v10949_v48  ;;  %v10297_v48 = vor.u32 %v14010_v38, %v14012_v15 }
 0x6b6   : > { %v4906_v2 = vpop.f32.mrf.mxu0 }
 0x6b7   : > { %v4934_v23 = vpop.f32.mrf.mxu1  ;;  %v4907_v10 = vadd.f32 %v4906_v2, %v4561_v35 }
 0x6b8   : > { %v4935_v50 = vadd.f32 %v4934_v23, %v4563_v39  ;;  %v14014_v23 = vld [vmem:[#allocation23 + $0x1e4] sm:$0xf] }
 0x6bc   : > { %v4920_v11 = vpop.f32.mrf.mxu3 }
 0x6bd   : > { %v4948_v51 = vpop.f32.mrf.mxu2  ;;  %v4921_v43 = vadd.f32 %v4920_v11, %v4562_v1 }
 0x6be   : > { %v4908_v44 = vpop.f32.mrf.mxu0  ;;  %v4949_v46 = vadd.f32 %v4948_v51, %v4564_v6 }
 0x6bf   : > { %v4936_v36 = vpop.f32.mrf.mxu1  ;;  %v5009_v21 = vpack.c.bf16 %v4921_v43, %v4907_v10  ;;  %v4909_v0 = vadd.f32 %v4908_v44, %v4561_v35 }
 0x6c0   : > { %v5010_v42 = vpack.c.bf16 %v4949_v46, %v4935_v50  ;;  %v4937_v58 = vadd.f32 %v4936_v36, %v4563_v39  ;;  %v10425_v36 = vor.u32 %v14014_v23, %v14016_v37  ;;  %v10553_v39 = vor.u32 %v14018_v26, %v14020_v61  ;;  %v12052_v61 = vld [vmem:[#allocation23 + $0xa4] sm:$0xf] }
 0x6c1   : > { %v5017_v52 = vunpack.c.l.bf16 %v5009_v21  ;;  %v5018_v57 = vunpack.c.h.bf16 %v5009_v21  ;;  %v10681_v50 = vor.u32 %v14024_v13, %v14026_v29 }
 0x6c2   : > { %v5019_v4 = vunpack.c.l.bf16 %v5010_v42  ;;  %v5020_v14 = vunpack.c.h.bf16 %v5010_v42 }
 0x6c4   : > { %v4922_v9 = vpop.f32.mrf.mxu3 }
 0x6c5   : > { %v4923_v30 = vadd.f32 %v4922_v9, %v4562_v1  ;;  %v4950_v40 = vpop.f32.mrf.mxu2 }
 0x6c6   : > { %v4951_v53 = vadd.f32 %v4950_v40, %v4564_v6  ;;  %v4962_v54 = vpop.f32.mrf.mxu0 }
 0x6c7   : > { %v5013_v5 = vpack.c.bf16 %v4923_v30, %v4909_v0  ;;  %v4990_v55 = vpop.f32.mrf.mxu1  ;;  %v4963_v49 = vadd.f32 %v4962_v54, %v4565_v7 }
 0x6c8   : > { %v5014_v60 = vpack.c.bf16 %v4951_v53, %v4937_v58  ;;  %v4991_v11 = vadd.f32 %v4990_v55, %v4567_v41 }
 0x6c9   : > { %v5025_v63 = vunpack.c.l.bf16 %v5013_v5  ;;  %v5026_v3 = vunpack.c.h.bf16 %v5013_v5 }
 0x6ca   : > { %v5027_v16 = vunpack.c.l.bf16 %v5014_v60  ;;  %v5028_v20 = vunpack.c.h.bf16 %v5014_v60 }
 0x6cb   : > { %v5033_v45 = vmax.f32 %v5017_v52, %v5025_v63  ;;  %v5040_v31 = vmax.f32 %v5018_v57, %v5026_v3 }
 0x6cc   : > { %v5047_v27 = vmax.f32 %v5019_v4, %v5027_v16  ;;  %v5054_v32 = vmax.f32 %v5020_v14, %v5028_v20  ;;  %v4976_v22 = vpop.f32.mrf.mxu3 }
 0x6cd   : > { %v5034_v12 = vrot.slane %v5033_v45, 4  ;;  %v5041_v17 = vrot.slane %v5040_v31, 4  ;;  %v4977_v62 = vadd.f32 %v4976_v22, %v4566_v8  ;;  %v5004_v2 = vpop.f32.mrf.mxu2  ;;  %v10278_v22 = vld [vmem:[#allocation23 + $0xd0] sm:$0xf0] }
 0x6ce   : > { %v5048_v56 = vrot.slane %v5047_v27, 4  ;;  %v5055_v18 = vrot.slane %v5054_v32, 4  ;;  %v5005_v25 = vadd.f32 %v5004_v2, %v4568_v59  ;;  %v4964_v51 = vpop.f32.mrf.mxu0  ;;  %v12088_v2 = vld [vmem:[#allocation23 + $0x1c4] sm:$0xf] }
 0x6cf   : > { %v5035_v24 = vmax.f32 %v5033_v45, %v5034_v12  ;;  %v5042_v19 = vmax.f32 %v5040_v31, %v5041_v17  ;;  %v5011_v1 = vpack.c.bf16 %v4977_v62, %v4963_v49  ;;  %v4992_v6 = vpop.f32.mrf.mxu1  ;;  %v4965_v0 = vadd.f32 %v4964_v51, %v4565_v7  ;;  %v12152_v49 = vld [vmem:[#allocation23 + $0x3c4] sm:$0xf] }
 0x6d0   : > { %v5049_v47 = vmax.f32 %v5047_v27, %v5048_v56  ;;  %v5056_v28 = vmax.f32 %v5054_v32, %v5055_v18  ;;  %v5012_v10 = vpack.c.bf16 %v5005_v25, %v4991_v11  ;;  %v4993_v30 = vadd.f32 %v4992_v6, %v4567_v41  ;;  %v10406_v56 = vld [vmem:[#allocation23 + $0x1d0] sm:$0xf0]  ;;  %v12120_v18 = vld [vmem:[#allocation23 + $0x2c4] sm:$0xf] }
 0x6d1   : > { %v5036_v33 = vrot.slane %v5035_v24, 2  ;;  %v5043_v34 = vrot.slane %v5042_v19, 2  ;;  %v5021_v53 = vunpack.c.l.bf16 %v5011_v1  ;;  %v5022_v52 = vunpack.c.h.bf16 %v5011_v1  ;;  %v10662_v25 = vld [vmem:[#allocation23 + $0x3d0] sm:$0xf0] }
 0x6d2   : > { %v5050_v44 = vrot.slane %v5049_v47, 2  ;;  %v5057_v35 = vrot.slane %v5056_v28, 2  ;;  %v5023_v63 = vunpack.c.l.bf16 %v5012_v10  ;;  %v5024_v16 = vunpack.c.h.bf16 %v5012_v10  ;;  %v10518_v10 = vld [vmem:[#allocation23 + $0x2b0] sm:$0xf0] }
 0x6d3   : > { %v5037_v43 = vmax.f32 %v5035_v24, %v5036_v33  ;;  %v5044_v46 = vmax.f32 %v5042_v19, %v5043_v34  ;;  %v10534_v19 = vld [vmem:[#allocation23 + $0x2d0] sm:$0xf0]  ;;  %v10409_v29 = vor.u32 %v12088_v2, %v10406_v56  ;;  %v12084_v34 = vld [vmem:[#allocation23 + $0x1a4] sm:$0xf]  ;;  %v10665_v6 = vor.u32 %v12152_v49, %v10662_v25 }
 0x6d4   : > { %v5051_v9 = vmax.f32 %v5049_v47, %v5050_v44  ;;  %v5058_v21 = vmax.f32 %v5056_v28, %v5057_v35  ;;  %v4978_v40 = vpop.f32.mrf.mxu3  ;;  %v10262_v33 = vld [vmem:[#allocation23 + $0xb0] sm:$0xf0]  ;;  %v10537_v51 = vor.u32 %v12120_v18, %v10534_v19  ;;  %v12116_v35 = vld [vmem:[#allocation23 + $0x2a4] sm:$0xf] }
 0x6d5   : > { %v5038_v42 = vrot.slane %v5037_v43, 1  ;;  %v5045_v58 = vrot.slane %v5044_v46, 1  ;;  %v4979_v5 = vadd.f32 %v4978_v40, %v4566_v8  ;;  %v5006_v54 = vpop.f32.mrf.mxu2  ;;  %v12056_v8 = vld [vmem:[#allocation23 + $0xc4] sm:$0xf]  ;;  %v10390_v44 = vld [vmem:[#allocation23 + $0x1b0] sm:$0xf0] }
 0x6d6   : > { %v5052_v55 = vrot.slane %v5051_v9, 1  ;;  %v5059_v60 = vrot.slane %v5058_v21, 1  ;;  %v5007_v57 = vadd.f32 %v5006_v54, %v4568_v59  ;;  %v10281_v13 = vor.u32 %v12056_v8, %v10278_v22  ;;  %v10374_v54 = vld [vmem:[#allocation23 + $0x190] sm:$0xf0]  ;;  %v12076_v8 = vld [vmem:[#allocation23 + $0x164] sm:$0xf] }
 0x6d7   : > { %v5015_v3 = vpack.c.bf16 %v4979_v5, %v4965_v0  ;;  %v5039_v4 = vmax.f32 %v5037_v43, %v5038_v42  ;;  %v5046_v14 = vmax.f32 %v5044_v46, %v5045_v58  ;;  %v10393_v40 = vor.u32 %v12084_v34, %v10390_v44  ;;  %v10358_v22 = vld [vmem:[#allocation23 + $0x170] sm:$0xf0]  ;;  %v12108_v18 = vld [vmem:[#allocation23 + $0x264] sm:$0xf] }
 0x6d8   : > { %v5016_v20 = vpack.c.bf16 %v5007_v57, %v4993_v30  ;;  %v5053_v45 = vmax.f32 %v5051_v9, %v5052_v55  ;;  %v5060_v31 = vmax.f32 %v5058_v21, %v5059_v60  ;;  %v12148_v9 = vld [vmem:[#allocation23 + $0x3a4] sm:$0xf]  ;;  %v10646_v21 = vld [vmem:[#allocation23 + $0x3b0] sm:$0xf0]  ;;  %v10265_v30 = vor.u32 %v12052_v61, %v10262_v33 }
 0x6d9   : > { %v5029_v7 = vunpack.c.l.bf16 %v5015_v3  ;;  %v5030_v27 = vunpack.c.h.bf16 %v5015_v3  ;;  %v14034_v32 = vpack.c.bf16 %v5039_v4, %v5039_v4  ;;  %v14036_v41 = vpack.c.bf16 %v5046_v14, %v5046_v14  ;;  %v12112_v55 = vld [vmem:[#allocation23 + $0x284] sm:$0xf]  ;;  %v10502_v57 = vld [vmem:[#allocation23 + $0x290] sm:$0xf0] }
 0x6da   : > { %v5031_v12 = vunpack.c.l.bf16 %v5016_v20  ;;  %v5032_v17 = vunpack.c.h.bf16 %v5016_v20  ;;  %v14038_v62 = vpack.c.bf16 %v5053_v45, %v5053_v45  ;;  %v14040_v59 = vpack.c.bf16 %v5060_v31, %v5060_v31  ;;  %v10630_v3 = vld [vmem:[#allocation23 + $0x390] sm:$0xf0]  ;;  %v12140_v49 = vld [vmem:[#allocation23 + $0x364] sm:$0xf] }
 0x6db   : > { %v5061_v23 = vmax.f32 %v5021_v53, %v5029_v7  ;;  %v5068_v24 = vmax.f32 %v5022_v52, %v5030_v27  ;;  %6803 = vmatmul.bf16.vlgmr.msrb.gmra.mxu2 %v14034_v32  ;;  %6816 = vmatmul.bf16.vlgmr.msra.gmra.mxu3 %v14036_v41  ;;  %v10521_v53 = vor.u32 %v12116_v35, %v10518_v10  ;;  %v10230_v20 = vld [vmem:[#allocation23 + $0x70] sm:$0xf0]  ;;  %v12040_v33 = vld [vmem:[#allocation23 + $0x44] sm:$0xf] }
 0x6dc   : > { %v5075_v37 = vmax.f32 %v5023_v63, %v5031_v12  ;;  %v5082_v26 = vmax.f32 %v5024_v16, %v5032_v17  ;;  %6829 = vmatmul.bf16.vlgmr.msra.gmra.mxu0 %v14038_v62  ;;  %6842 = vmatmul.bf16.vlgmr.msrb.gmra.mxu1 %v14040_v59  ;;  %v10649_v5 = vor.u32 %v12148_v9, %v10646_v21  ;;  %v12144_v63 = vld [vmem:[#allocation23 + $0x384] sm:$0xf]  ;;  %v10614_v25 = vld [vmem:[#allocation23 + $0x370] sm:$0xf0] }
 0x6dd   : > { %v5062_v47 = vrot.slane %v5061_v23, 4  ;;  %v5069_v28 = vrot.slane %v5068_v24, 4  ;;  %6899 = vmatpush.bf16.msrb.mxu2 %v10297_v48  ;;  %6912 = vmatpush.bf16.msra.mxu3 %v10425_v36  ;;  %v12048_v48 = vld [vmem:[#allocation23 + $0x84] sm:$0xf]  ;;  %v10505_v2 = vor.u32 %v12112_v55, %v10502_v57  ;;  %v10633_v56 = vor.u32 %v12144_v63, %v10630_v3  ;;  %v10214_v34 = vld [vmem:[#allocation23 + $0x50] sm:$0xf0] }
 0x6de   : > { %v5076_v11 = vrot.slane %v5075_v37, 4  ;;  %v5083_v1 = vrot.slane %v5082_v26, 4  ;;  %6925 = vmatpush.bf16.msra.mxu0 %v10553_v39  ;;  %6938 = vmatpush.bf16.msrb.mxu1 %v10681_v50  ;;  %v10246_v39 = vld [vmem:[#allocation23 + $0x90] sm:$0xf0]  ;;  %v12080_v50 = vld [vmem:[#allocation23 + $0x184] sm:$0xf]  ;;  %v10217_v9 = vor.u32 %v12040_v33, %v10214_v34 }
 0x6df   : > { %v5063_v43 = vmax.f32 %v5061_v23, %v5062_v47  ;;  %v5070_v46 = vmax.f32 %v5068_v24, %v5069_v28  ;;  %v12044_v16 = vld [vmem:[#allocation23 + $0x64] sm:$0xf]  ;;  %v10249_v7 = vor.u32 %v12048_v48, %v10246_v39  ;;  %v10377_v27 = vor.u32 %v12080_v50, %v10374_v54  ;;  %v10486_v23 = vld [vmem:[#allocation23 + $0x270] sm:$0xf0] }
 0x6e0   : > { %v5077_v38 = vmax.f32 %v5075_v37, %v5076_v11  ;;  %v5084_v15 = vmax.f32 %v5082_v26, %v5083_v1  ;;  %v10233_v61 = vor.u32 %v12044_v16, %v10230_v20  ;;  %v10361_v47 = vor.u32 %v12076_v8, %v10358_v22  ;;  %v10342_v44 = vld [vmem:[#allocation23 + $0x150] sm:$0xf0]  ;;  %v12104_v35 = vld [vmem:[#allocation23 + $0x244] sm:$0xf] }
 0x6e1   : > { %v5064_v36 = vrot.slane %v5063_v43, 2  ;;  %v5071_v0 = vrot.slane %v5070_v46, 2  ;;  %6900 = vmatpush.bf16.msrb.mxu2 %v10281_v13  ;;  %6913 = vmatpush.bf16.msra.mxu3 %v10409_v29  ;;  %v10489_v29 = vor.u32 %v12108_v18, %v10486_v23  ;;  %v10598_v10 = vld [vmem:[#allocation23 + $0x350] sm:$0xf0]  ;;  %v12132_v50 = vld [vmem:[#allocation23 + $0x324] sm:$0xf] }
 0x6e2   : > { %v5078_v42 = vrot.slane %v5077_v38, 2  ;;  %v5085_v58 = vrot.slane %v5084_v15, 2  ;;  %6926 = vmatpush.bf16.msra.mxu0 %v10537_v51  ;;  %6939 = vmatpush.bf16.msrb.mxu1 %v10665_v6  ;;  %v10617_v51 = vor.u32 %v12140_v49, %v10614_v25  ;;  %v12072_v6 = vld [vmem:[#allocation23 + $0x144] sm:$0xf]  ;;  %v10454_v39 = vld [vmem:[#allocation23 + $0x230] sm:$0xf0] }
 0x6e3   : > { %v5065_v60 = vmax.f32 %v5063_v43, %v5064_v36  ;;  %v5072_v52 = vmax.f32 %v5070_v46, %v5071_v0  ;;  %v10470_v43 = vld [vmem:[#allocation23 + $0x250] sm:$0xf0]  ;;  %v12136_v46 = vld [vmem:[#allocation23 + $0x344] sm:$0xf]  ;;  %v10345_v21 = vor.u32 %v12072_v6, %v10342_v44 }
 0x6e4   : > { %v5079_v4 = vmax.f32 %v5077_v38, %v5078_v42  ;;  %v5086_v14 = vmax.f32 %v5084_v15, %v5085_v58  ;;  %v12036_v38 = vld [vmem:[#allocation23 + $0x24] sm:$0xf]  ;;  %v10198_v15 = vld [vmem:[#allocation23 + $0x30] sm:$0xf0]  ;;  %v10473_v48 = vor.u32 %v12104_v35, %v10470_v43  ;;  %v10601_v36 = vor.u32 %v12136_v46, %v10598_v10 }
 0x6e5   : > { %v5066_v45 = vrot.slane %v5065_v60, 1  ;;  %v5073_v31 = vrot.slane %v5072_v52, 1  ;;  %6901 = vmatpush.bf16.msrb.mxu2 %v10265_v30  ;;  %6914 = vmatpush.bf16.msra.mxu3 %v10393_v40  ;;  %v12068_v0 = vld [vmem:[#allocation23 + $0x124] sm:$0xf]  ;;  %v10326_v30 = vld [vmem:[#allocation23 + $0x130] sm:$0xf0] }
 0x6e6   : > { %v5080_v12 = vrot.slane %v5079_v4, 1  ;;  %v5087_v17 = vrot.slane %v5086_v14, 1  ;;  %6927 = vmatpush.bf16.msra.mxu0 %v10521_v53  ;;  %6940 = vmatpush.bf16.msrb.mxu1 %v10649_v5  ;;  %v12100_v40 = vld [vmem:[#allocation23 + $0x224] sm:$0xf]  ;;  %v10582_v42 = vld [vmem:[#allocation23 + $0x330] sm:$0xf0]  ;;  %v10201_v53 = vor.u32 %v12036_v38, %v10198_v15  ;;  %v10329_v5 = vor.u32 %v12068_v0, %v10326_v30 }
 0x6e7   : > { %v5067_v24 = vmax.f32 %v5065_v60, %v5066_v45  ;;  %v5074_v19 = vmax.f32 %v5072_v52, %v5073_v31  ;;  %v12032_v58 = vld [vmem:[#allocation23 + $0x4] sm:$0xf]  ;;  %v10182_v54 = vld [vmem:[#allocation23 + $0x10] sm:$0xf0]  ;;  %v10457_v52 = vor.u32 %v12100_v40, %v10454_v39  ;;  %v10585_v57 = vor.u32 %v12132_v50, %v10582_v42 }
 0x6e8   : > { %v5081_v37 = vmax.f32 %v5079_v4, %v5080_v12  ;;  %v5088_v26 = vmax.f32 %v5086_v14, %v5087_v17  ;;  %v12064_v55 = vld [vmem:[#allocation23 + $0x104] sm:$0xf]  ;;  %v10310_v60 = vld [vmem:[#allocation23 + $0x110] sm:$0xf0] }
 0x6e9   : > { %6902 = vmatpush.bf16.msrb.mxu2 %v10249_v7  ;;  %6915 = vmatpush.bf16.msra.mxu3 %v10377_v27  ;;  %v14049_v28 = vpack.c.bf16 %v5067_v24, %v5067_v24  ;;  %v14051_v13 = vpack.c.bf16 %v5074_v19, %v5074_v19  ;;  %v12096_v63 = vld [vmem:[#allocation23 + $0x204] sm:$0xf]  ;;  %v10438_v3 = vld [vmem:[#allocation23 + $0x210] sm:$0xf0]  ;;  %v10185_v27 = vor.u32 %v12032_v58, %v10182_v54 }
 0x6ea   : > { %6928 = vmatpush.bf16.msra.mxu0 %v10505_v2  ;;  %6941 = vmatpush.bf16.msrb.mxu1 %v10633_v56  ;;  %v14053_v11 = vpack.c.bf16 %v5081_v37, %v5081_v37  ;;  %v14055_v1 = vpack.c.bf16 %v5088_v26, %v5088_v26  ;;  %v12128_v4 = vld [vmem:[#allocation23 + $0x304] sm:$0xf]  ;;  %v10566_v14 = vld [vmem:[#allocation23 + $0x310] sm:$0xf0]  ;;  %v10313_v8 = vor.u32 %v12064_v55, %v10310_v60 }
 0x6eb   : > { %6855 = vmatmul.bf16.vlgmr.msra.gmra.mxu2 %v14049_v28  ;;  %6868 = vmatmul.bf16.vlgmr.msrb.gmra.mxu3 %v14051_v13  ;;  %v12188_v16 = vld [vmem:[#allocation23 + $0x4e4] sm:$0xf]  ;;  %v10806_v20 = vld [vmem:[#allocation23 + $0x4f0] sm:$0xf0]  ;;  %v10441_v2 = vor.u32 %v12096_v63, %v10438_v3  ;;  %v10569_v56 = vor.u32 %v12128_v4, %v10566_v14 }
 0x6ec   : > { %6881 = vmatmul.bf16.vlgmr.msrb.gmra.mxu0 %v14053_v11  ;;  %6894 = vmatmul.bf16.vlgmr.msra.gmra.mxu1 %v14055_v1  ;;  %v12220_v45 = vld [vmem:[#allocation23 + $0x5e4] sm:$0xf]  ;;  %v10934_v31 = vld [vmem:[#allocation23 + $0x5f0] sm:$0xf0]  ;;  %v10809_v18 = vor.u32 %v12188_v16, %v10806_v20 }
 0x6ed   : > { %6903 = vmatpush.bf16.msrb.mxu2 %v10233_v61  ;;  %6916 = vmatpush.bf16.msra.mxu3 %v10361_v47  ;;  %v12252_v7 = vld [vmem:[#allocation23 + $0x6e4] sm:$0xf]  ;;  %v11062_v22 = vld [vmem:[#allocation23 + $0x6f0] sm:$0xf0]  ;;  %v10937_v23 = vor.u32 %v12220_v45, %v10934_v31 }
 0x6ee   : > { %6929 = vmatpush.bf16.msra.mxu0 %v10489_v29  ;;  %6942 = vmatpush.bf16.msrb.mxu1 %v10617_v51  ;;  %v12284_v12 = vld [vmem:[#allocation23 + $0x7e4] sm:$0xf]  ;;  %v11190_v17 = vld [vmem:[#allocation23 + $0x7f0] sm:$0xf0]  ;;  %v11065_v49 = vor.u32 %v12252_v7, %v11062_v22 }
 0x6ef   : > { %v12184_v24 = vld [vmem:[#allocation23 + $0x4c4] sm:$0xf]  ;;  %v10790_v19 = vld [vmem:[#allocation23 + $0x4d0] sm:$0xf0]  ;;  %v11193_v25 = vor.u32 %v12284_v12, %v11190_v17 }
 0x6f0   : > { %v12216_v37 = vld [vmem:[#allocation23 + $0x5c4] sm:$0xf]  ;;  %v10918_v26 = vld [vmem:[#allocation23 + $0x5d0] sm:$0xf0]  ;;  %v10793_v34 = vor.u32 %v12184_v24, %v10790_v19 }
 0x6f1   : > { %6904 = vmatpush.bf16.msrb.mxu2 %v10217_v9  ;;  %6917 = vmatpush.bf16.msra.mxu3 %v10345_v21  ;;  %v12248_v61 = vld [vmem:[#allocation23 + $0x6c4] sm:$0xf]  ;;  %v11046_v47 = vld [vmem:[#allocation23 + $0x6d0] sm:$0xf0]  ;;  %v10921_v51 = vor.u32 %v12216_v37, %v10918_v26 }
 0x6f2   : > { %6930 = vmatpush.bf16.msra.mxu0 %v10473_v48  ;;  %6943 = vmatpush.bf16.msrb.mxu1 %v10601_v36  ;;  %v12280_v29 = vld [vmem:[#allocation23 + $0x7c4] sm:$0xf]  ;;  %v11174_v33 = vld [vmem:[#allocation23 + $0x7d0] sm:$0xf0]  ;;  %v11049_v35 = vor.u32 %v12248_v61, %v11046_v47 }
 0x6f3   : > { %v12180_v6 = vld [vmem:[#allocation23 + $0x4a4] sm:$0xf]  ;;  %v10774_v44 = vld [vmem:[#allocation23 + $0x4b0] sm:$0xf0]  ;;  %v11177_v43 = vor.u32 %v12280_v29, %v11174_v33 }
 0x6f4   : > { %v12212_v46 = vld [vmem:[#allocation23 + $0x5a4] sm:$0xf]  ;;  %v10902_v10 = vld [vmem:[#allocation23 + $0x5b0] sm:$0xf0]  ;;  %v10777_v48 = vor.u32 %v12180_v6, %v10774_v44 }
 0x6f5   : > { %6905 = vmatpush.bf16.msrb.mxu2 %v10201_v53  ;;  %6918 = vmatpush.bf16.msra.mxu3 %v10329_v5  ;;  %v12244_v9 = vld [vmem:[#allocation23 + $0x6a4] sm:$0xf]  ;;  %v11030_v21 = vld [vmem:[#allocation23 + $0x6b0] sm:$0xf0]  ;;  %v10905_v36 = vor.u32 %v12212_v46, %v10902_v10 }
 0x6f6   : > { %6931 = vmatpush.bf16.msra.mxu0 %v10457_v52  ;;  %6944 = vmatpush.bf16.msrb.mxu1 %v10585_v57  ;;  %v12276_v38 = vld [vmem:[#allocation23 + $0x7a4] sm:$0xf]  ;;  %v11158_v15 = vld [vmem:[#allocation23 + $0x7b0] sm:$0xf0]  ;;  %v11033_v40 = vor.u32 %v12244_v9, %v11030_v21 }
 0x6f7   : > { %v12176_v0 = vld [vmem:[#allocation23 + $0x484] sm:$0xf]  ;;  %v10758_v30 = vld [vmem:[#allocation23 + $0x490] sm:$0xf0]  ;;  %v11161_v39 = vor.u32 %v12276_v38, %v11158_v15 }
 0x6f8   : > { %v12208_v50 = vld [vmem:[#allocation23 + $0x584] sm:$0xf]  ;;  %v10886_v42 = vld [vmem:[#allocation23 + $0x590] sm:$0xf0]  ;;  %v10761_v55 = vor.u32 %v12176_v0, %v10758_v30 }
 0x6f9   : > { %6906 = vmatpush.bf16.msrb.mxu2 %v10185_v27  ;;  %6919 = vmatpush.bf16.msra.mxu3 %v10313_v8  ;;  %v12240_v58 = vld [vmem:[#allocation23 + $0x684] sm:$0xf]  ;;  %v11014_v53 = vld [vmem:[#allocation23 + $0x690] sm:$0xf0]  ;;  %v10889_v60 = vor.u32 %v12208_v50, %v10886_v42  ;;  %v10428_v50 = vld [vmem:[#allocation23 + $0x1e8] sm:$0xf] }
 0x6fa   : > { %6932 = vmatpush.bf16.msra.mxu0 %v10441_v2  ;;  %6945 = vmatpush.bf16.msrb.mxu1 %v10569_v56  ;;  %v12272_v5 = vld [vmem:[#allocation23 + $0x784] sm:$0xf]  ;;  %v11142_v54 = vld [vmem:[#allocation23 + $0x790] sm:$0xf0]  ;;  %v11017_v63 = vor.u32 %v12240_v58, %v11014_v53  ;;  %v12095_v42 = vld [vmem:[#allocation23 + $0x1f4] sm:$0xf0] }
 0x6fb   : > { %v12172_v52 = vld [vmem:[#allocation23 + $0x464] sm:$0xf]  ;;  %v10742_v57 = vld [vmem:[#allocation23 + $0x470] sm:$0xf0]  ;;  %v11145_v3 = vor.u32 %v12272_v5, %v11142_v54  ;;  %v10556_v58 = vld [vmem:[#allocation23 + $0x2e8] sm:$0xf] }
 0x6fc   : > { %6907 = vmatmul.bf16.vlgmr.msrb.gmra.mxu2 %v14034_v32  ;;  %6920 = vmatmul.bf16.vlgmr.msra.gmra.mxu3 %v14036_v41  ;;  %v12204_v4 = vld [vmem:[#allocation23 + $0x564] sm:$0xf]  ;;  %v10870_v14 = vld [vmem:[#allocation23 + $0x570] sm:$0xf0]  ;;  %v10745_v7 = vor.u32 %v12172_v52, %v10742_v57  ;;  %v12127_v54 = vld [vmem:[#allocation23 + $0x2f4] sm:$0xf0] }
 0x6fd   : > { %6951 = vmatpush.bf16.msra.mxu2 %v10809_v18  ;;  %6964 = vmatpush.bf16.msrb.mxu3 %v10937_v23  ;;  %v12236_v16 = vld [vmem:[#allocation23 + $0x664] sm:$0xf]  ;;  %v10998_v20 = vld [vmem:[#allocation23 + $0x670] sm:$0xf0]  ;;  %v10873_v27 = vor.u32 %v12204_v4, %v10870_v14  ;;  %v10284_v4 = vld [vmem:[#allocation23 + $0xc8] sm:$0xf] }
 0x6fe   : > { %6977 = vmatpush.bf16.msrb.mxu0 %v11065_v49  ;;  %6990 = vmatpush.bf16.msra.mxu1 %v11193_v25  ;;  %v12268_v45 = vld [vmem:[#allocation23 + $0x764] sm:$0xf]  ;;  %v11126_v31 = vld [vmem:[#allocation23 + $0x770] sm:$0xf0]  ;;  %v11001_v12 = vor.u32 %v12236_v16, %v10998_v20  ;;  %v12059_v14 = vld [vmem:[#allocation23 + $0xd4] sm:$0xf0]  ;;  %v10557_v16 = vor.u32 %v12127_v54, %v10556_v58 }
 0x6ff   : > { %6933 = vmatmul.bf16.vlgmr.msra.gmra.mxu0 %v14038_v62  ;;  %6946 = vmatmul.bf16.vlgmr.msrb.gmra.mxu1 %v14040_v59  ;;  %v12168_v8 = vld [vmem:[#allocation23 + $0x444] sm:$0xf]  ;;  %v10726_v22 = vld [vmem:[#allocation23 + $0x450] sm:$0xf0]  ;;  %v11129_v17 = vor.u32 %v12268_v45, %v11126_v31  ;;  %v10412_v45 = vld [vmem:[#allocation23 + $0x1c8] sm:$0xf] }
 0x700   : > { %v12200_v2 = vld [vmem:[#allocation23 + $0x544] sm:$0xf]  ;;  %v10854_v56 = vld [vmem:[#allocation23 + $0x550] sm:$0xf0]  ;;  %v10729_v49 = vor.u32 %v12168_v8, %v10726_v22  ;;  %v12091_v31 = vld [vmem:[#allocation23 + $0x1d4] sm:$0xf0] }
 0x701   : > { %6952 = vmatpush.bf16.msra.mxu2 %v10793_v34  ;;  %6965 = vmatpush.bf16.msrb.mxu3 %v10921_v51  ;;  %v12232_v18 = vld [vmem:[#allocation23 + $0x644] sm:$0xf]  ;;  %v10982_v23 = vld [vmem:[#allocation23 + $0x650] sm:$0xf0]  ;;  %v10857_v25 = vor.u32 %v12200_v2, %v10854_v56  ;;  %v10668_v8 = vld [vmem:[#allocation23 + $0x3c8] sm:$0xf] }
 0x702   : > { %6978 = vmatpush.bf16.msrb.mxu0 %v11049_v35  ;;  %6991 = vmatpush.bf16.msra.mxu1 %v11177_v43  ;;  %v12264_v24 = vld [vmem:[#allocation23 + $0x744] sm:$0xf]  ;;  %v11110_v19 = vld [vmem:[#allocation23 + $0x750] sm:$0xf0]  ;;  %v10985_v61 = vor.u32 %v12232_v18, %v10982_v23  ;;  %v12155_v22 = vld [vmem:[#allocation23 + $0x3d4] sm:$0xf0] }
 0x703   : > { %v12164_v37 = vld [vmem:[#allocation23 + $0x424] sm:$0xf]  ;;  %v10710_v26 = vld [vmem:[#allocation23 + $0x430] sm:$0xf0]  ;;  %v11113_v47 = vor.u32 %v12264_v24, %v11110_v19  ;;  %v10268_v2 = vld [vmem:[#allocation23 + $0xa8] sm:$0xf]  ;;  %v10669_v23 = vor.u32 %v12155_v22, %v10668_v8 }
 0x704   : > { %v12196_v29 = vld [vmem:[#allocation23 + $0x524] sm:$0xf]  ;;  %v10838_v33 = vld [vmem:[#allocation23 + $0x530] sm:$0xf0]  ;;  %v10713_v43 = vor.u32 %v12164_v37, %v10710_v26  ;;  %v12055_v56 = vld [vmem:[#allocation23 + $0xb4] sm:$0xf0] }
 0x705   : > { %6953 = vmatpush.bf16.msra.mxu2 %v10777_v48  ;;  %6966 = vmatpush.bf16.msrb.mxu3 %v10905_v36  ;;  %v12228_v34 = vld [vmem:[#allocation23 + $0x624] sm:$0xf]  ;;  %v10966_v51 = vld [vmem:[#allocation23 + $0x630] sm:$0xf0]  ;;  %v10841_v46 = vor.u32 %v12196_v29, %v10838_v33  ;;  %v10396_v24 = vld [vmem:[#allocation23 + $0x1a8] sm:$0xf] }
 0x706   : > { %6979 = vmatpush.bf16.msrb.mxu0 %v11033_v40  ;;  %6992 = vmatpush.bf16.msra.mxu1 %v11161_v39  ;;  %v12260_v6 = vld [vmem:[#allocation23 + $0x724] sm:$0xf]  ;;  %v11094_v44 = vld [vmem:[#allocation23 + $0x730] sm:$0xf0]  ;;  %v10969_v38 = vor.u32 %v12228_v34, %v10966_v51  ;;  %v10300_v40 = vld [vmem:[#allocation23 + $0xe8] sm:$0xf] }
 0x707   : > { %v12160_v35 = vld [vmem:[#allocation23 + $0x404] sm:$0xf]  ;;  %v10694_v10 = vld [vmem:[#allocation23 + $0x410] sm:$0xf0]  ;;  %v11097_v15 = vor.u32 %v12260_v6, %v11094_v44  ;;  %v12063_v39 = vld [vmem:[#allocation23 + $0xf4] sm:$0xf0] }
 0x708   : > { %v12192_v9 = vld [vmem:[#allocation23 + $0x504] sm:$0xf]  ;;  %v10822_v21 = vld [vmem:[#allocation23 + $0x510] sm:$0xf0]  ;;  %v10697_v53 = vor.u32 %v12160_v35, %v10694_v10  ;;  %v12087_v19 = vld [vmem:[#allocation23 + $0x1b4] sm:$0xf0] }
 0x709   : > { %6954 = vmatpush.bf16.msra.mxu2 %v10761_v55  ;;  %6967 = vmatpush.bf16.msrb.mxu3 %v10889_v60  ;;  %v12224_v48 = vld [vmem:[#allocation23 + $0x604] sm:$0xf]  ;;  %v10950_v36 = vld [vmem:[#allocation23 + $0x610] sm:$0xf0]  ;;  %v10825_v5 = vor.u32 %v12192_v9, %v10822_v21  ;;  %v10684_v55 = vld [vmem:[#allocation23 + $0x3e8] sm:$0xf] }
 0x70a   : > { %6980 = vmatpush.bf16.msrb.mxu0 %v11017_v63  ;;  %6993 = vmatpush.bf16.msra.mxu1 %v11145_v3  ;;  %v12256_v0 = vld [vmem:[#allocation23 + $0x704] sm:$0xf]  ;;  %v11078_v30 = vld [vmem:[#allocation23 + $0x710] sm:$0xf0]  ;;  %v12159_v60 = vld [vmem:[#allocation23 + $0x3f4] sm:$0xf0]  ;;  %v10953_v52 = vor.u32 %v12224_v48, %v10950_v36  ;;  %v10301_v63 = vor.u32 %v12063_v39, %v10300_v40  ;;  %v10429_v3 = vor.u32 %v12095_v42, %v10428_v50 }
 0x70b   : > { %v11081_v57 = vor.u32 %v12256_v0, %v11078_v30  ;;  %v10685_v20 = vor.u32 %v12159_v60, %v10684_v55  ;;  %v10652_v37 = vld [vmem:[#allocation23 + $0x3a8] sm:$0xf]  ;;  %v12151_v26 = vld [vmem:[#allocation23 + $0x3b4] sm:$0xf0] }
 0x70c   : > { %v10252_v29 = vld [vmem:[#allocation23 + $0x88] sm:$0xf]  ;;  %v12051_v33 = vld [vmem:[#allocation23 + $0x94] sm:$0xf0]  ;;  %v10653_v51 = vor.u32 %v12151_v26, %v10652_v37 }
 0x70d   : > { %6955 = vmatpush.bf16.msra.mxu2 %v10745_v7  ;;  %6968 = vmatpush.bf16.msrb.mxu3 %v10873_v27  ;;  %v10540_v7 = vld [vmem:[#allocation23 + $0x2c8] sm:$0xf]  ;;  %v12123_v27 = vld [vmem:[#allocation23 + $0x2d4] sm:$0xf0]  ;;  %v10253_v9 = vor.u32 %v12051_v33, %v10252_v29 }
 0x70e   : > { %6981 = vmatpush.bf16.msrb.mxu0 %v11001_v12  ;;  %6994 = vmatpush.bf16.msra.mxu1 %v11129_v17  ;;  %v10285_v12 = vor.u32 %v12059_v14, %v10284_v4  ;;  %v10413_v17 = vor.u32 %v12091_v31, %v10412_v45  ;;  %v10541_v18 = vor.u32 %v12123_v27, %v10540_v7  ;;  %v10380_v6 = vld [vmem:[#allocation23 + $0x188] sm:$0xf]  ;;  %v12083_v44 = vld [vmem:[#allocation23 + $0x194] sm:$0xf0] }
 0x70f   : > { %v10508_v35 = vld [vmem:[#allocation23 + $0x288] sm:$0xf]  ;;  %v12147_v10 = vld [vmem:[#allocation23 + $0x394] sm:$0xf0]  ;;  %v10381_v21 = vor.u32 %v12083_v44, %v10380_v6 }
 0x710   : > { %v10364_v0 = vld [vmem:[#allocation23 + $0x168] sm:$0xf]  ;;  %v12079_v30 = vld [vmem:[#allocation23 + $0x174] sm:$0xf0] }
 0x711   : > { %6956 = vmatpush.bf16.msra.mxu2 %v10729_v49  ;;  %6969 = vmatpush.bf16.msrb.mxu3 %v10857_v25  ;;  %v10524_v49 = vld [vmem:[#allocation23 + $0x2a8] sm:$0xf]  ;;  %v12119_v25 = vld [vmem:[#allocation23 + $0x2b4] sm:$0xf0] }
 0x712   : > { %6982 = vmatpush.bf16.msrb.mxu0 %v10985_v61  ;;  %6995 = vmatpush.bf16.msra.mxu1 %v11113_v47  ;;  %v10269_v61 = vor.u32 %v12055_v56, %v10268_v2  ;;  %v10397_v47 = vor.u32 %v12087_v19, %v10396_v24  ;;  %v10525_v34 = vor.u32 %v12119_v25, %v10524_v49  ;;  %v10492_v40 = vld [vmem:[#allocation23 + $0x268] sm:$0xf]  ;;  %v12111_v39 = vld [vmem:[#allocation23 + $0x274] sm:$0xf0] }
 0x713   : > { %v10620_v50 = vld [vmem:[#allocation23 + $0x368] sm:$0xf]  ;;  %v12143_v42 = vld [vmem:[#allocation23 + $0x374] sm:$0xf0]  ;;  %v10493_v55 = vor.u32 %v12111_v39, %v10492_v40 }
 0x714   : > { %v12043_v54 = vld [vmem:[#allocation23 + $0x54] sm:$0xf0]  ;;  %v10621_v60 = vor.u32 %v12143_v42, %v10620_v50  ;;  %v10604_v4 = vld [vmem:[#allocation23 + $0x348] sm:$0xf] }
 0x715   : > { %6957 = vmatpush.bf16.msra.mxu2 %v10713_v43  ;;  %6970 = vmatpush.bf16.msrb.mxu3 %v10841_v46  ;;  %v12115_v43 = vld [vmem:[#allocation23 + $0x294] sm:$0xf0]  ;;  %v10636_v46 = vld [vmem:[#allocation23 + $0x388] sm:$0xf] }
 0x716   : > { %6983 = vmatpush.bf16.msrb.mxu0 %v10969_v38  ;;  %6996 = vmatpush.bf16.msra.mxu1 %v11097_v15  ;;  %v10236_v38 = vld [vmem:[#allocation23 + $0x68] sm:$0xf]  ;;  %v12047_v15 = vld [vmem:[#allocation23 + $0x74] sm:$0xf0]  ;;  %v10509_v48 = vor.u32 %v12115_v43, %v10508_v35  ;;  %v10637_v36 = vor.u32 %v12147_v10, %v10636_v46 }
 0x717   : > { %v10237_v58 = vor.u32 %v12047_v15, %v10236_v38  ;;  %v12139_v14 = vld [vmem:[#allocation23 + $0x354] sm:$0xf0]  ;;  %v10204_v45 = vld [vmem:[#allocation23 + $0x28] sm:$0xf] }
 0x718   : > { %v12039_v31 = vld [vmem:[#allocation23 + $0x34] sm:$0xf0]  ;;  %v10605_v27 = vor.u32 %v12139_v14, %v10604_v4  ;;  %v10332_v8 = vld [vmem:[#allocation23 + $0x128] sm:$0xf] }
 0x719   : > { %6958 = vmatpush.bf16.msra.mxu2 %v10697_v53  ;;  %6971 = vmatpush.bf16.msrb.mxu3 %v10825_v5  ;;  %v10365_v53 = vor.u32 %v12079_v30, %v10364_v0  ;;  %v10220_v5 = vld [vmem:[#allocation23 + $0x48] sm:$0xf]  ;;  %v12071_v22 = vld [vmem:[#allocation23 + $0x134] sm:$0xf0] }
 0x71a   : > { %6984 = vmatpush.bf16.msrb.mxu0 %v10953_v52  ;;  %6997 = vmatpush.bf16.msra.mxu1 %v11081_v57  ;;  %v10348_v52 = vld [vmem:[#allocation23 + $0x148] sm:$0xf]  ;;  %v12075_v57 = vld [vmem:[#allocation23 + $0x154] sm:$0xf0]  ;;  %v10333_v24 = vor.u32 %v12071_v22, %v10332_v8 }
 0x71b   : > { %v10588_v2 = vld [vmem:[#allocation23 + $0x328] sm:$0xf]  ;;  %v12135_v56 = vld [vmem:[#allocation23 + $0x334] sm:$0xf0] }
 0x71c   : > { %6959 = vmatmul.bf16.vlgmr.msra.gmra.mxu2 %v14049_v28  ;;  %6972 = vmatmul.bf16.vlgmr.msrb.gmra.mxu3 %v14051_v13  ;;  %v12035_v19 = vld [vmem:[#allocation23 + $0x14] sm:$0xf0]  ;;  %v10316_v49 = vld [vmem:[#allocation23 + $0x108] sm:$0xf]  ;;  %v10589_v26 = vor.u32 %v12135_v56, %v10588_v2 }
 0x71d   : > { %7003 = vmatpush.bf16.msrb.mxu2 %v10301_v63  ;;  %7016 = vmatpush.bf16.msra.mxu3 %v10429_v3  ;;  %v10476_v63 = vld [vmem:[#allocation23 + $0x248] sm:$0xf]  ;;  %v12107_v3 = vld [vmem:[#allocation23 + $0x254] sm:$0xf0] }
 0x71e   : > { %7029 = vmatpush.bf16.msra.mxu0 %v10557_v16  ;;  %7042 = vmatpush.bf16.msrb.mxu1 %v10685_v20  ;;  %v10221_v16 = vor.u32 %v12043_v54, %v10220_v5  ;;  %v10349_v20 = vor.u32 %v12075_v57, %v10348_v52  ;;  %v10477_v7 = vor.u32 %v12107_v3, %v10476_v63  ;;  %v12067_v25 = vld [vmem:[#allocation23 + $0x114] sm:$0xf0]  ;;  %v10572_v29 = vld [vmem:[#allocation23 + $0x308] sm:$0xf] }
 0x71f   : > { %6985 = vmatmul.bf16.vlgmr.msrb.gmra.mxu0 %v14053_v11  ;;  %6998 = vmatmul.bf16.vlgmr.msra.gmra.mxu1 %v14055_v1  ;;  %v12131_v33 = vld [vmem:[#allocation23 + $0x314] sm:$0xf0]  ;;  %v10940_v6 = vld [vmem:[#allocation23 + $0x5e8] sm:$0xf]  ;;  %v10317_v46 = vor.u32 %v12067_v25, %v10316_v49 }
 0x720   : > { %v12223_v44 = vld [vmem:[#allocation23 + $0x5f4] sm:$0xf0]  ;;  %v11068_v35 = vld [vmem:[#allocation23 + $0x6e8] sm:$0xf]  ;;  %v10573_v15 = vor.u32 %v12131_v33, %v10572_v29 }
 0x721   : > { %7004 = vmatpush.bf16.msrb.mxu2 %v10285_v12  ;;  %7017 = vmatpush.bf16.msra.mxu3 %v10413_v17  ;;  %v10460_v12 = vld [vmem:[#allocation23 + $0x228] sm:$0xf]  ;;  %v12103_v17 = vld [vmem:[#allocation23 + $0x234] sm:$0xf0]  ;;  %v10941_v0 = vor.u32 %v12223_v44, %v10940_v6 }
 0x722   : > { %7030 = vmatpush.bf16.msra.mxu0 %v10541_v18  ;;  %7043 = vmatpush.bf16.msrb.mxu1 %v10669_v23  ;;  %v10188_v18 = vld [vmem:[#allocation23 + $0x8] sm:$0xf]  ;;  %v10205_v23 = vor.u32 %v12039_v31, %v10204_v45  ;;  %v10461_v37 = vor.u32 %v12103_v17, %v10460_v12  ;;  %v12255_v10 = vld [vmem:[#allocation23 + $0x6f4] sm:$0xf0] }
 0x723   : > { %v10189_v43 = vor.u32 %v12035_v19, %v10188_v18  ;;  %v10796_v30 = vld [vmem:[#allocation23 + $0x4c8] sm:$0xf]  ;;  %v12187_v40 = vld [vmem:[#allocation23 + $0x4d4] sm:$0xf0]  ;;  %v11069_v39 = vor.u32 %v12255_v10, %v11068_v35 }
 0x724   : > { %v10924_v42 = vld [vmem:[#allocation23 + $0x5c8] sm:$0xf]  ;;  %v12251_v5 = vld [vmem:[#allocation23 + $0x6d4] sm:$0xf0] }
 0x725   : > { %7005 = vmatpush.bf16.msrb.mxu2 %v10269_v61  ;;  %7018 = vmatpush.bf16.msra.mxu3 %v10397_v47  ;;  %v10444_v61 = vld [vmem:[#allocation23 + $0x208] sm:$0xf]  ;;  %v12099_v47 = vld [vmem:[#allocation23 + $0x214] sm:$0xf0] }
 0x726   : > { %7031 = vmatpush.bf16.msra.mxu0 %v10525_v34  ;;  %7044 = vmatpush.bf16.msrb.mxu1 %v10653_v51  ;;  %v10812_v34 = vld [vmem:[#allocation23 + $0x4e8] sm:$0xf]  ;;  %v12191_v51 = vld [vmem:[#allocation23 + $0x4f4] sm:$0xf0]  ;;  %v10445_v38 = vor.u32 %v12099_v47, %v10444_v61 }
 0x727   : > { %v11180_v54 = vld [vmem:[#allocation23 + $0x7c8] sm:$0xf]  ;;  %v12183_v63 = vld [vmem:[#allocation23 + $0x4b4] sm:$0xf0] }
 0x728   : > { %v10780_v57 = vld [vmem:[#allocation23 + $0x4a8] sm:$0xf]  ;;  %v12247_v45 = vld [vmem:[#allocation23 + $0x6b4] sm:$0xf0] }
 0x729   : > { %7006 = vmatpush.bf16.msrb.mxu2 %v10253_v9  ;;  %7019 = vmatpush.bf16.msra.mxu3 %v10381_v21  ;;  %v11196_v9 = vld [vmem:[#allocation23 + $0x7e8] sm:$0xf]  ;;  %v12287_v21 = vld [vmem:[#allocation23 + $0x7f4] sm:$0xf0] }
 0x72a   : > { %7032 = vmatpush.bf16.msra.mxu0 %v10509_v48  ;;  %7045 = vmatpush.bf16.msrb.mxu1 %v10637_v36  ;;  %v14069_v48 = vpop.f32.mrf.mxu0  ;;  %v10813_v36 = vor.u32 %v12191_v51, %v10812_v34  ;;  %v11197_v50 = vor.u32 %v12287_v21, %v11196_v9  ;;  %v10908_v14 = vld [vmem:[#allocation23 + $0x5a8] sm:$0xf]  ;;  %v12179_v12 = vld [vmem:[#allocation23 + $0x494] sm:$0xf0] }
 0x72b   : > { %v11164_v31 = vld [vmem:[#allocation23 + $0x7a8] sm:$0xf]  ;;  %v12211_v18 = vld [vmem:[#allocation23 + $0x594] sm:$0xf0] }
 0x72c   : > { %v10764_v22 = vld [vmem:[#allocation23 + $0x488] sm:$0xf]  ;;  %v12243_v19 = vld [vmem:[#allocation23 + $0x694] sm:$0xf0] }
 0x72d   : > { %7007 = vmatpush.bf16.msrb.mxu2 %v10237_v58  ;;  %7020 = vmatpush.bf16.msra.mxu3 %v10365_v53  ;;  %v12219_v58 = vld [vmem:[#allocation23 + $0x5d4] sm:$0xf0]  ;;  %v11052_v53 = vld [vmem:[#allocation23 + $0x6c8] sm:$0xf] }
 0x72e   : > { %7033 = vmatpush.bf16.msra.mxu0 %v10493_v55  ;;  %7046 = vmatpush.bf16.msrb.mxu1 %v10621_v60  ;;  %v12283_v55 = vld [vmem:[#allocation23 + $0x7d4] sm:$0xf0]  ;;  %v10797_v60 = vor.u32 %v12187_v40, %v10796_v30  ;;  %v10925_v52 = vor.u32 %v12219_v58, %v10924_v42  ;;  %v11053_v3 = vor.u32 %v12251_v5, %v11052_v53  ;;  %v10892_v56 = vld [vmem:[#allocation23 + $0x588] sm:$0xf]  ;;  %v14077_v42 = vpop.f32.mrf.mxu1 }
 0x72f   : > { %v11181_v4 = vor.u32 %v12283_v55, %v11180_v54  ;;  %v11148_v49 = vld [vmem:[#allocation23 + $0x788] sm:$0xf]  ;;  %v12275_v25 = vld [vmem:[#allocation23 + $0x794] sm:$0xf0] }
 0x730   : > { %v10748_v61 = vld [vmem:[#allocation23 + $0x468] sm:$0xf]  ;;  %v12175_v47 = vld [vmem:[#allocation23 + $0x474] sm:$0xf0]  ;;  %v11149_v33 = vor.u32 %v12275_v25, %v11148_v49  ;;  %v10302_v49 = vld [vmem:[#allocation23 + $0xf8] sm:$0xf0] }
 0x731   : > { %7008 = vmatpush.bf16.msrb.mxu2 %v10221_v16  ;;  %7021 = vmatpush.bf16.msra.mxu3 %v10349_v20  ;;  %v12215_v16 = vld [vmem:[#allocation23 + $0x5b4] sm:$0xf0]  ;;  %v11036_v20 = vld [vmem:[#allocation23 + $0x6a8] sm:$0xf]  ;;  %v12093_v25 = vld [vmem:[#allocation23 + $0x1ec] sm:$0xf] }
 0x732   : > { %7034 = vmatpush.bf16.msra.mxu0 %v10477_v7  ;;  %7047 = vmatpush.bf16.msrb.mxu1 %v10605_v27  ;;  %v12279_v7 = vld [vmem:[#allocation23 + $0x7b4] sm:$0xf0]  ;;  %v10781_v27 = vor.u32 %v12183_v63, %v10780_v57  ;;  %v10909_v8 = vor.u32 %v12215_v16, %v10908_v14  ;;  %v11037_v17 = vor.u32 %v12247_v45, %v11036_v20  ;;  %v10876_v34 = vld [vmem:[#allocation23 + $0x568] sm:$0xf] }
 0x733   : > { %v11165_v2 = vor.u32 %v12279_v7, %v11164_v31  ;;  %v12207_v51 = vld [vmem:[#allocation23 + $0x574] sm:$0xf0]  ;;  %v11004_v6 = vld [vmem:[#allocation23 + $0x668] sm:$0xf] }
 0x734   : > { %v12239_v44 = vld [vmem:[#allocation23 + $0x674] sm:$0xf0]  ;;  %v11132_v35 = vld [vmem:[#allocation23 + $0x768] sm:$0xf]  ;;  %v10877_v10 = vor.u32 %v12207_v51, %v10876_v34  ;;  %v10686_v34 = vld [vmem:[#allocation23 + $0x3f8] sm:$0xf0] }
 0x735   : > { %7009 = vmatpush.bf16.msrb.mxu2 %v10205_v23  ;;  %7022 = vmatpush.bf16.msra.mxu3 %v10333_v24  ;;  %v11020_v23 = vld [vmem:[#allocation23 + $0x688] sm:$0xf]  ;;  %v14075_v24 = vpop.f32.mrf.mxu0  ;;  %v12171_v21 = vld [vmem:[#allocation23 + $0x454] sm:$0xf0] }
 0x736   : > { %7035 = vmatpush.bf16.msra.mxu0 %v10461_v37  ;;  %7048 = vmatpush.bf16.msrb.mxu1 %v10589_v26  ;;  %v10765_v37 = vor.u32 %v12179_v12, %v10764_v22  ;;  %v10893_v26 = vor.u32 %v12211_v18, %v10892_v56  ;;  %v11021_v29 = vor.u32 %v12243_v19, %v11020_v23  ;;  %v10732_v9 = vld [vmem:[#allocation23 + $0x448] sm:$0xf]  ;;  %v12235_v40 = vld [vmem:[#allocation23 + $0x654] sm:$0xf0]  ;;  %v14081_v22 = vpop.f32.mrf.mxu3  ;;  %v12061_v19 = vld [vmem:[#allocation23 + $0xec] sm:$0xf] }
 0x737   : > { %v10988_v30 = vld [vmem:[#allocation23 + $0x648] sm:$0xf]  ;;  %v10733_v53 = vor.u32 %v12171_v21, %v10732_v9  ;;  %v12167_v55 = vld [vmem:[#allocation23 + $0x434] sm:$0xf0]  ;;  %v10286_v9 = vld [vmem:[#allocation23 + $0xd8] sm:$0xf0] }
 0x738   : > { %v10716_v54 = vld [vmem:[#allocation23 + $0x428] sm:$0xf]  ;;  %v12199_v63 = vld [vmem:[#allocation23 + $0x534] sm:$0xf0] }
 0x739   : > { %7010 = vmatpush.bf16.msrb.mxu2 %v10189_v43  ;;  %7023 = vmatpush.bf16.msra.mxu3 %v10317_v46  ;;  %v12271_v43 = vld [vmem:[#allocation23 + $0x774] sm:$0xf0]  ;;  %v10749_v46 = vor.u32 %v12175_v47, %v10748_v61  ;;  %v10844_v57 = vld [vmem:[#allocation23 + $0x528] sm:$0xf]  ;;  %v10717_v45 = vor.u32 %v12167_v55, %v10716_v54  ;;  %v10270_v54 = vld [vmem:[#allocation23 + $0xb8] sm:$0xf0] }
 0x73a   : > { %7036 = vmatpush.bf16.msra.mxu0 %v10445_v38  ;;  %7049 = vmatpush.bf16.msrb.mxu1 %v10573_v15  ;;  %v11005_v38 = vor.u32 %v12239_v44, %v11004_v6  ;;  %v11133_v15 = vor.u32 %v12271_v43, %v11132_v35  ;;  %v11100_v14 = vld [vmem:[#allocation23 + $0x728] sm:$0xf]  ;;  %v12263_v16 = vld [vmem:[#allocation23 + $0x734] sm:$0xf0]  ;;  %v10845_v31 = vor.u32 %v12199_v63, %v10844_v57  ;;  %v14083_v44 = vpop.f32.mrf.mxu1  ;;  %v12085_v57 = vld [vmem:[#allocation23 + $0x1ac] sm:$0xf] }
 0x73b   : > { %v10700_v20 = vld [vmem:[#allocation23 + $0x408] sm:$0xf]  ;;  %v12163_v7 = vld [vmem:[#allocation23 + $0x414] sm:$0xf0]  ;;  %v10305_v43 = vor.u32 %v12061_v19, %v10302_v49  ;;  %v10398_v63 = vld [vmem:[#allocation23 + $0x1b8] sm:$0xf0] }
 0x73c   : > { %7011 = vmatmul.bf16.vlgmr.msrb.gmra.mxu2 %v14034_v32  ;;  %7024 = vmatmul.bf16.vlgmr.msra.gmra.mxu3 %v14036_v41  ;;  %v12227_v56 = vld [vmem:[#allocation23 + $0x614] sm:$0xf0]  ;;  %v11084_v18 = vld [vmem:[#allocation23 + $0x708] sm:$0xf]  ;;  %v10701_v61 = vor.u32 %v12163_v7, %v10700_v20  ;;  %v10510_v19 = vld [vmem:[#allocation23 + $0x298] sm:$0xf0] }
 0x73d   : > { %7055 = vmatpush.bf16.msra.mxu2 %v10813_v36  ;;  %7068 = vmatpush.bf16.msrb.mxu3 %v10941_v0  ;;  %v10860_v36 = vld [vmem:[#allocation23 + $0x548] sm:$0xf]  ;;  %v12203_v0 = vld [vmem:[#allocation23 + $0x554] sm:$0xf0]  ;;  %v14079_v58 = vpop.f32.mrf.mxu0  ;;  %v12145_v49 = vld [vmem:[#allocation23 + $0x38c] sm:$0xf] }
 0x73e   : > { %7081 = vmatpush.bf16.msrb.mxu0 %v11069_v39  ;;  %7094 = vmatpush.bf16.msra.mxu1 %v11197_v50  ;;  %v11116_v39 = vld [vmem:[#allocation23 + $0x748] sm:$0xf]  ;;  %v12267_v50 = vld [vmem:[#allocation23 + $0x754] sm:$0xf0]  ;;  %v10861_v5 = vor.u32 %v12203_v0, %v10860_v36  ;;  %v10414_v36 = vld [vmem:[#allocation23 + $0x1d8] sm:$0xf0]  ;;  %v14087_v55 = vpop.f32.mrf.mxu3 }
 0x73f   : > { %7037 = vmatmul.bf16.vlgmr.msra.gmra.mxu0 %v14038_v62  ;;  %7050 = vmatmul.bf16.vlgmr.msrb.gmra.mxu1 %v14040_v59  ;;  %v12259_v23 = vld [vmem:[#allocation23 + $0x714] sm:$0xf0]  ;;  %v12121_v0 = vld [vmem:[#allocation23 + $0x2cc] sm:$0xf] }
 0x740   : > { %v11085_v6 = vor.u32 %v12259_v23, %v11084_v18  ;;  %v14096_v20 = vld [vmem:[%s14269_s21] sm:$0xf]  ;;  %v10382_v18 = vld [vmem:[#allocation23 + $0x198] sm:$0xf0] }
 0x741   : > { %7056 = vmatpush.bf16.msra.mxu2 %v10797_v60  ;;  %7069 = vmatpush.bf16.msrb.mxu3 %v10925_v52  ;;  %v10989_v60 = vor.u32 %v12235_v40, %v10988_v30  ;;  %v11117_v52 = vor.u32 %v12267_v50, %v11116_v39  ;;  %v10542_v30 = vld [vmem:[#allocation23 + $0x2d8] sm:$0xf0]  ;;  %v12153_v40 = vld [vmem:[#allocation23 + $0x3cc] sm:$0xf] }
 0x742   : > { %7082 = vmatpush.bf16.msrb.mxu0 %v11053_v3  ;;  %7095 = vmatpush.bf16.msra.mxu1 %v11181_v4  ;;  %v10972_v3 = vld [vmem:[#allocation23 + $0x628] sm:$0xf]  ;;  %v12231_v4 = vld [vmem:[#allocation23 + $0x634] sm:$0xf0]  ;;  %v10670_v39 = vld [vmem:[#allocation23 + $0x3d8] sm:$0xf0] }
 0x743   : > { %v10973_v12 = vor.u32 %v12231_v4, %v10972_v3  ;;  %v12117_v3 = vld [vmem:[#allocation23 + $0x2ac] sm:$0xf]  ;;  %v10526_v4 = vld [vmem:[#allocation23 + $0x2b8] sm:$0xf0] }
 0x744   : > { %v12113_v23 = vld [vmem:[#allocation23 + $0x28c] sm:$0xf] }
 0x745   : > { %7057 = vmatpush.bf16.msra.mxu2 %v10781_v27  ;;  %7070 = vmatpush.bf16.msrb.mxu3 %v10909_v8  ;;  %v10828_v27 = vld [vmem:[#allocation23 + $0x508] sm:$0xf]  ;;  %v12195_v8 = vld [vmem:[#allocation23 + $0x514] sm:$0xf0]  ;;  %v14085_v35 = vpop.f32.mrf.mxu0 }
 0x746   : > { %7083 = vmatpush.bf16.msrb.mxu0 %v11037_v17  ;;  %7096 = vmatpush.bf16.msra.mxu1 %v11165_v2  ;;  %v11101_v17 = vor.u32 %v12263_v16, %v11100_v14  ;;  %v10956_v2 = vld [vmem:[#allocation23 + $0x608] sm:$0xf]  ;;  %v10829_v47 = vor.u32 %v12195_v8, %v10828_v27  ;;  %v12149_v14 = vld [vmem:[#allocation23 + $0x3ac] sm:$0xf]  ;;  %v10654_v16 = vld [vmem:[#allocation23 + $0x3b8] sm:$0xf0] }
 0x747   : > { %v10957_v51 = vor.u32 %v12227_v56, %v10956_v2  ;;  %v12049_v8 = vld [vmem:[#allocation23 + $0x8c] sm:$0xf]  ;;  %v10529_v2 = vor.u32 %v12117_v3, %v10526_v4  ;;  %v10657_v56 = vor.u32 %v12149_v14, %v10654_v16  ;;  %v10478_v3 = vld [vmem:[#allocation23 + $0x258] sm:$0xf0] }
 0x748   : > { %v12137_v4 = vld [vmem:[#allocation23 + $0x34c] sm:$0xf]  ;;  %v10606_v14 = vld [vmem:[#allocation23 + $0x358] sm:$0xf0] }
 0x749   : > { %7058 = vmatpush.bf16.msra.mxu2 %v10765_v37  ;;  %7071 = vmatpush.bf16.msrb.mxu3 %v10893_v26  ;;  %v10430_v37 = vld [vmem:[#allocation23 + $0x1f8] sm:$0xf0]  ;;  %v12125_v26 = vld [vmem:[#allocation23 + $0x2ec] sm:$0xf] }
 0x74a   : > { %7084 = vmatpush.bf16.msrb.mxu0 %v11021_v29  ;;  %7097 = vmatpush.bf16.msra.mxu1 %v11149_v33  ;;  %v10558_v29 = vld [vmem:[#allocation23 + $0x2f8] sm:$0xf0]  ;;  %v12157_v33 = vld [vmem:[#allocation23 + $0x3ec] sm:$0xf] }
 0x74b   : > { %v10561_v21 = vor.u32 %v12125_v26, %v10558_v29  ;;  %v10238_v29 = vld [vmem:[#allocation23 + $0x78] sm:$0xf0] }
 0x74d   : > { %7059 = vmatpush.bf16.msra.mxu2 %v10749_v46  ;;  %7072 = vmatpush.bf16.msrb.mxu3 %v10877_v10  ;;  %v10433_v46 = vor.u32 %v12093_v25, %v10430_v37  ;;  %v12057_v10 = vld [vmem:[#allocation23 + $0xcc] sm:$0xf]  ;;  %v10638_v25 = vld [vmem:[#allocation23 + $0x398] sm:$0xf0]  ;;  %v6787_v37 = vperm.slane %v14096_v20, 0 }
 0x74e   : > { %7085 = vmatpush.bf16.msrb.mxu0 %v11005_v38  ;;  %7098 = vmatpush.bf16.msra.mxu1 %v11133_v15  ;;  %v10689_v38 = vor.u32 %v12157_v33, %v10686_v34  ;;  %v12089_v15 = vld [vmem:[#allocation23 + $0x1cc] sm:$0xf]  ;;  %v10289_v50 = vor.u32 %v12057_v10, %v10286_v9  ;;  %v10513_v33 = vor.u32 %v12113_v23, %v10510_v19  ;;  %v10334_v19 = vld [vmem:[#allocation23 + $0x138] sm:$0xf0] }
 0x74f   : > { %v10641_v34 = vor.u32 %v12145_v49, %v10638_v25  ;;  %v12109_v10 = vld [vmem:[#allocation23 + $0x26c] sm:$0xf]  ;;  %v10462_v49 = vld [vmem:[#allocation23 + $0x238] sm:$0xf0] }
 0x750   : > { %v12069_v23 = vld [vmem:[#allocation23 + $0x12c] sm:$0xf] }
 0x751   : > { %7060 = vmatpush.bf16.msra.mxu2 %v10733_v53  ;;  %7073 = vmatpush.bf16.msrb.mxu3 %v10861_v5  ;;  %v10417_v53 = vor.u32 %v12089_v15, %v10414_v36  ;;  %v12053_v5 = vld [vmem:[#allocation23 + $0xac] sm:$0xf]  ;;  %v10622_v15 = vld [vmem:[#allocation23 + $0x378] sm:$0xf0] }
 0x752   : > { %7086 = vmatpush.bf16.msrb.mxu0 %v10989_v60  ;;  %7099 = vmatpush.bf16.msra.mxu1 %v11117_v52  ;;  %v10545_v60 = vor.u32 %v12121_v0, %v10542_v30  ;;  %v10673_v52 = vor.u32 %v12153_v40, %v10670_v39  ;;  %v12133_v25 = vld [vmem:[#allocation23 + $0x32c] sm:$0xf] }
 0x755   : > { %7061 = vmatpush.bf16.msra.mxu2 %v10717_v45  ;;  %7074 = vmatpush.bf16.msrb.mxu3 %v10845_v31  ;;  %v10273_v45 = vor.u32 %v12053_v5, %v10270_v54  ;;  %v10401_v31 = vor.u32 %v12085_v57, %v10398_v63  ;;  %v12105_v57 = vld [vmem:[#allocation23 + $0x24c] sm:$0xf] }
 0x756   : > { %7087 = vmatpush.bf16.msrb.mxu0 %v10973_v12  ;;  %7100 = vmatpush.bf16.msra.mxu1 %v11101_v17  ;;  %v10254_v12 = vld [vmem:[#allocation23 + $0x98] sm:$0xf0]  ;;  %v12081_v17 = vld [vmem:[#allocation23 + $0x18c] sm:$0xf] }
 0x757   : > { %v10257_v26 = vor.u32 %v12049_v8, %v10254_v12  ;;  %v10206_v8 = vld [vmem:[#allocation23 + $0x38] sm:$0xf0] }
 0x759   : > { %7062 = vmatpush.bf16.msra.mxu2 %v10701_v61  ;;  %7075 = vmatpush.bf16.msrb.mxu3 %v10829_v47  ;;  %v6830_v7 = vpop.f32.mrf.mxu0  ;;  %v6843_v27 = vpop.f32.mrf.mxu1  ;;  %v10385_v61 = vor.u32 %v12081_v17, %v10382_v18  ;;  %v12045_v47 = vld [vmem:[#allocation23 + $0x6c] sm:$0xf]  ;;  %v10481_v17 = vor.u32 %v12105_v57, %v10478_v3 }
 0x75a   : > { %7088 = vmatpush.bf16.msrb.mxu0 %v10957_v51  ;;  %7101 = vmatpush.bf16.msra.mxu1 %v11085_v6  ;;  %v10241_v0 = vor.u32 %v12045_v47, %v10238_v29  ;;  %v10337_v47 = vor.u32 %v12069_v23, %v10334_v19  ;;  %v12281_v23 = vld [vmem:[#allocation23 + $0x7cc] sm:$0xf]  ;;  %v11182_v19 = vld [vmem:[#allocation23 + $0x7d8] sm:$0xf0] }
 0x75c   : > { %7063 = vmatmul.bf16.vlgmr.msra.gmra.mxu2 %v14049_v28  ;;  %7076 = vmatmul.bf16.vlgmr.msrb.gmra.mxu3 %v14051_v13 }
 0x75d   : > { %7107 = vmatpush.bf16.msrb.mxu2 %v10305_v43  ;;  %7120 = vmatpush.bf16.msra.mxu3 %v10433_v46  ;;  %v12077_v43 = vld [vmem:[#allocation23 + $0x16c] sm:$0xf]  ;;  %v10366_v46 = vld [vmem:[#allocation23 + $0x178] sm:$0xf0] }
 0x75e   : > { %7133 = vmatpush.bf16.msra.mxu0 %v10561_v21  ;;  %7146 = vmatpush.bf16.msrb.mxu1 %v10689_v38  ;;  %v6804_v51 = vpop.f32.mrf.mxu2  ;;  %v6817_v6 = vpop.f32.mrf.mxu3  ;;  %v10494_v21 = vld [vmem:[#allocation23 + $0x278] sm:$0xf0]  ;;  %v12141_v38 = vld [vmem:[#allocation23 + $0x36c] sm:$0xf]  ;;  %v10369_v30 = vor.u32 %v12077_v43, %v10366_v46 }
 0x75f   : > { %7089 = vmatmul.bf16.vlgmr.msrb.gmra.mxu0 %v14053_v11  ;;  %7102 = vmatmul.bf16.vlgmr.msra.gmra.mxu1 %v14055_v1  ;;  %v6805_v9 = vadd.f32 %v6804_v51, %v6787_v37  ;;  %v10497_v5 = vor.u32 %v12109_v10, %v10494_v21  ;;  %v10625_v54 = vor.u32 %v12141_v38, %v10622_v15  ;;  %v10590_v37 = vld [vmem:[#allocation23 + $0x338] sm:$0xf0]  ;;  %v12097_v46 = vld [vmem:[#allocation23 + $0x20c] sm:$0xf] }
 0x760   : > { %v10318_v51 = vld [vmem:[#allocation23 + $0x118] sm:$0xf0]  ;;  %v10593_v43 = vor.u32 %v12133_v25, %v10590_v37  ;;  %v12189_v38 = vld [vmem:[#allocation23 + $0x4ec] sm:$0xf] }
 0x761   : > { %7108 = vmatpush.bf16.msrb.mxu2 %v10289_v50  ;;  %7121 = vmatpush.bf16.msra.mxu3 %v10417_v53  ;;  %v6818_v36 = vadd.f32 %v6817_v6, %v6805_v9  ;;  %v6832_v40 = vpop.f32.mrf.mxu0  ;;  %v6845_v39 = vpop.f32.mrf.mxu1  ;;  %v12041_v50 = vld [vmem:[#allocation23 + $0x4c] sm:$0xf]  ;;  %v10222_v53 = vld [vmem:[#allocation23 + $0x58] sm:$0xf0] }
 0x762   : > { %7134 = vmatpush.bf16.msra.mxu0 %v10545_v60  ;;  %7147 = vmatpush.bf16.msrb.mxu1 %v10673_v52  ;;  %v12073_v60 = vld [vmem:[#allocation23 + $0x14c] sm:$0xf]  ;;  %v10350_v52 = vld [vmem:[#allocation23 + $0x158] sm:$0xf0]  ;;  %v10225_v16 = vor.u32 %v12041_v50, %v10222_v53 }
 0x763   : > { %v6831_v63 = vadd.f32 %v6830_v7, %v6818_v36  ;;  %v12101_v7 = vld [vmem:[#allocation23 + $0x22c] sm:$0xf]  ;;  %v10446_v10 = vld [vmem:[#allocation23 + $0x218] sm:$0xf0] }
 0x764   : > { %v10465_v6 = vor.u32 %v12101_v7, %v10462_v49  ;;  %v12129_v9 = vld [vmem:[#allocation23 + $0x30c] sm:$0xf]  ;;  %v10574_v21 = vld [vmem:[#allocation23 + $0x318] sm:$0xf0] }
 0x765   : > { %7109 = vmatpush.bf16.msrb.mxu2 %v10273_v45  ;;  %7122 = vmatpush.bf16.msra.mxu3 %v10401_v31  ;;  %v10353_v45 = vor.u32 %v12073_v60, %v10350_v52  ;;  %v12037_v31 = vld [vmem:[#allocation23 + $0x2c] sm:$0xf]  ;;  %v14099_v12 = vadd.f32 %v6843_v27, %v6831_v63  ;;  %v10814_v15 = vld [vmem:[#allocation23 + $0x4f8] sm:$0xf0]  ;;  %v10577_v60 = vor.u32 %v12129_v9, %v10574_v21 }
 0x766   : > { %7135 = vmatpush.bf16.msra.mxu0 %v10529_v2  ;;  %7148 = vmatpush.bf16.msrb.mxu1 %v10657_v56  ;;  %v10609_v2 = vor.u32 %v12137_v4, %v10606_v14  ;;  %v6806_v56 = vpop.f32.mrf.mxu2  ;;  %v6819_v18 = vpop.f32.mrf.mxu3  ;;  %v12221_v36 = vld [vmem:[#allocation23 + $0x5ec] sm:$0xf]  ;;  %v11070_v50 = vld [vmem:[#allocation23 + $0x6f8] sm:$0xf0]  ;;  %v10817_v63 = vor.u32 %v12189_v38, %v10814_v15 }
 0x767   : > { %v12285_v53 = vld [vmem:[#allocation23 + $0x7ec] sm:$0xf]  ;;  %v10798_v14 = vld [vmem:[#allocation23 + $0x4d8] sm:$0xf0] }
 0x768   : > { %v12185_v4 = vld [vmem:[#allocation23 + $0x4cc] sm:$0xf]  ;;  %v11054_v18 = vld [vmem:[#allocation23 + $0x6d8] sm:$0xf0] }
 0x769   : > { %7110 = vmatpush.bf16.msrb.mxu2 %v10257_v26  ;;  %7123 = vmatpush.bf16.msra.mxu3 %v10385_v61  ;;  %v12033_v26 = vld [vmem:[#allocation23 + $0xc] sm:$0xf]  ;;  %v10209_v61 = vor.u32 %v12037_v31, %v10206_v8  ;;  %v14101_v29 = vpop.f32.mrf.mxu0  ;;  %v14103_v27 = vpop.f32.mrf.mxu1  ;;  %v10926_v8 = vld [vmem:[#allocation23 + $0x5d8] sm:$0xf0]  ;;  %v10801_v7 = vor.u32 %v12185_v4, %v10798_v14 }
 0x76a   : > { %7136 = vmatpush.bf16.msra.mxu0 %v10513_v33  ;;  %7149 = vmatpush.bf16.msrb.mxu1 %v10641_v34  ;;  %v10190_v33 = vld [vmem:[#allocation23 + $0x18] sm:$0xf0]  ;;  %v12065_v34 = vld [vmem:[#allocation23 + $0x10c] sm:$0xf] }
 0x76b   : > { %v10193_v40 = vor.u32 %v12033_v26, %v10190_v33  ;;  %v10321_v39 = vor.u32 %v12065_v34, %v10318_v51  ;;  %v12217_v31 = vld [vmem:[#allocation23 + $0x5cc] sm:$0xf]  ;;  %v10782_v37 = vld [vmem:[#allocation23 + $0x4b8] sm:$0xf0] }
 0x76c   : > { %v10929_v49 = vor.u32 %v12217_v31, %v10926_v8  ;;  %v12181_v25 = vld [vmem:[#allocation23 + $0x4ac] sm:$0xf]  ;;  %v10910_v33 = vld [vmem:[#allocation23 + $0x5b8] sm:$0xf0] }
 0x76d   : > { %7111 = vmatpush.bf16.msrb.mxu2 %v10241_v0  ;;  %7124 = vmatpush.bf16.msra.mxu3 %v10369_v30  ;;  %v10942_v0 = vld [vmem:[#allocation23 + $0x5f8] sm:$0xf0]  ;;  %v12253_v30 = vld [vmem:[#allocation23 + $0x6ec] sm:$0xf]  ;;  %v10785_v9 = vor.u32 %v12181_v25, %v10782_v37 }
 0x76e   : > { %7137 = vmatpush.bf16.msra.mxu0 %v10497_v5  ;;  %7150 = vmatpush.bf16.msrb.mxu1 %v10625_v54  ;;  %v11198_v5 = vld [vmem:[#allocation23 + $0x7f8] sm:$0xf0]  ;;  %v10449_v54 = vor.u32 %v12097_v46, %v10446_v10  ;;  %v14105_v52 = vpop.f32.mrf.mxu2  ;;  %v14107_v57 = vpop.f32.mrf.mxu3  ;;  %v10945_v3 = vor.u32 %v12221_v36, %v10942_v0  ;;  %v12245_v34 = vld [vmem:[#allocation23 + $0x6ac] sm:$0xf] }
 0x76f   : > { %v11038_v51 = vld [vmem:[#allocation23 + $0x6b8] sm:$0xf0]  ;;  %v12177_v38 = vld [vmem:[#allocation23 + $0x48c] sm:$0xf] }
 0x770   : > { %v10766_v15 = vld [vmem:[#allocation23 + $0x498] sm:$0xf0]  ;;  %v12205_v4 = vld [vmem:[#allocation23 + $0x56c] sm:$0xf] }
 0x771   : > { %7112 = vmatpush.bf16.msrb.mxu2 %v10225_v16  ;;  %7125 = vmatpush.bf16.msra.mxu3 %v10353_v45  ;;  %v11073_v16 = vor.u32 %v12253_v30, %v11070_v50  ;;  %v11201_v45 = vor.u32 %v12285_v53, %v11198_v5  ;;  %v6897_v56 = vpop.f32.mrf.mxu1  ;;  %v10894_v0 = vld [vmem:[#allocation23 + $0x598] sm:$0xf0]  ;;  %v12241_v30 = vld [vmem:[#allocation23 + $0x68c] sm:$0xf]  ;;  %v10769_v53 = vor.u32 %v12177_v38, %v10766_v15 }
 0x772   : > { %7138 = vmatpush.bf16.msra.mxu0 %v10481_v17  ;;  %7151 = vmatpush.bf16.msrb.mxu1 %v10609_v2  ;;  %v12249_v17 = vld [vmem:[#allocation23 + $0x6cc] sm:$0xf]  ;;  %v6884_v2 = vpop.f32.mrf.mxu0  ;;  %v10878_v14 = vld [vmem:[#allocation23 + $0x578] sm:$0xf0] }
 0x773   : > { %v11057_v26 = vor.u32 %v12249_v17, %v11054_v18  ;;  %v12269_v31 = vld [vmem:[#allocation23 + $0x76c] sm:$0xf]  ;;  %v11134_v8 = vld [vmem:[#allocation23 + $0x778] sm:$0xf0]  ;;  %v10881_v2 = vor.u32 %v12205_v4, %v10878_v14 }
 0x774   : > { %v12169_v56 = vld [vmem:[#allocation23 + $0x44c] sm:$0xf]  ;;  %v10734_v18 = vld [vmem:[#allocation23 + $0x458] sm:$0xf0] }
 0x775   : > { %7113 = vmatpush.bf16.msrb.mxu2 %v10209_v61  ;;  %7126 = vmatpush.bf16.msra.mxu3 %v10337_v47  ;;  %v11185_v61 = vor.u32 %v12281_v23, %v11182_v19  ;;  %v12213_v47 = vld [vmem:[#allocation23 + $0x5ac] sm:$0xf]  ;;  %v11137_v19 = vor.u32 %v12269_v31, %v11134_v8  ;;  %v10862_v37 = vld [vmem:[#allocation23 + $0x558] sm:$0xf0]  ;;  %v11260_v31 = vld [vmem:[#allocation25 + $0x70] sm:$0xf] }
 0x776   : > { %7139 = vmatpush.bf16.msra.mxu0 %v10465_v6  ;;  %7152 = vmatpush.bf16.msrb.mxu1 %v10593_v43  ;;  %v12277_v6 = vld [vmem:[#allocation23 + $0x7ac] sm:$0xf]  ;;  %v11166_v43 = vld [vmem:[#allocation23 + $0x7b8] sm:$0xf0]  ;;  %v6858_v46 = vpop.f32.mrf.mxu2  ;;  %v6871_v10 = vpop.f32.mrf.mxu3  ;;  %v10913_v21 = vor.u32 %v12213_v47, %v10910_v33  ;;  %v12303_v8 = vld [vmem:[#allocation25 + $0x74] sm:$0xf0] }
 0x777   : > { %v11169_v36 = vor.u32 %v12277_v6, %v11166_v43  ;;  %v12201_v25 = vld [vmem:[#allocation23 + $0x54c] sm:$0xf]  ;;  %v11118_v33 = vld [vmem:[#allocation23 + $0x758] sm:$0xf0]  ;;  %v10737_v6 = vor.u32 %v12169_v56, %v10734_v18 }
 0x778   : > { %v12265_v47 = vld [vmem:[#allocation23 + $0x74c] sm:$0xf]  ;;  %v10865_v43 = vor.u32 %v12201_v25, %v10862_v37  ;;  %v10718_v10 = vld [vmem:[#allocation23 + $0x438] sm:$0xf0]  ;;  %v6788_v25 = vperm.slane %v14096_v20, 1  ;;  %v11261_v37 = vor.u32 %v12303_v8, %v11260_v31 }
 0x779   : > { %7114 = vmatpush.bf16.msrb.mxu2 %v10193_v40  ;;  %7127 = vmatpush.bf16.msra.mxu3 %v10321_v39  ;;  %v11022_v40 = vld [vmem:[#allocation23 + $0x698] sm:$0xf0]  ;;  %v12273_v39 = vld [vmem:[#allocation23 + $0x78c] sm:$0xf] }
 0x77a   : > { %7140 = vmatpush.bf16.msra.mxu0 %v10449_v54  ;;  %7153 = vmatpush.bf16.msrb.mxu1 %v10577_v60  ;;  %v12173_v54 = vld [vmem:[#allocation23 + $0x46c] sm:$0xf]  ;;  %v10750_v60 = vld [vmem:[#allocation23 + $0x478] sm:$0xf0] }
 0x77b   : > { %v10753_v17 = vor.u32 %v12173_v54, %v10750_v60  ;;  %v12165_v46 = vld [vmem:[#allocation23 + $0x42c] sm:$0xf]  ;;  %v10846_v15 = vld [vmem:[#allocation23 + $0x538] sm:$0xf0] }
 0x77c   : > { %7115 = vmatmul.bf16.vlgmr.msrb.gmra.mxu2 %v14034_v32  ;;  %7128 = vmatmul.bf16.vlgmr.msra.gmra.mxu3 %v14036_v41  ;;  %v11041_v32 = vor.u32 %v12245_v34, %v11038_v51  ;;  %v12209_v41 = vld [vmem:[#allocation23 + $0x58c] sm:$0xf]  ;;  %v14115_v50 = vpop.f32.mrf.mxu1  ;;  %v10958_v14 = vld [vmem:[#allocation23 + $0x618] sm:$0xf0] }
 0x77d   : > { %7159 = vmatpush.bf16.msra.mxu2 %v10817_v63  ;;  %7172 = vmatpush.bf16.msrb.mxu3 %v10945_v3  ;;  %v10897_v5 = vor.u32 %v12209_v41, %v10894_v0  ;;  %v11025_v63 = vor.u32 %v12241_v30, %v11022_v40  ;;  %v12197_v38 = vld [vmem:[#allocation23 + $0x52c] sm:$0xf]  ;;  %v11102_v0 = vld [vmem:[#allocation23 + $0x738] sm:$0xf0]  ;;  %v10721_v30 = vor.u32 %v12165_v46, %v10718_v10  ;;  %v11244_v10 = vld [vmem:[#allocation25 + $0x50] sm:$0xf] }
 0x77e   : > { %7185 = vmatpush.bf16.msrb.mxu0 %v11073_v16  ;;  %7198 = vmatpush.bf16.msra.mxu1 %v11201_v45  ;;  %v12237_v16 = vld [vmem:[#allocation23 + $0x66c] sm:$0xf]  ;;  %v11006_v45 = vld [vmem:[#allocation23 + $0x678] sm:$0xf0]  ;;  %v10849_v40 = vor.u32 %v12197_v38, %v10846_v15  ;;  %v12315_v38 = vld [vmem:[#allocation25 + $0xd4] sm:$0xf0] }
 0x77f   : > { %7141 = vmatmul.bf16.vlgmr.msra.gmra.mxu0 %v14038_v62  ;;  %7154 = vmatmul.bf16.vlgmr.msrb.gmra.mxu1 %v14040_v59  ;;  %v11150_v62 = vld [vmem:[#allocation23 + $0x798] sm:$0xf0]  ;;  %v14113_v59 = vpop.f32.mrf.mxu0  ;;  %v11009_v23 = vor.u32 %v12237_v16, %v11006_v45  ;;  %v12261_v41 = vld [vmem:[#allocation23 + $0x72c] sm:$0xf] }
 0x780   : > { %v11153_v3 = vor.u32 %v12273_v39, %v11150_v62  ;;  %v12161_v39 = vld [vmem:[#allocation23 + $0x40c] sm:$0xf]  ;;  %v10702_v62 = vld [vmem:[#allocation23 + $0x418] sm:$0xf0]  ;;  %v11105_v54 = vor.u32 %v12261_v41, %v11102_v0  ;;  %v12313_v41 = vld [vmem:[#allocation25 + $0xc4] sm:$0xf0] }
 0x781   : > { %7160 = vmatpush.bf16.msra.mxu2 %v10801_v7  ;;  %7173 = vmatpush.bf16.msrb.mxu3 %v10929_v49  ;;  %v14117_v7 = vpop.f32.mrf.mxu2  ;;  %v14119_v49 = vpop.f32.mrf.mxu3  ;;  %v12225_v4 = vld [vmem:[#allocation23 + $0x60c] sm:$0xf]  ;;  %v11086_v45 = vld [vmem:[#allocation23 + $0x718] sm:$0xf0]  ;;  %v10705_v56 = vor.u32 %v12161_v39, %v10702_v62  ;;  %v11292_v39 = vld [vmem:[#allocation25 + $0xb0] sm:$0xf] }
 0x782   : > { %7186 = vmatpush.bf16.msrb.mxu0 %v11057_v26  ;;  %7199 = vmatpush.bf16.msra.mxu1 %v11185_v61  ;;  %v12233_v26 = vld [vmem:[#allocation23 + $0x64c] sm:$0xf]  ;;  %v10990_v61 = vld [vmem:[#allocation23 + $0x658] sm:$0xf0]  ;;  %v12311_v62 = vld [vmem:[#allocation25 + $0xb4] sm:$0xf0] }
 0x783   : > { %v12257_v16 = vld [vmem:[#allocation23 + $0x70c] sm:$0xf] }
 0x784   : > { %v6949_v51 = vpop.f32.mrf.mxu1 }
 0x785   : > { %7161 = vmatpush.bf16.msra.mxu2 %v10785_v9  ;;  %7174 = vmatpush.bf16.msrb.mxu3 %v10913_v21  ;;  %v10993_v9 = vor.u32 %v12233_v26, %v10990_v61  ;;  %v11121_v21 = vor.u32 %v12265_v47, %v11118_v33  ;;  %v11252_v61 = vld [vmem:[#allocation25 + $0x60] sm:$0xf]  ;;  %v12301_v47 = vld [vmem:[#allocation25 + $0x64] sm:$0xf0]  ;;  %v6857_v51 = vadd.f32 %v14105_v52, %v14099_v12 }
 0x786   : > { %7187 = vmatpush.bf16.msrb.mxu0 %v11041_v32  ;;  %7200 = vmatpush.bf16.msra.mxu1 %v11169_v36  ;;  %v12229_v32 = vld [vmem:[#allocation23 + $0x62c] sm:$0xf]  ;;  %v10974_v36 = vld [vmem:[#allocation23 + $0x638] sm:$0xf0]  ;;  %v11316_v33 = vld [vmem:[#allocation25 + $0xe0] sm:$0xf] }
 0x787   : > { %v6936_v34 = vpop.f32.mrf.mxu0  ;;  %v6870_v12 = vadd.f32 %v14107_v57, %v6857_v51 }
 0x788   : > { %v12317_v34 = vld [vmem:[#allocation25 + $0xe4] sm:$0xf0] }
 0x789   : > { %7162 = vmatpush.bf16.msra.mxu2 %v10769_v53  ;;  %7175 = vmatpush.bf16.msrb.mxu3 %v10897_v5  ;;  %v12193_v53 = vld [vmem:[#allocation23 + $0x50c] sm:$0xf]  ;;  %v10977_v5 = vor.u32 %v12229_v32, %v10974_v36  ;;  %v6910_v60 = vpop.f32.mrf.mxu2  ;;  %v11317_v46 = vor.u32 %v12317_v34, %v11316_v33  ;;  %v11236_v32 = vld [vmem:[#allocation25 + $0x40] sm:$0xf]  ;;  %v12297_v36 = vld [vmem:[#allocation25 + $0x44] sm:$0xf0] }
 0x78a   : > { %7188 = vmatpush.bf16.msrb.mxu0 %v11025_v63  ;;  %7201 = vmatpush.bf16.msra.mxu1 %v11153_v3  ;;  %v6923_v63 = vpop.f32.mrf.mxu3  ;;  %v10830_v3 = vld [vmem:[#allocation23 + $0x518] sm:$0xf0]  ;;  %v11220_v60 = vld [vmem:[#allocation25 + $0x20] sm:$0xf] }
 0x78b   : > { %v10833_v18 = vor.u32 %v12193_v53, %v10830_v3  ;;  %v12293_v3 = vld [vmem:[#allocation25 + $0x24] sm:$0xf0]  ;;  %v11268_v33 = vld [vmem:[#allocation25 + $0x80] sm:$0xf] }
 0x78d   : > { %7163 = vmatpush.bf16.msra.mxu2 %v10753_v17  ;;  %7176 = vmatpush.bf16.msrb.mxu3 %v10881_v2  ;;  %v11324_v17 = vld [vmem:[#allocation25 + $0xf0] sm:$0xf]  ;;  %v12319_v2 = vld [vmem:[#allocation25 + $0xf4] sm:$0xf0] }
 0x78e   : > { %7189 = vmatpush.bf16.msrb.mxu0 %v11009_v23  ;;  %7202 = vmatpush.bf16.msra.mxu1 %v11137_v19  ;;  %v10961_v23 = vor.u32 %v12225_v4, %v10958_v14  ;;  %v11089_v19 = vor.u32 %v12257_v16, %v11086_v45  ;;  %v11325_v26 = vor.u32 %v12319_v2, %v11324_v17  ;;  %v11284_v4 = vld [vmem:[#allocation25 + $0xa0] sm:$0xf]  ;;  %v12309_v14 = vld [vmem:[#allocation25 + $0xa4] sm:$0xf0] }
 0x78f   : > { %v11285_v2 = vor.u32 %v12309_v14, %v11284_v4  ;;  %v12296_v14 = vld [vmem:[#allocation25 + $0x44] sm:$0xf] }
 0x791   : > { %7164 = vmatpush.bf16.msra.mxu2 %v10737_v6  ;;  %7177 = vmatpush.bf16.msrb.mxu3 %v10865_v43  ;;  %v6909_v6 = vadd.f32 %v14117_v7, %v6788_v25  ;;  %v11253_v43 = vor.u32 %v12301_v47, %v11252_v61  ;;  %v11204_v61 = vld [vmem:[#allocation25] sm:$0xf]  ;;  %v12289_v47 = vld [vmem:[#allocation25 + $0x4] sm:$0xf0] }
 0x792   : > { %7190 = vmatpush.bf16.msrb.mxu0 %v10993_v9  ;;  %7203 = vmatpush.bf16.msra.mxu1 %v11121_v21  ;;  %v12299_v9 = vld [vmem:[#allocation25 + $0x54] sm:$0xf0]  ;;  %v11308_v21 = vld [vmem:[#allocation25 + $0xd0] sm:$0xf] }
 0x793   : > { %v6922_v52 = vadd.f32 %v14119_v49, %v6909_v6  ;;  %v11245_v7 = vor.u32 %v12299_v9, %v11244_v10  ;;  %v11309_v15 = vor.u32 %v12315_v38, %v11308_v21  ;;  %v12295_v49 = vld [vmem:[#allocation25 + $0x34] sm:$0xf0]  ;;  %v12302_v10 = vld [vmem:[#allocation25 + $0x74] sm:$0xf]  ;;  %v11262_v9 = vld [vmem:[#allocation25 + $0x78] sm:$0xf0] }
 0x794   : > { %v12318_v38 = vld [vmem:[#allocation25 + $0xf4] sm:$0xf] }
 0x795   : > { %7165 = vmatpush.bf16.msra.mxu2 %v10721_v30  ;;  %7178 = vmatpush.bf16.msrb.mxu3 %v10849_v40  ;;  %v6935_v0 = vadd.f32 %v14113_v59, %v6922_v52  ;;  %v11237_v30 = vor.u32 %v12297_v36, %v11236_v32  ;;  %v11228_v40 = vld [vmem:[#allocation25 + $0x30] sm:$0xf]  ;;  %v11205_v52 = vor.u32 %v12289_v47, %v11204_v61  ;;  %v11222_v61 = vld [vmem:[#allocation25 + $0x28] sm:$0xf0]  ;;  %v12308_v47 = vld [vmem:[#allocation25 + $0xa4] sm:$0xf] }
 0x796   : > { %7191 = vmatpush.bf16.msrb.mxu0 %v10977_v5  ;;  %7204 = vmatpush.bf16.msra.mxu1 %v11105_v54  ;;  %v11229_v5 = vor.u32 %v12295_v49, %v11228_v40  ;;  %v11293_v54 = vor.u32 %v12311_v62, %v11292_v39  ;;  %v12298_v49 = vld [vmem:[#allocation25 + $0x54] sm:$0xf] }
 0x799   : > { %7166 = vmatpush.bf16.msra.mxu2 %v10705_v56  ;;  %7179 = vmatpush.bf16.msrb.mxu3 %v10833_v18  ;;  %v11212_v56 = vld [vmem:[#allocation25 + $0x10] sm:$0xf]  ;;  %v12291_v18 = vld [vmem:[#allocation25 + $0x14] sm:$0xf0] }
 0x79a   : > { %7192 = vmatpush.bf16.msrb.mxu0 %v10961_v23  ;;  %7205 = vmatpush.bf16.msra.mxu1 %v11089_v19  ;;  %v11276_v23 = vld [vmem:[#allocation25 + $0x90] sm:$0xf]  ;;  %v12307_v19 = vld [vmem:[#allocation25 + $0x94] sm:$0xf0] }
 0x79c   : > { %7167 = vmatmul.bf16.vlgmr.msra.gmra.mxu2 %v14049_v28  ;;  %7180 = vmatmul.bf16.vlgmr.msrb.gmra.mxu3 %v14051_v13  ;;  %v11300_v28 = vld [vmem:[#allocation25 + $0xc0] sm:$0xf]  ;;  %v6883_v13 = vadd.f32 %v14101_v29, %v6870_v12  ;;  %v6948_v29 = vadd.f32 %v14115_v50, %v6935_v0  ;;  %v11326_v12 = vld [vmem:[#allocation25 + $0xf8] sm:$0xf0] }
 0x79d   : > { %7645 = vmatpush.bf16.msrb.mxu2 %v11261_v37  ;;  %7659 = vmatpush.bf16.msra.mxu3 %v11325_v26  ;;  %v11301_v57 = vor.u32 %v12313_v41, %v11300_v28  ;;  %v11213_v37 = vor.u32 %v12291_v18, %v11212_v56  ;;  %v11277_v26 = vor.u32 %v12307_v19, %v11276_v23  ;;  %v12300_v41 = vld [vmem:[#allocation25 + $0x64] sm:$0xf]  ;;  %v11230_v18 = vld [vmem:[#allocation25 + $0x38] sm:$0xf0]  ;;  %v12310_v23 = vld [vmem:[#allocation25 + $0xb4] sm:$0xf] }
 0x79e   : > { %7193 = vmatmul.bf16.vlgmr.msrb.gmra.mxu0 %v14053_v11  ;;  %7206 = vmatmul.bf16.vlgmr.msra.gmra.mxu1 %v14055_v1  ;;  %v6986_v11 = vpop.f32.mrf.mxu0  ;;  %v6999_v1 = vpop.f32.mrf.mxu1  ;;  %v6896_v53 = vadd.f32 %v14103_v27, %v6883_v13  ;;  %v11221_v27 = vor.u32 %v12293_v3, %v11220_v60  ;;  %v11265_v28 = vor.u32 %v12302_v10, %v11262_v9  ;;  %v11254_v13 = vld [vmem:[#allocation25 + $0x68] sm:$0xf0]  ;;  %v11310_v60 = vld [vmem:[#allocation25 + $0xd8] sm:$0xf0]  ;;  %v12290_v10 = vld [vmem:[#allocation25 + $0x14] sm:$0xf] }
 0x79f   : > { %v6960_v59 = vpop.f32.mrf.mxu2  ;;  %v6973_v63 = vpop.f32.mrf.mxu3  ;;  %v11294_v19 = vld [vmem:[#allocation25 + $0xb8] sm:$0xf0] }
 0x7a0   : > { %v6961_v16 = vadd.f32 %v6960_v59, %v6948_v29  ;;  %v7211_v45 = vperm.slane %v6896_v53, 0  ;;  %v12314_v29 = vld [vmem:[#allocation25 + $0xd4] sm:$0xf] }
 0x7a1   : > { %7646 = vmatpush.bf16.msrb.mxu2 %v11253_v43  ;;  %7660 = vmatpush.bf16.msra.mxu3 %v11317_v46  ;;  %v12305_v46 = vld [vmem:[#allocation25 + $0x84] sm:$0xf0]  ;;  %v11313_v4 = vor.u32 %v12314_v29, %v11310_v60  ;;  %v12351_v60 = vld [vmem:[#allocation25 + $0x1f4] sm:$0xf0] }
 0x7a2   : > { %v6974_v31 = vadd.f32 %v6973_v63, %v6961_v16  ;;  %v7215_v34 = vadd.f32 %v7211_v45, %v14069_v48  ;;  %v7219_v51 = vadd.f32 %v7211_v45, %v14075_v24  ;;  %v11269_v32 = vor.u32 %v12305_v46, %v11268_v33  ;;  %v11238_v16 = vld [vmem:[#allocation25 + $0x48] sm:$0xf0]  ;;  %v12312_v45 = vld [vmem:[#allocation25 + $0xc4] sm:$0xf] }
 0x7a3   : > { %v11329_v24 = vor.u32 %v12318_v38, %v11326_v12  ;;  %v11286_v33 = vld [vmem:[#allocation25 + $0xa8] sm:$0xf0]  ;;  %v12306_v12 = vld [vmem:[#allocation25 + $0x94] sm:$0xf] }
 0x7a4   : > { %v6987_v50 = vadd.f32 %v6986_v11, %v6974_v31  ;;  %v7223_v36 = vmax.f32 %v7215_v34, 0.0  ;;  %v7227_v48 = vmax.f32 %v7219_v51, 0.0  ;;  %v11302_v31 = vld [vmem:[#allocation25 + $0xc8] sm:$0xf0]  ;;  %v11289_v46 = vor.u32 %v12308_v47, %v11286_v33 }
 0x7a5   : > { %7647 = vmatpush.bf16.msrb.mxu2 %v11245_v7  ;;  %7661 = vmatpush.bf16.msra.mxu3 %v11309_v15 }
 0x7a6   : > { %v6988_v8 = vpop.f32.mrf.mxu0  ;;  %v7001_v17 = vpop.f32.mrf.mxu1  ;;  %v7000_v25 = vadd.f32 %v6999_v1, %v6987_v50  ;;  %v12316_v1 = vld [vmem:[#allocation25 + $0xe4] sm:$0xf]  ;;  %v6789_v50 = vperm.slane %v14096_v20, 2  ;;  %v11214_v20 = vld [vmem:[#allocation25 + $0x18] sm:$0xf0] }
 0x7a7   : > { %v6962_v6 = vpop.f32.mrf.mxu2  ;;  %v6975_v43 = vpop.f32.mrf.mxu3  ;;  %v11241_v8 = vor.u32 %v12296_v14, %v11238_v16  ;;  %v11305_v17 = vor.u32 %v12312_v45, %v11302_v31  ;;  %v11380_v14 = vld [vmem:[#allocation25 + $0x160] sm:$0xf]  ;;  %v12349_v31 = vld [vmem:[#allocation25 + $0x1e4] sm:$0xf0] }
 0x7a8   : > { %v7212_v21 = vperm.slane %v7000_v25, 0 }
 0x7a9   : > { %7648 = vmatpush.bf16.msrb.mxu2 %v11237_v30  ;;  %7662 = vmatpush.bf16.msra.mxu3 %v11301_v57  ;;  %v11318_v30 = vld [vmem:[#allocation25 + $0xe8] sm:$0xf0] }
 0x7aa   : > { %v7216_v7 = vadd.f32 %v7212_v21, %v14081_v22  ;;  %v7220_v15 = vadd.f32 %v7212_v21, %v14087_v55  ;;  %v11257_v22 = vor.u32 %v12300_v41, %v11254_v13  ;;  %v11321_v55 = vor.u32 %v12316_v1, %v11318_v30 }
 0x7ac   : > { %v7224_v0 = vmax.f32 %v7216_v7, 0.0  ;;  %v7228_v11 = vmax.f32 %v7220_v15, 0.0  ;;  %v11217_v15 = vor.u32 %v12290_v10, %v11214_v20 }
 0x7ad   : > { %7649 = vmatpush.bf16.msrb.mxu2 %v11229_v5  ;;  %7663 = vmatpush.bf16.msra.mxu3 %v11293_v54  ;;  %v11246_v54 = vld [vmem:[#allocation25 + $0x58] sm:$0xf0] }
 0x7ae   : > { %v7231_v57 = vpack.c.bf16 %v7224_v0, %v7223_v36  ;;  %v7233_v40 = vpack.c.bf16 %v7228_v11, %v7227_v48  ;;  %v11249_v3 = vor.u32 %v12298_v49, %v11246_v54  ;;  %v12288_v36 = vld [vmem:[#allocation25 + $0x4] sm:$0xf]  ;;  %v11206_v48 = vld [vmem:[#allocation25 + $0x8] sm:$0xf0]  ;;  %v11388_v49 = vld [vmem:[#allocation25 + $0x170] sm:$0xf] }
 0x7af   : > { %v11209_v11 = vor.u32 %v12288_v36, %v11206_v48  ;;  %v12323_v36 = vld [vmem:[#allocation25 + $0x114] sm:$0xf0]  ;;  %v11404_v48 = vld [vmem:[#allocation25 + $0x190] sm:$0xf] }
 0x7b0   : > { %v7309_v39 = vunpack.c.l.b16 %v7231_v57  ;;  %v7310_v62 = vunpack.c.h.b16 %v7231_v57  ;;  %v7313_v53 = vunpack.c.l.b16 %v7233_v40  ;;  %v7314_v5 = vunpack.c.h.b16 %v7233_v40 }
 0x7b1   : > { %7650 = vmatpush.bf16.msrb.mxu2 %v11221_v27  ;;  %7664 = vmatpush.bf16.msra.mxu3 %v11285_v2  ;;  %v12294_v27 = vld [vmem:[#allocation25 + $0x34] sm:$0xf] }
 0x7b2   : > { %v7317_v59 = vpack.c.b16 %v7313_v53, %v7309_v39  ;;  %v7318_v63 = vpack.c.b16 %v7314_v5, %v7310_v62  ;;  %v11233_v25 = vor.u32 %v12294_v27, %v11230_v18  ;;  %v12335_v39 = vld [vmem:[#allocation25 + $0x174] sm:$0xf0]  ;;  %v11452_v62 = vld [vmem:[#allocation25 + $0x1f0] sm:$0xf] }
 0x7b3   : > { %v11389_v29 = vor.u32 %v12335_v39, %v11388_v49  ;;  %v11436_v18 = vld [vmem:[#allocation25 + $0x1d0] sm:$0xf] }
 0x7b5   : > { %7651 = vmatpush.bf16.msrb.mxu2 %v11213_v37  ;;  %7665 = vmatpush.bf16.msra.mxu3 %v11277_v26  ;;  %v11297_v37 = vor.u32 %v12310_v23, %v11294_v19  ;;  %v12292_v26 = vld [vmem:[#allocation25 + $0x24] sm:$0xf]  ;;  %v12347_v23 = vld [vmem:[#allocation25 + $0x1d4] sm:$0xf0] }
 0x7b6   : > { %v11225_v43 = vor.u32 %v12292_v26, %v11222_v61  ;;  %7673 = vmatpush.bf16.msra.mxu0 %v11389_v29  ;;  %v11428_v26 = vld [vmem:[#allocation25 + $0x1c0] sm:$0xf]  ;;  %v12345_v61 = vld [vmem:[#allocation25 + $0x1c4] sm:$0xf0] }
 0x7b7   : > { %v11429_v33 = vor.u32 %v12345_v61, %v11428_v26  ;;  %v11430_v61 = vld [vmem:[#allocation25 + $0x1c8] sm:$0xf0] }
 0x7b9   : > { %7652 = vmatpush.bf16.msrb.mxu2 %v11205_v52  ;;  %7666 = vmatpush.bf16.msra.mxu3 %v11269_v32  ;;  %v11278_v52 = vld [vmem:[#allocation25 + $0x98] sm:$0xf0] }
 0x7ba   : > { %v11281_v32 = vor.u32 %v12306_v12, %v11278_v52  ;;  %v12341_v12 = vld [vmem:[#allocation25 + $0x1a4] sm:$0xf0] }
 0x7bc   : > { %7653 = vmatmul.bf16.vlgmr.msrb.gmra.mxu2 %v7317_v59  ;;  %7667 = vmatmul.bf16.vlgmr.msra.gmra.mxu3 %v7318_v63  ;;  %v7038_v2 = vpop.f32.mrf.mxu0  ;;  %v7051_v56 = vpop.f32.mrf.mxu1 }
 0x7bd   : > { %7701 = vmatpush.bf16.msra.mxu2 %v11265_v28  ;;  %7715 = vmatpush.bf16.msrb.mxu3 %v11329_v24  ;;  %v12304_v28 = vld [vmem:[#allocation25 + $0x84] sm:$0xf]  ;;  %v11270_v24 = vld [vmem:[#allocation25 + $0x88] sm:$0xf0] }
 0x7be   : > { %v11273_v1 = vor.u32 %v12304_v28, %v11270_v24  ;;  %v12339_v24 = vld [vmem:[#allocation25 + $0x194] sm:$0xf0] }
 0x7bf   : > { %v7012_v34 = vpop.f32.mrf.mxu2  ;;  %v7025_v51 = vpop.f32.mrf.mxu3 }
 0x7c0   : > { %v7013_v6 = vadd.f32 %v7012_v34, %v6789_v50  ;;  %v11437_v50 = vor.u32 %v12347_v23, %v11436_v18  ;;  %v11356_v34 = vld [vmem:[#allocation25 + $0x130] sm:$0xf]  ;;  %v12614_v23 = vld [vmem:[%s14269_s21] sm:$0xf] }
 0x7c1   : > { %7702 = vmatpush.bf16.msra.mxu2 %v11257_v22  ;;  %7716 = vmatpush.bf16.msrb.mxu3 %v11321_v55 }
 0x7c2   : > { %v7026_v9 = vadd.f32 %v7025_v51, %v7013_v6  ;;  %v12327_v51 = vld [vmem:[#allocation25 + $0x134] sm:$0xf0]  ;;  %v11420_v6 = vld [vmem:[#allocation25 + $0x1b0] sm:$0xf] }
 0x7c4   : > { %v7040_v21 = vpop.f32.mrf.mxu0  ;;  %v7053_v38 = vpop.f32.mrf.mxu1  ;;  %v7039_v7 = vadd.f32 %v7038_v2, %v7026_v9  ;;  %v11348_v9 = vld [vmem:[#allocation25 + $0x120] sm:$0xf] }
 0x7c5   : > { %7703 = vmatpush.bf16.msra.mxu2 %v11249_v3  ;;  %7717 = vmatpush.bf16.msrb.mxu3 %v11313_v4  ;;  %v11453_v3 = vor.u32 %v12351_v60, %v11452_v62  ;;  %v12325_v21 = vld [vmem:[#allocation25 + $0x124] sm:$0xf0]  ;;  %v11412_v38 = vld [vmem:[#allocation25 + $0x1a0] sm:$0xf]  ;;  %v12350_v62 = vld [vmem:[#allocation25 + $0x1f4] sm:$0xf] }
 0x7c6   : > { %v7052_v41 = vadd.f32 %v7051_v56, %v7039_v7  ;;  %v11349_v20 = vor.u32 %v12325_v21, %v11348_v9  ;;  %v11413_v52 = vor.u32 %v12341_v12, %v11412_v38  ;;  %v12332_v60 = vld [vmem:[#allocation25 + $0x164] sm:$0xf]  ;;  %v11350_v9 = vld [vmem:[#allocation25 + $0x128] sm:$0xf0] }
 0x7c7   : > { %v7014_v13 = vpop.f32.mrf.mxu2  ;;  %v7027_v0 = vpop.f32.mrf.mxu3  ;;  %7687 = vmatpush.bf16.msrb.mxu1 %v11453_v3  ;;  %v11382_v3 = vld [vmem:[#allocation25 + $0x168] sm:$0xf0]  ;;  %v12340_v38 = vld [vmem:[#allocation25 + $0x1a4] sm:$0xf] }
 0x7c9   : > { %7704 = vmatpush.bf16.msra.mxu2 %v11241_v8  ;;  %7718 = vmatpush.bf16.msrb.mxu3 %v11305_v17  ;;  %v11372_v8 = vld [vmem:[#allocation25 + $0x150] sm:$0xf]  ;;  %v12331_v17 = vld [vmem:[#allocation25 + $0x154] sm:$0xf0] }
 0x7ca   : > { %v11373_v19 = vor.u32 %v12331_v17, %v11372_v8  ;;  %v12330_v8 = vld [vmem:[#allocation25 + $0x154] sm:$0xf]  ;;  %v11374_v17 = vld [vmem:[#allocation25 + $0x158] sm:$0xf0] }
 0x7cd   : > { %7705 = vmatpush.bf16.msra.mxu2 %v11233_v25  ;;  %7719 = vmatpush.bf16.msrb.mxu3 %v11297_v37  ;;  %v11364_v25 = vld [vmem:[#allocation25 + $0x140] sm:$0xf]  ;;  %v12329_v37 = vld [vmem:[#allocation25 + $0x144] sm:$0xf0] }
 0x7ce   : > { %v11365_v47 = vor.u32 %v12329_v37, %v11364_v25  ;;  %v11366_v25 = vld [vmem:[#allocation25 + $0x148] sm:$0xf0]  ;;  %v12344_v37 = vld [vmem:[#allocation25 + $0x1c4] sm:$0xf] }
 0x7d1   : > { %7706 = vmatpush.bf16.msra.mxu2 %v11225_v43  ;;  %7720 = vmatpush.bf16.msrb.mxu3 %v11289_v46  ;;  %v12343_v43 = vld [vmem:[#allocation25 + $0x1b4] sm:$0xf0]  ;;  %v11357_v46 = vor.u32 %v12327_v51, %v11356_v34  ;;  %v12326_v34 = vld [vmem:[#allocation25 + $0x134] sm:$0xf]  ;;  %v11358_v51 = vld [vmem:[#allocation25 + $0x138] sm:$0xf0] }
 0x7d2   : > { %v11421_v10 = vor.u32 %v12343_v43, %v11420_v6  ;;  %v12342_v6 = vld [vmem:[#allocation25 + $0x1b4] sm:$0xf]  ;;  %v11361_v43 = vor.u32 %v12326_v34, %v11358_v51  ;;  %v12366_v34 = vld [vmem:[%s14272_s24 + $0x70] sm:$0xff] }
 0x7d3   : > { %v12353_v51 = vld [vmem:[%s14272_s24 + $0x8] sm:$0xff] }
 0x7d5   : > { %7707 = vmatpush.bf16.msra.mxu2 %v11217_v15  ;;  %7721 = vmatpush.bf16.msrb.mxu3 %v11281_v32  ;;  %v11340_v32 = vld [vmem:[#allocation25 + $0x110] sm:$0xf] }
 0x7d6   : > { %v11341_v28 = vor.u32 %v12323_v36, %v11340_v32  ;;  %v12322_v36 = vld [vmem:[#allocation25 + $0x114] sm:$0xf] }
 0x7d9   : > { %7708 = vmatpush.bf16.msra.mxu2 %v11209_v11  ;;  %7722 = vmatpush.bf16.msrb.mxu3 %v11273_v1  ;;  %v11332_v11 = vld [vmem:[#allocation25 + $0x100] sm:$0xf]  ;;  %v12321_v1 = vld [vmem:[#allocation25 + $0x104] sm:$0xf0] }
 0x7dc   : > { %7709 = vmatmul.bf16.vlgmr.msra.gmra.mxu2 %v7317_v59  ;;  %7723 = vmatmul.bf16.vlgmr.msrb.gmra.mxu3 %v7318_v63  ;;  %v7090_v30 = vpop.f32.mrf.mxu0  ;;  %v7103_v57 = vpop.f32.mrf.mxu1  ;;  %v12333_v59 = vld [vmem:[#allocation25 + $0x164] sm:$0xf0]  ;;  %v11444_v63 = vld [vmem:[#allocation25 + $0x1e0] sm:$0xf] }
 0x7dd   : > { %v11381_v45 = vor.u32 %v12333_v59, %v11380_v14  ;;  %v11445_v56 = vor.u32 %v12349_v31, %v11444_v63  ;;  %v11385_v14 = vor.u32 %v12332_v60, %v11382_v3  ;;  %v11446_v59 = vld [vmem:[#allocation25 + $0x1e8] sm:$0xf0] }
 0x7df   : > { %v7064_v40 = vpop.f32.mrf.mxu2  ;;  %v7077_v22 = vpop.f32.mrf.mxu3  ;;  %7674 = vmatpush.bf16.msra.mxu0 %v11381_v45  ;;  %7688 = vmatpush.bf16.msrb.mxu1 %v11445_v56  ;;  %v11438_v56 = vld [vmem:[#allocation25 + $0x1d8] sm:$0xf0] }
 0x7e0   : > { %v7065_v55 = vadd.f32 %v7064_v40, %v7052_v41  ;;  %v11405_v41 = vor.u32 %v12339_v24, %v11404_v48  ;;  %v12337_v40 = vld [vmem:[#allocation25 + $0x184] sm:$0xf0]  ;;  %v11342_v48 = vld [vmem:[#allocation25 + $0x118] sm:$0xf0] }
 0x7e1   : > { %v11406_v24 = vld [vmem:[#allocation25 + $0x198] sm:$0xf0] }
 0x7e2   : > { %v7078_v53 = vadd.f32 %v7077_v22, %v7065_v55  ;;  %v12334_v22 = vld [vmem:[#allocation25 + $0x174] sm:$0xf]  ;;  %v11390_v55 = vld [vmem:[#allocation25 + $0x178] sm:$0xf0] }
 0x7e3   : > { %7675 = vmatpush.bf16.msra.mxu0 %v11373_v19  ;;  %7689 = vmatpush.bf16.msrb.mxu1 %v11437_v50  ;;  %v11393_v39 = vor.u32 %v12334_v22, %v11390_v55  ;;  %v6790_v19 = vperm.slane %v12614_v23, 3  ;;  %v12328_v50 = vld [vmem:[#allocation25 + $0x144] sm:$0xf] }
 0x7e4   : > { %v7092_v5 = vpop.f32.mrf.mxu0  ;;  %v7105_v54 = vpop.f32.mrf.mxu1  ;;  %v7091_v4 = vadd.f32 %v7090_v30, %v7078_v53  ;;  %v11396_v30 = vld [vmem:[#allocation25 + $0x180] sm:$0xf]  ;;  %v11454_v53 = vld [vmem:[#allocation25 + $0x1f8] sm:$0xf0]  ;;  %v11369_v26 = vor.u32 %v12328_v50, %v11366_v25  ;;  %v12336_v22 = vld [vmem:[#allocation25 + $0x184] sm:$0xf] }
 0x7e5   : > { %v11397_v49 = vor.u32 %v12337_v40, %v11396_v30  ;;  %v11457_v29 = vor.u32 %v12350_v62, %v11454_v53  ;;  %v11334_v40 = vld [vmem:[#allocation25 + $0x108] sm:$0xf0] }
 0x7e6   : > { %v14140_v16 = vadd.f32 %v7103_v57, %v7091_v4  ;;  %v11333_v57 = vor.u32 %v12321_v1, %v11332_v11  ;;  %v12348_v4 = vld [vmem:[#allocation25 + $0x1e4] sm:$0xf]  ;;  %v11345_v1 = vor.u32 %v12322_v36, %v11342_v48  ;;  %v12360_v36 = vld [vmem:[%s14272_s24 + $0x40] sm:$0xff] }
 0x7e7   : > { %v7066_v27 = vpop.f32.mrf.mxu2  ;;  %v7079_v2 = vpop.f32.mrf.mxu3  ;;  %7676 = vmatpush.bf16.msra.mxu0 %v11365_v47  ;;  %7690 = vmatpush.bf16.msrb.mxu1 %v11429_v33  ;;  %v11449_v63 = vor.u32 %v12348_v4, %v11446_v59  ;;  %v11433_v47 = vor.u32 %v12344_v37, %v11430_v61  ;;  %v12355_v61 = vld [vmem:[%s14272_s24 + $0x18] sm:$0xff] }
 0x7e8   : > { %v12346_v27 = vld [vmem:[#allocation25 + $0x1d4] sm:$0xf]  ;;  %v11377_v2 = vor.u32 %v12330_v8, %v11374_v17  ;;  %v7213_v60 = vperm.slane %v14140_v16, 0 }
 0x7e9   : > { %v11441_v18 = vor.u32 %v12346_v27, %v11438_v56 }
 0x7eb   : > { %7677 = vmatpush.bf16.msra.mxu0 %v11357_v46  ;;  %7691 = vmatpush.bf16.msrb.mxu1 %v11421_v10  ;;  %v11422_v46 = vld [vmem:[#allocation25 + $0x1b8] sm:$0xf0]  ;;  %v12324_v10 = vld [vmem:[#allocation25 + $0x124] sm:$0xf] }
 0x7ec   : > { %v11425_v21 = vor.u32 %v12342_v6, %v11422_v46  ;;  %v12365_v6 = vld [vmem:[%s14272_s24 + $0x68] sm:$0xff]  ;;  %v12364_v46 = vld [vmem:[%s14272_s24 + $0x60] sm:$0xff] }
 0x7ef   : > { %7678 = vmatpush.bf16.msra.mxu0 %v11349_v20  ;;  %7692 = vmatpush.bf16.msrb.mxu1 %v11413_v52  ;;  %v11414_v20 = vld [vmem:[#allocation25 + $0x1a8] sm:$0xf0]  ;;  %v11353_v52 = vor.u32 %v12324_v10, %v11350_v9  ;;  %v12363_v10 = vld [vmem:[%s14272_s24 + $0x58] sm:$0xff] }
 0x7f0   : > { %v11417_v32 = vor.u32 %v12340_v38, %v11414_v20  ;;  %v7299_v38 = vld [vmem:[%s14337_s11] sm:$0x3]  ;;  %v12361_v20 = vld [vmem:[%s14272_s24 + $0x48] sm:$0xff] }
 0x7f3   : > { %7679 = vmatpush.bf16.msra.mxu0 %v11341_v28  ;;  %7693 = vmatpush.bf16.msrb.mxu1 %v11405_v41  ;;  %v12338_v28 = vld [vmem:[#allocation25 + $0x194] sm:$0xf] }
 0x7f4   : > { %v11409_v30 = vor.u32 %v12338_v28, %v11406_v24 }
 0x7f7   : > { %7680 = vmatpush.bf16.msra.mxu0 %v11333_v57  ;;  %7694 = vmatpush.bf16.msrb.mxu1 %v11397_v49  ;;  %v12320_v57 = vld [vmem:[#allocation25 + $0x104] sm:$0xf] }
 0x7f8   : > { %v11337_v49 = vor.u32 %v12320_v57, %v11334_v40 }
 0x7fb   : > { %7729 = vmatpush.bf16.msrb.mxu0 %v11393_v39  ;;  %7743 = vmatpush.bf16.msra.mxu1 %v11457_v29 }
 0x7fc   : > { %v14142_v7 = vpop.f32.mrf.mxu0  ;;  %v14144_v15 = vpop.f32.mrf.mxu1 }
 0x7ff   : > { %v7116_v13 = vpop.f32.mrf.mxu2  ;;  %v7129_v0 = vpop.f32.mrf.mxu3  ;;  %7730 = vmatpush.bf16.msrb.mxu0 %v11385_v14  ;;  %7744 = vmatpush.bf16.msra.mxu1 %v11449_v63  ;;  %v7221_v63 = vadd.f32 %v7213_v60, %v14085_v35  ;;  %v12356_v35 = vld [vmem:[%s14272_s24 + $0x20] sm:$0xff] }
 0x800   : > { %v7117_v33 = vadd.f32 %v7116_v13, %v6790_v19 }
 0x801   : > { %v7229_v27 = vmax.f32 %v7221_v63, 0.0 }
 0x802   : > { %v7130_v12 = vadd.f32 %v7129_v0, %v7117_v33  ;;  %v11398_v0 = vld [vmem:[#allocation25 + $0x188] sm:$0xf0]  ;;  %v12354_v33 = vld [vmem:[%s14272_s24 + $0x10] sm:$0xff] }
 0x803   : > { %7731 = vmatpush.bf16.msrb.mxu0 %v11377_v2  ;;  %7745 = vmatpush.bf16.msra.mxu1 %v11441_v18  ;;  %v11401_v53 = vor.u32 %v12336_v22, %v11398_v0 }
 0x804   : > { %v7144_v5 = vpop.f32.mrf.mxu0  ;;  %v7157_v54 = vpop.f32.mrf.mxu1  ;;  %v7143_v41 = vadd.f32 %v14142_v7, %v7130_v12 }
 0x806   : > { %v7156_v55 = vadd.f32 %v14144_v15, %v7143_v41  ;;  %v7217_v15 = vadd.f32 %v7213_v60, %v14079_v58  ;;  %v12358_v58 = vld [vmem:[%s14272_s24 + $0x30] sm:$0xff] }
 0x807   : > { %v7118_v45 = vpop.f32.mrf.mxu2  ;;  %v7131_v31 = vpop.f32.mrf.mxu3  ;;  %7732 = vmatpush.bf16.msrb.mxu0 %v11369_v26  ;;  %7746 = vmatpush.bf16.msra.mxu1 %v11433_v47  ;;  %v12367_v47 = vld [vmem:[%s14272_s24 + $0x78] sm:$0xff] }
 0x808   : > { %v7225_v17 = vmax.f32 %v7217_v15, 0.0  ;;  %7909 = vmatpush.bf16.msra.mxu3 %v12367_v47 }
 0x80b   : > { %7733 = vmatpush.bf16.msrb.mxu0 %v11361_v43  ;;  %7747 = vmatpush.bf16.msra.mxu1 %v11425_v21  ;;  %v12352_v43 = vld [vmem:[%s14272_s24] sm:$0xff]  ;;  %v12362_v21 = vld [vmem:[%s14272_s24 + $0x50] sm:$0xff] }
 0x80c   : > { %7910 = vmatpush.bf16.msra.mxu3 %v12366_v34 }
 0x80f   : > { %7734 = vmatpush.bf16.msrb.mxu0 %v11353_v52  ;;  %7748 = vmatpush.bf16.msra.mxu1 %v11417_v32  ;;  %v7301_v52 = vperm.slane %v7299_v38, 0 }
 0x810   : > { %7911 = vmatpush.bf16.msra.mxu3 %v12365_v6 }
 0x813   : > { %7735 = vmatpush.bf16.msrb.mxu0 %v11345_v1  ;;  %7749 = vmatpush.bf16.msra.mxu1 %v11409_v30 }
 0x814   : > { %7912 = vmatpush.bf16.msra.mxu3 %v12364_v46 }
 0x817   : > { %7736 = vmatpush.bf16.msrb.mxu0 %v11337_v49  ;;  %7750 = vmatpush.bf16.msra.mxu1 %v11401_v53  ;;  %v7302_v49 = vperm.slane %v7299_v38, 1 }
 0x818   : > { %7913 = vmatpush.bf16.msra.mxu3 %v12363_v10 }
 0x81b   : > { %v7194_v13 = vpop.f32.mrf.mxu0  ;;  %v7207_v11 = vpop.f32.mrf.mxu1 }
 0x81c   : > { %7914 = vmatpush.bf16.msra.mxu3 %v12362_v21  ;;  %v12612_v21 = vld [vmem:[%s14341_s6] ss:$0 sm:$0xff] }
 0x81f   : > { %v7168_v39 = vpop.f32.mrf.mxu2  ;;  %v7181_v62 = vpop.f32.mrf.mxu3 }
 0x820   : > { %v7169_v5 = vadd.f32 %v7168_v39, %v7156_v55  ;;  %7915 = vmatpush.bf16.msra.mxu3 %v12361_v20 }
 0x822   : > { %v7182_v7 = vadd.f32 %v7181_v62, %v7169_v5 }
 0x823   : > { %v7196_v54 = vpop.f32.mrf.mxu0  ;;  %v7209_v29 = vpop.f32.mrf.mxu1 }
 0x824   : > { %v7195_v3 = vadd.f32 %v7194_v13, %v7182_v7  ;;  %7916 = vmatpush.bf16.msra.mxu3 %v12360_v36 }
 0x826   : > { %v7208_v4 = vadd.f32 %v7207_v11, %v7195_v3 }
 0x827   : > { %v7170_v14 = vpop.f32.mrf.mxu2  ;;  %v7183_v59 = vpop.f32.mrf.mxu3 }
 0x828   : > { %v7214_v45 = vperm.slane %v7208_v4, 0 }
 0x82a   : > { %v7218_v31 = vadd.f32 %v7214_v45, %v14077_v42  ;;  %v7222_v8 = vadd.f32 %v7214_v45, %v14083_v44  ;;  %v12359_v42 = vld [vmem:[%s14272_s24 + $0x38] sm:$0xff]  ;;  %v12357_v44 = vld [vmem:[%s14272_s24 + $0x28] sm:$0xff] }
 0x82b   : > { %7895 = vmatpush.bf16.msrb.mxu2 %v12359_v42  ;;  %v12368_v42 = vld [vmem:[#allocation26] sm:$0xff] }
 0x82c   : > { %v7226_v2 = vmax.f32 %v7218_v31, 0.0  ;;  %v7230_v56 = vmax.f32 %v7222_v8, 0.0 }
 0x82e   : > { %v7232_v18 = vpack.c.bf16 %v7226_v2, %v7225_v17  ;;  %v7234_v23 = vpack.c.bf16 %v7230_v56, %v7229_v27 }
 0x82f   : > { %7896 = vmatpush.bf16.msrb.mxu2 %v12358_v58 }
 0x830   : > { %v7311_v16 = vunpack.c.l.b16 %v7232_v18  ;;  %v7312_v19 = vunpack.c.h.b16 %v7232_v18  ;;  %v7315_v50 = vunpack.c.l.b16 %v7234_v23  ;;  %v7316_v25 = vunpack.c.h.b16 %v7234_v23  ;;  %v12375_v23 = vld [vmem:[#allocation26 + $0x38] sm:$0xff] }
 0x832   : > { %v7319_v37 = vpack.c.b16 %v7315_v50, %v7311_v16  ;;  %v7320_v26 = vpack.c.b16 %v7316_v25, %v7312_v19  ;;  %v12374_v16 = vld [vmem:[#allocation26 + $0x30] sm:$0xff]  ;;  %v12373_v19 = vld [vmem:[#allocation26 + $0x28] sm:$0xff]  ;;  %v12372_v50 = vld [vmem:[#allocation26 + $0x20] sm:$0xff] }
 0x833   : > { %7897 = vmatpush.bf16.msrb.mxu2 %v12357_v44  ;;  %v12371_v25 = vld [vmem:[#allocation26 + $0x18] sm:$0xff] }
 0x834   : > { %7681 = vmatmul.bf16.vlgmr.msra.gmra.mxu0 %v7319_v37  ;;  %7695 = vmatmul.bf16.vlgmr.msrb.gmra.mxu1 %v7320_v26 }
 0x835   : > { %7994 = vmatpush.bf16.msra.mxu0 %v12375_v23 }
 0x837   : > { %7898 = vmatpush.bf16.msrb.mxu2 %v12356_v35  ;;  %v12611_v35 = vld [vmem:[%s14339_s25] ss:$0 sm:$0xff] }
 0x839   : > { %7995 = vmatpush.bf16.msra.mxu0 %v12374_v16 }
 0x83b   : > { %7899 = vmatpush.bf16.msrb.mxu2 %v12355_v61 }
 0x83d   : > { %7996 = vmatpush.bf16.msra.mxu0 %v12373_v19 }
 0x83f   : > { %7900 = vmatpush.bf16.msrb.mxu2 %v12354_v33  ;;  %v7654_v9 = vpop.f32.mrf.mxu2  ;;  %v7668_v12 = vpop.f32.mrf.mxu3 }
 0x840   : > { %v7655_v48 = vadd.f32 %v7654_v9, %v7301_v52 }
 0x841   : > { %7997 = vmatpush.bf16.msra.mxu0 %v12372_v50 }
 0x842   : > { %v7669_v41 = vadd.f32 %v7668_v12, %v7655_v48 }
 0x843   : > { %7901 = vmatpush.bf16.msrb.mxu2 %v12353_v51 }
 0x844   : > { %7737 = vmatmul.bf16.vlgmr.msrb.gmra.mxu0 %v7319_v37  ;;  %7751 = vmatmul.bf16.vlgmr.msra.gmra.mxu1 %v7320_v26  ;;  %v12370_v37 = vld [vmem:[#allocation26 + $0x10] sm:$0xff]  ;;  %v12369_v26 = vld [vmem:[#allocation26 + $0x8] sm:$0xff] }
 0x845   : > { %7998 = vmatpush.bf16.msra.mxu0 %v12371_v25 }
 0x847   : > { %7902 = vmatpush.bf16.msrb.mxu2 %v12352_v43  ;;  %v7656_v32 = vpop.f32.mrf.mxu2  ;;  %v7670_v11 = vpop.f32.mrf.mxu3 }
 0x848   : > { %v7657_v13 = vadd.f32 %v7656_v32, %v7301_v52 }
 0x849   : > { %7999 = vmatpush.bf16.msra.mxu0 %v12370_v37 }
 0x84a   : > { %v7671_v57 = vadd.f32 %v7670_v11, %v7657_v13 }
 0x84d   : > { %8000 = vmatpush.bf16.msra.mxu0 %v12369_v26 }
 0x851   : > { %8001 = vmatpush.bf16.msra.mxu0 %v12368_v42 }
 0x85f   : > { %v7710_v1 = vpop.f32.mrf.mxu2  ;;  %v7724_v62 = vpop.f32.mrf.mxu3 }
 0x860   : > { %v7711_v7 = vadd.f32 %v7710_v1, %v7302_v49 }
 0x862   : > { %v7725_v4 = vadd.f32 %v7724_v62, %v7711_v7 }
 0x867   : > { %v7712_v54 = vpop.f32.mrf.mxu2  ;;  %v7726_v15 = vpop.f32.mrf.mxu3 }
 0x868   : > { %v7713_v14 = vadd.f32 %v7712_v54, %v7302_v49 }
 0x86a   : > { %v7727_v63 = vadd.f32 %v7726_v15, %v7713_v14 }
 0x8b1   : > { %v7682_v28 = vpop.f32.mrf.mxu0  ;;  %v7696_v24 = vpop.f32.mrf.mxu1 }
 0x8b2   : > { %v7683_v30 = vadd.f32 %v7682_v28, %v7669_v41 }
 0x8b4   : > { %v7697_v0 = vadd.f32 %v7696_v24, %v7683_v30 }
 0x8b6   : > { %v7757_v53 = vmax.f32 %v7697_v0, 0.0 }
 0x8b9   : > { %v7684_v40 = vpop.f32.mrf.mxu0  ;;  %v7698_v22 = vpop.f32.mrf.mxu1 }
 0x8ba   : > { %v7685_v55 = vadd.f32 %v7684_v40, %v7671_v57 }
 0x8bc   : > { %v7699_v39 = vadd.f32 %v7698_v22, %v7685_v55 }
 0x8be   : > { %v7759_v5 = vmax.f32 %v7699_v39, 0.0 }
 0x8c0   : > { %v7761_v29 = vpack.c.bf16 %v7759_v5, %v7757_v53 }
 0x8c1   : > { %v7738_v60 = vpop.f32.mrf.mxu0  ;;  %v7752_v3 = vpop.f32.mrf.mxu1 }
 0x8c2   : > { %7903 = vmatmul.bf16.vlgmr.msrb.gmra.mxu2 %v7761_v29  ;;  %v7739_v59 = vadd.f32 %v7738_v60, %v7725_v4 }
 0x8c4   : > { %v7753_v31 = vadd.f32 %v7752_v3, %v7739_v59 }
 0x8c6   : > { %v7758_v2 = vmax.f32 %v7753_v31, 0.0 }
 0x8c9   : > { %v7740_v45 = vpop.f32.mrf.mxu0  ;;  %v7754_v17 = vpop.f32.mrf.mxu1 }
 0x8ca   : > { %v7741_v8 = vadd.f32 %v7740_v45, %v7727_v63 }
 0x8cc   : > { %v7755_v27 = vadd.f32 %v7754_v17, %v7741_v8 }
 0x8ce   : > { %v7760_v56 = vmax.f32 %v7755_v27, 0.0 }
 0x8d0   : > { %v7762_v18 = vpack.c.bf16 %v7760_v56, %v7758_v2 }
 0x8d2   : > { %7917 = vmatmul.bf16.vlgmr.msra.gmra.mxu3 %v7762_v18 }
 0x945   : > { %v7904_v58 = vpop.f32.mrf.mxu2 }
 0x946   : > { %v7905_v47 = vadd.f32 %v12611_v35, %v7904_v58 }
 0x94d   : > { %v7906_v61 = vpop.f32.mrf.mxu2 }
 0x94e   : > { %v7907_v33 = vadd.f32 %v12611_v35, %v7906_v61 }
 0x955   : > { %v7918_v44 = vpop.f32.mrf.mxu3 }
 0x956   : > { %v7919_v34 = vadd.f32 %v7918_v44, %v7905_v47 }
 0x958   : > { %v7923_v43 = vmax.f32 %v7919_v34, 0.0 }
 0x95d   : > { %v7920_v51 = vpop.f32.mrf.mxu3 }
 0x95e   : > { %v7921_v6 = vadd.f32 %v7920_v51, %v7907_v33 }
 0x960   : > { %v7924_v46 = vmax.f32 %v7921_v6, 0.0 }
 0x962   : > { %v7925_v10 = vpack.c.bf16 %v7924_v46, %v7923_v43 }
 0x964   : > { %8002 = vmatmul.bf16.vlgmr.msra.gmra.mxu0 %v7925_v10 }
 0x9e1   : > { %v8003_v9 = vpop.f32.mrf.mxu0 }
 0x9e2   : > { %v8004_v20 = vadd.f32 %v12612_v21, %v8003_v9 }
 0x9e9   : > { %v8005_v38 = vpop.f32.mrf.mxu0 }
 0x9ea   : > { %v8006_v12 = vadd.f32 %v12612_v21, %v8005_v38 }
 0x9ec   : > { %v12380_v52 = vpack.c.bf16 %v8006_v12, %v8004_v20 }
 0x9ee   : > { %12381 = vst [vmem:[%s1087_s27] sm:$0xff] %v12380_v52  }
 0x9ef   : > { %13122 = shalt.err (!%p13119_p8)
}
 0x9f0   : > { %s13224_s4 = smov 64   ;;  %s13225_s29 = smov 4  }
 0x9f1   : > { %12446 = dma.vmem_to_hbm [thread:$0]  (%p13409_p5), %s8026_s14, 128, %s8028_s0, %s8013_s3, %s13224_s4, %s13224_s4, %s13225_s29  }
 0x9f2 PF: > { %s14343_s8 = sld [smem:[#allocation42_spill]] }
 0x9f3   : > { %s14344_s11 = sld [smem:[#allocation39_spill]] }
 0x9f8   : > { %p12533_p9 = scmp.ge.s32.totalorder %s14343_s8, 2 }
 0x9f9   : > { %s8042_s27 = sand.u32 1, %s14344_s11  }
 0x9fa   : > { %p12498_p10 = pnand %p12533_p9, %p13413_p6  ;;  %s8043_s25 = scalar_lea.sflag [#allocation4], %s8042_s27 }
 0x9fc   : > { %p12499_p11 = pneg %p12498_p10 }
 0x9fe   : > { %13176 = dma.done.wait (%p12499_p11), %s8043_s25, 128  }
 0x9ff   : > { %13178 = vsyncadd (%p12499_p11), %s8043_s25, 4294967168  ;;  %s14346_s30 = sld [smem:[#allocation43_spill]] }
 0xa00   : > { %s14347_s8 = sld [smem:[#allocation40_spill]] }
 0xa01   : > { %s14348_s5 = sld [smem:[#allocation41_spill]] }
 0xa02   : > { %s14349_s9 = sld [smem:[#allocation44_spill]] }
 0xa05   : > { %p47_p12 = scmp.ge.s32.totalorder %s14346_s30, 4  }
 0xa07   :  { %49 = sbr.rel (!%p47_p12) target bundleno = 31 (0x1f), region = 232 }
 0xa0c   :  { %8049 = vsyncpa [#allocation3], 1 }
 0xa0d   :  { %8051 = vsyncpa [#allocation3 + $0x1], 1 }
 0xa0e   :  { %8052 = vsyncpa [#allocation6], 1 }
 0xa0f   :  { %8053 = vsyncpa [#allocation9], 1 }
 0xa10   :  { %8054 = vsyncpa [#allocation12], 1 }
 0xa11   :  { %8055 = vsyncpa [#allocation15], 1 }
 0xa12   :  { %8056 = vsyncpa [#allocation18], 1 }
 0xa13   :  { %8057 = vsyncpa [#allocation21], 1 }
 0xa14   :  { %8058 = vsyncpa [#allocation24], 1 }
 0xa15   :  { %8059 = vsyncpa [#allocation27], 1 }
 0xa16   :  { %8060 = vsyncpa [#allocation4], 1 }
 0xa17   :  { %8062 = vsyncpa [#allocation4 + $0x1], 1 }

</bundles_post_ra>
